<compile_context>
chip_gen: v6e
topology: v6e:2x2x1
jax: 0.10.0
libtpu: 0.0.40
codegen_flags: <defaults>
</compile_context>

<pallas_src>
import re

import jax
import jax.numpy as jnp
from jax import lax
from jax.experimental import pallas as pl
from jax.experimental.pallas import tpu as pltpu

EPS = 1e-8
V = 256          # VisualConv1D "V"
H = 512          # VisualConv1D "H"
FIN = 30         # v_us in_channels
N_BLOCKS = 5     # number of stacked VisualConv1D blocks


def _tpu_generation():
    """Best-effort TPU generation from device_kind (e.g. 'TPU v6e' -> 6)."""
    try:
        kind = jax.devices()[0].device_kind
    except Exception:
        return 6
    m = re.search(r"(\d+)", kind)
    return int(m.group(1)) if m else 6


def _seg_stats(y3, inv_n):
    """gLN statistics per batch segment.  y3: [bm, k, C] (f32 or bf16).

    Sums accumulate in f32.  Reduction order: time (sublanes) first, channels
    (lanes) second, so the expensive cross-lane XLU reduce only sees [bm,1,C].
    Returns (mean, rstd), each [bm, 1, 1] f32."""
    yf = y3.astype(jnp.float32)
    s1 = jnp.sum(jnp.sum(yf, axis=1, keepdims=True), axis=2, keepdims=True)
    s2 = jnp.sum(jnp.sum(yf * yf, axis=1, keepdims=True), axis=2, keepdims=True)
    mean = s1 * inv_n
    var = jnp.maximum(s2 * inv_n - mean * mean, 0.0)   # E[x^2]-m^2 can round < 0
    rstd = lax.rsqrt(var + EPS)                        # EUP rsqrt
    return mean, rstd


def _make_kernel(bm, k_pad, k_valid, cw):
    bmk = bm * k_pad
    inv_nv = 1.0 / (k_valid * V)
    inv_nh = 1.0 / (k_valid * H)
    padded = k_pad != k_valid

    def kernel(x_ref, wus_ref, w1_ref, w2_ref, dw_ref, a_ref,
               g0w1_ref, b0w1_ref, g1_ref, b1_ref, g2w2_ref, b2w2_ref,
               out_ref):
        # v_us: Conv1d(30, 256, 1, bias=False) as one MXU matmul (bf16 ops, f32 acc).
        x = x_ref[...].reshape(bmk, FIN).astype(jnp.bfloat16)
        h = jnp.dot(x, wus_ref[...],
                    preferred_element_type=jnp.float32).reshape(bm, k_pad, V)

        # Hoisted time-position masks: narrow [rows, 1] {0,1} columns that are
        # lane-broadcast in the multiplies (no full-width mask tensors).
        tpos3 = lax.broadcasted_iota(jnp.int32, (bm, k_pad, 1), 1)
        tpos2 = tpos3.reshape(bmk, 1)
        m_prev = (tpos2 != 0).astype(jnp.float32).astype(cw)
        m_next = (tpos2 != k_valid - 1).astype(jnp.float32).astype(cw)
        if padded:
            valid3 = (tpos3 < k_valid).astype(jnp.float32)
            valid2 = valid3.reshape(bmk, 1).astype(cw)

        for j in range(N_BLOCKS):                     # unrolled VisualConv1D stack
            # ---- ReLU -> gLN(V) statistics (gamma0/beta0 folded into W1) ----
            y0 = jnp.maximum(h, 0.0)                                  # [bm,k,V] f32
            if padded:
                y0 = y0 * valid3
            mean0, rstd0 = _seg_stats(y0, inv_nv)
            # ---- 1x1 conv V->H with folded gLN: rstd0*(y0 @ g0*W1) + bias0 ----
            z = jnp.dot(y0.reshape(bmk, V).astype(jnp.bfloat16), w1_ref[j],
                        preferred_element_type=jnp.float32).reshape(bm, k_pad, H)
            g0w1 = g0w1_ref[pl.ds(j, 1), :][:, None, :]               # [1,1,H]
            b0w1 = b0w1_ref[pl.ds(j, 1), :][:, None, :]
            bias0 = b0w1 - (mean0 * rstd0) * g0w1                     # [bm,1,H]
            # ---- ReLU -> gLN(H) statistics + apply ----
            y = jnp.maximum(z * rstd0 + bias0, 0.0)                   # [bm,k,H] f32
            if padded:
                y = y * valid3
            mean1, rstd1 = _seg_stats(y, inv_nh)
            scale1 = g1_ref[pl.ds(j, 1), :][:, None, :] * rstd1       # [bm,1,H]
            shift1 = b1_ref[pl.ds(j, 1), :][:, None, :] - mean1 * scale1
            yf = (y * scale1 + shift1).reshape(bmk, H)                # f32 for the rolls
            # ---- depthwise conv: kernel=3, stride=1, padding=1, groups=H ----
            # rolls stay in f32 (proven path); products/adds run in cw (bf16 on v6e/v7x)
            prev = pltpu.roll(yf, shift=1, axis=0).astype(cw) * m_prev        # y[t-1]
            nxt = pltpu.roll(yf, shift=bmk - 1, axis=0).astype(cw) * m_next   # y[t+1]
            yc = yf.astype(cw)
            dwj = dw_ref[j]                                           # [3,H] cw
            y = prev * dwj[0:1, :] + yc * dwj[1:2, :] + nxt * dwj[2:3, :]
            # ---- PReLU (single slope, pre-broadcast over lanes, working dtype) ----
            a = a_ref[pl.ds(j, 1), :]                                 # [1,H] cw
            y = jnp.maximum(y, 0.0) + a * jnp.minimum(y, 0.0)
            if padded:
                y = y * valid2
            # ---- gLN(H) statistics (gamma2/beta2 folded into W2) ----
            mean2, rstd2 = _seg_stats(y.reshape(bm, k_pad, H), inv_nh)
            # ---- 1x1 conv H->V with folded gLN, fused with the residual add ----
            z2 = jnp.dot(y.astype(jnp.bfloat16), w2_ref[j],
                         preferred_element_type=jnp.float32).reshape(bm, k_pad, V)
            g2w2 = g2w2_ref[pl.ds(j, 1), :][:, None, :]               # [1,1,V]
            b2w2 = b2w2_ref[pl.ds(j, 1), :][:, None, :]
            bias2 = b2w2 - (mean2 * rstd2) * g2w2                     # [bm,1,V]
            h = h + z2 * rstd2 + bias2

        out_ref[...] = h

    return kernel


def _pick_bm(m, k, gen, max_rows, row_mult, target_rows=512):
    """Batch-block size: fill the MXU rows (>= target_rows, aligned to row_mult)
    with the longest possible grid; on v7x prefer an even grid so both
    TensorCores get work under dimension_semantics=("parallel",)."""
    cands = [d for d in range(1, m + 1) if m % d == 0 and d * k <= max_rows]
    if not cands:
        # TODO(synk): add a K-tiled two-pass gLN so a single sequence longer than
        # max_rows does not have to fit in one VMEM block.
        raise ValueError(
            f"sequence length {k} exceeds the per-block row budget {max_rows}; "
            "K tiling is not implemented")

    def score(d):
        rows, grid = d * k, m // d
        both_cores = (grid % 2 == 0) if gen >= 7 else True
        return (both_cores,                # v7x: even grid -> both TensorCores busy
                rows >= target_rows,       # fill the MXU rows
                rows % row_mult == 0,      # MXU-tile aligned row count
                min(rows, target_rows),    # otherwise: as many rows as possible
                -d)                        # then: longest grid (pipelining / split)

    return max(cands, key=score)


def visualnet_forward(visual, p, bm=None):
    m, k, fin = visual.shape
    assert fin == FIN, (fin, FIN)

    gen = _tpu_generation()
    # bf16 element-wise chain only where the VPU has native bf16 (v6e/v7x);
    # v5e and older keep f32 element-wise math (bf16 stays MXU-operand-only).
    cw = jnp.bfloat16 if gen >= 6 else jnp.float32
    if gen >= 7:        # 64 MiB VMEM per TC, 2 TCs
        max_rows, row_mult, vmem_limit = 2048, 256, 48 * 1024 * 1024
    elif gen == 6:      # 128 MiB VMEM
        max_rows, row_mult, vmem_limit = 4096, 256, 96 * 1024 * 1024
    elif gen == 5:      # 128 MiB VMEM, 128-wide MXU rows
        max_rows, row_mult, vmem_limit = 4096, 128, 96 * 1024 * 1024
    else:               # older generations: be conservative
        max_rows, row_mult, vmem_limit = 1024, 128, 32 * 1024 * 1024

    # Pad time to a multiple of 8 so every (bm,k,C)<->(bm*k,C) reshape stays
    # sublane-tile aligned.  Pad rows are masked out of the gLN statistics and
    # the depthwise conv in-kernel, and sliced off below.
    k_pad = -(-k // 8) * 8
    x = visual.astype(jnp.float32)
    if k_pad != k:
        x = jnp.pad(x, ((0, 0), (0, k_pad - k), (0, 0)))

    if bm is None:
        bm = _pick_bm(m, k_pad, gen, max_rows, row_mult)
    assert m % bm == 0, (m, bm)

    f32 = jnp.float32
    w1 = p['w1'].astype(f32)
    w2 = p['w2'].astype(f32)
    g0, b0 = p['g0'].astype(f32), p['b0'].astype(f32)
    g2, b2 = p['g2'].astype(f32), p['b2'].astype(f32)

    # gamma/beta of a gLN immediately followed by a 1x1 conv are folded into it:
    #   gLN(y) @ W == rstd * (y @ diag(g)W) + (b@W - mean*rstd*(g@W))
    wus = p['wus'].astype(jnp.bfloat16)
    w1p = (g0[:, :, None] * w1).astype(jnp.bfloat16)       # [5, V, H]
    w2p = (g2[:, :, None] * w2).astype(jnp.bfloat16)       # [5, H, V]
    g0w1 = jnp.einsum('nc,ncd->nd', g0, w1)                # [5, H]
    b0w1 = jnp.einsum('nc,ncd->nd', b0, w1)                # [5, H]
    g2w2 = jnp.einsum('nd,ndc->nc', g2, w2)                # [5, V]
    b2w2 = jnp.einsum('nd,ndc->nc', b2, w2)                # [5, V]
    dw = p['dw'].astype(cw)                                # [5, 3, H]
    a_vec = jnp.broadcast_to(p['a'].astype(cw)[:, None], (N_BLOCKS, H))  # PReLU slopes

    def full(shape):
        n = len(shape)
        return pl.BlockSpec(shape, lambda i, n=n: (0,) * n)

    in_specs = [
        pl.BlockSpec((bm, k_pad, FIN), lambda i: (i, 0, 0)),   # visual
        full((FIN, V)),                                        # wus        (bf16)
        full((N_BLOCKS, V, H)),                                # g0*W1      (bf16)
        full((N_BLOCKS, H, V)),                                # g2*W2      (bf16)
        full((N_BLOCKS, 3, H)),                                # depthwise  (cw)
        full((N_BLOCKS, H)),                                   # PReLU a    (cw)
        full((N_BLOCKS, H)), full((N_BLOCKS, H)),              # g0@W1, b0@W1
        full((N_BLOCKS, H)), full((N_BLOCKS, H)),              # g1, b1
        full((N_BLOCKS, V)), full((N_BLOCKS, V)),              # g2@W2, b2@W2
    ]

    out = pl.pallas_call(
        _make_kernel(bm, k_pad, k, cw),
        out_shape=jax.ShapeDtypeStruct((m, k_pad, V), jnp.float32),
        grid=(m // bm,),
        in_specs=in_specs,
        out_specs=pl.BlockSpec((bm, k_pad, V), lambda i: (i, 0, 0)),
        compiler_params=pltpu.CompilerParams(
            dimension_semantics=("parallel",),
            vmem_limit_bytes=vmem_limit),
    )(x, wus, w1p, w2p, dw, a_vec,
      g0w1, b0w1, p['g1'].astype(f32), p['b1'].astype(f32), g2w2, b2w2)

    return out[:, :k, :] if k_pad != k else out


def init_params(key):
    """Deterministic synthetic parameters (shapes from the module's __init__)."""
    ks = jax.random.split(key, 10)

    def n(k_, shape, scale):
        return scale * jax.random.normal(k_, shape, jnp.float32)

    return {
        'wus': n(ks[0], (FIN, V), 1.0 / jnp.sqrt(30.0)),
        'w1': n(ks[1], (N_BLOCKS, V, H), 1.0 / jnp.sqrt(float(V))),
        'w2': n(ks[2], (N_BLOCKS, H, V), 1.0 / jnp.sqrt(float(H))),
        'dw': n(ks[3], (N_BLOCKS, 3, H), 1.0 / jnp.sqrt(3.0)),
        # module init is gamma=1, beta=0; perturb slightly so the gamma/beta->conv
        # folding is genuinely exercised by the reference check below.
        'g0': 1.0 + n(ks[4], (N_BLOCKS, V), 0.1),
        'b0': n(ks[5], (N_BLOCKS, V), 0.1),
        'g1': 1.0 + n(ks[6], (N_BLOCKS, H), 0.1),
        'b1': n(ks[7], (N_BLOCKS, H), 0.1),
        'g2': 1.0 + n(ks[8], (N_BLOCKS, H), 0.1),
        'b2': n(ks[9], (N_BLOCKS, H), 0.1),
        'a': jnp.full((N_BLOCKS,), 0.25, jnp.float32),   # PReLU default slope
    }


def gln_ref(y, gamma, beta):
    mean = jnp.mean(y, axis=(1, 2), keepdims=True)
    var = jnp.mean((y - mean) ** 2, axis=(1, 2), keepdims=True)
    return gamma[None, None, :] * (y - mean) / jnp.sqrt(var + EPS) + beta[None, None, :]


def reference_forward(visual, p):
    """Pure-JAX f32 reference (channel-last), mirrors the PyTorch forward."""
    h = jnp.einsum('mki,ic->mkc', visual, p['wus'])
    for j in range(N_BLOCKS):
        y = jnp.maximum(h, 0.0)
        y = gln_ref(y, p['g0'][j], p['b0'][j])
        y = jnp.einsum('mkc,cd->mkd', y, p['w1'][j])
        y = jnp.maximum(y, 0.0)
        y = gln_ref(y, p['g1'][j], p['b1'][j])
        zeros = jnp.zeros_like(y[:, :1, :])
        prev = jnp.concatenate([zeros, y[:, :-1, :]], axis=1)
        nxt = jnp.concatenate([y[:, 1:, :], zeros], axis=1)
        y = prev * p['dw'][j, 0] + y * p['dw'][j, 1] + nxt * p['dw'][j, 2]
        y = jnp.where(y >= 0.0, y, p['a'][j] * y)
        y = gln_ref(y, p['g2'][j], p['b2'][j])
        y = jnp.einsum('mkd,dc->mkc', y, p['w2'][j])
        h = h + y
    return h


if __name__ == "__main__":
    key = jax.random.PRNGKey(0)
    kx, kp = jax.random.split(key)
    M, K = 2, 16
    visual = jax.random.normal(kx, (M, K, FIN), jnp.float32)
    params = init_params(kp)

    out = jax.block_until_ready(visualnet_forward(visual, params))

    assert out.shape == (M, K, V)
    assert bool(jnp.all(jnp.isfinite(out)))

    ref = reference_forward(visual, params)
    rel_err = float(jnp.max(jnp.abs(out - ref)) / (jnp.max(jnp.abs(ref)) + 1e-6))
    assert rel_err < 2e-2, f"mismatch vs reference: rel err {rel_err}"

    print("KERNEL_OK")
</pallas_src>

<mosaic_0001>
module attributes {stable_mosaic.version = 11 : i64} {
  func.func @kernel(%arg0: i32, %arg1: memref<2x16x30xf32, #tpu.memory_space<vmem>>, %arg2: memref<30x256xbf16, #tpu.memory_space<vmem>>, %arg3: memref<5x256x512xbf16, #tpu.memory_space<vmem>>, %arg4: memref<5x512x256xbf16, #tpu.memory_space<vmem>>, %arg5: memref<5x3x512xbf16, #tpu.memory_space<vmem>>, %arg6: memref<5x512xbf16, #tpu.memory_space<vmem>>, %arg7: memref<5x512xf32, #tpu.memory_space<vmem>>, %arg8: memref<5x512xf32, #tpu.memory_space<vmem>>, %arg9: memref<5x512xf32, #tpu.memory_space<vmem>>, %arg10: memref<5x512xf32, #tpu.memory_space<vmem>>, %arg11: memref<5x256xf32, #tpu.memory_space<vmem>>, %arg12: memref<5x256xf32, #tpu.memory_space<vmem>>, %arg13: memref<2x16x256xf32, #tpu.memory_space<vmem>>) attributes {dimension_semantics = [#tpu.dimension_semantics<parallel>], iteration_bounds = array<i64: 1>, scalar_prefetch = 0 : i64, scratch_operands = 0 : i64, tpu.core_type = #tpu.core_type<tc>, window_params = [{transform_indices = @transform_0, window_bounds = array<i64: 2, 16, 30>}, {pipeline_mode = #tpu.pipeline_mode<synchronous>, transform_indices = @transform_1, window_bounds = array<i64: 30, 256>}, {pipeline_mode = #tpu.pipeline_mode<synchronous>, transform_indices = @transform_2, window_bounds = array<i64: 5, 256, 512>}, {pipeline_mode = #tpu.pipeline_mode<synchronous>, transform_indices = @transform_3, window_bounds = array<i64: 5, 512, 256>}, {pipeline_mode = #tpu.pipeline_mode<synchronous>, transform_indices = @transform_4, window_bounds = array<i64: 5, 3, 512>}, {pipeline_mode = #tpu.pipeline_mode<synchronous>, transform_indices = @transform_5, window_bounds = array<i64: 5, 512>}, {pipeline_mode = #tpu.pipeline_mode<synchronous>, transform_indices = @transform_6, window_bounds = array<i64: 5, 512>}, {pipeline_mode = #tpu.pipeline_mode<synchronous>, transform_indices = @transform_7, window_bounds = array<i64: 5, 512>}, {pipeline_mode = #tpu.pipeline_mode<synchronous>, transform_indices = @transform_8, window_bounds = array<i64: 5, 512>}, {pipeline_mode = #tpu.pipeline_mode<synchronous>, transform_indices = @transform_9, window_bounds = array<i64: 5, 512>}, {pipeline_mode = #tpu.pipeline_mode<synchronous>, transform_indices = @transform_10, window_bounds = array<i64: 5, 256>}, {pipeline_mode = #tpu.pipeline_mode<synchronous>, transform_indices = @transform_11, window_bounds = array<i64: 5, 256>}, {transform_indices = @transform_12, window_bounds = array<i64: 2, 16, 256>}]} {
    %c0 = arith.constant 0 : index
    %c0_0 = arith.constant 0 : index
    %c0_1 = arith.constant 0 : index
    %0 = vector.load %arg1[%c0, %c0_0, %c0_1] : memref<2x16x30xf32, #tpu.memory_space<vmem>>, vector<2x16x30xf32>
    %1 = vector.shape_cast %0 : vector<2x16x30xf32> to vector<32x30xf32>
    %2 = arith.truncf %1 : vector<32x30xf32> to vector<32x30xbf16>
    %c0_2 = arith.constant 0 : index
    %c0_3 = arith.constant 0 : index
    %3 = vector.load %arg2[%c0_2, %c0_3] : memref<30x256xbf16, #tpu.memory_space<vmem>>, vector<30x256xbf16>
    %cst = arith.constant dense<0.000000e+00> : vector<32x256xf32>
    %4 = tpu.matmul %2, %3, %cst {dimension_numbers = #tpu.dot_dimension_numbers<[1], [0], [0], [1], [0, 0, 1, 1], [], []>} : vector<32x30xbf16>, vector<30x256xbf16>, vector<32x256xf32> -> vector<32x256xf32>
    %5 = vector.shape_cast %4 : vector<32x256xf32> to vector<2x16x256xf32>
    %6 = tpu.iota {dimensions = array<i32: 1>} : vector<2x16x1xi32>
    %7 = vector.shape_cast %6 : vector<2x16x1xi32> to vector<32x1xi32>
    %c0_i32 = arith.constant 0 : i32
    %8 = vector.broadcast %c0_i32 : i32 to vector<32x1xi32>
    %9 = arith.cmpi ne, %7, %8 : vector<32x1xi32>
    %10 = arith.extui %9 : vector<32x1xi1> to vector<32x1xi32>
    %11 = arith.sitofp %10 : vector<32x1xi32> to vector<32x1xf32>
    %12 = arith.truncf %11 : vector<32x1xf32> to vector<32x1xbf16>
    %c15_i32 = arith.constant 15 : i32
    %13 = vector.broadcast %c15_i32 : i32 to vector<32x1xi32>
    %14 = arith.cmpi ne, %7, %13 : vector<32x1xi32>
    %15 = arith.extui %14 : vector<32x1xi1> to vector<32x1xi32>
    %16 = arith.sitofp %15 : vector<32x1xi32> to vector<32x1xf32>
    %17 = arith.truncf %16 : vector<32x1xf32> to vector<32x1xbf16>
    %cst_4 = arith.constant 0.000000e+00 : f32
    %18 = vector.broadcast %cst_4 : f32 to vector<2x16x256xf32>
    %19 = arith.maximumf %5, %18 : vector<2x16x256xf32>
    %cst_5 = arith.constant dense<0.000000e+00> : vector<2x256xf32>
    %20 = vector.multi_reduction <add>, %19, %cst_5 [1] : vector<2x16x256xf32> to vector<2x256xf32>
    %21 = vector.shape_cast %20 : vector<2x256xf32> to vector<2x1x256xf32>
    %cst_6 = arith.constant dense<0.000000e+00> : vector<2x1xf32>
    %22 = vector.multi_reduction <add>, %21, %cst_6 [2] : vector<2x1x256xf32> to vector<2x1xf32>
    %23 = vector.shape_cast %22 : vector<2x1xf32> to vector<2x1x1xf32>
    %24 = arith.mulf %19, %19 : vector<2x16x256xf32>
    %cst_7 = arith.constant dense<0.000000e+00> : vector<2x256xf32>
    %25 = vector.multi_reduction <add>, %24, %cst_7 [1] : vector<2x16x256xf32> to vector<2x256xf32>
    %26 = vector.shape_cast %25 : vector<2x256xf32> to vector<2x1x256xf32>
    %cst_8 = arith.constant dense<0.000000e+00> : vector<2x1xf32>
    %27 = vector.multi_reduction <add>, %26, %cst_8 [2] : vector<2x1x256xf32> to vector<2x1xf32>
    %28 = vector.shape_cast %27 : vector<2x1xf32> to vector<2x1x1xf32>
    %cst_9 = arith.constant 2.44140625E-4 : f32
    %29 = vector.broadcast %cst_9 : f32 to vector<2x1x1xf32>
    %30 = arith.mulf %23, %29 : vector<2x1x1xf32>
    %cst_10 = arith.constant 2.44140625E-4 : f32
    %31 = vector.broadcast %cst_10 : f32 to vector<2x1x1xf32>
    %32 = arith.mulf %28, %31 : vector<2x1x1xf32>
    %33 = arith.mulf %30, %30 : vector<2x1x1xf32>
    %34 = arith.subf %32, %33 : vector<2x1x1xf32>
    %cst_11 = arith.constant 0.000000e+00 : f32
    %35 = vector.broadcast %cst_11 : f32 to vector<2x1x1xf32>
    %36 = arith.maximumf %34, %35 : vector<2x1x1xf32>
    %cst_12 = arith.constant 9.99999993E-9 : f32
    %37 = vector.broadcast %cst_12 : f32 to vector<2x1x1xf32>
    %38 = arith.addf %36, %37 : vector<2x1x1xf32>
    %39 = math.rsqrt %38 : vector<2x1x1xf32>
    %40 = vector.shape_cast %19 : vector<2x16x256xf32> to vector<32x256xf32>
    %41 = arith.truncf %40 : vector<32x256xf32> to vector<32x256xbf16>
    %c0_13 = arith.constant 0 : index
    %c0_14 = arith.constant 0 : index
    %c0_15 = arith.constant 0 : index
    %42 = vector.load %arg3[%c0_13, %c0_14, %c0_15] : memref<5x256x512xbf16, #tpu.memory_space<vmem>>, vector<1x256x512xbf16>
    %43 = vector.shape_cast %42 : vector<1x256x512xbf16> to vector<256x512xbf16>
    %cst_16 = arith.constant dense<0.000000e+00> : vector<32x512xf32>
    %44 = tpu.matmul %41, %43, %cst_16 {dimension_numbers = #tpu.dot_dimension_numbers<[1], [0], [0], [1], [0, 0, 1, 1], [], []>} : vector<32x256xbf16>, vector<256x512xbf16>, vector<32x512xf32> -> vector<32x512xf32>
    %45 = vector.shape_cast %44 : vector<32x512xf32> to vector<2x16x512xf32>
    %c0_17 = arith.constant 0 : index
    %c0_18 = arith.constant 0 : index
    %46 = vector.load %arg7[%c0_17, %c0_18] : memref<5x512xf32, #tpu.memory_space<vmem>>, vector<1x512xf32>
    %47 = vector.shape_cast %46 : vector<1x512xf32> to vector<1x1x512xf32>
    %c0_19 = arith.constant 0 : index
    %c0_20 = arith.constant 0 : index
    %48 = vector.load %arg8[%c0_19, %c0_20] : memref<5x512xf32, #tpu.memory_space<vmem>>, vector<1x512xf32>
    %49 = vector.shape_cast %48 : vector<1x512xf32> to vector<1x1x512xf32>
    %50 = arith.mulf %30, %39 : vector<2x1x1xf32>
    %51 = vector.broadcast %50 : vector<2x1x1xf32> to vector<2x1x512xf32>
    %52 = vector.broadcast %47 : vector<1x1x512xf32> to vector<2x1x512xf32>
    %53 = arith.mulf %51, %52 : vector<2x1x512xf32>
    %54 = vector.broadcast %49 : vector<1x1x512xf32> to vector<2x1x512xf32>
    %55 = arith.subf %54, %53 : vector<2x1x512xf32>
    %56 = vector.broadcast %39 : vector<2x1x1xf32> to vector<2x16x512xf32>
    %57 = arith.mulf %45, %56 : vector<2x16x512xf32>
    %58 = vector.broadcast %55 : vector<2x1x512xf32> to vector<2x16x512xf32>
    %59 = arith.addf %57, %58 : vector<2x16x512xf32>
    %cst_21 = arith.constant 0.000000e+00 : f32
    %60 = vector.broadcast %cst_21 : f32 to vector<2x16x512xf32>
    %61 = arith.maximumf %59, %60 : vector<2x16x512xf32>
    %cst_22 = arith.constant dense<0.000000e+00> : vector<2x512xf32>
    %62 = vector.multi_reduction <add>, %61, %cst_22 [1] : vector<2x16x512xf32> to vector<2x512xf32>
    %63 = vector.shape_cast %62 : vector<2x512xf32> to vector<2x1x512xf32>
    %cst_23 = arith.constant dense<0.000000e+00> : vector<2x1xf32>
    %64 = vector.multi_reduction <add>, %63, %cst_23 [2] : vector<2x1x512xf32> to vector<2x1xf32>
    %65 = vector.shape_cast %64 : vector<2x1xf32> to vector<2x1x1xf32>
    %66 = arith.mulf %61, %61 : vector<2x16x512xf32>
    %cst_24 = arith.constant dense<0.000000e+00> : vector<2x512xf32>
    %67 = vector.multi_reduction <add>, %66, %cst_24 [1] : vector<2x16x512xf32> to vector<2x512xf32>
    %68 = vector.shape_cast %67 : vector<2x512xf32> to vector<2x1x512xf32>
    %cst_25 = arith.constant dense<0.000000e+00> : vector<2x1xf32>
    %69 = vector.multi_reduction <add>, %68, %cst_25 [2] : vector<2x1x512xf32> to vector<2x1xf32>
    %70 = vector.shape_cast %69 : vector<2x1xf32> to vector<2x1x1xf32>
    %cst_26 = arith.constant 1.22070313E-4 : f32
    %71 = vector.broadcast %cst_26 : f32 to vector<2x1x1xf32>
    %72 = arith.mulf %65, %71 : vector<2x1x1xf32>
    %cst_27 = arith.constant 1.22070313E-4 : f32
    %73 = vector.broadcast %cst_27 : f32 to vector<2x1x1xf32>
    %74 = arith.mulf %70, %73 : vector<2x1x1xf32>
    %75 = arith.mulf %72, %72 : vector<2x1x1xf32>
    %76 = arith.subf %74, %75 : vector<2x1x1xf32>
    %cst_28 = arith.constant 0.000000e+00 : f32
    %77 = vector.broadcast %cst_28 : f32 to vector<2x1x1xf32>
    %78 = arith.maximumf %76, %77 : vector<2x1x1xf32>
    %cst_29 = arith.constant 9.99999993E-9 : f32
    %79 = vector.broadcast %cst_29 : f32 to vector<2x1x1xf32>
    %80 = arith.addf %78, %79 : vector<2x1x1xf32>
    %81 = math.rsqrt %80 : vector<2x1x1xf32>
    %c0_30 = arith.constant 0 : index
    %c0_31 = arith.constant 0 : index
    %82 = vector.load %arg9[%c0_30, %c0_31] : memref<5x512xf32, #tpu.memory_space<vmem>>, vector<1x512xf32>
    %83 = vector.shape_cast %82 : vector<1x512xf32> to vector<1x1x512xf32>
    %84 = vector.broadcast %83 : vector<1x1x512xf32> to vector<2x1x512xf32>
    %85 = vector.broadcast %81 : vector<2x1x1xf32> to vector<2x1x512xf32>
    %86 = arith.mulf %84, %85 : vector<2x1x512xf32>
    %c0_32 = arith.constant 0 : index
    %c0_33 = arith.constant 0 : index
    %87 = vector.load %arg10[%c0_32, %c0_33] : memref<5x512xf32, #tpu.memory_space<vmem>>, vector<1x512xf32>
    %88 = vector.shape_cast %87 : vector<1x512xf32> to vector<1x1x512xf32>
    %89 = vector.broadcast %72 : vector<2x1x1xf32> to vector<2x1x512xf32>
    %90 = arith.mulf %89, %86 : vector<2x1x512xf32>
    %91 = vector.broadcast %88 : vector<1x1x512xf32> to vector<2x1x512xf32>
    %92 = arith.subf %91, %90 : vector<2x1x512xf32>
    %93 = vector.broadcast %86 : vector<2x1x512xf32> to vector<2x16x512xf32>
    %94 = arith.mulf %61, %93 : vector<2x16x512xf32>
    %95 = vector.broadcast %92 : vector<2x1x512xf32> to vector<2x16x512xf32>
    %96 = arith.addf %94, %95 : vector<2x16x512xf32>
    %97 = vector.shape_cast %96 : vector<2x16x512xf32> to vector<32x512xf32>
    %c1_i32 = arith.constant 1 : i32
    %98 = tpu.dynamic_rotate %97 by %c1_i32 dim 0 : vector<32x512xf32>, i32 -> vector<32x512xf32>
    %99 = arith.truncf %98 : vector<32x512xf32> to vector<32x512xbf16>
    %100 = vector.broadcast %12 : vector<32x1xbf16> to vector<32x512xbf16>
    %101 = arith.mulf %99, %100 : vector<32x512xbf16>
    %c31_i32 = arith.constant 31 : i32
    %102 = tpu.dynamic_rotate %97 by %c31_i32 dim 0 : vector<32x512xf32>, i32 -> vector<32x512xf32>
    %103 = arith.truncf %102 : vector<32x512xf32> to vector<32x512xbf16>
    %104 = vector.broadcast %17 : vector<32x1xbf16> to vector<32x512xbf16>
    %105 = arith.mulf %103, %104 : vector<32x512xbf16>
    %106 = arith.truncf %97 : vector<32x512xf32> to vector<32x512xbf16>
    %c0_34 = arith.constant 0 : index
    %c0_35 = arith.constant 0 : index
    %c0_36 = arith.constant 0 : index
    %107 = vector.load %arg5[%c0_34, %c0_35, %c0_36] : memref<5x3x512xbf16, #tpu.memory_space<vmem>>, vector<1x3x512xbf16>
    %108 = vector.shape_cast %107 : vector<1x3x512xbf16> to vector<3x512xbf16>
    %109 = vector.extract_strided_slice %108 {offsets = [0, 0], sizes = [1, 512], strides = [1, 1]} : vector<3x512xbf16> to vector<1x512xbf16>
    %110 = vector.broadcast %109 : vector<1x512xbf16> to vector<32x512xbf16>
    %111 = arith.mulf %101, %110 : vector<32x512xbf16>
    %112 = vector.extract_strided_slice %108 {offsets = [1, 0], sizes = [1, 512], strides = [1, 1]} : vector<3x512xbf16> to vector<1x512xbf16>
    %113 = vector.broadcast %112 : vector<1x512xbf16> to vector<32x512xbf16>
    %114 = arith.mulf %106, %113 : vector<32x512xbf16>
    %115 = arith.addf %111, %114 : vector<32x512xbf16>
    %116 = vector.extract_strided_slice %108 {offsets = [2, 0], sizes = [1, 512], strides = [1, 1]} : vector<3x512xbf16> to vector<1x512xbf16>
    %117 = vector.broadcast %116 : vector<1x512xbf16> to vector<32x512xbf16>
    %118 = arith.mulf %105, %117 : vector<32x512xbf16>
    %119 = arith.addf %115, %118 : vector<32x512xbf16>
    %c0_37 = arith.constant 0 : index
    %c0_38 = arith.constant 0 : index
    %120 = vector.load %arg6[%c0_37, %c0_38] : memref<5x512xbf16, #tpu.memory_space<vmem>>, vector<1x512xbf16>
    %cst_39 = arith.constant 0.000000e+00 : bf16
    %121 = vector.broadcast %cst_39 : bf16 to vector<32x512xbf16>
    %122 = arith.maximumf %119, %121 : vector<32x512xbf16>
    %cst_40 = arith.constant 0.000000e+00 : bf16
    %123 = vector.broadcast %cst_40 : bf16 to vector<32x512xbf16>
    %124 = arith.minimumf %119, %123 : vector<32x512xbf16>
    %125 = vector.broadcast %120 : vector<1x512xbf16> to vector<32x512xbf16>
    %126 = arith.mulf %125, %124 : vector<32x512xbf16>
    %127 = arith.addf %122, %126 : vector<32x512xbf16>
    %128 = vector.shape_cast %127 : vector<32x512xbf16> to vector<2x16x512xbf16>
    %129 = arith.extf %128 : vector<2x16x512xbf16> to vector<2x16x512xf32>
    %cst_41 = arith.constant dense<0.000000e+00> : vector<2x512xf32>
    %130 = vector.multi_reduction <add>, %129, %cst_41 [1] : vector<2x16x512xf32> to vector<2x512xf32>
    %131 = vector.shape_cast %130 : vector<2x512xf32> to vector<2x1x512xf32>
    %cst_42 = arith.constant dense<0.000000e+00> : vector<2x1xf32>
    %132 = vector.multi_reduction <add>, %131, %cst_42 [2] : vector<2x1x512xf32> to vector<2x1xf32>
    %133 = vector.shape_cast %132 : vector<2x1xf32> to vector<2x1x1xf32>
    %134 = arith.mulf %129, %129 : vector<2x16x512xf32>
    %cst_43 = arith.constant dense<0.000000e+00> : vector<2x512xf32>
    %135 = vector.multi_reduction <add>, %134, %cst_43 [1] : vector<2x16x512xf32> to vector<2x512xf32>
    %136 = vector.shape_cast %135 : vector<2x512xf32> to vector<2x1x512xf32>
    %cst_44 = arith.constant dense<0.000000e+00> : vector<2x1xf32>
    %137 = vector.multi_reduction <add>, %136, %cst_44 [2] : vector<2x1x512xf32> to vector<2x1xf32>
    %138 = vector.shape_cast %137 : vector<2x1xf32> to vector<2x1x1xf32>
    %cst_45 = arith.constant 1.22070313E-4 : f32
    %139 = vector.broadcast %cst_45 : f32 to vector<2x1x1xf32>
    %140 = arith.mulf %133, %139 : vector<2x1x1xf32>
    %cst_46 = arith.constant 1.22070313E-4 : f32
    %141 = vector.broadcast %cst_46 : f32 to vector<2x1x1xf32>
    %142 = arith.mulf %138, %141 : vector<2x1x1xf32>
    %143 = arith.mulf %140, %140 : vector<2x1x1xf32>
    %144 = arith.subf %142, %143 : vector<2x1x1xf32>
    %cst_47 = arith.constant 0.000000e+00 : f32
    %145 = vector.broadcast %cst_47 : f32 to vector<2x1x1xf32>
    %146 = arith.maximumf %144, %145 : vector<2x1x1xf32>
    %cst_48 = arith.constant 9.99999993E-9 : f32
    %147 = vector.broadcast %cst_48 : f32 to vector<2x1x1xf32>
    %148 = arith.addf %146, %147 : vector<2x1x1xf32>
    %149 = math.rsqrt %148 : vector<2x1x1xf32>
    %c0_49 = arith.constant 0 : index
    %c0_50 = arith.constant 0 : index
    %c0_51 = arith.constant 0 : index
    %150 = vector.load %arg4[%c0_49, %c0_50, %c0_51] : memref<5x512x256xbf16, #tpu.memory_space<vmem>>, vector<1x512x256xbf16>
    %151 = vector.shape_cast %150 : vector<1x512x256xbf16> to vector<512x256xbf16>
    %cst_52 = arith.constant dense<0.000000e+00> : vector<32x256xf32>
    %152 = tpu.matmul %127, %151, %cst_52 {dimension_numbers = #tpu.dot_dimension_numbers<[1], [0], [0], [1], [0, 0, 1, 1], [], []>} : vector<32x512xbf16>, vector<512x256xbf16>, vector<32x256xf32> -> vector<32x256xf32>
    %153 = vector.shape_cast %152 : vector<32x256xf32> to vector<2x16x256xf32>
    %c0_53 = arith.constant 0 : index
    %c0_54 = arith.constant 0 : index
    %154 = vector.load %arg11[%c0_53, %c0_54] : memref<5x256xf32, #tpu.memory_space<vmem>>, vector<1x256xf32>
    %155 = vector.shape_cast %154 : vector<1x256xf32> to vector<1x1x256xf32>
    %c0_55 = arith.constant 0 : index
    %c0_56 = arith.constant 0 : index
    %156 = vector.load %arg12[%c0_55, %c0_56] : memref<5x256xf32, #tpu.memory_space<vmem>>, vector<1x256xf32>
    %157 = vector.shape_cast %156 : vector<1x256xf32> to vector<1x1x256xf32>
    %158 = arith.mulf %140, %149 : vector<2x1x1xf32>
    %159 = vector.broadcast %158 : vector<2x1x1xf32> to vector<2x1x256xf32>
    %160 = vector.broadcast %155 : vector<1x1x256xf32> to vector<2x1x256xf32>
    %161 = arith.mulf %159, %160 : vector<2x1x256xf32>
    %162 = vector.broadcast %157 : vector<1x1x256xf32> to vector<2x1x256xf32>
    %163 = arith.subf %162, %161 : vector<2x1x256xf32>
    %164 = vector.broadcast %149 : vector<2x1x1xf32> to vector<2x16x256xf32>
    %165 = arith.mulf %153, %164 : vector<2x16x256xf32>
    %166 = arith.addf %5, %165 : vector<2x16x256xf32>
    %167 = vector.broadcast %163 : vector<2x1x256xf32> to vector<2x16x256xf32>
    %168 = arith.addf %166, %167 : vector<2x16x256xf32>
    %cst_57 = arith.constant 0.000000e+00 : f32
    %169 = vector.broadcast %cst_57 : f32 to vector<2x16x256xf32>
    %170 = arith.maximumf %168, %169 : vector<2x16x256xf32>
    %cst_58 = arith.constant dense<0.000000e+00> : vector<2x256xf32>
    %171 = vector.multi_reduction <add>, %170, %cst_58 [1] : vector<2x16x256xf32> to vector<2x256xf32>
    %172 = vector.shape_cast %171 : vector<2x256xf32> to vector<2x1x256xf32>
    %cst_59 = arith.constant dense<0.000000e+00> : vector<2x1xf32>
    %173 = vector.multi_reduction <add>, %172, %cst_59 [2] : vector<2x1x256xf32> to vector<2x1xf32>
    %174 = vector.shape_cast %173 : vector<2x1xf32> to vector<2x1x1xf32>
    %175 = arith.mulf %170, %170 : vector<2x16x256xf32>
    %cst_60 = arith.constant dense<0.000000e+00> : vector<2x256xf32>
    %176 = vector.multi_reduction <add>, %175, %cst_60 [1] : vector<2x16x256xf32> to vector<2x256xf32>
    %177 = vector.shape_cast %176 : vector<2x256xf32> to vector<2x1x256xf32>
    %cst_61 = arith.constant dense<0.000000e+00> : vector<2x1xf32>
    %178 = vector.multi_reduction <add>, %177, %cst_61 [2] : vector<2x1x256xf32> to vector<2x1xf32>
    %179 = vector.shape_cast %178 : vector<2x1xf32> to vector<2x1x1xf32>
    %cst_62 = arith.constant 2.44140625E-4 : f32
    %180 = vector.broadcast %cst_62 : f32 to vector<2x1x1xf32>
    %181 = arith.mulf %174, %180 : vector<2x1x1xf32>
    %cst_63 = arith.constant 2.44140625E-4 : f32
    %182 = vector.broadcast %cst_63 : f32 to vector<2x1x1xf32>
    %183 = arith.mulf %179, %182 : vector<2x1x1xf32>
    %184 = arith.mulf %181, %181 : vector<2x1x1xf32>
    %185 = arith.subf %183, %184 : vector<2x1x1xf32>
    %cst_64 = arith.constant 0.000000e+00 : f32
    %186 = vector.broadcast %cst_64 : f32 to vector<2x1x1xf32>
    %187 = arith.maximumf %185, %186 : vector<2x1x1xf32>
    %cst_65 = arith.constant 9.99999993E-9 : f32
    %188 = vector.broadcast %cst_65 : f32 to vector<2x1x1xf32>
    %189 = arith.addf %187, %188 : vector<2x1x1xf32>
    %190 = math.rsqrt %189 : vector<2x1x1xf32>
    %191 = vector.shape_cast %170 : vector<2x16x256xf32> to vector<32x256xf32>
    %192 = arith.truncf %191 : vector<32x256xf32> to vector<32x256xbf16>
    %c1 = arith.constant 1 : index
    %c0_66 = arith.constant 0 : index
    %c0_67 = arith.constant 0 : index
    %193 = vector.load %arg3[%c1, %c0_66, %c0_67] : memref<5x256x512xbf16, #tpu.memory_space<vmem>>, vector<1x256x512xbf16>
    %194 = vector.shape_cast %193 : vector<1x256x512xbf16> to vector<256x512xbf16>
    %cst_68 = arith.constant dense<0.000000e+00> : vector<32x512xf32>
    %195 = tpu.matmul %192, %194, %cst_68 {dimension_numbers = #tpu.dot_dimension_numbers<[1], [0], [0], [1], [0, 0, 1, 1], [], []>} : vector<32x256xbf16>, vector<256x512xbf16>, vector<32x512xf32> -> vector<32x512xf32>
    %196 = vector.shape_cast %195 : vector<32x512xf32> to vector<2x16x512xf32>
    %c1_69 = arith.constant 1 : index
    %c0_70 = arith.constant 0 : index
    %197 = vector.load %arg7[%c1_69, %c0_70] : memref<5x512xf32, #tpu.memory_space<vmem>>, vector<1x512xf32>
    %198 = vector.shape_cast %197 : vector<1x512xf32> to vector<1x1x512xf32>
    %c1_71 = arith.constant 1 : index
    %c0_72 = arith.constant 0 : index
    %199 = vector.load %arg8[%c1_71, %c0_72] : memref<5x512xf32, #tpu.memory_space<vmem>>, vector<1x512xf32>
    %200 = vector.shape_cast %199 : vector<1x512xf32> to vector<1x1x512xf32>
    %201 = arith.mulf %181, %190 : vector<2x1x1xf32>
    %202 = vector.broadcast %201 : vector<2x1x1xf32> to vector<2x1x512xf32>
    %203 = vector.broadcast %198 : vector<1x1x512xf32> to vector<2x1x512xf32>
    %204 = arith.mulf %202, %203 : vector<2x1x512xf32>
    %205 = vector.broadcast %200 : vector<1x1x512xf32> to vector<2x1x512xf32>
    %206 = arith.subf %205, %204 : vector<2x1x512xf32>
    %207 = vector.broadcast %190 : vector<2x1x1xf32> to vector<2x16x512xf32>
    %208 = arith.mulf %196, %207 : vector<2x16x512xf32>
    %209 = vector.broadcast %206 : vector<2x1x512xf32> to vector<2x16x512xf32>
    %210 = arith.addf %208, %209 : vector<2x16x512xf32>
    %cst_73 = arith.constant 0.000000e+00 : f32
    %211 = vector.broadcast %cst_73 : f32 to vector<2x16x512xf32>
    %212 = arith.maximumf %210, %211 : vector<2x16x512xf32>
    %cst_74 = arith.constant dense<0.000000e+00> : vector<2x512xf32>
    %213 = vector.multi_reduction <add>, %212, %cst_74 [1] : vector<2x16x512xf32> to vector<2x512xf32>
    %214 = vector.shape_cast %213 : vector<2x512xf32> to vector<2x1x512xf32>
    %cst_75 = arith.constant dense<0.000000e+00> : vector<2x1xf32>
    %215 = vector.multi_reduction <add>, %214, %cst_75 [2] : vector<2x1x512xf32> to vector<2x1xf32>
    %216 = vector.shape_cast %215 : vector<2x1xf32> to vector<2x1x1xf32>
    %217 = arith.mulf %212, %212 : vector<2x16x512xf32>
    %cst_76 = arith.constant dense<0.000000e+00> : vector<2x512xf32>
    %218 = vector.multi_reduction <add>, %217, %cst_76 [1] : vector<2x16x512xf32> to vector<2x512xf32>
    %219 = vector.shape_cast %218 : vector<2x512xf32> to vector<2x1x512xf32>
    %cst_77 = arith.constant dense<0.000000e+00> : vector<2x1xf32>
    %220 = vector.multi_reduction <add>, %219, %cst_77 [2] : vector<2x1x512xf32> to vector<2x1xf32>
    %221 = vector.shape_cast %220 : vector<2x1xf32> to vector<2x1x1xf32>
    %cst_78 = arith.constant 1.22070313E-4 : f32
    %222 = vector.broadcast %cst_78 : f32 to vector<2x1x1xf32>
    %223 = arith.mulf %216, %222 : vector<2x1x1xf32>
    %cst_79 = arith.constant 1.22070313E-4 : f32
    %224 = vector.broadcast %cst_79 : f32 to vector<2x1x1xf32>
    %225 = arith.mulf %221, %224 : vector<2x1x1xf32>
    %226 = arith.mulf %223, %223 : vector<2x1x1xf32>
    %227 = arith.subf %225, %226 : vector<2x1x1xf32>
    %cst_80 = arith.constant 0.000000e+00 : f32
    %228 = vector.broadcast %cst_80 : f32 to vector<2x1x1xf32>
    %229 = arith.maximumf %227, %228 : vector<2x1x1xf32>
    %cst_81 = arith.constant 9.99999993E-9 : f32
    %230 = vector.broadcast %cst_81 : f32 to vector<2x1x1xf32>
    %231 = arith.addf %229, %230 : vector<2x1x1xf32>
    %232 = math.rsqrt %231 : vector<2x1x1xf32>
    %c1_82 = arith.constant 1 : index
    %c0_83 = arith.constant 0 : index
    %233 = vector.load %arg9[%c1_82, %c0_83] : memref<5x512xf32, #tpu.memory_space<vmem>>, vector<1x512xf32>
    %234 = vector.shape_cast %233 : vector<1x512xf32> to vector<1x1x512xf32>
    %235 = vector.broadcast %234 : vector<1x1x512xf32> to vector<2x1x512xf32>
    %236 = vector.broadcast %232 : vector<2x1x1xf32> to vector<2x1x512xf32>
    %237 = arith.mulf %235, %236 : vector<2x1x512xf32>
    %c1_84 = arith.constant 1 : index
    %c0_85 = arith.constant 0 : index
    %238 = vector.load %arg10[%c1_84, %c0_85] : memref<5x512xf32, #tpu.memory_space<vmem>>, vector<1x512xf32>
    %239 = vector.shape_cast %238 : vector<1x512xf32> to vector<1x1x512xf32>
    %240 = vector.broadcast %223 : vector<2x1x1xf32> to vector<2x1x512xf32>
    %241 = arith.mulf %240, %237 : vector<2x1x512xf32>
    %242 = vector.broadcast %239 : vector<1x1x512xf32> to vector<2x1x512xf32>
    %243 = arith.subf %242, %241 : vector<2x1x512xf32>
    %244 = vector.broadcast %237 : vector<2x1x512xf32> to vector<2x16x512xf32>
    %245 = arith.mulf %212, %244 : vector<2x16x512xf32>
    %246 = vector.broadcast %243 : vector<2x1x512xf32> to vector<2x16x512xf32>
    %247 = arith.addf %245, %246 : vector<2x16x512xf32>
    %248 = vector.shape_cast %247 : vector<2x16x512xf32> to vector<32x512xf32>
    %c1_i32_86 = arith.constant 1 : i32
    %249 = tpu.dynamic_rotate %248 by %c1_i32_86 dim 0 : vector<32x512xf32>, i32 -> vector<32x512xf32>
    %250 = arith.truncf %249 : vector<32x512xf32> to vector<32x512xbf16>
    %251 = vector.broadcast %12 : vector<32x1xbf16> to vector<32x512xbf16>
    %252 = arith.mulf %250, %251 : vector<32x512xbf16>
    %c31_i32_87 = arith.constant 31 : i32
    %253 = tpu.dynamic_rotate %248 by %c31_i32_87 dim 0 : vector<32x512xf32>, i32 -> vector<32x512xf32>
    %254 = arith.truncf %253 : vector<32x512xf32> to vector<32x512xbf16>
    %255 = vector.broadcast %17 : vector<32x1xbf16> to vector<32x512xbf16>
    %256 = arith.mulf %254, %255 : vector<32x512xbf16>
    %257 = arith.truncf %248 : vector<32x512xf32> to vector<32x512xbf16>
    %c1_88 = arith.constant 1 : index
    %c0_89 = arith.constant 0 : index
    %c0_90 = arith.constant 0 : index
    %258 = vector.load %arg5[%c1_88, %c0_89, %c0_90] : memref<5x3x512xbf16, #tpu.memory_space<vmem>>, vector<1x3x512xbf16>
    %259 = vector.shape_cast %258 : vector<1x3x512xbf16> to vector<3x512xbf16>
    %260 = vector.extract_strided_slice %259 {offsets = [0, 0], sizes = [1, 512], strides = [1, 1]} : vector<3x512xbf16> to vector<1x512xbf16>
    %261 = vector.broadcast %260 : vector<1x512xbf16> to vector<32x512xbf16>
    %262 = arith.mulf %252, %261 : vector<32x512xbf16>
    %263 = vector.extract_strided_slice %259 {offsets = [1, 0], sizes = [1, 512], strides = [1, 1]} : vector<3x512xbf16> to vector<1x512xbf16>
    %264 = vector.broadcast %263 : vector<1x512xbf16> to vector<32x512xbf16>
    %265 = arith.mulf %257, %264 : vector<32x512xbf16>
    %266 = arith.addf %262, %265 : vector<32x512xbf16>
    %267 = vector.extract_strided_slice %259 {offsets = [2, 0], sizes = [1, 512], strides = [1, 1]} : vector<3x512xbf16> to vector<1x512xbf16>
    %268 = vector.broadcast %267 : vector<1x512xbf16> to vector<32x512xbf16>
    %269 = arith.mulf %256, %268 : vector<32x512xbf16>
    %270 = arith.addf %266, %269 : vector<32x512xbf16>
    %c1_91 = arith.constant 1 : index
    %c0_92 = arith.constant 0 : index
    %271 = vector.load %arg6[%c1_91, %c0_92] : memref<5x512xbf16, #tpu.memory_space<vmem>>, vector<1x512xbf16>
    %cst_93 = arith.constant 0.000000e+00 : bf16
    %272 = vector.broadcast %cst_93 : bf16 to vector<32x512xbf16>
    %273 = arith.maximumf %270, %272 : vector<32x512xbf16>
    %cst_94 = arith.constant 0.000000e+00 : bf16
    %274 = vector.broadcast %cst_94 : bf16 to vector<32x512xbf16>
    %275 = arith.minimumf %270, %274 : vector<32x512xbf16>
    %276 = vector.broadcast %271 : vector<1x512xbf16> to vector<32x512xbf16>
    %277 = arith.mulf %276, %275 : vector<32x512xbf16>
    %278 = arith.addf %273, %277 : vector<32x512xbf16>
    %279 = vector.shape_cast %278 : vector<32x512xbf16> to vector<2x16x512xbf16>
    %280 = arith.extf %279 : vector<2x16x512xbf16> to vector<2x16x512xf32>
    %cst_95 = arith.constant dense<0.000000e+00> : vector<2x512xf32>
    %281 = vector.multi_reduction <add>, %280, %cst_95 [1] : vector<2x16x512xf32> to vector<2x512xf32>
    %282 = vector.shape_cast %281 : vector<2x512xf32> to vector<2x1x512xf32>
    %cst_96 = arith.constant dense<0.000000e+00> : vector<2x1xf32>
    %283 = vector.multi_reduction <add>, %282, %cst_96 [2] : vector<2x1x512xf32> to vector<2x1xf32>
    %284 = vector.shape_cast %283 : vector<2x1xf32> to vector<2x1x1xf32>
    %285 = arith.mulf %280, %280 : vector<2x16x512xf32>
    %cst_97 = arith.constant dense<0.000000e+00> : vector<2x512xf32>
    %286 = vector.multi_reduction <add>, %285, %cst_97 [1] : vector<2x16x512xf32> to vector<2x512xf32>
    %287 = vector.shape_cast %286 : vector<2x512xf32> to vector<2x1x512xf32>
    %cst_98 = arith.constant dense<0.000000e+00> : vector<2x1xf32>
    %288 = vector.multi_reduction <add>, %287, %cst_98 [2] : vector<2x1x512xf32> to vector<2x1xf32>
    %289 = vector.shape_cast %288 : vector<2x1xf32> to vector<2x1x1xf32>
    %cst_99 = arith.constant 1.22070313E-4 : f32
    %290 = vector.broadcast %cst_99 : f32 to vector<2x1x1xf32>
    %291 = arith.mulf %284, %290 : vector<2x1x1xf32>
    %cst_100 = arith.constant 1.22070313E-4 : f32
    %292 = vector.broadcast %cst_100 : f32 to vector<2x1x1xf32>
    %293 = arith.mulf %289, %292 : vector<2x1x1xf32>
    %294 = arith.mulf %291, %291 : vector<2x1x1xf32>
    %295 = arith.subf %293, %294 : vector<2x1x1xf32>
    %cst_101 = arith.constant 0.000000e+00 : f32
    %296 = vector.broadcast %cst_101 : f32 to vector<2x1x1xf32>
    %297 = arith.maximumf %295, %296 : vector<2x1x1xf32>
    %cst_102 = arith.constant 9.99999993E-9 : f32
    %298 = vector.broadcast %cst_102 : f32 to vector<2x1x1xf32>
    %299 = arith.addf %297, %298 : vector<2x1x1xf32>
    %300 = math.rsqrt %299 : vector<2x1x1xf32>
    %c1_103 = arith.constant 1 : index
    %c0_104 = arith.constant 0 : index
    %c0_105 = arith.constant 0 : index
    %301 = vector.load %arg4[%c1_103, %c0_104, %c0_105] : memref<5x512x256xbf16, #tpu.memory_space<vmem>>, vector<1x512x256xbf16>
    %302 = vector.shape_cast %301 : vector<1x512x256xbf16> to vector<512x256xbf16>
    %cst_106 = arith.constant dense<0.000000e+00> : vector<32x256xf32>
    %303 = tpu.matmul %278, %302, %cst_106 {dimension_numbers = #tpu.dot_dimension_numbers<[1], [0], [0], [1], [0, 0, 1, 1], [], []>} : vector<32x512xbf16>, vector<512x256xbf16>, vector<32x256xf32> -> vector<32x256xf32>
    %304 = vector.shape_cast %303 : vector<32x256xf32> to vector<2x16x256xf32>
    %c1_107 = arith.constant 1 : index
    %c0_108 = arith.constant 0 : index
    %305 = vector.load %arg11[%c1_107, %c0_108] : memref<5x256xf32, #tpu.memory_space<vmem>>, vector<1x256xf32>
    %306 = vector.shape_cast %305 : vector<1x256xf32> to vector<1x1x256xf32>
    %c1_109 = arith.constant 1 : index
    %c0_110 = arith.constant 0 : index
    %307 = vector.load %arg12[%c1_109, %c0_110] : memref<5x256xf32, #tpu.memory_space<vmem>>, vector<1x256xf32>
    %308 = vector.shape_cast %307 : vector<1x256xf32> to vector<1x1x256xf32>
    %309 = arith.mulf %291, %300 : vector<2x1x1xf32>
    %310 = vector.broadcast %309 : vector<2x1x1xf32> to vector<2x1x256xf32>
    %311 = vector.broadcast %306 : vector<1x1x256xf32> to vector<2x1x256xf32>
    %312 = arith.mulf %310, %311 : vector<2x1x256xf32>
    %313 = vector.broadcast %308 : vector<1x1x256xf32> to vector<2x1x256xf32>
    %314 = arith.subf %313, %312 : vector<2x1x256xf32>
    %315 = vector.broadcast %300 : vector<2x1x1xf32> to vector<2x16x256xf32>
    %316 = arith.mulf %304, %315 : vector<2x16x256xf32>
    %317 = arith.addf %168, %316 : vector<2x16x256xf32>
    %318 = vector.broadcast %314 : vector<2x1x256xf32> to vector<2x16x256xf32>
    %319 = arith.addf %317, %318 : vector<2x16x256xf32>
    %cst_111 = arith.constant 0.000000e+00 : f32
    %320 = vector.broadcast %cst_111 : f32 to vector<2x16x256xf32>
    %321 = arith.maximumf %319, %320 : vector<2x16x256xf32>
    %cst_112 = arith.constant dense<0.000000e+00> : vector<2x256xf32>
    %322 = vector.multi_reduction <add>, %321, %cst_112 [1] : vector<2x16x256xf32> to vector<2x256xf32>
    %323 = vector.shape_cast %322 : vector<2x256xf32> to vector<2x1x256xf32>
    %cst_113 = arith.constant dense<0.000000e+00> : vector<2x1xf32>
    %324 = vector.multi_reduction <add>, %323, %cst_113 [2] : vector<2x1x256xf32> to vector<2x1xf32>
    %325 = vector.shape_cast %324 : vector<2x1xf32> to vector<2x1x1xf32>
    %326 = arith.mulf %321, %321 : vector<2x16x256xf32>
    %cst_114 = arith.constant dense<0.000000e+00> : vector<2x256xf32>
    %327 = vector.multi_reduction <add>, %326, %cst_114 [1] : vector<2x16x256xf32> to vector<2x256xf32>
    %328 = vector.shape_cast %327 : vector<2x256xf32> to vector<2x1x256xf32>
    %cst_115 = arith.constant dense<0.000000e+00> : vector<2x1xf32>
    %329 = vector.multi_reduction <add>, %328, %cst_115 [2] : vector<2x1x256xf32> to vector<2x1xf32>
    %330 = vector.shape_cast %329 : vector<2x1xf32> to vector<2x1x1xf32>
    %cst_116 = arith.constant 2.44140625E-4 : f32
    %331 = vector.broadcast %cst_116 : f32 to vector<2x1x1xf32>
    %332 = arith.mulf %325, %331 : vector<2x1x1xf32>
    %cst_117 = arith.constant 2.44140625E-4 : f32
    %333 = vector.broadcast %cst_117 : f32 to vector<2x1x1xf32>
    %334 = arith.mulf %330, %333 : vector<2x1x1xf32>
    %335 = arith.mulf %332, %332 : vector<2x1x1xf32>
    %336 = arith.subf %334, %335 : vector<2x1x1xf32>
    %cst_118 = arith.constant 0.000000e+00 : f32
    %337 = vector.broadcast %cst_118 : f32 to vector<2x1x1xf32>
    %338 = arith.maximumf %336, %337 : vector<2x1x1xf32>
    %cst_119 = arith.constant 9.99999993E-9 : f32
    %339 = vector.broadcast %cst_119 : f32 to vector<2x1x1xf32>
    %340 = arith.addf %338, %339 : vector<2x1x1xf32>
    %341 = math.rsqrt %340 : vector<2x1x1xf32>
    %342 = vector.shape_cast %321 : vector<2x16x256xf32> to vector<32x256xf32>
    %343 = arith.truncf %342 : vector<32x256xf32> to vector<32x256xbf16>
    %c2 = arith.constant 2 : index
    %c0_120 = arith.constant 0 : index
    %c0_121 = arith.constant 0 : index
    %344 = vector.load %arg3[%c2, %c0_120, %c0_121] : memref<5x256x512xbf16, #tpu.memory_space<vmem>>, vector<1x256x512xbf16>
    %345 = vector.shape_cast %344 : vector<1x256x512xbf16> to vector<256x512xbf16>
    %cst_122 = arith.constant dense<0.000000e+00> : vector<32x512xf32>
    %346 = tpu.matmul %343, %345, %cst_122 {dimension_numbers = #tpu.dot_dimension_numbers<[1], [0], [0], [1], [0, 0, 1, 1], [], []>} : vector<32x256xbf16>, vector<256x512xbf16>, vector<32x512xf32> -> vector<32x512xf32>
    %347 = vector.shape_cast %346 : vector<32x512xf32> to vector<2x16x512xf32>
    %c2_123 = arith.constant 2 : index
    %c0_124 = arith.constant 0 : index
    %348 = vector.load %arg7[%c2_123, %c0_124] : memref<5x512xf32, #tpu.memory_space<vmem>>, vector<1x512xf32>
    %349 = vector.shape_cast %348 : vector<1x512xf32> to vector<1x1x512xf32>
    %c2_125 = arith.constant 2 : index
    %c0_126 = arith.constant 0 : index
    %350 = vector.load %arg8[%c2_125, %c0_126] : memref<5x512xf32, #tpu.memory_space<vmem>>, vector<1x512xf32>
    %351 = vector.shape_cast %350 : vector<1x512xf32> to vector<1x1x512xf32>
    %352 = arith.mulf %332, %341 : vector<2x1x1xf32>
    %353 = vector.broadcast %352 : vector<2x1x1xf32> to vector<2x1x512xf32>
    %354 = vector.broadcast %349 : vector<1x1x512xf32> to vector<2x1x512xf32>
    %355 = arith.mulf %353, %354 : vector<2x1x512xf32>
    %356 = vector.broadcast %351 : vector<1x1x512xf32> to vector<2x1x512xf32>
    %357 = arith.subf %356, %355 : vector<2x1x512xf32>
    %358 = vector.broadcast %341 : vector<2x1x1xf32> to vector<2x16x512xf32>
    %359 = arith.mulf %347, %358 : vector<2x16x512xf32>
    %360 = vector.broadcast %357 : vector<2x1x512xf32> to vector<2x16x512xf32>
    %361 = arith.addf %359, %360 : vector<2x16x512xf32>
    %cst_127 = arith.constant 0.000000e+00 : f32
    %362 = vector.broadcast %cst_127 : f32 to vector<2x16x512xf32>
    %363 = arith.maximumf %361, %362 : vector<2x16x512xf32>
    %cst_128 = arith.constant dense<0.000000e+00> : vector<2x512xf32>
    %364 = vector.multi_reduction <add>, %363, %cst_128 [1] : vector<2x16x512xf32> to vector<2x512xf32>
    %365 = vector.shape_cast %364 : vector<2x512xf32> to vector<2x1x512xf32>
    %cst_129 = arith.constant dense<0.000000e+00> : vector<2x1xf32>
    %366 = vector.multi_reduction <add>, %365, %cst_129 [2] : vector<2x1x512xf32> to vector<2x1xf32>
    %367 = vector.shape_cast %366 : vector<2x1xf32> to vector<2x1x1xf32>
    %368 = arith.mulf %363, %363 : vector<2x16x512xf32>
    %cst_130 = arith.constant dense<0.000000e+00> : vector<2x512xf32>
    %369 = vector.multi_reduction <add>, %368, %cst_130 [1] : vector<2x16x512xf32> to vector<2x512xf32>
    %370 = vector.shape_cast %369 : vector<2x512xf32> to vector<2x1x512xf32>
    %cst_131 = arith.constant dense<0.000000e+00> : vector<2x1xf32>
    %371 = vector.multi_reduction <add>, %370, %cst_131 [2] : vector<2x1x512xf32> to vector<2x1xf32>
    %372 = vector.shape_cast %371 : vector<2x1xf32> to vector<2x1x1xf32>
    %cst_132 = arith.constant 1.22070313E-4 : f32
    %373 = vector.broadcast %cst_132 : f32 to vector<2x1x1xf32>
    %374 = arith.mulf %367, %373 : vector<2x1x1xf32>
    %cst_133 = arith.constant 1.22070313E-4 : f32
    %375 = vector.broadcast %cst_133 : f32 to vector<2x1x1xf32>
    %376 = arith.mulf %372, %375 : vector<2x1x1xf32>
    %377 = arith.mulf %374, %374 : vector<2x1x1xf32>
    %378 = arith.subf %376, %377 : vector<2x1x1xf32>
    %cst_134 = arith.constant 0.000000e+00 : f32
    %379 = vector.broadcast %cst_134 : f32 to vector<2x1x1xf32>
    %380 = arith.maximumf %378, %379 : vector<2x1x1xf32>
    %cst_135 = arith.constant 9.99999993E-9 : f32
    %381 = vector.broadcast %cst_135 : f32 to vector<2x1x1xf32>
    %382 = arith.addf %380, %381 : vector<2x1x1xf32>
    %383 = math.rsqrt %382 : vector<2x1x1xf32>
    %c2_136 = arith.constant 2 : index
    %c0_137 = arith.constant 0 : index
    %384 = vector.load %arg9[%c2_136, %c0_137] : memref<5x512xf32, #tpu.memory_space<vmem>>, vector<1x512xf32>
    %385 = vector.shape_cast %384 : vector<1x512xf32> to vector<1x1x512xf32>
    %386 = vector.broadcast %385 : vector<1x1x512xf32> to vector<2x1x512xf32>
    %387 = vector.broadcast %383 : vector<2x1x1xf32> to vector<2x1x512xf32>
    %388 = arith.mulf %386, %387 : vector<2x1x512xf32>
    %c2_138 = arith.constant 2 : index
    %c0_139 = arith.constant 0 : index
    %389 = vector.load %arg10[%c2_138, %c0_139] : memref<5x512xf32, #tpu.memory_space<vmem>>, vector<1x512xf32>
    %390 = vector.shape_cast %389 : vector<1x512xf32> to vector<1x1x512xf32>
    %391 = vector.broadcast %374 : vector<2x1x1xf32> to vector<2x1x512xf32>
    %392 = arith.mulf %391, %388 : vector<2x1x512xf32>
    %393 = vector.broadcast %390 : vector<1x1x512xf32> to vector<2x1x512xf32>
    %394 = arith.subf %393, %392 : vector<2x1x512xf32>
    %395 = vector.broadcast %388 : vector<2x1x512xf32> to vector<2x16x512xf32>
    %396 = arith.mulf %363, %395 : vector<2x16x512xf32>
    %397 = vector.broadcast %394 : vector<2x1x512xf32> to vector<2x16x512xf32>
    %398 = arith.addf %396, %397 : vector<2x16x512xf32>
    %399 = vector.shape_cast %398 : vector<2x16x512xf32> to vector<32x512xf32>
    %c1_i32_140 = arith.constant 1 : i32
    %400 = tpu.dynamic_rotate %399 by %c1_i32_140 dim 0 : vector<32x512xf32>, i32 -> vector<32x512xf32>
    %401 = arith.truncf %400 : vector<32x512xf32> to vector<32x512xbf16>
    %402 = vector.broadcast %12 : vector<32x1xbf16> to vector<32x512xbf16>
    %403 = arith.mulf %401, %402 : vector<32x512xbf16>
    %c31_i32_141 = arith.constant 31 : i32
    %404 = tpu.dynamic_rotate %399 by %c31_i32_141 dim 0 : vector<32x512xf32>, i32 -> vector<32x512xf32>
    %405 = arith.truncf %404 : vector<32x512xf32> to vector<32x512xbf16>
    %406 = vector.broadcast %17 : vector<32x1xbf16> to vector<32x512xbf16>
    %407 = arith.mulf %405, %406 : vector<32x512xbf16>
    %408 = arith.truncf %399 : vector<32x512xf32> to vector<32x512xbf16>
    %c2_142 = arith.constant 2 : index
    %c0_143 = arith.constant 0 : index
    %c0_144 = arith.constant 0 : index
    %409 = vector.load %arg5[%c2_142, %c0_143, %c0_144] : memref<5x3x512xbf16, #tpu.memory_space<vmem>>, vector<1x3x512xbf16>
    %410 = vector.shape_cast %409 : vector<1x3x512xbf16> to vector<3x512xbf16>
    %411 = vector.extract_strided_slice %410 {offsets = [0, 0], sizes = [1, 512], strides = [1, 1]} : vector<3x512xbf16> to vector<1x512xbf16>
    %412 = vector.broadcast %411 : vector<1x512xbf16> to vector<32x512xbf16>
    %413 = arith.mulf %403, %412 : vector<32x512xbf16>
    %414 = vector.extract_strided_slice %410 {offsets = [1, 0], sizes = [1, 512], strides = [1, 1]} : vector<3x512xbf16> to vector<1x512xbf16>
    %415 = vector.broadcast %414 : vector<1x512xbf16> to vector<32x512xbf16>
    %416 = arith.mulf %408, %415 : vector<32x512xbf16>
    %417 = arith.addf %413, %416 : vector<32x512xbf16>
    %418 = vector.extract_strided_slice %410 {offsets = [2, 0], sizes = [1, 512], strides = [1, 1]} : vector<3x512xbf16> to vector<1x512xbf16>
    %419 = vector.broadcast %418 : vector<1x512xbf16> to vector<32x512xbf16>
    %420 = arith.mulf %407, %419 : vector<32x512xbf16>
    %421 = arith.addf %417, %420 : vector<32x512xbf16>
    %c2_145 = arith.constant 2 : index
    %c0_146 = arith.constant 0 : index
    %422 = vector.load %arg6[%c2_145, %c0_146] : memref<5x512xbf16, #tpu.memory_space<vmem>>, vector<1x512xbf16>
    %cst_147 = arith.constant 0.000000e+00 : bf16
    %423 = vector.broadcast %cst_147 : bf16 to vector<32x512xbf16>
    %424 = arith.maximumf %421, %423 : vector<32x512xbf16>
    %cst_148 = arith.constant 0.000000e+00 : bf16
    %425 = vector.broadcast %cst_148 : bf16 to vector<32x512xbf16>
    %426 = arith.minimumf %421, %425 : vector<32x512xbf16>
    %427 = vector.broadcast %422 : vector<1x512xbf16> to vector<32x512xbf16>
    %428 = arith.mulf %427, %426 : vector<32x512xbf16>
    %429 = arith.addf %424, %428 : vector<32x512xbf16>
    %430 = vector.shape_cast %429 : vector<32x512xbf16> to vector<2x16x512xbf16>
    %431 = arith.extf %430 : vector<2x16x512xbf16> to vector<2x16x512xf32>
    %cst_149 = arith.constant dense<0.000000e+00> : vector<2x512xf32>
    %432 = vector.multi_reduction <add>, %431, %cst_149 [1] : vector<2x16x512xf32> to vector<2x512xf32>
    %433 = vector.shape_cast %432 : vector<2x512xf32> to vector<2x1x512xf32>
    %cst_150 = arith.constant dense<0.000000e+00> : vector<2x1xf32>
    %434 = vector.multi_reduction <add>, %433, %cst_150 [2] : vector<2x1x512xf32> to vector<2x1xf32>
    %435 = vector.shape_cast %434 : vector<2x1xf32> to vector<2x1x1xf32>
    %436 = arith.mulf %431, %431 : vector<2x16x512xf32>
    %cst_151 = arith.constant dense<0.000000e+00> : vector<2x512xf32>
    %437 = vector.multi_reduction <add>, %436, %cst_151 [1] : vector<2x16x512xf32> to vector<2x512xf32>
    %438 = vector.shape_cast %437 : vector<2x512xf32> to vector<2x1x512xf32>
    %cst_152 = arith.constant dense<0.000000e+00> : vector<2x1xf32>
    %439 = vector.multi_reduction <add>, %438, %cst_152 [2] : vector<2x1x512xf32> to vector<2x1xf32>
    %440 = vector.shape_cast %439 : vector<2x1xf32> to vector<2x1x1xf32>
    %cst_153 = arith.constant 1.22070313E-4 : f32
    %441 = vector.broadcast %cst_153 : f32 to vector<2x1x1xf32>
    %442 = arith.mulf %435, %441 : vector<2x1x1xf32>
    %cst_154 = arith.constant 1.22070313E-4 : f32
    %443 = vector.broadcast %cst_154 : f32 to vector<2x1x1xf32>
    %444 = arith.mulf %440, %443 : vector<2x1x1xf32>
    %445 = arith.mulf %442, %442 : vector<2x1x1xf32>
    %446 = arith.subf %444, %445 : vector<2x1x1xf32>
    %cst_155 = arith.constant 0.000000e+00 : f32
    %447 = vector.broadcast %cst_155 : f32 to vector<2x1x1xf32>
    %448 = arith.maximumf %446, %447 : vector<2x1x1xf32>
    %cst_156 = arith.constant 9.99999993E-9 : f32
    %449 = vector.broadcast %cst_156 : f32 to vector<2x1x1xf32>
    %450 = arith.addf %448, %449 : vector<2x1x1xf32>
    %451 = math.rsqrt %450 : vector<2x1x1xf32>
    %c2_157 = arith.constant 2 : index
    %c0_158 = arith.constant 0 : index
    %c0_159 = arith.constant 0 : index
    %452 = vector.load %arg4[%c2_157, %c0_158, %c0_159] : memref<5x512x256xbf16, #tpu.memory_space<vmem>>, vector<1x512x256xbf16>
    %453 = vector.shape_cast %452 : vector<1x512x256xbf16> to vector<512x256xbf16>
    %cst_160 = arith.constant dense<0.000000e+00> : vector<32x256xf32>
    %454 = tpu.matmul %429, %453, %cst_160 {dimension_numbers = #tpu.dot_dimension_numbers<[1], [0], [0], [1], [0, 0, 1, 1], [], []>} : vector<32x512xbf16>, vector<512x256xbf16>, vector<32x256xf32> -> vector<32x256xf32>
    %455 = vector.shape_cast %454 : vector<32x256xf32> to vector<2x16x256xf32>
    %c2_161 = arith.constant 2 : index
    %c0_162 = arith.constant 0 : index
    %456 = vector.load %arg11[%c2_161, %c0_162] : memref<5x256xf32, #tpu.memory_space<vmem>>, vector<1x256xf32>
    %457 = vector.shape_cast %456 : vector<1x256xf32> to vector<1x1x256xf32>
    %c2_163 = arith.constant 2 : index
    %c0_164 = arith.constant 0 : index
    %458 = vector.load %arg12[%c2_163, %c0_164] : memref<5x256xf32, #tpu.memory_space<vmem>>, vector<1x256xf32>
    %459 = vector.shape_cast %458 : vector<1x256xf32> to vector<1x1x256xf32>
    %460 = arith.mulf %442, %451 : vector<2x1x1xf32>
    %461 = vector.broadcast %460 : vector<2x1x1xf32> to vector<2x1x256xf32>
    %462 = vector.broadcast %457 : vector<1x1x256xf32> to vector<2x1x256xf32>
    %463 = arith.mulf %461, %462 : vector<2x1x256xf32>
    %464 = vector.broadcast %459 : vector<1x1x256xf32> to vector<2x1x256xf32>
    %465 = arith.subf %464, %463 : vector<2x1x256xf32>
    %466 = vector.broadcast %451 : vector<2x1x1xf32> to vector<2x16x256xf32>
    %467 = arith.mulf %455, %466 : vector<2x16x256xf32>
    %468 = arith.addf %319, %467 : vector<2x16x256xf32>
    %469 = vector.broadcast %465 : vector<2x1x256xf32> to vector<2x16x256xf32>
    %470 = arith.addf %468, %469 : vector<2x16x256xf32>
    %cst_165 = arith.constant 0.000000e+00 : f32
    %471 = vector.broadcast %cst_165 : f32 to vector<2x16x256xf32>
    %472 = arith.maximumf %470, %471 : vector<2x16x256xf32>
    %cst_166 = arith.constant dense<0.000000e+00> : vector<2x256xf32>
    %473 = vector.multi_reduction <add>, %472, %cst_166 [1] : vector<2x16x256xf32> to vector<2x256xf32>
    %474 = vector.shape_cast %473 : vector<2x256xf32> to vector<2x1x256xf32>
    %cst_167 = arith.constant dense<0.000000e+00> : vector<2x1xf32>
    %475 = vector.multi_reduction <add>, %474, %cst_167 [2] : vector<2x1x256xf32> to vector<2x1xf32>
    %476 = vector.shape_cast %475 : vector<2x1xf32> to vector<2x1x1xf32>
    %477 = arith.mulf %472, %472 : vector<2x16x256xf32>
    %cst_168 = arith.constant dense<0.000000e+00> : vector<2x256xf32>
    %478 = vector.multi_reduction <add>, %477, %cst_168 [1] : vector<2x16x256xf32> to vector<2x256xf32>
    %479 = vector.shape_cast %478 : vector<2x256xf32> to vector<2x1x256xf32>
    %cst_169 = arith.constant dense<0.000000e+00> : vector<2x1xf32>
    %480 = vector.multi_reduction <add>, %479, %cst_169 [2] : vector<2x1x256xf32> to vector<2x1xf32>
    %481 = vector.shape_cast %480 : vector<2x1xf32> to vector<2x1x1xf32>
    %cst_170 = arith.constant 2.44140625E-4 : f32
    %482 = vector.broadcast %cst_170 : f32 to vector<2x1x1xf32>
    %483 = arith.mulf %476, %482 : vector<2x1x1xf32>
    %cst_171 = arith.constant 2.44140625E-4 : f32
    %484 = vector.broadcast %cst_171 : f32 to vector<2x1x1xf32>
    %485 = arith.mulf %481, %484 : vector<2x1x1xf32>
    %486 = arith.mulf %483, %483 : vector<2x1x1xf32>
    %487 = arith.subf %485, %486 : vector<2x1x1xf32>
    %cst_172 = arith.constant 0.000000e+00 : f32
    %488 = vector.broadcast %cst_172 : f32 to vector<2x1x1xf32>
    %489 = arith.maximumf %487, %488 : vector<2x1x1xf32>
    %cst_173 = arith.constant 9.99999993E-9 : f32
    %490 = vector.broadcast %cst_173 : f32 to vector<2x1x1xf32>
    %491 = arith.addf %489, %490 : vector<2x1x1xf32>
    %492 = math.rsqrt %491 : vector<2x1x1xf32>
    %493 = vector.shape_cast %472 : vector<2x16x256xf32> to vector<32x256xf32>
    %494 = arith.truncf %493 : vector<32x256xf32> to vector<32x256xbf16>
    %c3 = arith.constant 3 : index
    %c0_174 = arith.constant 0 : index
    %c0_175 = arith.constant 0 : index
    %495 = vector.load %arg3[%c3, %c0_174, %c0_175] : memref<5x256x512xbf16, #tpu.memory_space<vmem>>, vector<1x256x512xbf16>
    %496 = vector.shape_cast %495 : vector<1x256x512xbf16> to vector<256x512xbf16>
    %cst_176 = arith.constant dense<0.000000e+00> : vector<32x512xf32>
    %497 = tpu.matmul %494, %496, %cst_176 {dimension_numbers = #tpu.dot_dimension_numbers<[1], [0], [0], [1], [0, 0, 1, 1], [], []>} : vector<32x256xbf16>, vector<256x512xbf16>, vector<32x512xf32> -> vector<32x512xf32>
    %498 = vector.shape_cast %497 : vector<32x512xf32> to vector<2x16x512xf32>
    %c3_177 = arith.constant 3 : index
    %c0_178 = arith.constant 0 : index
    %499 = vector.load %arg7[%c3_177, %c0_178] : memref<5x512xf32, #tpu.memory_space<vmem>>, vector<1x512xf32>
    %500 = vector.shape_cast %499 : vector<1x512xf32> to vector<1x1x512xf32>
    %c3_179 = arith.constant 3 : index
    %c0_180 = arith.constant 0 : index
    %501 = vector.load %arg8[%c3_179, %c0_180] : memref<5x512xf32, #tpu.memory_space<vmem>>, vector<1x512xf32>
    %502 = vector.shape_cast %501 : vector<1x512xf32> to vector<1x1x512xf32>
    %503 = arith.mulf %483, %492 : vector<2x1x1xf32>
    %504 = vector.broadcast %503 : vector<2x1x1xf32> to vector<2x1x512xf32>
    %505 = vector.broadcast %500 : vector<1x1x512xf32> to vector<2x1x512xf32>
    %506 = arith.mulf %504, %505 : vector<2x1x512xf32>
    %507 = vector.broadcast %502 : vector<1x1x512xf32> to vector<2x1x512xf32>
    %508 = arith.subf %507, %506 : vector<2x1x512xf32>
    %509 = vector.broadcast %492 : vector<2x1x1xf32> to vector<2x16x512xf32>
    %510 = arith.mulf %498, %509 : vector<2x16x512xf32>
    %511 = vector.broadcast %508 : vector<2x1x512xf32> to vector<2x16x512xf32>
    %512 = arith.addf %510, %511 : vector<2x16x512xf32>
    %cst_181 = arith.constant 0.000000e+00 : f32
    %513 = vector.broadcast %cst_181 : f32 to vector<2x16x512xf32>
    %514 = arith.maximumf %512, %513 : vector<2x16x512xf32>
    %cst_182 = arith.constant dense<0.000000e+00> : vector<2x512xf32>
    %515 = vector.multi_reduction <add>, %514, %cst_182 [1] : vector<2x16x512xf32> to vector<2x512xf32>
    %516 = vector.shape_cast %515 : vector<2x512xf32> to vector<2x1x512xf32>
    %cst_183 = arith.constant dense<0.000000e+00> : vector<2x1xf32>
    %517 = vector.multi_reduction <add>, %516, %cst_183 [2] : vector<2x1x512xf32> to vector<2x1xf32>
    %518 = vector.shape_cast %517 : vector<2x1xf32> to vector<2x1x1xf32>
    %519 = arith.mulf %514, %514 : vector<2x16x512xf32>
    %cst_184 = arith.constant dense<0.000000e+00> : vector<2x512xf32>
    %520 = vector.multi_reduction <add>, %519, %cst_184 [1] : vector<2x16x512xf32> to vector<2x512xf32>
    %521 = vector.shape_cast %520 : vector<2x512xf32> to vector<2x1x512xf32>
    %cst_185 = arith.constant dense<0.000000e+00> : vector<2x1xf32>
    %522 = vector.multi_reduction <add>, %521, %cst_185 [2] : vector<2x1x512xf32> to vector<2x1xf32>
    %523 = vector.shape_cast %522 : vector<2x1xf32> to vector<2x1x1xf32>
    %cst_186 = arith.constant 1.22070313E-4 : f32
    %524 = vector.broadcast %cst_186 : f32 to vector<2x1x1xf32>
    %525 = arith.mulf %518, %524 : vector<2x1x1xf32>
    %cst_187 = arith.constant 1.22070313E-4 : f32
    %526 = vector.broadcast %cst_187 : f32 to vector<2x1x1xf32>
    %527 = arith.mulf %523, %526 : vector<2x1x1xf32>
    %528 = arith.mulf %525, %525 : vector<2x1x1xf32>
    %529 = arith.subf %527, %528 : vector<2x1x1xf32>
    %cst_188 = arith.constant 0.000000e+00 : f32
    %530 = vector.broadcast %cst_188 : f32 to vector<2x1x1xf32>
    %531 = arith.maximumf %529, %530 : vector<2x1x1xf32>
    %cst_189 = arith.constant 9.99999993E-9 : f32
    %532 = vector.broadcast %cst_189 : f32 to vector<2x1x1xf32>
    %533 = arith.addf %531, %532 : vector<2x1x1xf32>
    %534 = math.rsqrt %533 : vector<2x1x1xf32>
    %c3_190 = arith.constant 3 : index
    %c0_191 = arith.constant 0 : index
    %535 = vector.load %arg9[%c3_190, %c0_191] : memref<5x512xf32, #tpu.memory_space<vmem>>, vector<1x512xf32>
    %536 = vector.shape_cast %535 : vector<1x512xf32> to vector<1x1x512xf32>
    %537 = vector.broadcast %536 : vector<1x1x512xf32> to vector<2x1x512xf32>
    %538 = vector.broadcast %534 : vector<2x1x1xf32> to vector<2x1x512xf32>
    %539 = arith.mulf %537, %538 : vector<2x1x512xf32>
    %c3_192 = arith.constant 3 : index
    %c0_193 = arith.constant 0 : index
    %540 = vector.load %arg10[%c3_192, %c0_193] : memref<5x512xf32, #tpu.memory_space<vmem>>, vector<1x512xf32>
    %541 = vector.shape_cast %540 : vector<1x512xf32> to vector<1x1x512xf32>
    %542 = vector.broadcast %525 : vector<2x1x1xf32> to vector<2x1x512xf32>
    %543 = arith.mulf %542, %539 : vector<2x1x512xf32>
    %544 = vector.broadcast %541 : vector<1x1x512xf32> to vector<2x1x512xf32>
    %545 = arith.subf %544, %543 : vector<2x1x512xf32>
    %546 = vector.broadcast %539 : vector<2x1x512xf32> to vector<2x16x512xf32>
    %547 = arith.mulf %514, %546 : vector<2x16x512xf32>
    %548 = vector.broadcast %545 : vector<2x1x512xf32> to vector<2x16x512xf32>
    %549 = arith.addf %547, %548 : vector<2x16x512xf32>
    %550 = vector.shape_cast %549 : vector<2x16x512xf32> to vector<32x512xf32>
    %c1_i32_194 = arith.constant 1 : i32
    %551 = tpu.dynamic_rotate %550 by %c1_i32_194 dim 0 : vector<32x512xf32>, i32 -> vector<32x512xf32>
    %552 = arith.truncf %551 : vector<32x512xf32> to vector<32x512xbf16>
    %553 = vector.broadcast %12 : vector<32x1xbf16> to vector<32x512xbf16>
    %554 = arith.mulf %552, %553 : vector<32x512xbf16>
    %c31_i32_195 = arith.constant 31 : i32
    %555 = tpu.dynamic_rotate %550 by %c31_i32_195 dim 0 : vector<32x512xf32>, i32 -> vector<32x512xf32>
    %556 = arith.truncf %555 : vector<32x512xf32> to vector<32x512xbf16>
    %557 = vector.broadcast %17 : vector<32x1xbf16> to vector<32x512xbf16>
    %558 = arith.mulf %556, %557 : vector<32x512xbf16>
    %559 = arith.truncf %550 : vector<32x512xf32> to vector<32x512xbf16>
    %c3_196 = arith.constant 3 : index
    %c0_197 = arith.constant 0 : index
    %c0_198 = arith.constant 0 : index
    %560 = vector.load %arg5[%c3_196, %c0_197, %c0_198] : memref<5x3x512xbf16, #tpu.memory_space<vmem>>, vector<1x3x512xbf16>
    %561 = vector.shape_cast %560 : vector<1x3x512xbf16> to vector<3x512xbf16>
    %562 = vector.extract_strided_slice %561 {offsets = [0, 0], sizes = [1, 512], strides = [1, 1]} : vector<3x512xbf16> to vector<1x512xbf16>
    %563 = vector.broadcast %562 : vector<1x512xbf16> to vector<32x512xbf16>
    %564 = arith.mulf %554, %563 : vector<32x512xbf16>
    %565 = vector.extract_strided_slice %561 {offsets = [1, 0], sizes = [1, 512], strides = [1, 1]} : vector<3x512xbf16> to vector<1x512xbf16>
    %566 = vector.broadcast %565 : vector<1x512xbf16> to vector<32x512xbf16>
    %567 = arith.mulf %559, %566 : vector<32x512xbf16>
    %568 = arith.addf %564, %567 : vector<32x512xbf16>
    %569 = vector.extract_strided_slice %561 {offsets = [2, 0], sizes = [1, 512], strides = [1, 1]} : vector<3x512xbf16> to vector<1x512xbf16>
    %570 = vector.broadcast %569 : vector<1x512xbf16> to vector<32x512xbf16>
    %571 = arith.mulf %558, %570 : vector<32x512xbf16>
    %572 = arith.addf %568, %571 : vector<32x512xbf16>
    %c3_199 = arith.constant 3 : index
    %c0_200 = arith.constant 0 : index
    %573 = vector.load %arg6[%c3_199, %c0_200] : memref<5x512xbf16, #tpu.memory_space<vmem>>, vector<1x512xbf16>
    %cst_201 = arith.constant 0.000000e+00 : bf16
    %574 = vector.broadcast %cst_201 : bf16 to vector<32x512xbf16>
    %575 = arith.maximumf %572, %574 : vector<32x512xbf16>
    %cst_202 = arith.constant 0.000000e+00 : bf16
    %576 = vector.broadcast %cst_202 : bf16 to vector<32x512xbf16>
    %577 = arith.minimumf %572, %576 : vector<32x512xbf16>
    %578 = vector.broadcast %573 : vector<1x512xbf16> to vector<32x512xbf16>
    %579 = arith.mulf %578, %577 : vector<32x512xbf16>
    %580 = arith.addf %575, %579 : vector<32x512xbf16>
    %581 = vector.shape_cast %580 : vector<32x512xbf16> to vector<2x16x512xbf16>
    %582 = arith.extf %581 : vector<2x16x512xbf16> to vector<2x16x512xf32>
    %cst_203 = arith.constant dense<0.000000e+00> : vector<2x512xf32>
    %583 = vector.multi_reduction <add>, %582, %cst_203 [1] : vector<2x16x512xf32> to vector<2x512xf32>
    %584 = vector.shape_cast %583 : vector<2x512xf32> to vector<2x1x512xf32>
    %cst_204 = arith.constant dense<0.000000e+00> : vector<2x1xf32>
    %585 = vector.multi_reduction <add>, %584, %cst_204 [2] : vector<2x1x512xf32> to vector<2x1xf32>
    %586 = vector.shape_cast %585 : vector<2x1xf32> to vector<2x1x1xf32>
    %587 = arith.mulf %582, %582 : vector<2x16x512xf32>
    %cst_205 = arith.constant dense<0.000000e+00> : vector<2x512xf32>
    %588 = vector.multi_reduction <add>, %587, %cst_205 [1] : vector<2x16x512xf32> to vector<2x512xf32>
    %589 = vector.shape_cast %588 : vector<2x512xf32> to vector<2x1x512xf32>
    %cst_206 = arith.constant dense<0.000000e+00> : vector<2x1xf32>
    %590 = vector.multi_reduction <add>, %589, %cst_206 [2] : vector<2x1x512xf32> to vector<2x1xf32>
    %591 = vector.shape_cast %590 : vector<2x1xf32> to vector<2x1x1xf32>
    %cst_207 = arith.constant 1.22070313E-4 : f32
    %592 = vector.broadcast %cst_207 : f32 to vector<2x1x1xf32>
    %593 = arith.mulf %586, %592 : vector<2x1x1xf32>
    %cst_208 = arith.constant 1.22070313E-4 : f32
    %594 = vector.broadcast %cst_208 : f32 to vector<2x1x1xf32>
    %595 = arith.mulf %591, %594 : vector<2x1x1xf32>
    %596 = arith.mulf %593, %593 : vector<2x1x1xf32>
    %597 = arith.subf %595, %596 : vector<2x1x1xf32>
    %cst_209 = arith.constant 0.000000e+00 : f32
    %598 = vector.broadcast %cst_209 : f32 to vector<2x1x1xf32>
    %599 = arith.maximumf %597, %598 : vector<2x1x1xf32>
    %cst_210 = arith.constant 9.99999993E-9 : f32
    %600 = vector.broadcast %cst_210 : f32 to vector<2x1x1xf32>
    %601 = arith.addf %599, %600 : vector<2x1x1xf32>
    %602 = math.rsqrt %601 : vector<2x1x1xf32>
    %c3_211 = arith.constant 3 : index
    %c0_212 = arith.constant 0 : index
    %c0_213 = arith.constant 0 : index
    %603 = vector.load %arg4[%c3_211, %c0_212, %c0_213] : memref<5x512x256xbf16, #tpu.memory_space<vmem>>, vector<1x512x256xbf16>
    %604 = vector.shape_cast %603 : vector<1x512x256xbf16> to vector<512x256xbf16>
    %cst_214 = arith.constant dense<0.000000e+00> : vector<32x256xf32>
    %605 = tpu.matmul %580, %604, %cst_214 {dimension_numbers = #tpu.dot_dimension_numbers<[1], [0], [0], [1], [0, 0, 1, 1], [], []>} : vector<32x512xbf16>, vector<512x256xbf16>, vector<32x256xf32> -> vector<32x256xf32>
    %606 = vector.shape_cast %605 : vector<32x256xf32> to vector<2x16x256xf32>
    %c3_215 = arith.constant 3 : index
    %c0_216 = arith.constant 0 : index
    %607 = vector.load %arg11[%c3_215, %c0_216] : memref<5x256xf32, #tpu.memory_space<vmem>>, vector<1x256xf32>
    %608 = vector.shape_cast %607 : vector<1x256xf32> to vector<1x1x256xf32>
    %c3_217 = arith.constant 3 : index
    %c0_218 = arith.constant 0 : index
    %609 = vector.load %arg12[%c3_217, %c0_218] : memref<5x256xf32, #tpu.memory_space<vmem>>, vector<1x256xf32>
    %610 = vector.shape_cast %609 : vector<1x256xf32> to vector<1x1x256xf32>
    %611 = arith.mulf %593, %602 : vector<2x1x1xf32>
    %612 = vector.broadcast %611 : vector<2x1x1xf32> to vector<2x1x256xf32>
    %613 = vector.broadcast %608 : vector<1x1x256xf32> to vector<2x1x256xf32>
    %614 = arith.mulf %612, %613 : vector<2x1x256xf32>
    %615 = vector.broadcast %610 : vector<1x1x256xf32> to vector<2x1x256xf32>
    %616 = arith.subf %615, %614 : vector<2x1x256xf32>
    %617 = vector.broadcast %602 : vector<2x1x1xf32> to vector<2x16x256xf32>
    %618 = arith.mulf %606, %617 : vector<2x16x256xf32>
    %619 = arith.addf %470, %618 : vector<2x16x256xf32>
    %620 = vector.broadcast %616 : vector<2x1x256xf32> to vector<2x16x256xf32>
    %621 = arith.addf %619, %620 : vector<2x16x256xf32>
    %cst_219 = arith.constant 0.000000e+00 : f32
    %622 = vector.broadcast %cst_219 : f32 to vector<2x16x256xf32>
    %623 = arith.maximumf %621, %622 : vector<2x16x256xf32>
    %cst_220 = arith.constant dense<0.000000e+00> : vector<2x256xf32>
    %624 = vector.multi_reduction <add>, %623, %cst_220 [1] : vector<2x16x256xf32> to vector<2x256xf32>
    %625 = vector.shape_cast %624 : vector<2x256xf32> to vector<2x1x256xf32>
    %cst_221 = arith.constant dense<0.000000e+00> : vector<2x1xf32>
    %626 = vector.multi_reduction <add>, %625, %cst_221 [2] : vector<2x1x256xf32> to vector<2x1xf32>
    %627 = vector.shape_cast %626 : vector<2x1xf32> to vector<2x1x1xf32>
    %628 = arith.mulf %623, %623 : vector<2x16x256xf32>
    %cst_222 = arith.constant dense<0.000000e+00> : vector<2x256xf32>
    %629 = vector.multi_reduction <add>, %628, %cst_222 [1] : vector<2x16x256xf32> to vector<2x256xf32>
    %630 = vector.shape_cast %629 : vector<2x256xf32> to vector<2x1x256xf32>
    %cst_223 = arith.constant dense<0.000000e+00> : vector<2x1xf32>
    %631 = vector.multi_reduction <add>, %630, %cst_223 [2] : vector<2x1x256xf32> to vector<2x1xf32>
    %632 = vector.shape_cast %631 : vector<2x1xf32> to vector<2x1x1xf32>
    %cst_224 = arith.constant 2.44140625E-4 : f32
    %633 = vector.broadcast %cst_224 : f32 to vector<2x1x1xf32>
    %634 = arith.mulf %627, %633 : vector<2x1x1xf32>
    %cst_225 = arith.constant 2.44140625E-4 : f32
    %635 = vector.broadcast %cst_225 : f32 to vector<2x1x1xf32>
    %636 = arith.mulf %632, %635 : vector<2x1x1xf32>
    %637 = arith.mulf %634, %634 : vector<2x1x1xf32>
    %638 = arith.subf %636, %637 : vector<2x1x1xf32>
    %cst_226 = arith.constant 0.000000e+00 : f32
    %639 = vector.broadcast %cst_226 : f32 to vector<2x1x1xf32>
    %640 = arith.maximumf %638, %639 : vector<2x1x1xf32>
    %cst_227 = arith.constant 9.99999993E-9 : f32
    %641 = vector.broadcast %cst_227 : f32 to vector<2x1x1xf32>
    %642 = arith.addf %640, %641 : vector<2x1x1xf32>
    %643 = math.rsqrt %642 : vector<2x1x1xf32>
    %644 = vector.shape_cast %623 : vector<2x16x256xf32> to vector<32x256xf32>
    %645 = arith.truncf %644 : vector<32x256xf32> to vector<32x256xbf16>
    %c4 = arith.constant 4 : index
    %c0_228 = arith.constant 0 : index
    %c0_229 = arith.constant 0 : index
    %646 = vector.load %arg3[%c4, %c0_228, %c0_229] : memref<5x256x512xbf16, #tpu.memory_space<vmem>>, vector<1x256x512xbf16>
    %647 = vector.shape_cast %646 : vector<1x256x512xbf16> to vector<256x512xbf16>
    %cst_230 = arith.constant dense<0.000000e+00> : vector<32x512xf32>
    %648 = tpu.matmul %645, %647, %cst_230 {dimension_numbers = #tpu.dot_dimension_numbers<[1], [0], [0], [1], [0, 0, 1, 1], [], []>} : vector<32x256xbf16>, vector<256x512xbf16>, vector<32x512xf32> -> vector<32x512xf32>
    %649 = vector.shape_cast %648 : vector<32x512xf32> to vector<2x16x512xf32>
    %c4_231 = arith.constant 4 : index
    %c0_232 = arith.constant 0 : index
    %650 = vector.load %arg7[%c4_231, %c0_232] : memref<5x512xf32, #tpu.memory_space<vmem>>, vector<1x512xf32>
    %651 = vector.shape_cast %650 : vector<1x512xf32> to vector<1x1x512xf32>
    %c4_233 = arith.constant 4 : index
    %c0_234 = arith.constant 0 : index
    %652 = vector.load %arg8[%c4_233, %c0_234] : memref<5x512xf32, #tpu.memory_space<vmem>>, vector<1x512xf32>
    %653 = vector.shape_cast %652 : vector<1x512xf32> to vector<1x1x512xf32>
    %654 = arith.mulf %634, %643 : vector<2x1x1xf32>
    %655 = vector.broadcast %654 : vector<2x1x1xf32> to vector<2x1x512xf32>
    %656 = vector.broadcast %651 : vector<1x1x512xf32> to vector<2x1x512xf32>
    %657 = arith.mulf %655, %656 : vector<2x1x512xf32>
    %658 = vector.broadcast %653 : vector<1x1x512xf32> to vector<2x1x512xf32>
    %659 = arith.subf %658, %657 : vector<2x1x512xf32>
    %660 = vector.broadcast %643 : vector<2x1x1xf32> to vector<2x16x512xf32>
    %661 = arith.mulf %649, %660 : vector<2x16x512xf32>
    %662 = vector.broadcast %659 : vector<2x1x512xf32> to vector<2x16x512xf32>
    %663 = arith.addf %661, %662 : vector<2x16x512xf32>
    %cst_235 = arith.constant 0.000000e+00 : f32
    %664 = vector.broadcast %cst_235 : f32 to vector<2x16x512xf32>
    %665 = arith.maximumf %663, %664 : vector<2x16x512xf32>
    %cst_236 = arith.constant dense<0.000000e+00> : vector<2x512xf32>
    %666 = vector.multi_reduction <add>, %665, %cst_236 [1] : vector<2x16x512xf32> to vector<2x512xf32>
    %667 = vector.shape_cast %666 : vector<2x512xf32> to vector<2x1x512xf32>
    %cst_237 = arith.constant dense<0.000000e+00> : vector<2x1xf32>
    %668 = vector.multi_reduction <add>, %667, %cst_237 [2] : vector<2x1x512xf32> to vector<2x1xf32>
    %669 = vector.shape_cast %668 : vector<2x1xf32> to vector<2x1x1xf32>
    %670 = arith.mulf %665, %665 : vector<2x16x512xf32>
    %cst_238 = arith.constant dense<0.000000e+00> : vector<2x512xf32>
    %671 = vector.multi_reduction <add>, %670, %cst_238 [1] : vector<2x16x512xf32> to vector<2x512xf32>
    %672 = vector.shape_cast %671 : vector<2x512xf32> to vector<2x1x512xf32>
    %cst_239 = arith.constant dense<0.000000e+00> : vector<2x1xf32>
    %673 = vector.multi_reduction <add>, %672, %cst_239 [2] : vector<2x1x512xf32> to vector<2x1xf32>
    %674 = vector.shape_cast %673 : vector<2x1xf32> to vector<2x1x1xf32>
    %cst_240 = arith.constant 1.22070313E-4 : f32
    %675 = vector.broadcast %cst_240 : f32 to vector<2x1x1xf32>
    %676 = arith.mulf %669, %675 : vector<2x1x1xf32>
    %cst_241 = arith.constant 1.22070313E-4 : f32
    %677 = vector.broadcast %cst_241 : f32 to vector<2x1x1xf32>
    %678 = arith.mulf %674, %677 : vector<2x1x1xf32>
    %679 = arith.mulf %676, %676 : vector<2x1x1xf32>
    %680 = arith.subf %678, %679 : vector<2x1x1xf32>
    %cst_242 = arith.constant 0.000000e+00 : f32
    %681 = vector.broadcast %cst_242 : f32 to vector<2x1x1xf32>
    %682 = arith.maximumf %680, %681 : vector<2x1x1xf32>
    %cst_243 = arith.constant 9.99999993E-9 : f32
    %683 = vector.broadcast %cst_243 : f32 to vector<2x1x1xf32>
    %684 = arith.addf %682, %683 : vector<2x1x1xf32>
    %685 = math.rsqrt %684 : vector<2x1x1xf32>
    %c4_244 = arith.constant 4 : index
    %c0_245 = arith.constant 0 : index
    %686 = vector.load %arg9[%c4_244, %c0_245] : memref<5x512xf32, #tpu.memory_space<vmem>>, vector<1x512xf32>
    %687 = vector.shape_cast %686 : vector<1x512xf32> to vector<1x1x512xf32>
    %688 = vector.broadcast %687 : vector<1x1x512xf32> to vector<2x1x512xf32>
    %689 = vector.broadcast %685 : vector<2x1x1xf32> to vector<2x1x512xf32>
    %690 = arith.mulf %688, %689 : vector<2x1x512xf32>
    %c4_246 = arith.constant 4 : index
    %c0_247 = arith.constant 0 : index
    %691 = vector.load %arg10[%c4_246, %c0_247] : memref<5x512xf32, #tpu.memory_space<vmem>>, vector<1x512xf32>
    %692 = vector.shape_cast %691 : vector<1x512xf32> to vector<1x1x512xf32>
    %693 = vector.broadcast %676 : vector<2x1x1xf32> to vector<2x1x512xf32>
    %694 = arith.mulf %693, %690 : vector<2x1x512xf32>
    %695 = vector.broadcast %692 : vector<1x1x512xf32> to vector<2x1x512xf32>
    %696 = arith.subf %695, %694 : vector<2x1x512xf32>
    %697 = vector.broadcast %690 : vector<2x1x512xf32> to vector<2x16x512xf32>
    %698 = arith.mulf %665, %697 : vector<2x16x512xf32>
    %699 = vector.broadcast %696 : vector<2x1x512xf32> to vector<2x16x512xf32>
    %700 = arith.addf %698, %699 : vector<2x16x512xf32>
    %701 = vector.shape_cast %700 : vector<2x16x512xf32> to vector<32x512xf32>
    %c1_i32_248 = arith.constant 1 : i32
    %702 = tpu.dynamic_rotate %701 by %c1_i32_248 dim 0 : vector<32x512xf32>, i32 -> vector<32x512xf32>
    %703 = arith.truncf %702 : vector<32x512xf32> to vector<32x512xbf16>
    %704 = vector.broadcast %12 : vector<32x1xbf16> to vector<32x512xbf16>
    %705 = arith.mulf %703, %704 : vector<32x512xbf16>
    %c31_i32_249 = arith.constant 31 : i32
    %706 = tpu.dynamic_rotate %701 by %c31_i32_249 dim 0 : vector<32x512xf32>, i32 -> vector<32x512xf32>
    %707 = arith.truncf %706 : vector<32x512xf32> to vector<32x512xbf16>
    %708 = vector.broadcast %17 : vector<32x1xbf16> to vector<32x512xbf16>
    %709 = arith.mulf %707, %708 : vector<32x512xbf16>
    %710 = arith.truncf %701 : vector<32x512xf32> to vector<32x512xbf16>
    %c4_250 = arith.constant 4 : index
    %c0_251 = arith.constant 0 : index
    %c0_252 = arith.constant 0 : index
    %711 = vector.load %arg5[%c4_250, %c0_251, %c0_252] : memref<5x3x512xbf16, #tpu.memory_space<vmem>>, vector<1x3x512xbf16>
    %712 = vector.shape_cast %711 : vector<1x3x512xbf16> to vector<3x512xbf16>
    %713 = vector.extract_strided_slice %712 {offsets = [0, 0], sizes = [1, 512], strides = [1, 1]} : vector<3x512xbf16> to vector<1x512xbf16>
    %714 = vector.broadcast %713 : vector<1x512xbf16> to vector<32x512xbf16>
    %715 = arith.mulf %705, %714 : vector<32x512xbf16>
    %716 = vector.extract_strided_slice %712 {offsets = [1, 0], sizes = [1, 512], strides = [1, 1]} : vector<3x512xbf16> to vector<1x512xbf16>
    %717 = vector.broadcast %716 : vector<1x512xbf16> to vector<32x512xbf16>
    %718 = arith.mulf %710, %717 : vector<32x512xbf16>
    %719 = arith.addf %715, %718 : vector<32x512xbf16>
    %720 = vector.extract_strided_slice %712 {offsets = [2, 0], sizes = [1, 512], strides = [1, 1]} : vector<3x512xbf16> to vector<1x512xbf16>
    %721 = vector.broadcast %720 : vector<1x512xbf16> to vector<32x512xbf16>
    %722 = arith.mulf %709, %721 : vector<32x512xbf16>
    %723 = arith.addf %719, %722 : vector<32x512xbf16>
    %c4_253 = arith.constant 4 : index
    %c0_254 = arith.constant 0 : index
    %724 = vector.load %arg6[%c4_253, %c0_254] : memref<5x512xbf16, #tpu.memory_space<vmem>>, vector<1x512xbf16>
    %cst_255 = arith.constant 0.000000e+00 : bf16
    %725 = vector.broadcast %cst_255 : bf16 to vector<32x512xbf16>
    %726 = arith.maximumf %723, %725 : vector<32x512xbf16>
    %cst_256 = arith.constant 0.000000e+00 : bf16
    %727 = vector.broadcast %cst_256 : bf16 to vector<32x512xbf16>
    %728 = arith.minimumf %723, %727 : vector<32x512xbf16>
    %729 = vector.broadcast %724 : vector<1x512xbf16> to vector<32x512xbf16>
    %730 = arith.mulf %729, %728 : vector<32x512xbf16>
    %731 = arith.addf %726, %730 : vector<32x512xbf16>
    %732 = vector.shape_cast %731 : vector<32x512xbf16> to vector<2x16x512xbf16>
    %733 = arith.extf %732 : vector<2x16x512xbf16> to vector<2x16x512xf32>
    %cst_257 = arith.constant dense<0.000000e+00> : vector<2x512xf32>
    %734 = vector.multi_reduction <add>, %733, %cst_257 [1] : vector<2x16x512xf32> to vector<2x512xf32>
    %735 = vector.shape_cast %734 : vector<2x512xf32> to vector<2x1x512xf32>
    %cst_258 = arith.constant dense<0.000000e+00> : vector<2x1xf32>
    %736 = vector.multi_reduction <add>, %735, %cst_258 [2] : vector<2x1x512xf32> to vector<2x1xf32>
    %737 = vector.shape_cast %736 : vector<2x1xf32> to vector<2x1x1xf32>
    %738 = arith.mulf %733, %733 : vector<2x16x512xf32>
    %cst_259 = arith.constant dense<0.000000e+00> : vector<2x512xf32>
    %739 = vector.multi_reduction <add>, %738, %cst_259 [1] : vector<2x16x512xf32> to vector<2x512xf32>
    %740 = vector.shape_cast %739 : vector<2x512xf32> to vector<2x1x512xf32>
    %cst_260 = arith.constant dense<0.000000e+00> : vector<2x1xf32>
    %741 = vector.multi_reduction <add>, %740, %cst_260 [2] : vector<2x1x512xf32> to vector<2x1xf32>
    %742 = vector.shape_cast %741 : vector<2x1xf32> to vector<2x1x1xf32>
    %cst_261 = arith.constant 1.22070313E-4 : f32
    %743 = vector.broadcast %cst_261 : f32 to vector<2x1x1xf32>
    %744 = arith.mulf %737, %743 : vector<2x1x1xf32>
    %cst_262 = arith.constant 1.22070313E-4 : f32
    %745 = vector.broadcast %cst_262 : f32 to vector<2x1x1xf32>
    %746 = arith.mulf %742, %745 : vector<2x1x1xf32>
    %747 = arith.mulf %744, %744 : vector<2x1x1xf32>
    %748 = arith.subf %746, %747 : vector<2x1x1xf32>
    %cst_263 = arith.constant 0.000000e+00 : f32
    %749 = vector.broadcast %cst_263 : f32 to vector<2x1x1xf32>
    %750 = arith.maximumf %748, %749 : vector<2x1x1xf32>
    %cst_264 = arith.constant 9.99999993E-9 : f32
    %751 = vector.broadcast %cst_264 : f32 to vector<2x1x1xf32>
    %752 = arith.addf %750, %751 : vector<2x1x1xf32>
    %753 = math.rsqrt %752 : vector<2x1x1xf32>
    %c4_265 = arith.constant 4 : index
    %c0_266 = arith.constant 0 : index
    %c0_267 = arith.constant 0 : index
    %754 = vector.load %arg4[%c4_265, %c0_266, %c0_267] : memref<5x512x256xbf16, #tpu.memory_space<vmem>>, vector<1x512x256xbf16>
    %755 = vector.shape_cast %754 : vector<1x512x256xbf16> to vector<512x256xbf16>
    %cst_268 = arith.constant dense<0.000000e+00> : vector<32x256xf32>
    %756 = tpu.matmul %731, %755, %cst_268 {dimension_numbers = #tpu.dot_dimension_numbers<[1], [0], [0], [1], [0, 0, 1, 1], [], []>} : vector<32x512xbf16>, vector<512x256xbf16>, vector<32x256xf32> -> vector<32x256xf32>
    %757 = vector.shape_cast %756 : vector<32x256xf32> to vector<2x16x256xf32>
    %c4_269 = arith.constant 4 : index
    %c0_270 = arith.constant 0 : index
    %758 = vector.load %arg11[%c4_269, %c0_270] : memref<5x256xf32, #tpu.memory_space<vmem>>, vector<1x256xf32>
    %759 = vector.shape_cast %758 : vector<1x256xf32> to vector<1x1x256xf32>
    %c4_271 = arith.constant 4 : index
    %c0_272 = arith.constant 0 : index
    %760 = vector.load %arg12[%c4_271, %c0_272] : memref<5x256xf32, #tpu.memory_space<vmem>>, vector<1x256xf32>
    %761 = vector.shape_cast %760 : vector<1x256xf32> to vector<1x1x256xf32>
    %762 = arith.mulf %744, %753 : vector<2x1x1xf32>
    %763 = vector.broadcast %762 : vector<2x1x1xf32> to vector<2x1x256xf32>
    %764 = vector.broadcast %759 : vector<1x1x256xf32> to vector<2x1x256xf32>
    %765 = arith.mulf %763, %764 : vector<2x1x256xf32>
    %766 = vector.broadcast %761 : vector<1x1x256xf32> to vector<2x1x256xf32>
    %767 = arith.subf %766, %765 : vector<2x1x256xf32>
    %768 = vector.broadcast %753 : vector<2x1x1xf32> to vector<2x16x256xf32>
    %769 = arith.mulf %757, %768 : vector<2x16x256xf32>
    %770 = arith.addf %621, %769 : vector<2x16x256xf32>
    %771 = vector.broadcast %767 : vector<2x1x256xf32> to vector<2x16x256xf32>
    %772 = arith.addf %770, %771 : vector<2x16x256xf32>
    %c0_273 = arith.constant 0 : index
    %c0_274 = arith.constant 0 : index
    %c0_275 = arith.constant 0 : index
    %773 = vector.load %arg13[%c0_273, %c0_274, %c0_275] : memref<2x16x256xf32, #tpu.memory_space<vmem>>, vector<2x16x256xf32>
    tpu.vector_store %arg13[%c0_273, %c0_274, %c0_275], %772 {strides = array<i32>} : memref<2x16x256xf32, #tpu.memory_space<vmem>>, vector<2x16x256xf32>,
    return
  }
  func.func @transform_0(%arg0: i32) -> (i32, i32, i32) {
    %c0_i32 = arith.constant 0 : i32
    %c0_i32_0 = arith.constant 0 : i32
    %c0_i32_1 = arith.constant 0 : i32
    return %arg0, %c0_i32, %c0_i32_0 : i32, i32, i32
  }
  func.func @transform_1(%arg0: i32) -> (i32, i32) {
    %c0_i32 = arith.constant 0 : i32
    %c0_i32_0 = arith.constant 0 : i32
    %c0_i32_1 = arith.constant 0 : i32
    return %c0_i32, %c0_i32_0 : i32, i32
  }
  func.func @transform_2(%arg0: i32) -> (i32, i32, i32) {
    %c0_i32 = arith.constant 0 : i32
    %c0_i32_0 = arith.constant 0 : i32
    %c0_i32_1 = arith.constant 0 : i32
    %c0_i32_2 = arith.constant 0 : i32
    return %c0_i32, %c0_i32_0, %c0_i32_1 : i32, i32, i32
  }
  func.func @transform_3(%arg0: i32) -> (i32, i32, i32) {
    %c0_i32 = arith.constant 0 : i32
    %c0_i32_0 = arith.constant 0 : i32
    %c0_i32_1 = arith.constant 0 : i32
    %c0_i32_2 = arith.constant 0 : i32
    return %c0_i32, %c0_i32_0, %c0_i32_1 : i32, i32, i32
  }
  func.func @transform_4(%arg0: i32) -> (i32, i32, i32) {
    %c0_i32 = arith.constant 0 : i32
    %c0_i32_0 = arith.constant 0 : i32
    %c0_i32_1 = arith.constant 0 : i32
    %c0_i32_2 = arith.constant 0 : i32
    return %c0_i32, %c0_i32_0, %c0_i32_1 : i32, i32, i32
  }
  func.func @transform_5(%arg0: i32) -> (i32, i32) {
    %c0_i32 = arith.constant 0 : i32
    %c0_i32_0 = arith.constant 0 : i32
    %c0_i32_1 = arith.constant 0 : i32
    return %c0_i32, %c0_i32_0 : i32, i32
  }
  func.func @transform_6(%arg0: i32) -> (i32, i32) {
    %c0_i32 = arith.constant 0 : i32
    %c0_i32_0 = arith.constant 0 : i32
    %c0_i32_1 = arith.constant 0 : i32
    return %c0_i32, %c0_i32_0 : i32, i32
  }
  func.func @transform_7(%arg0: i32) -> (i32, i32) {
    %c0_i32 = arith.constant 0 : i32
    %c0_i32_0 = arith.constant 0 : i32
    %c0_i32_1 = arith.constant 0 : i32
    return %c0_i32, %c0_i32_0 : i32, i32
  }
  func.func @transform_8(%arg0: i32) -> (i32, i32) {
    %c0_i32 = arith.constant 0 : i32
    %c0_i32_0 = arith.constant 0 : i32
    %c0_i32_1 = arith.constant 0 : i32
    return %c0_i32, %c0_i32_0 : i32, i32
  }
  func.func @transform_9(%arg0: i32) -> (i32, i32) {
    %c0_i32 = arith.constant 0 : i32
    %c0_i32_0 = arith.constant 0 : i32
    %c0_i32_1 = arith.constant 0 : i32
    return %c0_i32, %c0_i32_0 : i32, i32
  }
  func.func @transform_10(%arg0: i32) -> (i32, i32) {
    %c0_i32 = arith.constant 0 : i32
    %c0_i32_0 = arith.constant 0 : i32
    %c0_i32_1 = arith.constant 0 : i32
    return %c0_i32, %c0_i32_0 : i32, i32
  }
  func.func @transform_11(%arg0: i32) -> (i32, i32) {
    %c0_i32 = arith.constant 0 : i32
    %c0_i32_0 = arith.constant 0 : i32
    %c0_i32_1 = arith.constant 0 : i32
    return %c0_i32, %c0_i32_0 : i32, i32
  }
  func.func @transform_12(%arg0: i32) -> (i32, i32, i32) {
    %c0_i32 = arith.constant 0 : i32
    %c0_i32_0 = arith.constant 0 : i32
    %c0_i32_1 = arith.constant 0 : i32
    return %arg0, %c0_i32, %c0_i32_0 : i32, i32, i32
  }
}

</mosaic_0001>

<bundles_post_ra>
// kernel: tpu_custom_call.1
= control target key start
LH: loop header
LB: loop body
LE: loop exit
PB: predicated region body
PF: predicated region fallthrough
CT: control target
= control target key end

     0   :  { %17 = vsyncpa [#allocation3], 0  ;;  %s15717_s0 = inlined_call_operand.hbm [shape: f32[2,16,30], index: 0, kind: input, shape index: {}]   ;;  %s15718_s1 = inlined_call_operand.hbm [shape: bf16[30,256], index: 1, kind: input, shape index: {}]   ;;  %s15719_s2 = inlined_call_operand.hbm [shape: bf16[5,256,512], index: 2, kind: input, shape index: {}]   ;;  %s15720_s3 = inlined_call_operand.hbm [shape: bf16[5,512,256], index: 3, kind: input, shape index: {}]   ;;  %s15721_s4 = inlined_call_operand.hbm [shape: bf16[5,3,512], index: 4, kind: input, shape index: {}]   ;;  %s15722_s5 = inlined_call_operand.hbm [shape: bf16[5,512], index: 5, kind: input, shape index: {}]   ;;  %s15723_s6 = inlined_call_operand.hbm [shape: f32[5,512], index: 6, kind: input, shape index: {}]   ;;  %s15724_s7 = inlined_call_operand.hbm [shape: f32[5,512], index: 7, kind: input, shape index: {}]   ;;  %s15725_s8 = inlined_call_operand.hbm [shape: f32[5,512], index: 8, kind: input, shape index: {}]   ;;  %s15726_s9 = inlined_call_operand.hbm [shape: f32[5,512], index: 9, kind: input, shape index: {}]   ;;  %s15727_s10 = inlined_call_operand.hbm [shape: f32[5,256], index: 10, kind: input, shape index: {}]   ;;  %s15728_s11 = inlined_call_operand.hbm [shape: f32[5,256], index: 11, kind: input, shape index: {}]   ;;  %s15729_s12 = inlined_call_operand.hbm [shape: f32[2,16,256], index: 12, kind: output, shape index: {}]  }
   0x1   :  { %18 = vsyncpa [#allocation6], 0 }
   0x2   :  { %19 = vsyncpa [#allocation9], 0 }
   0x3   :  { %20 = vsyncpa [#allocation12], 0 }
   0x4   :  { %21 = vsyncpa [#allocation15], 0 }
   0x5   :  { %22 = vsyncpa [#allocation18], 0 }
   0x6   :  { %23 = vsyncpa [#allocation21], 0 }
   0x7   :  { %24 = vsyncpa [#allocation4], 0  ;;  %s12423_s21 = smov [#allocation5]   ;;  %s12424_s23 = smov [#allocation8]  }
   0x8   :  { %s42_s22 = sshll.u32 %s12423_s21, 4  ;;  %s66_s24 = sshll.u32 %s12424_s23, 4  ;;  %s43_s22 = int_to_ptr.vmem [resolvable:$true] %s42_s22  ;;  %s67_s24 = int_to_ptr.vmem [resolvable:$true] %s66_s24 }
   0x9   :  { %s12155_s25 = scalar_lea.vmem %s43_s22, 512  ;;  %p12160_p1 = scmp.lt.s32.totalorder %s43_s22, %s43_s22 }
   0xa   :  { %p12156_p0 = scmp.ne.s32.totalorder %s43_s22, %s12155_s25  ;;  %p12161_p2 = scmp.lt.s32.totalorder %s12155_s25, %s12155_s25 }
   0xc   :  { %p12162_p3 = por %p12161_p2, %p12160_p1 }
   0xe   :  { %p12163_p4 = pnand %p12162_p3, %p12156_p0 }
  0x10   :  { %12166 = shalt.err (!%p12163_p4)
}
  0x11   :  { %s12425_s26 = smov 128   ;;  %s12426_s27 = smov 8  }
  0x12   :  { %48 = dma.hbm_to_vmem [thread:$0]  %s15718_s1, 512, %s43_s22, [#allocation6], %s12425_s26, %s12425_s26, %s12426_s27  }
  0x13   :  { %s12175_s30 = scalar_lea.vmem %s67_s24, 40960  ;;  %p12180_p6 = scmp.lt.s32.totalorder %s67_s24, %s67_s24 }
  0x14   :  { %p12176_p5 = scmp.ne.s32.totalorder %s67_s24, %s12175_s30  ;;  %p12181_p7 = scmp.lt.s32.totalorder %s12175_s30, %s12175_s30 }
  0x16   :  { %p12182_p8 = por %p12181_p7, %p12180_p6 }
  0x18   :  { %p12183_p9 = pnand %p12182_p8, %p12176_p5 }
  0x1a   :  { %12186 = shalt.err (!%p12183_p9)
}
  0x1b   :  { %72 = dma.hbm_to_vmem [thread:$0]  %s15720_s3, 40960, %s67_s24, [#allocation9], %s12425_s26, %s12425_s26, %s12426_s27  }
  0x1c   :  { %s12427_s15 = smov [#allocation11]   ;;  %s12428_s17 = smov [#allocation14]  }
  0x1d   :  { %s91_s16 = sshll.u32 %s12427_s15, 4  ;;  %s111_s18 = sshll.u32 %s12428_s17, 4  ;;  %s92_s16 = int_to_ptr.vmem [resolvable:$true] %s91_s16  ;;  %s112_s18 = int_to_ptr.vmem [resolvable:$true] %s111_s18 }
  0x1e   :  { %s12195_s1 = scalar_lea.vmem %s92_s16, 256  ;;  %p12200_p11 = scmp.lt.s32.totalorder %s92_s16, %s92_s16 }
  0x1f   :  { %p12196_p10 = scmp.ne.s32.totalorder %s92_s16, %s12195_s1  ;;  %p12201_p12 = scmp.lt.s32.totalorder %s12195_s1, %s12195_s1 }
  0x21   :  { %p12202_p13 = por %p12201_p12, %p12200_p11 }
  0x23   :  { %p12203_p0 = pnand %p12202_p13, %p12196_p10 }
  0x25   :  { %12206 = shalt.err (!%p12203_p0)
}
  0x26   :  { %94 = dma.hbm_to_vmem [thread:$0]  %s15722_s5, 256, %s92_s16, [#allocation12]  }
  0x27   :  { %s12215_s21 = scalar_lea.vmem %s112_s18, 512  ;;  %p12220_p2 = scmp.lt.s32.totalorder %s112_s18, %s112_s18 }
  0x28   :  { %p12216_p1 = scmp.ne.s32.totalorder %s112_s18, %s12215_s21  ;;  %p12221_p3 = scmp.lt.s32.totalorder %s12215_s21, %s12215_s21 }
  0x2a   :  { %p12222_p4 = por %p12221_p3, %p12220_p2 }
  0x2c   :  { %p12223_p5 = pnand %p12222_p4, %p12216_p1 }
  0x2e   :  { %12226 = shalt.err (!%p12223_p5)
}
  0x2f   :  { %114 = dma.hbm_to_vmem [thread:$0]  %s15724_s7, 512, %s112_s18, [#allocation15]  }
  0x30   :  { %s12429_s23 = smov [#allocation17]   ;;  %s12430_s25 = smov [#allocation2]  }
  0x31   :  { %s131_s24 = sshll.u32 %s12429_s23, 4  ;;  %s30_s28 = sshll.u32 %s12430_s25, 4  ;;  %s132_s24 = int_to_ptr.vmem [resolvable:$true] %s131_s24  ;;  %s31_s28 = int_to_ptr.vmem [resolvable:$true] %s30_s28 }
  0x32   :  { %s12235_s29 = scalar_lea.vmem %s132_s24, 512  ;;  %p12240_p7 = scmp.lt.s32.totalorder %s132_s24, %s132_s24 }
  0x33   :  { %p12236_p6 = scmp.ne.s32.totalorder %s132_s24, %s12235_s29  ;;  %p12241_p8 = scmp.lt.s32.totalorder %s12235_s29, %s12235_s29 }
  0x35   :  { %p12242_p9 = por %p12241_p8, %p12240_p7 }
  0x37   :  { %p12243_p10 = pnand %p12242_p9, %p12236_p6 }
  0x39   :  { %12246 = shalt.err (!%p12243_p10)
}
  0x3a   :  { %134 = dma.hbm_to_vmem [thread:$0]  %s15726_s9, 512, %s132_s24, [#allocation18]  }
  0x3b   :  { %s12255_s13 = scalar_lea.vmem %s31_s28, 512  ;;  %p12260_p12 = scmp.lt.s32.totalorder %s31_s28, %s31_s28 }
  0x3c   :  { %p12256_p11 = scmp.ne.s32.totalorder %s31_s28, %s12255_s13  ;;  %p12261_p13 = scmp.lt.s32.totalorder %s12255_s13, %s12255_s13 }
  0x3e   :  { %p12262_p0 = por %p12261_p13, %p12260_p12 }
  0x40   :  { %p12263_p1 = pnand %p12262_p0, %p12256_p11 }
  0x42   :  { %12266 = shalt.err (!%p12263_p1)
}
  0x43   :  { %36 = dma.hbm_to_vmem [thread:$0]  %s15717_s0, 512, %s31_s28, [#allocation3], %s12425_s26, %s12425_s26, %s12426_s27  }
  0x44   :  { %s12431_s15 = smov [#allocation7]  }
  0x45   :  { %s54_s16 = sshll.u32 %s12431_s15, 4  ;;  %s55_s16 = int_to_ptr.vmem [resolvable:$true] %s54_s16 }
  0x46   :  { %s12275_s17 = scalar_lea.vmem %s55_s16, 40960  ;;  %p12280_p3 = scmp.lt.s32.totalorder %s55_s16, %s55_s16 }
  0x47   :  { %p12276_p2 = scmp.ne.s32.totalorder %s55_s16, %s12275_s17  ;;  %p12281_p4 = scmp.lt.s32.totalorder %s12275_s17, %s12275_s17 }
  0x49   :  { %p12282_p5 = por %p12281_p4, %p12280_p3 }
  0x4b   :  { %p12283_p6 = pnand %p12282_p5, %p12276_p2 }
  0x4d   :  { %12286 = shalt.err (!%p12283_p6)
}
  0x4e   :  { %s12432_s9 = smov 256   ;;  %s12433_s18 = smov 16  }
  0x4f   :  { %60 = dma.hbm_to_vmem [thread:$0]  %s15719_s2, 40960, %s55_s16, [#allocation6], %s12432_s9, %s12432_s9, %s12433_s18  }
  0x50   :  { %s12434_s0 = smov [#allocation10]   ;;  %s12435_s21 = smov [#allocation13]  }
  0x51   :  { %s78_s20 = sshll.u32 %s12434_s0, 4  ;;  %s101_s3 = sshll.u32 %s12435_s21, 4  ;;  %s79_s20 = int_to_ptr.vmem [resolvable:$true] %s78_s20  ;;  %s102_s3 = int_to_ptr.vmem [resolvable:$true] %s101_s3 }
  0x52   :  { %s12295_s22 = scalar_lea.vmem %s79_s20, 640  ;;  %p12300_p8 = scmp.lt.s32.totalorder %s79_s20, %s79_s20 }
  0x53   :  { %p12296_p7 = scmp.ne.s32.totalorder %s79_s20, %s12295_s22  ;;  %p12301_p9 = scmp.lt.s32.totalorder %s12295_s22, %s12295_s22 }
  0x55   :  { %p12302_p10 = por %p12301_p9, %p12300_p8 }
  0x57   :  { %p12303_p11 = pnand %p12302_p10, %p12296_p7 }
  0x59   :  { %12306 = shalt.err (!%p12303_p11)
}
  0x5a   :  { %84 = dma.hbm_to_vmem [thread:$0]  %s15721_s4, 640, %s79_s20, [#allocation9], %s12425_s26, %s12425_s26, %s12426_s27  }
  0x5b   :  { %s12315_s2 = scalar_lea.vmem %s102_s3, 512  ;;  %p12320_p13 = scmp.lt.s32.totalorder %s102_s3, %s102_s3 }
  0x5c   :  { %p12316_p12 = scmp.ne.s32.totalorder %s102_s3, %s12315_s2  ;;  %p12321_p0 = scmp.lt.s32.totalorder %s12315_s2, %s12315_s2 }
  0x5e   :  { %p12322_p1 = por %p12321_p0, %p12320_p13 }
  0x60   :  { %p12323_p2 = pnand %p12322_p1, %p12316_p12 }
  0x62   :  { %12326 = shalt.err (!%p12323_p2)
}
  0x63   :  { %104 = dma.hbm_to_vmem [thread:$0]  %s15723_s6, 512, %s102_s3, [#allocation12]  }
  0x64   :  { %s12436_s29 = smov [#allocation16]   ;;  %s12437_s30 = smov [#allocation19]  }
  0x65   :  { %s121_s5 = sshll.u32 %s12436_s29, 4  ;;  %s141_s13 = sshll.u32 %s12437_s30, 4  ;;  %s122_s5 = int_to_ptr.vmem [resolvable:$true] %s121_s5  ;;  %s142_s13 = int_to_ptr.vmem [resolvable:$true] %s141_s13 }
  0x66   :  { %s12335_s7 = scalar_lea.vmem %s122_s5, 512  ;;  %p12340_p4 = scmp.lt.s32.totalorder %s122_s5, %s122_s5 }
  0x67   :  { %p12336_p3 = scmp.ne.s32.totalorder %s122_s5, %s12335_s7  ;;  %p12341_p5 = scmp.lt.s32.totalorder %s12335_s7, %s12335_s7 }
  0x69   :  { %p12342_p6 = por %p12341_p5, %p12340_p4 }
  0x6b   :  { %p12343_p7 = pnand %p12342_p6, %p12336_p3 }
  0x6d   :  { %12346 = shalt.err (!%p12343_p7)
}
  0x6e   :  { %124 = dma.hbm_to_vmem [thread:$0]  %s15725_s8, 512, %s122_s5, [#allocation15]  }
  0x6f   :  { %s12355_s27 = scalar_lea.vmem %s142_s13, 256  ;;  %p12360_p9 = scmp.lt.s32.totalorder %s142_s13, %s142_s13 }
  0x70   :  { %p12356_p8 = scmp.ne.s32.totalorder %s142_s13, %s12355_s27  ;;  %p12361_p10 = scmp.lt.s32.totalorder %s12355_s27, %s12355_s27 }
  0x72   :  { %p12362_p11 = por %p12361_p10, %p12360_p9 }
  0x74   :  { %p12363_p12 = pnand %p12362_p11, %p12356_p8 }
  0x76   :  { %12366 = shalt.err (!%p12363_p12)
}
  0x77   :  { %144 = dma.hbm_to_vmem [thread:$0]  %s15727_s10, 256, %s142_s13, [#allocation18]  }
  0x78   :  { %s12438_s15 = smov [#allocation20]  }
  0x79   :  { %s151_s16 = sshll.u32 %s12438_s15, 4  ;;  %s152_s16 = int_to_ptr.vmem [resolvable:$true] %s151_s16 }
  0x7a   :  { %s12375_s17 = scalar_lea.vmem %s152_s16, 256  ;;  %p12380_p0 = scmp.lt.s32.totalorder %s152_s16, %s152_s16 }
  0x7b   :  { %p12376_p13 = scmp.ne.s32.totalorder %s152_s16, %s12375_s17  ;;  %p12381_p1 = scmp.lt.s32.totalorder %s12375_s17, %s12375_s17 }
  0x7d   :  { %p12382_p2 = por %p12381_p1, %p12380_p0 }
  0x7f   :  { %p12383_p3 = pnand %p12382_p2, %p12376_p13 }
  0x81   :  { %12386 = shalt.err (!%p12383_p3)
}
  0x82   :  { %154 = dma.hbm_to_vmem [thread:$0]  %s15728_s11, 256, %s152_s16, [#allocation21]  }
  0x83   :  { %12407 = dma.done.wait [#allocation3], 512  }
  0x84   :  { %12408 = vsyncadd [#allocation3], 4294966784 }
  0x85   :  { %12409 = dma.done.wait [#allocation6], 41472  }
  0x86   :  { %12410 = vsyncadd [#allocation6], 4294925824 }
  0x87   :  { %12411 = dma.done.wait [#allocation9], 41600  }
  0x88   :  { %12412 = vsyncadd [#allocation9], 4294925696 }
  0x89   :  { %12413 = dma.done.wait [#allocation12], 768  }
  0x8a   :  { %12414 = vsyncadd [#allocation12], 4294966528 }
  0x8b   :  { %12415 = dma.done.wait [#allocation15], 1024  }
  0x8c   :  { %12416 = vsyncadd [#allocation15], 4294966272 }
  0x8d   :  { %12417 = dma.done.wait [#allocation18], 768  }
  0x8e   :  { %12418 = vsyncadd [#allocation18], 4294966528 }
  0x8f   :  { %12419 = dma.done.wait [#allocation21], 256  }
  0x90   :  { %12420 = vsyncadd [#allocation21], 4294967040  ;;  %v15730_v0 = vmov 0   ;;  %vm227_vm0 = vcmask 1046528   ;;  %v11099_v3 = vld [vmem:[#allocation5 + $0x4] ss:$8 sps:$4 sm:$0xff]  }
  0x91   :  { %266 = vmatprep.mubr.bf16.mxu0 %v15730_v0  ;;  %v11096_v1 = vld [vmem:[#allocation5 + $0x14] ss:$8 sps:$4 sm:$0x7f]   ;;  %v11098_v2 = vld [vmem:[#allocation5 + $0x10] ss:$8 sps:$4 sm:$0x7f]  }
  0x92   :  { %10410 = vmatprep.subr.msk.bf16.mxu0 %vm227_vm0, %v11096_v1  ;;  %v229_v4 = vsel %vm227_vm0, %v11098_v2, 0  ;;  %v11101_v5 = vld [vmem:[#allocation5] ss:$8 sps:$4 sm:$0xff]   ;;  %v11102_v8 = vld [vmem:[#allocation7 + $0xe4] ss:$16 sps:$4 sm:$0xff]   ;;  %vm220_vm1 = vcmask 244736  }
  0x93   :  { %v192_v6 = vld [vmem:[#allocation2] sm:$0xff]  ;;  %v193_v7 = vld [vmem:[#allocation2 + $0x8] sm:$0xff]  ;;  %247 = vmatpush1.bf16.msra.mxu0 %v229_v4  ;;  %790 = vmatprep.subr.bf16.mxu1 %v11102_v8  ;;  %v194_v17 = vld [vmem:[#allocation2 + $0x10] sm:$0xff]  ;;  %s12443_s10 = smov [#allocation22]  }
  0x94   :  { %248 = vmatprep.subr.bf16.mxu0 %v11099_v3  ;;  %v11106_v9 = vld [vmem:[#allocation7 + $0xec] ss:$16 sps:$4 sm:$0xff]   ;;  %v11107_v10 = vld [vmem:[#allocation7 + $0xe0] ss:$16 sps:$4 sm:$0xff]   ;;  %v196_v11 = vpack.c.bf16 %v193_v7, %v192_v6  ;;  %v11108_v12 = vld [vmem:[#allocation7 + $0xc4] ss:$16 sps:$4 sm:$0xff]  }
  0x95   :  { %v11104_v13 = vld [vmem:[#allocation7 + $0xe8] ss:$16 sps:$4 sm:$0xff]   ;;  %791 = vmatpush1.bf16.msra.mxu1 %v11107_v10  ;;  %v11112_v14 = vld [vmem:[#allocation7 + $0xcc] ss:$16 sps:$4 sm:$0xff]   ;;  %v11113_v15 = vld [vmem:[#allocation7 + $0xc0] ss:$16 sps:$4 sm:$0xff]  }
  0x96   :  { %792 = vmatprep.subr.bf16.mxu1 %v11108_v12  ;;  %v11114_v16 = vld [vmem:[#allocation7 + $0xa4] ss:$16 sps:$4 sm:$0xff]   ;;  %v195_v18 = vld [vmem:[#allocation2 + $0x18] sm:$0xff]  ;;  %v11119_v21 = vld [vmem:[#allocation7 + $0xa0] ss:$16 sps:$4 sm:$0xff]   ;;  %s10388_s11 = sshll.u32 %s12443_s10, 4  ;;  %s10389_s11 = int_to_ptr.vmem [resolvable:$true] %s10388_s11 }
  0x97   :  { %249 = vmatpush1.bf16.msra.mxu0 %v11101_v5  ;;  %v11110_v19 = vld [vmem:[#allocation7 + $0xc8] ss:$16 sps:$4 sm:$0xff]   ;;  %v11118_v20 = vld [vmem:[#allocation7 + $0xac] ss:$16 sps:$4 sm:$0xff]   ;;  %v11120_v22 = vld [vmem:[#allocation7 + $0x84] ss:$16 sps:$4 sm:$0xff]   ;;  %v197_v23 = vpack.c.bf16 %v195_v18, %v194_v17  ;;  %p12392_p5 = scmp.lt.s32.totalorder %s10389_s11, %s10389_s11 }
  0x98   :  { %843 = vmatprep.subr.bf16.mxu0 %v11106_v9  ;;  %v11116_v24 = vld [vmem:[#allocation7 + $0xa8] ss:$16 sps:$4 sm:$0xff]   ;;  %v11124_v25 = vld [vmem:[#allocation7 + $0x8c] ss:$16 sps:$4 sm:$0xff]   ;;  %v11125_v26 = vld [vmem:[#allocation7 + $0x80] ss:$16 sps:$4 sm:$0xff]  }
  0x99   :  { %793 = vmatpush1.bf16.msra.mxu1 %v11113_v15  ;;  %v11126_v27 = vld [vmem:[#allocation7 + $0x64] ss:$16 sps:$4 sm:$0xff]   ;;  %v11122_v28 = vld [vmem:[#allocation7 + $0x88] ss:$16 sps:$4 sm:$0xff]   ;;  %v11130_v29 = vld [vmem:[#allocation7 + $0x6c] ss:$16 sps:$4 sm:$0xff]  }
  0x9a   :  { %10411 = vmatmul.mubr.msk.bf16.vlgmr.msra.gmra.mxu0 %vm220_vm1, %v196_v11  ;;  %794 = vmatprep.subr.bf16.mxu1 %v11114_v16  ;;  %v11131_v30 = vld [vmem:[#allocation7 + $0x60] ss:$16 sps:$4 sm:$0xff]   ;;  %v11132_v31 = vld [vmem:[#allocation7 + $0x44] ss:$16 sps:$4 sm:$0xff]   ;;  %v11128_v32 = vld [vmem:[#allocation7 + $0x68] ss:$16 sps:$4 sm:$0xff]  }
  0x9b   :  { %276 = vmatprep.mubr.bf16.mxu0 %v15730_v0  ;;  %844 = vmatpush1.bf16.msra.mxu0 %v11104_v13  ;;  %v11136_v33 = vld [vmem:[#allocation7 + $0x4c] ss:$16 sps:$4 sm:$0xff]   ;;  %v11137_v34 = vld [vmem:[#allocation7 + $0x40] ss:$16 sps:$4 sm:$0xff]   ;;  %v11138_v35 = vld [vmem:[#allocation7 + $0x24] ss:$16 sps:$4 sm:$0xff]  }
  0x9c   :  { %845 = vmatprep.subr.bf16.mxu0 %v11112_v14  ;;  %v11134_v36 = vld [vmem:[#allocation7 + $0x48] ss:$16 sps:$4 sm:$0xff]   ;;  %v11142_v37 = vld [vmem:[#allocation7 + $0x2c] ss:$16 sps:$4 sm:$0xff]   ;;  %v11143_v38 = vld [vmem:[#allocation7 + $0x20] ss:$16 sps:$4 sm:$0xff]  }
  0x9d   :  { %795 = vmatpush1.bf16.msra.mxu1 %v11119_v21  ;;  %v11144_v39 = vld [vmem:[#allocation7 + $0x4] ss:$16 sps:$4 sm:$0xff]   ;;  %v11140_v40 = vld [vmem:[#allocation7 + $0x28] ss:$16 sps:$4 sm:$0xff]   ;;  %v11148_v41 = vld [vmem:[#allocation7 + $0xc] ss:$16 sps:$4 sm:$0xff]  }
  0x9e   :  { %796 = vmatprep.subr.bf16.mxu1 %v11120_v22  ;;  %v11149_v42 = vld [vmem:[#allocation7] ss:$16 sps:$4 sm:$0xff]   ;;  %v11150_v43 = vld [vmem:[#allocation7 + $0x1e4] ss:$16 sps:$4 sm:$0xff]   ;;  %v11146_v44 = vld [vmem:[#allocation7 + $0x8] ss:$16 sps:$4 sm:$0xff]  }
  0x9f   :  { %846 = vmatpush1.bf16.msra.mxu0 %v11110_v19  ;;  %v11154_v45 = vld [vmem:[#allocation7 + $0x1ec] ss:$16 sps:$4 sm:$0xff]   ;;  %v11155_v46 = vld [vmem:[#allocation7 + $0x1e0] ss:$16 sps:$4 sm:$0xff]   ;;  %v11152_v47 = vld [vmem:[#allocation7 + $0x1e8] ss:$16 sps:$4 sm:$0xff]  }
  0xa0   :  { %847 = vmatprep.subr.bf16.mxu0 %v11118_v20  ;;  %v11156_v48 = vld [vmem:[#allocation7 + $0x1c4] ss:$16 sps:$4 sm:$0xff]   ;;  %v11160_v49 = vld [vmem:[#allocation7 + $0x1cc] ss:$16 sps:$4 sm:$0xff]   ;;  %v11161_v50 = vld [vmem:[#allocation7 + $0x1c0] ss:$16 sps:$4 sm:$0xff]  }
  0xa1   :  { %797 = vmatpush1.bf16.msra.mxu1 %v11125_v26  ;;  %v11162_v51 = vld [vmem:[#allocation7 + $0x1a4] ss:$16 sps:$4 sm:$0xff]   ;;  %v11158_v52 = vld [vmem:[#allocation7 + $0x1c8] ss:$16 sps:$4 sm:$0xff]   ;;  %v11166_v53 = vld [vmem:[#allocation7 + $0x1ac] ss:$16 sps:$4 sm:$0xff]  }
  0xa2   :  { %10412 = vmatmul.mubr.msk.bf16.gmra.mxu0 %vm220_vm1, %v197_v23  ;;  %798 = vmatprep.subr.bf16.mxu1 %v11126_v27  ;;  %v11167_v54 = vld [vmem:[#allocation7 + $0x1a0] ss:$16 sps:$4 sm:$0xff]   ;;  %v11168_v55 = vld [vmem:[#allocation7 + $0x184] ss:$16 sps:$4 sm:$0xff]   ;;  %v11164_v56 = vld [vmem:[#allocation7 + $0x1a8] ss:$16 sps:$4 sm:$0xff]  }
  0xa3   :  { %848 = vmatpush1.bf16.msra.mxu0 %v11116_v24  ;;  %v11172_v57 = vld [vmem:[#allocation7 + $0x18c] ss:$16 sps:$4 sm:$0xff]   ;;  %v11173_v58 = vld [vmem:[#allocation7 + $0x180] ss:$16 sps:$4 sm:$0xff]   ;;  %v11174_v59 = vld [vmem:[#allocation7 + $0x164] ss:$16 sps:$4 sm:$0xff]  }
  0xa4   :  { %849 = vmatprep.subr.bf16.mxu0 %v11124_v25  ;;  %v11170_v60 = vld [vmem:[#allocation7 + $0x188] ss:$16 sps:$4 sm:$0xff]   ;;  %v11178_v61 = vld [vmem:[#allocation7 + $0x16c] ss:$16 sps:$4 sm:$0xff]   ;;  %v11179_v62 = vld [vmem:[#allocation7 + $0x160] ss:$16 sps:$4 sm:$0xff]  }
  0xa5   :  { %799 = vmatpush1.bf16.msra.mxu1 %v11131_v30  ;;  %v11176_v63 = vld [vmem:[#allocation7 + $0x168] ss:$16 sps:$4 sm:$0xff]   ;;  %v11180_v1 = vld [vmem:[#allocation7 + $0x144] ss:$16 sps:$4 sm:$0xff]   ;;  %v11184_v2 = vld [vmem:[#allocation7 + $0x14c] ss:$16 sps:$4 sm:$0xff]  }
  0xa6   :  { %800 = vmatprep.subr.bf16.mxu1 %v11132_v31  ;;  %v11182_v3 = vld [vmem:[#allocation7 + $0x148] ss:$16 sps:$4 sm:$0xff]   ;;  %v11185_v4 = vld [vmem:[#allocation7 + $0x140] ss:$16 sps:$4 sm:$0xff]   ;;  %v11186_v5 = vld [vmem:[#allocation7 + $0x124] ss:$16 sps:$4 sm:$0xff]  }
  0xa7   :  { %850 = vmatpush1.bf16.msra.mxu0 %v11122_v28  ;;  %v11190_v6 = vld [vmem:[#allocation7 + $0x12c] ss:$16 sps:$4 sm:$0xff]   ;;  %v11188_v7 = vld [vmem:[#allocation7 + $0x128] ss:$16 sps:$4 sm:$0xff]   ;;  %v11191_v8 = vld [vmem:[#allocation7 + $0x120] ss:$16 sps:$4 sm:$0xff]  }
  0xa8   :  { %851 = vmatprep.subr.bf16.mxu0 %v11130_v29  ;;  %v11192_v9 = vld [vmem:[#allocation7 + $0x104] ss:$16 sps:$4 sm:$0xff]   ;;  %v11196_v10 = vld [vmem:[#allocation7 + $0x10c] ss:$16 sps:$4 sm:$0xff]   ;;  %v11194_v11 = vld [vmem:[#allocation7 + $0x108] ss:$16 sps:$4 sm:$0xff]  }
  0xa9   :  { %801 = vmatpush1.bf16.msra.mxu1 %v11137_v34  ;;  %v11197_v12 = vld [vmem:[#allocation7 + $0x100] ss:$16 sps:$4 sm:$0xff]   ;;  %s12387_s19 = scalar_lea.vmem %s10389_s11, 1024 }
  0xaa   :  { %802 = vmatprep.subr.bf16.mxu1 %v11138_v35  ;;  %p12388_p4 = scmp.ne.s32.totalorder %s10389_s11, %s12387_s19  ;;  %p12393_p6 = scmp.lt.s32.totalorder %s12387_s19, %s12387_s19 }
  0xab   :  { %852 = vmatpush1.bf16.msra.mxu0 %v11128_v32 }
  0xac   :  { %853 = vmatprep.subr.bf16.mxu0 %v11136_v33  ;;  %p12394_p7 = por %p12393_p6, %p12392_p5 }
  0xad   :  { %803 = vmatpush1.bf16.msra.mxu1 %v11143_v38 }
  0xae   :  { %804 = vmatprep.subr.bf16.mxu1 %v11144_v39  ;;  %p12395_p8 = pnand %p12394_p7, %p12388_p4 }
  0xaf   :  { %854 = vmatpush1.bf16.msra.mxu0 %v11134_v36 }
  0xb0   :  { %855 = vmatprep.subr.bf16.mxu0 %v11142_v37 }
  0xb1   :  { %805 = vmatpush1.bf16.msra.mxu1 %v11149_v42 }
  0xb2   :  { %806 = vmatprep.subr.bf16.mxu1 %v11150_v43 }
  0xb3   :  { %856 = vmatpush1.bf16.msra.mxu0 %v11140_v40 }
  0xb4   :  { %857 = vmatprep.subr.bf16.mxu0 %v11148_v41 }
  0xb5   :  { %807 = vmatpush2.bf16.msra.mxu1 %v11155_v46 }
  0xb6   :  { %808 = vmatprep.subr.bf16.mxu1 %v11156_v48 }
  0xb7   :  { %858 = vmatpush1.bf16.msra.mxu0 %v11146_v44 }
  0xb8   :  { %859 = vmatprep.subr.bf16.mxu0 %v11154_v45 }
  0xb9   :  { %809 = vmatpush2.bf16.msra.mxu1 %v11161_v50 }
  0xba   :  { %810 = vmatprep.subr.bf16.mxu1 %v11162_v51 }
  0xbb   :  { %860 = vmatpush2.bf16.msra.mxu0 %v11152_v47 }
  0xbc   :  { %861 = vmatprep.subr.bf16.mxu0 %v11160_v49 }
  0xbd   :  { %811 = vmatpush2.bf16.msra.mxu1 %v11167_v54 }
  0xbe   :  { %812 = vmatprep.subr.bf16.mxu1 %v11168_v55 }
  0xbf   :  { %862 = vmatpush2.bf16.msra.mxu0 %v11158_v52 }
  0xc0   :  { %863 = vmatprep.subr.bf16.mxu0 %v11166_v53 }
  0xc1   :  { %813 = vmatpush2.bf16.msra.mxu1 %v11173_v58 }
  0xc2   :  { %814 = vmatprep.subr.bf16.mxu1 %v11174_v59 }
  0xc3   :  { %864 = vmatpush2.bf16.msra.mxu0 %v11164_v56 }
  0xc4   :  { %865 = vmatprep.subr.bf16.mxu0 %v11172_v57 }
  0xc5   :  { %815 = vmatpush2.bf16.msra.mxu1 %v11179_v62 }
  0xc6   :  { %816 = vmatprep.subr.bf16.mxu1 %v11180_v1 }
  0xc7   :  { %866 = vmatpush2.bf16.msra.mxu0 %v11170_v60 }
  0xc8   :  { %867 = vmatprep.subr.bf16.mxu0 %v11178_v61 }
  0xc9   :  { %817 = vmatpush2.bf16.msra.mxu1 %v11185_v4 }
  0xca   :  { %818 = vmatprep.subr.bf16.mxu1 %v11186_v5 }
  0xcb   :  { %868 = vmatpush2.bf16.msra.mxu0 %v11176_v63 }
  0xcc   :  { %869 = vmatprep.subr.bf16.mxu0 %v11184_v2 }
  0xcd   :  { %819 = vmatpush2.bf16.msra.mxu1 %v11191_v8 }
  0xce   :  { %820 = vmatprep.subr.bf16.mxu1 %v11192_v9 }
  0xcf   :  { %870 = vmatpush2.bf16.msra.mxu0 %v11182_v3 }
  0xd0   :  { %871 = vmatprep.subr.bf16.mxu0 %v11190_v6 }
  0xd1   :  { %821 = vmatpush2.bf16.msra.mxu1 %v11197_v12 }
  0xd3   :  { %872 = vmatpush2.bf16.msra.mxu0 %v11188_v7 }
  0xd4   :  { %873 = vmatprep.subr.bf16.mxu0 %v11196_v10 }
  0xd7   :  { %874 = vmatpush2.bf16.msra.mxu0 %v11194_v11 }
 0x15a   :  { %v12564_v13 = vpop.f32.mrf.mxu0 }
 0x15b   :  { %15865 = vst [vmem:[#allocation31_spill] sm:$0xff] %v12564_v13  ;;  %v304_v15 = vmax.f32 %v12564_v13, 0.0 }
 0x15c   :  { %v12566_v14 = vpop.f32.mrf.mxu0 }
 0x15d   :  { %15866 = vst [vmem:[#allocation32_spill] sm:$0xff] %v12566_v14  ;;  %v305_v17 = vmax.f32 %v12566_v14, 0.0  ;;  %v346_v23 = vmul.f32 %v304_v15, %v304_v15 }
 0x15e   :  { %v12569_v16 = vpop.f32.mrf.mxu0 }
 0x15f   :  { %15867 = vst [vmem:[#allocation33_spill] sm:$0xff] %v12569_v16  ;;  %v306_v18 = vmax.f32 %v12569_v16, 0.0  ;;  %v347_v25 = vmul.f32 %v305_v17, %v305_v17 }
 0x160   :  { %v12573_v19 = vpop.f32.mrf.mxu0 }
 0x161   :  { %15868 = vst [vmem:[#allocation34_spill] sm:$0xff] %v12573_v19  ;;  %v312_v20 = vadd.f32 %v306_v18, %v304_v15  ;;  %v348_v21 = vmul.f32 %v306_v18, %v306_v18  ;;  %v307_v22 = vmax.f32 %v12573_v19, 0.0  ;;  %v402_v31 = vpack.c.bf16 %v306_v18, %v304_v15 }
 0x162   :  { %v12576_v24 = vpop.f32.mrf.mxu0 }
 0x163   :  { %15869 = vst [vmem:[#allocation35_spill] sm:$0xff] %v12576_v24  ;;  %v319_v26 = vadd.f32 %v307_v22, %v305_v17  ;;  %v349_v27 = vmul.f32 %v307_v22, %v307_v22  ;;  %v403_v28 = vpack.c.bf16 %v307_v22, %v305_v17  ;;  %v308_v29 = vmax.f32 %v12576_v24, 0.0 }
 0x164   :  { %v12579_v30 = vpop.f32.mrf.mxu0  ;;  %v313_v32 = vrot.slane %v312_v20, 4  ;;  %v354_v33 = vadd.f32 %v348_v21, %v346_v23 }
 0x165   :  { %15870 = vst [vmem:[#allocation36_spill] sm:$0xff] %v12579_v30  ;;  %v309_v34 = vmax.f32 %v12579_v30, 0.0  ;;  %822 = vmatprep.mubr.bf16.mxu1 %v403_v28  ;;  %875 = vmatprep.mubr.bf16.mxu0 %v403_v28  ;;  %v320_v35 = vrot.slane %v319_v26, 4  ;;  %v361_v36 = vadd.f32 %v349_v27, %v347_v25  ;;  %v350_v43 = vmul.f32 %v308_v29, %v308_v29 }
 0x166   :  { %v12582_v37 = vpop.f32.mrf.mxu0  ;;  %823 = vmatmul.mubr.bf16.vlgmr.msra.gmra.mxu1 %v402_v31  ;;  %876 = vmatmul.mubr.bf16.vlgmr.msra.gmra.mxu0 %v402_v31  ;;  %v314_v38 = vadd.f32 %v313_v32, %v312_v20  ;;  %v355_v39 = vrot.slane %v354_v33, 4 }
 0x167   :  { %15871 = vst [vmem:[#allocation37_spill] sm:$0xff] %v12582_v37  ;;  %v310_v40 = vmax.f32 %v12582_v37, 0.0  ;;  %v321_v41 = vadd.f32 %v320_v35, %v319_v26  ;;  %v362_v42 = vrot.slane %v361_v36, 4  ;;  %v351_v44 = vmul.f32 %v309_v34, %v309_v34 }
 0x168   :  { %v12585_v45 = vpop.f32.mrf.mxu0  ;;  %v315_v46 = vrot.slane %v314_v38, 2  ;;  %v356_v47 = vadd.f32 %v355_v39, %v354_v33 }
 0x169   :  { %15872 = vst [vmem:[#allocation38_spill] sm:$0xff] %v12585_v45  ;;  %v326_v48 = vadd.f32 %v310_v40, %v308_v29  ;;  %v352_v49 = vmul.f32 %v310_v40, %v310_v40  ;;  %v311_v50 = vmax.f32 %v12585_v45, 0.0  ;;  %v404_v51 = vpack.c.bf16 %v310_v40, %v308_v29 }
 0x16a   :  { %v316_v52 = vadd.f32 %v315_v46, %v314_v38  ;;  %v322_v53 = vrot.slane %v321_v41, 2  ;;  %v357_v54 = vrot.slane %v356_v47, 2  ;;  %v363_v55 = vadd.f32 %v362_v42, %v361_v36 }
 0x16b   :  { %v327_v56 = vrot.slane %v326_v48, 4  ;;  %v368_v57 = vadd.f32 %v352_v49, %v350_v43  ;;  %v333_v58 = vadd.f32 %v311_v50, %v309_v34  ;;  %v353_v59 = vmul.f32 %v311_v50, %v311_v50 }
 0x16c   :  { %v405_v60 = vpack.c.bf16 %v311_v50, %v309_v34  ;;  %v317_v61 = vrot.slane %v316_v52, 1  ;;  %v323_v62 = vadd.f32 %v322_v53, %v321_v41  ;;  %v358_v63 = vadd.f32 %v357_v54, %v356_v47 }
 0x16d   :  { %v334_v1 = vrot.slane %v333_v58, 4  ;;  %v375_v2 = vadd.f32 %v353_v59, %v351_v44  ;;  %v364_v3 = vrot.slane %v363_v55, 2  ;;  %v328_v4 = vadd.f32 %v327_v56, %v326_v48 }
 0x16e   :  { %832 = vmatprep.mubr.bf16.mxu1 %v405_v60  ;;  %885 = vmatprep.mubr.bf16.mxu0 %v405_v60  ;;  %v324_v5 = vrot.slane %v323_v62, 1  ;;  %v359_v6 = vrot.slane %v358_v63, 1  ;;  %v369_v7 = vrot.slane %v368_v57, 4  ;;  %v318_v12 = vadd.f32 %v317_v61, %v316_v52 }
 0x16f   :  { %833 = vmatmul.mubr.bf16.gmra.mxu1 %v404_v51  ;;  %886 = vmatmul.mubr.bf16.gmra.mxu0 %v404_v51  ;;  %v365_v8 = vadd.f32 %v364_v3, %v363_v55  ;;  %v329_v9 = vrot.slane %v328_v4, 2  ;;  %v335_v10 = vadd.f32 %v334_v1, %v333_v58  ;;  %v376_v11 = vrot.slane %v375_v2, 4 }
 0x170   :  { %v325_v15 = vadd.f32 %v324_v5, %v323_v62  ;;  %v370_v17 = vadd.f32 %v369_v7, %v368_v57  ;;  %v360_v25 = vadd.f32 %v359_v6, %v358_v63  ;;  %v287_v63 = vlaneseq  ;;  %v897_v6 = vld [vmem:[#allocation14] ss:$8 sm:$0xf] }
 0x171   :  { %v366_v18 = vrot.slane %v365_v8, 1  ;;  %v330_v20 = vadd.f32 %v329_v9, %v328_v4  ;;  %v336_v21 = vrot.slane %v335_v10, 2  ;;  %v377_v22 = vadd.f32 %v376_v11, %v375_v2  ;;  %v896_v2 = vld [vmem:[#allocation13] ss:$8 sm:$0xf] }
 0x172   :  { %v340_v23 = vadd.f32 %v325_v15, %v318_v12  ;;  %v371_v26 = vrot.slane %v370_v17, 2  ;;  %v12590_v4 = vshrl.u32 %v287_v63, 7 }
 0x173   :  { %v367_v27 = vadd.f32 %v366_v18, %v365_v8  ;;  %v331_v28 = vrot.slane %v330_v20, 1  ;;  %v337_v29 = vadd.f32 %v336_v21, %v335_v10  ;;  %v378_v31 = vrot.slane %v377_v22, 2 }
 0x174   :  { %341 = vadd.xlane.f32.xlu0 %v340_v23  ;;  %v372_v32 = vadd.f32 %v371_v26, %v370_v17  ;;  %v12594_v9 = vsub.s32 0, %v12590_v4  ;;  %v12597_v10 = vsub.s32 2, %v12590_v4  ;;  %v12600_v11 = vsub.s32 1, %v12590_v4 }
 0x175   :  { %v382_v33 = vadd.f32 %v367_v27, %v360_v25  ;;  %v338_v34 = vrot.slane %v337_v29, 1  ;;  %v379_v35 = vadd.f32 %v378_v31, %v377_v22  ;;  %v332_v38 = vadd.f32 %v331_v28, %v330_v20 }
 0x176   :  { %v373_v36 = vrot.slane %v372_v32, 1  ;;  %15873 = vst [vmem:[#allocation39_spill] sm:$0xff] %v12594_v9  ;;  %15874 = vst [vmem:[#allocation40_spill] sm:$0xff] %v12597_v10  ;;  %v12603_v12 = vsub.s32 3, %v12590_v4  ;;  %vm290_vm2 = vcmp.ne.s32.totalorder %v12590_v4, 0  ;;  %vm1296_vm4 = vcmp.lt.s32.totalorder %v12590_v4, 1 }
 0x177   :  { %383 = vadd.xlane.f32.xlu1 %v382_v33  ;;  %v339_v39 = vadd.f32 %v338_v34, %v337_v29  ;;  %v380_v40 = vrot.slane %v379_v35, 1  ;;  %15875 = vst [vmem:[#allocation41_spill] sm:$0xff] %v12600_v11  ;;  %vm1345_vm5 = vcmp.lt.s32.totalorder %v12590_v4, 7 }
 0x178   :  { %v374_v42 = vadd.f32 %v373_v36, %v372_v32  ;;  %15876 = vst [vmem:[#allocation42_spill] sm:$0xff] %v12603_v12 }
 0x179   :  { %v343_v41 = vadd.f32 %v339_v39, %v332_v38  ;;  %v381_v43 = vadd.f32 %v380_v40, %v379_v35 }
 0x17b   :  { %344 = vadd.xlane.f32.xlu0 %v343_v41  ;;  %v385_v44 = vadd.f32 %v381_v43, %v374_v42 }
 0x17d   :  { %386 = vadd.xlane.f32.xlu1 %v385_v44 }
 0x1fd   :  { %v342_v46 = vpop.xlane.xlu0 %341 }
 0x1fe   :  { %v388_v47 = vmul.f32 0.00024414063, %v342_v46 }
 0x200   :  { %v392_v48 = vmul.f32 %v388_v47, %v388_v47  ;;  %v384_v49 = vpop.xlane.xlu1 %383 }
 0x201   :  { %v390_v50 = vmul.f32 0.00024414063, %v384_v49 }
 0x203   :  { %v394_v51 = vsub.f32 %v390_v50, %v392_v48 }
 0x204   :  { %v345_v52 = vpop.xlane.xlu0 %344 }
 0x205   :  { %v396_v53 = vmax.f32 %v394_v51, 0.0  ;;  %v389_v54 = vmul.f32 0.00024414063, %v345_v52 }
 0x206   :  { %v387_v55 = vpop.xlane.xlu1 %386 }
 0x207   :  { %v398_v56 = vadd.f32 1e-08, %v396_v53  ;;  %v393_v57 = vmul.f32 %v389_v54, %v389_v54  ;;  %v391_v58 = vmul.f32 0.00024414063, %v387_v55 }
 0x209   :  { %v395_v59 = vsub.f32 %v391_v58, %v393_v57  ;;  %12087 = vrsqrt.f32 %v398_v56 }
 0x20b   :  { %v397_v60 = vmax.f32 %v395_v59, 0.0 }
 0x20d   :  { %v399_v61 = vadd.f32 1e-08, %v397_v60 }
 0x20f   :  { %12089 = vrsqrt.f32 %v399_v61 }
 0x216   :  { %v12088_v62 = vpop.eup %12087 }
 0x217   :  { %v898_v1 = vmul.f32 %v12088_v62, %v388_v47 }
 0x219   :  { %v900_v5 = vmul.f32 %v898_v1, %v896_v2 }
 0x21b   :  { %v902_v8 = vsub.f32 %v897_v6, %v900_v5 }
 0x21c   :  { %v12588_v3 = vpop.eup %12089 }
 0x21d   :  { %v899_v7 = vmul.f32 %v12588_v3, %v389_v54  ;;  %v925_v21 = vrot.slane %v902_v8, %v12594_v9  ;;  %v933_v23 = vrot.slane %v902_v8, %v12597_v10  ;;  %v929_v26 = vrot.slane %v902_v8, %v12600_v11 }
 0x21e   :  { %v937_v28 = vrot.slane %v902_v8, %v12603_v12 }
 0x21f   :  { %v901_v15 = vmul.f32 %v899_v7, %v896_v2 }
 0x221   :  { %v903_v29 = vsub.f32 %v897_v6, %v901_v15 }
 0x223   :  { %v941_v47 = vrot.slane %v903_v29, %v12594_v9  ;;  %v949_v48 = vrot.slane %v903_v29, %v12597_v10  ;;  %v945_v57 = vrot.slane %v903_v29, %v12600_v11  ;;  %v953_v58 = vrot.slane %v903_v29, %v12603_v12 }
 0x226   :  { %v824_v17 = vpop.f32.mrf.mxu1  ;;  %v877_v18 = vpop.f32.mrf.mxu0 }
 0x227   :  { %v904_v20 = vmul.f32 %v12088_v62, %v824_v17  ;;  %v906_v22 = vmul.f32 %v12088_v62, %v877_v18 }
 0x228   :  { %v826_v25 = vpop.f32.mrf.mxu1  ;;  %v879_v27 = vpop.f32.mrf.mxu0 }
 0x229   :  { %v962_v31 = vadd.f32 %v925_v21, %v904_v20  ;;  %v964_v32 = vadd.f32 %v933_v23, %v906_v22  ;;  %v905_v33 = vmul.f32 %v12088_v62, %v826_v25  ;;  %v907_v34 = vmul.f32 %v12088_v62, %v879_v27 }
 0x22a   :  { %v828_v35 = vpop.f32.mrf.mxu1  ;;  %v881_v36 = vpop.f32.mrf.mxu0 }
 0x22b   :  { %v963_v38 = vadd.f32 %v929_v26, %v905_v33  ;;  %v965_v39 = vadd.f32 %v937_v28, %v907_v34  ;;  %v908_v40 = vmul.f32 %v12088_v62, %v828_v35  ;;  %v910_v41 = vmul.f32 %v12088_v62, %v881_v36 }
 0x22c   :  { %v830_v42 = vpop.f32.mrf.mxu1  ;;  %v883_v43 = vpop.f32.mrf.mxu0  ;;  %v12609_v44 = vmax.f32 %v962_v31, 0.0  ;;  %v12611_v46 = vmax.f32 %v964_v32, 0.0 }
 0x22d   :  { %v966_v49 = vadd.f32 %v925_v21, %v908_v40  ;;  %v968_v50 = vadd.f32 %v933_v23, %v910_v41  ;;  %v909_v51 = vmul.f32 %v12088_v62, %v830_v42  ;;  %v911_v52 = vmul.f32 %v12088_v62, %v883_v43 }
 0x22e   :  { %v12615_v53 = vmax.f32 %v963_v38, 0.0  ;;  %v12617_v54 = vmax.f32 %v965_v39, 0.0  ;;  %v1060_v1 = vmul.f32 %v12609_v44, %v12609_v44  ;;  %v1062_v62 = vmul.f32 %v12611_v46, %v12611_v46 }
 0x22f   :  { %v834_v55 = vpop.f32.mrf.mxu1  ;;  %v887_v56 = vpop.f32.mrf.mxu0  ;;  %v12621_v59 = vmax.f32 %v966_v49, 0.0  ;;  %v12623_v60 = vmax.f32 %v968_v50, 0.0  ;;  %v967_v61 = vadd.f32 %v929_v26, %v909_v51  ;;  %v969_v63 = vadd.f32 %v937_v28, %v911_v52 }
 0x230   :  { %v912_v2 = vmul.f32 %v12588_v3, %v834_v55  ;;  %v914_v5 = vmul.f32 %v12588_v3, %v887_v56  ;;  %v1061_v20 = vmul.f32 %v12615_v53, %v12615_v53  ;;  %v12649_v27 = vmul.f32 %v12617_v54, %v12617_v54 }
 0x231   :  { %v836_v6 = vpop.f32.mrf.mxu1  ;;  %v889_v7 = vpop.f32.mrf.mxu0  ;;  %v994_v8 = vadd.f32 %v12621_v59, %v12609_v44  ;;  %v1064_v15 = vmul.f32 %v12621_v59, %v12621_v59  ;;  %v12637_v17 = vadd.f32 %v12623_v60, %v12611_v46  ;;  %v1066_v18 = vmul.f32 %v12623_v60, %v12623_v60 }
 0x232   :  { %v12643_v21 = vmax.f32 %v967_v61, 0.0  ;;  %v12645_v22 = vmax.f32 %v969_v63, 0.0  ;;  %v970_v23 = vadd.f32 %v941_v47, %v912_v2  ;;  %v972_v31 = vadd.f32 %v949_v48, %v914_v5 }
 0x233   :  { %v838_v25 = vpop.f32.mrf.mxu1  ;;  %v891_v26 = vpop.f32.mrf.mxu0  ;;  %v995_v28 = vrot.slane %v994_v8, 4  ;;  %v12651_v29 = vadd.f32 %v1064_v15, %v1060_v1  ;;  %v1009_v32 = vrot.slane %v12637_v17, 4  ;;  %v12654_v33 = vadd.f32 %v1066_v18, %v1062_v62 }
 0x234   :  { %v1001_v34 = vadd.f32 %v12643_v21, %v12615_v53  ;;  %v1065_v35 = vmul.f32 %v12643_v21, %v12643_v21  ;;  %v12662_v38 = vadd.f32 %v12645_v22, %v12617_v54  ;;  %v12666_v39 = vmul.f32 %v12645_v22, %v12645_v22 }
 0x235   :  { %v996_v36 = vadd.f32 %v995_v28, %v994_v8  ;;  %v12668_v40 = vmax.f32 %v970_v23, 0.0  ;;  %v1077_v41 = vrot.slane %v12651_v29, 4  ;;  %v913_v43 = vmul.f32 %v12588_v3, %v836_v6  ;;  %v840_v50 = vpop.f32.mrf.mxu1  ;;  %v893_v51 = vpop.f32.mrf.mxu0 }
 0x236   :  { %v1002_v42 = vrot.slane %v1001_v34, 4  ;;  %v915_v49 = vmul.f32 %v12588_v3, %v889_v7  ;;  %v1083_v52 = vadd.f32 %v1065_v35, %v1061_v20  ;;  %v12673_v55 = vmax.f32 %v972_v31, 0.0 }
 0x237   :  { %v916_v56 = vmul.f32 %v12588_v3, %v838_v25  ;;  %v918_v61 = vmul.f32 %v12588_v3, %v891_v26  ;;  %v1068_v1 = vmul.f32 %v12668_v40, %v12668_v40  ;;  %v971_v62 = vadd.f32 %v945_v57, %v913_v43 }
 0x238   :  { %v1003_v63 = vadd.f32 %v1002_v42, %v1001_v34  ;;  %v973_v2 = vadd.f32 %v953_v58, %v915_v49  ;;  %v917_v6 = vmul.f32 %v12588_v3, %v840_v50  ;;  %v919_v7 = vmul.f32 %v12588_v3, %v893_v51 }
 0x239   :  { %v974_v5 = vadd.f32 %v941_v47, %v916_v56  ;;  %v976_v8 = vadd.f32 %v949_v48, %v918_v61  ;;  %v12681_v15 = vmax.f32 %v971_v62, 0.0  ;;  %v997_v20 = vrot.slane %v996_v36, 2 }
 0x23a   :  { %v12683_v18 = vmax.f32 %v973_v2, 0.0  ;;  %v1004_v23 = vrot.slane %v1003_v63, 2  ;;  %v975_v28 = vadd.f32 %v945_v57, %v917_v6  ;;  %v977_v31 = vadd.f32 %v953_v58, %v919_v7 }
 0x23b   :  { %v12685_v25 = vmax.f32 %v974_v5, 0.0  ;;  %v12687_v26 = vmax.f32 %v976_v8, 0.0  ;;  %v1084_v34 = vrot.slane %v1083_v52, 4  ;;  %v1070_v47 = vmul.f32 %v12673_v55, %v12673_v55 }
 0x23c   :  { %v998_v48 = vadd.f32 %v997_v20, %v996_v36  ;;  %v1005_v35 = vadd.f32 %v1004_v23, %v1003_v63  ;;  %v12701_v58 = vmax.f32 %v975_v28, 0.0  ;;  %v12703_v49 = vmax.f32 %v977_v31, 0.0 }
 0x23d   :  { %v1022_v3 = vadd.f32 %v12685_v25, %v12668_v40  ;;  %v1072_v42 = vmul.f32 %v12685_v25, %v12685_v25  ;;  %v12697_v43 = vadd.f32 %v12687_v26, %v12673_v55  ;;  %v1074_v57 = vmul.f32 %v12687_v26, %v12687_v26 }
 0x23e   :  { %v999_v50 = vrot.slane %v998_v48, 1  ;;  %v1006_v36 = vrot.slane %v1005_v35, 1  ;;  %v1069_v51 = vmul.f32 %v12681_v15, %v12681_v15  ;;  %v12709_v56 = vmul.f32 %v12683_v18, %v12683_v18 }
 0x23f   :  { %v1023_v61 = vrot.slane %v1022_v3, 4  ;;  %v1104_v63 = vadd.f32 %v1072_v42, %v1068_v1  ;;  %v1037_v62 = vrot.slane %v12697_v43, 4  ;;  %v12712_v2 = vadd.f32 %v1074_v57, %v1070_v47 }
 0x240   :  { %v1029_v5 = vadd.f32 %v12701_v58, %v12681_v15  ;;  %v1073_v8 = vmul.f32 %v12701_v58, %v12701_v58  ;;  %v1043_v20 = vadd.f32 %v12703_v49, %v12683_v18  ;;  %v1007_v23 = vadd.f32 %v1006_v36, %v1005_v35 }
 0x241   :  { %v1024_v6 = vadd.f32 %v1023_v61, %v1022_v3  ;;  %v1105_v7 = vrot.slane %v1104_v63, 4  ;;  %v1000_v31 = vadd.f32 %v999_v50, %v998_v48  ;;  %v1010_v1 = vadd.f32 %v1009_v32, %v12637_v17 }
 0x242   :  { %v1030_v28 = vrot.slane %v1029_v5, 4  ;;  %v1016_v42 = vrot.slane %v12662_v38, 4  ;;  %v1111_v47 = vadd.f32 %v1073_v8, %v1069_v51  ;;  %v1078_v57 = vadd.f32 %v1077_v41, %v12651_v29 }
 0x243   :  { %v1085_v0 = vadd.f32 %v1084_v34, %v1083_v52  ;;  %v1091_v45 = vrot.slane %v12654_v33, 4  ;;  %v1011_v30 = vrot.slane %v1010_v1, 2  ;;  %v1050_v61 = vadd.f32 %v1007_v23, %v1000_v31 }
 0x244   :  { %v1031_v37 = vadd.f32 %v1030_v28, %v1029_v5  ;;  %v1017_v3 = vadd.f32 %v1016_v42, %v12662_v38  ;;  %v1079_v24 = vrot.slane %v1078_v57, 2  ;;  %v1097_v17 = vadd.f32 %v12666_v39, %v12649_v27 }
 0x245   :  { %v1086_v19 = vrot.slane %v1085_v0, 2  ;;  %v1092_v35 = vadd.f32 %v1091_v45, %v12654_v33  ;;  %v1012_v32 = vadd.f32 %v1011_v30, %v1010_v1  ;;  %v1025_v50 = vrot.slane %v1024_v6, 2 }
 0x246   :  { %v1018_v48 = vrot.slane %v1017_v3, 2  ;;  %v1032_v36 = vrot.slane %v1031_v37, 2  ;;  %v1080_v29 = vadd.f32 %v1079_v24, %v1078_v57  ;;  %v1098_v34 = vrot.slane %v1097_v17, 4 }
 0x247   :  { %v1087_v41 = vadd.f32 %v1086_v19, %v1085_v0  ;;  %v1093_v52 = vrot.slane %v1092_v35, 2  ;;  %v1013_v51 = vrot.slane %v1012_v32, 1  ;;  %v1026_v8 = vadd.f32 %v1025_v50, %v1024_v6 }
 0x248   :  { %v1019_v5 = vadd.f32 %v1018_v48, %v1017_v3  ;;  %v1033_v38 = vadd.f32 %v1032_v36, %v1031_v37  ;;  %v1081_v23 = vrot.slane %v1080_v29, 1  ;;  %v1099_v42 = vadd.f32 %v1098_v34, %v1097_v17 }
 0x249   :  { %v1088_v28 = vrot.slane %v1087_v41, 1  ;;  %v1094_v31 = vadd.f32 %v1093_v52, %v1092_v35  ;;  %v1112_v45 = vrot.slane %v1111_v47, 4  ;;  %v1014_v33 = vadd.f32 %v1013_v51, %v1012_v32 }
 0x24a   :  { %v1020_v16 = vrot.slane %v1019_v5, 1  ;;  %v1034_v27 = vrot.slane %v1033_v38, 1  ;;  %v1082_v30 = vadd.f32 %v1081_v23, %v1080_v29  ;;  %v1100_v14 = vrot.slane %v1099_v42, 2 }
 0x24b   :  { %v1089_v39 = vadd.f32 %v1088_v28, %v1087_v41  ;;  %v1095_v1 = vrot.slane %v1094_v31, 1  ;;  %v1075_v0 = vmul.f32 %v12703_v49, %v12703_v49  ;;  %v1051_v24 = vadd.f32 %v1050_v61, %v1014_v33 }
 0x24c   :  { %v1021_v19 = vadd.f32 %v1020_v16, %v1019_v5  ;;  %v1027_v57 = vrot.slane %v1026_v8, 1  ;;  %v1101_v37 = vadd.f32 %v1100_v14, %v1099_v42  ;;  %v1038_v35 = vadd.f32 %v1037_v62, %v12697_v43 }
 0x24d   :  { %v1096_v6 = vadd.f32 %v1095_v1, %v1094_v31  ;;  %v1132_v3 = vadd.f32 %v1089_v39, %v1082_v30  ;;  %v1035_v48 = vadd.f32 %v1034_v27, %v1033_v38  ;;  %v1044_v32 = vrot.slane %v1043_v20, 4 }
 0x24e   :  { %v1052_v17 = vadd.f32 %v1051_v24, %v1021_v19  ;;  %v1106_v50 = vadd.f32 %v1105_v7, %v1104_v63  ;;  %v1102_v36 = vrot.slane %v1101_v37, 1  ;;  %v1039_v41 = vrot.slane %v1038_v35, 2 }
 0x24f   :  { %v1133_v29 = vadd.f32 %v1132_v3, %v1096_v6  ;;  %v1113_v52 = vadd.f32 %v1112_v45, %v1111_v47  ;;  %v1045_v34 = vadd.f32 %v1044_v32, %v1043_v20  ;;  %v1119_v16 = vrot.slane %v12712_v2, 4 }
 0x250   :  { %1053 = vadd.xlane.f32.xlu0 %v1052_v17  ;;  %v1107_v51 = vrot.slane %v1106_v50, 2  ;;  %v1125_v61 = vadd.f32 %v1075_v0, %v12709_v56  ;;  %v1103_v5 = vadd.f32 %v1102_v36, %v1101_v37  ;;  %v1028_v14 = vadd.f32 %v1027_v57, %v1026_v8  ;;  %v11200_v36 = vld [vmem:[#allocation8 + $0x74] ss:$8 sps:$4 sm:$0xff]  }
 0x251   :  { %v1040_v23 = vadd.f32 %v1039_v41, %v1038_v35  ;;  %v1114_v28 = vrot.slane %v1113_v52, 2  ;;  %v1046_v43 = vrot.slane %v1045_v34, 2  ;;  %v1120_v38 = vadd.f32 %v1119_v16, %v12712_v2  ;;  %v11203_v41 = vld [vmem:[#allocation8 + $0x174] ss:$8 sps:$4 sm:$0xff]   ;;  %2151 = vmatprep.subr.bf16.mxu1 %v11200_v36  ;;  %v11204_v16 = vld [vmem:[#allocation8 + $0x60] ss:$8 sps:$4 sm:$0xff]  }
 0x252   :  { %v1108_v62 = vadd.f32 %v1107_v51, %v1106_v50  ;;  %v1126_v63 = vrot.slane %v1125_v61, 4  ;;  %v1134_v7 = vadd.f32 %v1133_v29, %v1103_v5  ;;  %v1055_v42 = vadd.f32 %v1035_v48, %v1028_v14  ;;  %v11198_v50 = vld [vmem:[#allocation8 + $0x70] ss:$8 sps:$4 sm:$0xff]   ;;  %2204 = vmatprep.subr.bf16.mxu0 %v11203_v41  ;;  %v11209_v51 = vld [vmem:[#allocation8 + $0x164] ss:$8 sps:$4 sm:$0xff]  }
 0x253   :  { %v1041_v31 = vrot.slane %v1040_v23, 1  ;;  %v1115_v47 = vadd.f32 %v1114_v28, %v1113_v52  ;;  %v1047_v45 = vadd.f32 %v1046_v43, %v1045_v34  ;;  %v1121_v33 = vrot.slane %v1120_v38, 2  ;;  %v11201_v29 = vld [vmem:[#allocation8 + $0x170] ss:$8 sps:$4 sm:$0xff]   ;;  %2152 = vmatpush1.bf16.msra.mxu1 %v11198_v50  ;;  %v11206_v34 = vld [vmem:[#allocation8 + $0x64] ss:$8 sps:$4 sm:$0xff]  }
 0x254   :  { %v1109_v20 = vrot.slane %v1108_v62, 1  ;;  %v1127_v27 = vadd.f32 %v1126_v63, %v1125_v61  ;;  %1135 = vadd.xlane.f32.xlu0 %v1134_v7  ;;  %2205 = vmatpush1.bf16.msra.mxu0 %v11201_v29  ;;  %v11207_v61 = vld [vmem:[#allocation8 + $0x160] ss:$8 sps:$4 sm:$0xff]   ;;  %v11212_v5 = vld [vmem:[#allocation8 + $0x54] ss:$8 sps:$4 sm:$0xff]  }
 0x255   :  { %v1042_v30 = vadd.f32 %v1041_v31, %v1040_v23  ;;  %v1116_v56 = vrot.slane %v1115_v47, 1  ;;  %v1048_v39 = vrot.slane %v1047_v45, 1  ;;  %v1122_v8 = vadd.f32 %v1121_v33, %v1120_v38  ;;  %2153 = vmatprep.subr.bf16.mxu1 %v11206_v34  ;;  %2206 = vmatprep.subr.bf16.mxu0 %v11209_v51  ;;  %v11215_v14 = vld [vmem:[#allocation8 + $0x154] ss:$8 sps:$4 sm:$0xff]   ;;  %v11210_v23 = vld [vmem:[#allocation8 + $0x50] ss:$8 sps:$4 sm:$0xff]  }
 0x256   :  { %v1128_v1 = vrot.slane %v1127_v27, 2  ;;  %v1110_v19 = vadd.f32 %v1109_v20, %v1108_v62  ;;  %v11213_v28 = vld [vmem:[#allocation8 + $0x150] ss:$8 sps:$4 sm:$0xff]   ;;  %v11218_v43 = vld [vmem:[#allocation8 + $0x44] ss:$8 sps:$4 sm:$0xff]  }
 0x257   :  { %v1056_v0 = vadd.f32 %v1055_v42, %v1042_v30  ;;  %v1117_v24 = vadd.f32 %v1116_v56, %v1115_v47  ;;  %v1049_v57 = vadd.f32 %v1048_v39, %v1047_v45  ;;  %v1123_v2 = vrot.slane %v1122_v8, 1  ;;  %2154 = vmatpush1.bf16.msra.mxu1 %v11204_v16  ;;  %v11221_v62 = vld [vmem:[#allocation8 + $0x144] ss:$8 sps:$4 sm:$0xff]   ;;  %v11216_v38 = vld [vmem:[#allocation8 + $0x40] ss:$8 sps:$4 sm:$0xff]  }
 0x258   :  { %v1129_v6 = vadd.f32 %v1128_v1, %v1127_v27  ;;  %2207 = vmatpush1.bf16.msra.mxu0 %v11207_v61  ;;  %2155 = vmatprep.subr.bf16.mxu1 %v11212_v5  ;;  %v11219_v63 = vld [vmem:[#allocation8 + $0x140] ss:$8 sps:$4 sm:$0xff]   ;;  %v11224_v7 = vld [vmem:[#allocation8 + $0x34] ss:$8 sps:$4 sm:$0xff]   ;;  %v11222_v42 = vld [vmem:[#allocation8 + $0x30] ss:$8 sps:$4 sm:$0xff]  }
 0x259   :  { %v1137_v37 = vadd.f32 %v1117_v24, %v1110_v19  ;;  %v1057_v3 = vadd.f32 %v1056_v0, %v1049_v57  ;;  %v1124_v35 = vadd.f32 %v1123_v2, %v1122_v8  ;;  %2208 = vmatprep.subr.bf16.mxu0 %v11215_v14  ;;  %v11227_v31 = vld [vmem:[#allocation8 + $0x134] ss:$8 sps:$4 sm:$0xff]   ;;  %v11225_v47 = vld [vmem:[#allocation8 + $0x130] ss:$8 sps:$4 sm:$0xff]   ;;  %v11230_v45 = vld [vmem:[#allocation8 + $0x24] ss:$8 sps:$4 sm:$0xff]  }
 0x25a   :  { %v1130_v17 = vrot.slane %v1129_v6, 1  ;;  %v11233_v20 = vld [vmem:[#allocation8 + $0x124] ss:$8 sps:$4 sm:$0xff]   ;;  %v11228_v33 = vld [vmem:[#allocation8 + $0x20] ss:$8 sps:$4 sm:$0xff]  }
 0x25b   :  { %1058 = vadd.xlane.f32.xlu1 %v1057_v3  ;;  %v1138_v32 = vadd.f32 %v1137_v37, %v1124_v35  ;;  %2156 = vmatpush1.bf16.msra.mxu1 %v11210_v23  ;;  %v11231_v27 = vld [vmem:[#allocation8 + $0x120] ss:$8 sps:$4 sm:$0xff]   ;;  %v11236_v30 = vld [vmem:[#allocation8 + $0x14] ss:$8 sps:$4 sm:$0xff]   ;;  %v11234_v39 = vld [vmem:[#allocation8 + $0x10] ss:$8 sps:$4 sm:$0xff]  }
 0x25c   :  { %v1131_v48 = vadd.f32 %v1130_v17, %v1129_v6  ;;  %2209 = vmatpush1.bf16.msra.mxu0 %v11213_v28  ;;  %2157 = vmatprep.subr.bf16.mxu1 %v11218_v43  ;;  %v11239_v56 = vld [vmem:[#allocation8 + $0x114] ss:$8 sps:$4 sm:$0xff]   ;;  %v11237_v8 = vld [vmem:[#allocation8 + $0x110] ss:$8 sps:$4 sm:$0xff]   ;;  %v11242_v1 = vld [vmem:[#allocation8 + $0x4] ss:$8 sps:$4 sm:$0xff]  }
 0x25d   :  { %2210 = vmatprep.subr.bf16.mxu0 %v11221_v62  ;;  %v11245_v0 = vld [vmem:[#allocation8 + $0x104] ss:$8 sps:$4 sm:$0xff]   ;;  %v11240_v19 = vld [vmem:[#allocation8] ss:$8 sps:$4 sm:$0xff]   ;;  %v11248_v57 = vld [vmem:[#allocation8 + $0xf4] ss:$8 sps:$4 sm:$0xff]  }
 0x25e   :  { %v1139_v52 = vadd.f32 %v1138_v32, %v1131_v48  ;;  %v11243_v24 = vld [vmem:[#allocation8 + $0x100] ss:$8 sps:$4 sm:$0xff]   ;;  %v11251_v2 = vld [vmem:[#allocation8 + $0x1f4] ss:$8 sps:$4 sm:$0xff]   ;;  %v11246_v6 = vld [vmem:[#allocation8 + $0xf0] ss:$8 sps:$4 sm:$0xff]  }
 0x25f   :  { %2158 = vmatpush1.bf16.msra.mxu1 %v11216_v38  ;;  %v11249_v37 = vld [vmem:[#allocation8 + $0x1f0] ss:$8 sps:$4 sm:$0xff]   ;;  %v11254_v3 = vld [vmem:[#allocation8 + $0xe4] ss:$8 sps:$4 sm:$0xff]   ;;  %v11252_v35 = vld [vmem:[#allocation8 + $0xe0] ss:$8 sps:$4 sm:$0xff]  }
 0x260   :  { %1140 = vadd.xlane.f32.xlu1 %v1139_v52  ;;  %2211 = vmatpush1.bf16.msra.mxu0 %v11219_v63  ;;  %v11255_v17 = vld [vmem:[#allocation8 + $0x1e0] ss:$8 sps:$4 sm:$0xff]   ;;  %v11257_v48 = vld [vmem:[#allocation8 + $0x1e4] ss:$8 sps:$4 sm:$0xff]   ;;  %v11260_v32 = vld [vmem:[#allocation8 + $0xd4] ss:$8 sps:$4 sm:$0xff]  }
 0x261   :  { %2159 = vmatprep.subr.bf16.mxu1 %v11224_v7  ;;  %2212 = vmatprep.subr.bf16.mxu0 %v11227_v31  ;;  %v11263_v50 = vld [vmem:[#allocation8 + $0x1d4] ss:$8 sps:$4 sm:$0xff]   ;;  %v11258_v36 = vld [vmem:[#allocation8 + $0xd0] ss:$8 sps:$4 sm:$0xff]   ;;  %v11266_v41 = vld [vmem:[#allocation8 + $0xc4] ss:$8 sps:$4 sm:$0xff]  }
 0x262   :  { %v11261_v29 = vld [vmem:[#allocation8 + $0x1d0] ss:$8 sps:$4 sm:$0xff]   ;;  %v11269_v52 = vld [vmem:[#allocation8 + $0x1c4] ss:$8 sps:$4 sm:$0xff]   ;;  %v11264_v34 = vld [vmem:[#allocation8 + $0xc0] ss:$8 sps:$4 sm:$0xff]  }
 0x263   :  { %2160 = vmatpush1.bf16.msra.mxu1 %v11222_v42  ;;  %v11267_v51 = vld [vmem:[#allocation8 + $0x1c0] ss:$8 sps:$4 sm:$0xff]   ;;  %v11272_v16 = vld [vmem:[#allocation8 + $0xb4] ss:$8 sps:$4 sm:$0xff]   ;;  %v11270_v5 = vld [vmem:[#allocation8 + $0xb0] ss:$8 sps:$4 sm:$0xff]  }
 0x264   :  { %2213 = vmatpush1.bf16.msra.mxu0 %v11225_v47  ;;  %2161 = vmatprep.subr.bf16.mxu1 %v11230_v45  ;;  %v11275_v61 = vld [vmem:[#allocation8 + $0x1b4] ss:$8 sps:$4 sm:$0xff]   ;;  %v11273_v14 = vld [vmem:[#allocation8 + $0x1b0] ss:$8 sps:$4 sm:$0xff]   ;;  %v11278_v23 = vld [vmem:[#allocation8 + $0xa4] ss:$8 sps:$4 sm:$0xff]  }
 0x265   :  { %2214 = vmatprep.subr.bf16.mxu0 %v11233_v20  ;;  %v11281_v28 = vld [vmem:[#allocation8 + $0x1a4] ss:$8 sps:$4 sm:$0xff]   ;;  %v11276_v43 = vld [vmem:[#allocation8 + $0xa0] ss:$8 sps:$4 sm:$0xff]   ;;  %v11284_v38 = vld [vmem:[#allocation8 + $0x94] ss:$8 sps:$4 sm:$0xff]  }
 0x266   :  { %v11279_v62 = vld [vmem:[#allocation8 + $0x1a0] ss:$8 sps:$4 sm:$0xff]   ;;  %v11287_v63 = vld [vmem:[#allocation8 + $0x194] ss:$8 sps:$4 sm:$0xff]   ;;  %v11282_v7 = vld [vmem:[#allocation8 + $0x90] ss:$8 sps:$4 sm:$0xff]  }
 0x267   :  { %2162 = vmatpush1.bf16.msra.mxu1 %v11228_v33  ;;  %v11285_v31 = vld [vmem:[#allocation8 + $0x190] ss:$8 sps:$4 sm:$0xff]   ;;  %v11290_v42 = vld [vmem:[#allocation8 + $0x84] ss:$8 sps:$4 sm:$0xff]   ;;  %v11288_v45 = vld [vmem:[#allocation8 + $0x80] ss:$8 sps:$4 sm:$0xff]  }
 0x268   :  { %2215 = vmatpush1.bf16.msra.mxu0 %v11231_v27  ;;  %2163 = vmatprep.subr.bf16.mxu1 %v11236_v30  ;;  %v11293_v47 = vld [vmem:[#allocation8 + $0x184] ss:$8 sps:$4 sm:$0xff]   ;;  %v11291_v20 = vld [vmem:[#allocation8 + $0x180] ss:$8 sps:$4 sm:$0xff]   ;;  %v12440_v33 = vmov 1983009808  }
 0x269   :  { %2216 = vmatprep.subr.bf16.mxu0 %v11239_v56  ;;  %v1390_v27 = vunpack.c.l.s4 %v12440_v33 }
 0x26b   :  { %2164 = vmatpush1.bf16.msra.mxu1 %v11234_v39  ;;  %v1391_v39 = vunpack.c.0.s8 %v1390_v27 }
 0x26c   :  { %2217 = vmatpush1.bf16.msra.mxu0 %v11237_v8  ;;  %2165 = vmatprep.subr.bf16.mxu1 %v11242_v1  ;;  %v1386_v8 = vld [vmem:[#allocation10] sm:$0xff] }
 0x26d   :  { %2218 = vmatprep.subr.bf16.mxu0 %v11245_v0 }
 0x26f   :  { %2166 = vmatpush1.bf16.msra.mxu1 %v11240_v19 }
 0x270   :  { %2219 = vmatpush1.bf16.msra.mxu0 %v11243_v24  ;;  %2167 = vmatprep.subr.bf16.mxu1 %v11248_v57  ;;  %v12739_v24 = vsub.s32 %v1391_v39, %v12590_v4  ;;  %v1388_v57 = vcombine.high %v1386_v8, %v1386_v8  ;;  %v12442_v39 = vmov 1.0  }
 0x271   :  { %2220 = vmatprep.subr.bf16.mxu0 %v11251_v2 }
 0x272   :  { %15877 = vst [vmem:[#allocation43_spill] sm:$0xff] %v12739_v24 }
 0x273   :  { %2168 = vmatpush2.bf16.msra.mxu1 %v11246_v6  ;;  %v11301_v6 = vld [vmem:[#allocation7 + $0x2e4] ss:$16 sps:$4 sm:$0xff]  }
 0x274   :  { %2221 = vmatpush2.bf16.msra.mxu0 %v11249_v37  ;;  %2169 = vmatprep.subr.bf16.mxu1 %v11254_v3  ;;  %v1395_v3 = vrot.slane %v1386_v8, %v12739_v24 }
 0x275   :  { %2222 = vmatprep.subr.bf16.mxu0 %v11257_v48 }
 0x277   :  { %2170 = vmatpush2.bf16.msra.mxu1 %v11252_v35  ;;  %v1402_v35 = vrot.slane %v1388_v57, %v12739_v24  ;;  %v1156_v57 = vld [vmem:[#allocation16] ss:$8 sm:$0xf] }
 0x278   :  { %2223 = vmatpush2.bf16.msra.mxu0 %v11255_v17  ;;  %2171 = vmatprep.subr.bf16.mxu1 %v11260_v32  ;;  %v11304_v17 = vld [vmem:[#allocation7 + $0x2ec] ss:$16 sps:$4 sm:$0xff]  }
 0x279   :  { %2224 = vmatprep.subr.bf16.mxu0 %v11263_v50 }
 0x27b   :  { %2172 = vmatpush2.bf16.msra.mxu1 %v11258_v36  ;;  %v289_v36 = vadd.s32 8, %v12590_v4 }
 0x27c   :  { %2225 = vmatpush2.bf16.msra.mxu0 %v11261_v29  ;;  %2173 = vmatprep.subr.bf16.mxu1 %v11266_v41  ;;  %v1403_v29 = vcombine.high %v1395_v3, %v1395_v3  ;;  %v1404_v41 = vcombine.high %v1402_v35, %v1402_v35 }
 0x27d   :  { %2226 = vmatprep.subr.bf16.mxu0 %v11269_v52  ;;  %vm298_vm3 = vcmp.ne.s32.totalorder %v289_v36, 15 }
 0x27f   :  { %2174 = vmatpush2.bf16.msra.mxu1 %v11264_v34 }
 0x280   :  { %2227 = vmatpush2.bf16.msra.mxu0 %v11267_v51  ;;  %2175 = vmatprep.subr.bf16.mxu1 %v11272_v16  ;;  %v1448_v16 = vshrl.u32 %v1403_v29, 16 }
 0x281   :  { %2228 = vmatprep.subr.bf16.mxu0 %v11275_v61  ;;  %v1462_v61 = vshrl.u32 %v1404_v41, 16 }
 0x283   :  { %2176 = vmatpush2.bf16.msra.mxu1 %v11270_v5  ;;  %v1441_v5 = vshrl.u32 %v1395_v3, 16 }
 0x284   :  { %2229 = vmatpush2.bf16.msra.mxu0 %v11273_v14  ;;  %2177 = vmatprep.subr.bf16.mxu1 %v11278_v23  ;;  %v1517_v23 = vld [vmem:[#allocation11] sm:$0x11] }
 0x285   :  { %2230 = vmatprep.subr.bf16.mxu0 %v11281_v28  ;;  %v1518_v28 = vld [vmem:[#allocation11 + $0x8] sm:$0x11]  ;;  %v10479_v33 = vcombine.low %v1517_v23, %v1517_v23  ;;  %v10480_v27 = vcombine.high %v1517_v23, %v1517_v23 }
 0x287   :  { %2178 = vmatpush2.bf16.msra.mxu1 %v11276_v43  ;;  %v12441_v43 = vmov 0.0  }
 0x288   :  { %2231 = vmatpush2.bf16.msra.mxu0 %v11279_v62  ;;  %2179 = vmatprep.subr.bf16.mxu1 %v11284_v38  ;;  %v10413_v62 = vsel %vm290_vm2, 1.0, %v12441_v43  ;;  %v10414_v38 = vsel %vm298_vm3, 1.0, %v12441_v43 }
 0x289   :  { %2232 = vmatprep.subr.bf16.mxu0 %v11287_v63  ;;  %v12749_v8 = vpack.c.bf16 %v12442_v39, %v10413_v62 }
 0x28b   :  { %2180 = vmatpush2.bf16.msra.mxu1 %v11282_v7  ;;  %v1455_v7 = vshrl.u32 %v1402_v35, 16  ;;  %15878 = vst [vmem:[#allocation44_spill] sm:$0xff] %v12749_v8 }
 0x28c   :  { %2233 = vmatpush2.bf16.msra.mxu0 %v11285_v31  ;;  %2181 = vmatprep.subr.bf16.mxu1 %v11290_v42  ;;  %v1413_v31 = vpack.i.b16 %v1403_v29, %v1403_v29  ;;  %v1449_v42 = vpack.i.b16 %v1448_v16, %v1448_v16 }
 0x28d   :  { %2234 = vmatprep.subr.bf16.mxu0 %v11293_v47  ;;  %v1463_v47 = vpack.i.b16 %v1462_v61, %v1462_v61  ;;  %v1420_v61 = vpack.i.b16 %v1402_v35, %v1402_v35 }
 0x28e   :  { %v12766_v29 = vrot.slane %v1413_v31, %v12600_v11 }
 0x28f   :  { %2182 = vmatpush2.bf16.msra.mxu1 %v11288_v45  ;;  %v1442_v45 = vpack.i.b16 %v1441_v5, %v1441_v5  ;;  %v1159_v5 = vld [vmem:[#allocation17] ss:$8 sm:$0xf] }
 0x290   :  { %2235 = vmatpush2.bf16.msra.mxu0 %v11291_v20  ;;  %2798 = vmatprep.subr.bf16.mxu1 %v11301_v6  ;;  %v1456_v6 = vpack.i.b16 %v1455_v7, %v1455_v7 }
 0x291   :  { %2851 = vmatprep.subr.bf16.mxu0 %v11304_v17  ;;  %v12757_v17 = vrot.slane %v1449_v42, %v12594_v9 }
 0x292   :  { %v12783_v43 = vrot.slane %v1456_v6, %v12594_v9 }
 0x2d9   :  { %v1054_v30 = vpop.xlane.xlu0 %1053 }
 0x2da   :  { %v12734_v56 = vmul.f32 0.00012207031, %v1054_v30  ;;  %v10481_v30 = vcombine.low %v1518_v28, %v1518_v28 }
 0x2dc   :  { %v1146_v0 = vmul.f32 %v12734_v56, %v12734_v56 }
 0x2dd   :  { %v1136_v1 = vpop.xlane.xlu0 %1135 }
 0x2de   :  { %v1144_v19 = vmul.f32 0.00012207031, %v1136_v1  ;;  %v1427_v1 = vpack.i.b16 %v1404_v41, %v1404_v41  ;;  %v1546_v41 = vpack.i.b16 %v10479_v33, %v10479_v33  ;;  %v12806_v33 = vrot.slane %v1420_v61, %v12600_v11 }
 0x2e0   :  { %v1148_v2 = vsub.f32 %v1144_v19, %v1146_v0  ;;  %v10482_v0 = vcombine.high %v1518_v28, %v1518_v28  ;;  %v12751_v19 = vpack.c.bf16 %v10414_v38, %v12442_v39  ;;  %v12790_v7 = vrot.slane %v1546_v41, %v12594_v9 }
 0x2e2   :  { %v1150_v37 = vmax.f32 %v1148_v2, 0.0  ;;  %15879 = vst [vmem:[#allocation45_spill] sm:$0xff] %v12751_v19  ;;  %v1406_v2 = vpack.i.b16 %v1395_v3, %v1395_v3  ;;  %v1560_v3 = vpack.i.b16 %v10481_v30, %v10481_v30  ;;  %v1567_v16 = vpack.i.b16 %v10482_v0, %v10482_v0 }
 0x2e4   :  { %v1152_v48 = vadd.f32 1e-08, %v1150_v37  ;;  %v1059_v32 = vpop.xlane.xlu1 %1058  ;;  %v12754_v37 = vrot.slane %v1413_v31, %v12594_v9  ;;  %v12777_v23 = vrot.slane %v1406_v2, %v12594_v9  ;;  %v12780_v28 = vrot.slane %v1406_v2, %v12600_v11 }
 0x2e5   :  { %v12743_v50 = vmul.f32 0.00012207031, %v1059_v32  ;;  %v12763_v32 = vrot.slane %v1442_v45, %v12594_v9  ;;  %v12796_v42 = vrot.slane %v1560_v3, %v12594_v9 }
 0x2e6   :  { %12091 = vrsqrt.f32 %v1152_v48  ;;  %v12760_v48 = vrot.slane %v1463_v47, %v12594_v9 }
 0x2e7   :  { %v1147_v34 = vmul.f32 %v12743_v50, %v12743_v50 }
 0x2e9   :  { %v1141_v52 = vpop.xlane.xlu1 %1140 }
 0x2ea   :  { %v1145_v51 = vmul.f32 0.00012207031, %v1141_v52  ;;  %v1553_v52 = vpack.i.b16 %v10480_v27, %v10480_v27 }
 0x2ec   :  { %v1149_v14 = vsub.f32 %v1145_v51, %v1147_v34  ;;  %v12769_v51 = vrot.slane %v1427_v1, %v12594_v9  ;;  %v12793_v31 = vrot.slane %v1553_v52, %v12594_v9 }
 0x2ee   :  { %v1151_v63 = vmax.f32 %v1149_v14, 0.0  ;;  %v12774_v14 = vrot.slane %v1427_v1, %v12600_v11 }
 0x2f0   :  { %v1153_v20 = vadd.f32 1e-08, %v1151_v63 }
 0x2f2   :  { %12093 = vrsqrt.f32 %v1153_v20  ;;  %v12803_v20 = vrot.slane %v1420_v61, %v12594_v9 }
 0x2f3   :  { %v12092_v36 = vpop.eup %12091 }
 0x2f4   :  { %v1157_v34 = vmul.f32 %v12092_v36, %v1156_v57 }
 0x2f6   :  { %v1160_v62 = vmul.f32 %v1157_v34, %v12734_v56  ;;  %v1173_v35 = vrot.slane %v1157_v34, %v12600_v11  ;;  %v1181_v38 = vrot.slane %v1157_v34, %v12603_v12  ;;  %v1169_v63 = vrot.slane %v1157_v34, %v12594_v9 }
 0x2f7   :  { %v1177_v47 = vrot.slane %v1157_v34, %v12597_v10  ;;  %v12800_v56 = vrot.slane %v1567_v16, %v12594_v9 }
 0x2f8   :  { %v1162_v45 = vsub.f32 %v1159_v5, %v1160_v62  ;;  %v1207_v27 = vmul.f32 %v1173_v35, %v12615_v53  ;;  %v1211_v30 = vmul.f32 %v1173_v35, %v12643_v21  ;;  %v1209_v39 = vmul.f32 %v1181_v38, %v12617_v54 }
 0x2f9   :  { %v1213_v1 = vmul.f32 %v1181_v38, %v12645_v22  ;;  %v1206_v6 = vmul.f32 %v1169_v63, %v12609_v44  ;;  %v1210_v41 = vmul.f32 %v1169_v63, %v12621_v59  ;;  %v1208_v52 = vmul.f32 %v1177_v47, %v12611_v46 }
 0x2fa   :  { %v1231_v0 = vrot.slane %v1162_v45, %v12600_v11  ;;  %v1239_v2 = vrot.slane %v1162_v45, %v12603_v12  ;;  %v1227_v36 = vrot.slane %v1162_v45, %v12594_v9  ;;  %v1212_v53 = vmul.f32 %v1177_v47, %v12623_v60 }
 0x2fb   :  { %v1235_v21 = vrot.slane %v1162_v45, %v12597_v10 }
 0x2fc   :  { %v12820_v3 = vadd.f32 %v1231_v0, %v1207_v27  ;;  %v12822_v54 = vadd.f32 %v1231_v0, %v1211_v30  ;;  %v12824_v22 = vadd.f32 %v1239_v2, %v1209_v39  ;;  %v12826_v34 = vadd.f32 %v1239_v2, %v1213_v1 }
 0x2fd   :  { %v12828_v16 = vadd.f32 %v1227_v36, %v1206_v6  ;;  %v12830_v44 = vadd.f32 %v1227_v36, %v1210_v41  ;;  %v12832_v61 = vadd.f32 %v1235_v21, %v1208_v52  ;;  %v12834_v59 = vadd.f32 %v1235_v21, %v1212_v53 }
 0x2fe   :  { %v1281_v60 = vrot.slane %v12820_v3, 7  ;;  %v15740_v62 = vrot.slane %v12822_v54, 7  ;;  %v15739_v35 = vrot.slane %v12820_v3, 1  ;;  %v1334_v38 = vrot.slane %v12822_v54, 1 }
 0x2ff   :  { %v12094_v46 = vpop.eup %12093  ;;  %v1379_v47 = vpack.c.bf16 %v12822_v54, %v12820_v3  ;;  %v1283_v45 = vrot.slane %v12824_v22, 7  ;;  %v15743_v27 = vrot.slane %v12826_v34, 7  ;;  %v15745_v1 = vrot.slane %v12824_v22, 1 }
 0x300   :  { %v1158_v63 = vmul.f32 %v12094_v46, %v1156_v57  ;;  %v1306_v30 = vsel %vm1296_vm4, %v1281_v60, %v15740_v62  ;;  %v1355_v39 = vsel %vm1345_vm5, %v15739_v35, %v1334_v38  ;;  %v1336_v57 = vrot.slane %v12826_v34, 1 }
 0x301   :  { %v12859_v41 = vmul.bf16 %v12757_v17, %v1379_v47  ;;  %v1308_v53 = vsel %vm1296_vm4, %v1283_v45, %v15743_v27 }
 0x302   :  { %v1161_v0 = vmul.f32 %v1158_v63, %v12743_v50  ;;  %v1185_v2 = vrot.slane %v1158_v63, %v12594_v9  ;;  %v1193_v6 = vrot.slane %v1158_v63, %v12597_v10  ;;  %v1189_v36 = vrot.slane %v1158_v63, %v12600_v11 }
 0x303   :  { %v1197_v52 = vrot.slane %v1158_v63, %v12603_v12  ;;  %v1357_v50 = vsel %vm1345_vm5, %v15745_v1, %v1336_v57  ;;  %v1381_v1 = vpack.c.bf16 %v12826_v34, %v12824_v22 }
 0x304   :  { %v1214_v21 = vmul.f32 %v1185_v2, %v12668_v40  ;;  %v1216_v46 = vmul.f32 %v1193_v6, %v12673_v55  ;;  %v1218_v35 = vmul.f32 %v1185_v2, %v12685_v25  ;;  %v1220_v47 = vmul.f32 %v1193_v6, %v12687_v26 }
 0x305   :  { %v1163_v62 = vsub.f32 %v1159_v5, %v1161_v0  ;;  %v1215_v63 = vmul.f32 %v1189_v36, %v12681_v15  ;;  %v1219_v24 = vmul.f32 %v1189_v36, %v12701_v58  ;;  %v1217_v27 = vmul.f32 %v1197_v52, %v12683_v18 }
 0x306   :  { %v1221_v13 = vmul.f32 %v1197_v52, %v12703_v49  ;;  %v1280_v40 = vrot.slane %v12828_v16, 7  ;;  %v15748_v55 = vrot.slane %v12830_v44, 7  ;;  %v1472_v58 = vmul.bf16 %v12760_v48, %v1381_v1 }
 0x307   :  { %v1247_v25 = vrot.slane %v1163_v62, %v12600_v11  ;;  %v1255_v26 = vrot.slane %v1163_v62, %v12603_v12  ;;  %v1243_v5 = vrot.slane %v1163_v62, %v12594_v9  ;;  %v1333_v49 = vrot.slane %v12830_v44, 1 }
 0x308   :  { %v1305_v18 = vsel %vm1296_vm4, %v1280_v40, %v15748_v55  ;;  %v1378_v0 = vpack.c.bf16 %v12830_v44, %v12828_v16  ;;  %v15880_v12 = vrot.slane %v12828_v16, 1 }
 0x309   :  { %v12894_v2 = vadd.f32 %v1247_v25, %v1215_v63  ;;  %v12896_v6 = vadd.f32 %v1247_v25, %v1219_v24  ;;  %v12898_v36 = vadd.f32 %v1255_v26, %v1217_v27  ;;  %v12900_v52 = vadd.f32 %v1255_v26, %v1221_v13 }
 0x30a   :  { %v12902_v15 = vadd.f32 %v1243_v5, %v1214_v21  ;;  %v12904_v1 = vadd.f32 %v1243_v5, %v1218_v35  ;;  %v1354_v55 = vsel %vm1345_vm5, %v15880_v12, %v1333_v49  ;;  %v1469_v11 = vmul.bf16 %v12763_v32, %v1378_v0 }
 0x30b   :  { %v15755_v63 = vrot.slane %v12896_v6, 7  ;;  %v15756_v24 = vrot.slane %v12894_v2, 1  ;;  %v15757_v27 = vrot.slane %v12900_v52, 7  ;;  %v1340_v13 = vrot.slane %v12898_v36, 1 }
 0x30c   :  { %v1251_v25 = vrot.slane %v1163_v62, %v12597_v10  ;;  %v1282_v26 = vrot.slane %v12832_v61, 7 }
 0x30d   :  { %v1310_v12 = vsel %vm1296_vm4, %v15755_v63, %v1281_v60  ;;  %v1351_v5 = vsel %vm1345_vm5, %v1334_v38, %v15756_v24  ;;  %v1312_v0 = vsel %vm1296_vm4, %v15757_v27, %v1283_v45  ;;  %v1353_v62 = vsel %vm1345_vm5, %v1336_v57, %v1340_v13 }
 0x30e   :  { %v1314_v35 = vpack.c.bf16 %v1306_v30, %v1310_v12  ;;  %v1363_v21 = vpack.c.bf16 %v1351_v5, %v1355_v39  ;;  %v1316_v10 = vpack.c.bf16 %v1308_v53, %v1312_v0  ;;  %v1365_v9 = vpack.c.bf16 %v1353_v62, %v1357_v50 }
 0x30f   :  { %v15881_v60 = vrot.slane %v12904_v1, 7  ;;  %v15882_v38 = vrot.slane %v12902_v15, 1  ;;  %v12943_v45 = vadd.f32 %v1251_v25, %v1216_v46  ;;  %v12945_v27 = vadd.f32 %v1251_v25, %v1220_v47 }
 0x310   :  { %v1322_v57 = vmul.bf16 %v1314_v35, %v12749_v8  ;;  %v1371_v30 = vmul.bf16 %v1363_v21, %v12751_v19  ;;  %v1324_v39 = vmul.bf16 %v1316_v10, %v12749_v8  ;;  %v1373_v53 = vmul.bf16 %v1365_v9, %v12751_v19 }
 0x311   :  { %v1309_v63 = vsel %vm1296_vm4, %v15881_v60, %v1280_v40  ;;  %v1350_v24 = vsel %vm1345_vm5, %v1333_v49, %v15882_v38  ;;  %v1286_v40 = vrot.slane %v12834_v59, 7  ;;  %v1294_v5 = vrot.slane %v12945_v27, 7 }
 0x312   :  { %v1313_v50 = vpack.c.bf16 %v1305_v18, %v1309_v63  ;;  %v1362_v12 = vpack.c.bf16 %v1350_v24, %v1354_v55  ;;  %v1434_v49 = vmul.bf16 %v12754_v37, %v1322_v57  ;;  %v1502_v46 = vmul.bf16 %v12766_v29, %v1371_v30 }
 0x313   :  { %v1436_v47 = vmul.bf16 %v12769_v51, %v1324_v39  ;;  %v1504_v35 = vmul.bf16 %v12774_v14, %v1373_v53  ;;  %v1307_v9 = vsel %vm1296_vm4, %v1282_v26, %v1286_v40  ;;  %v1311_v55 = vsel %vm1296_vm4, %v1294_v5, %v1282_v26 }
 0x314   :  { %v1321_v21 = vmul.bf16 %v1313_v50, %v12749_v8  ;;  %v1370_v10 = vmul.bf16 %v1362_v12, %v12751_v19  ;;  %v1478_v18 = vadd.bf16 %v12859_v41, %v1434_v49  ;;  %v1315_v24 = vpack.c.bf16 %v1307_v9, %v1311_v55 }
 0x315   :  { %v1480_v63 = vadd.bf16 %v1472_v58, %v1436_v47  ;;  %v15758_v25 = vrot.slane %v12832_v61, 1  ;;  %v1335_v60 = vrot.slane %v12834_v59, 1  ;;  %v1339_v38 = vrot.slane %v12943_v45, 1 }
 0x316   :  { %v1433_v0 = vmul.bf16 %v12777_v23, %v1321_v21  ;;  %v1501_v62 = vmul.bf16 %v12780_v28, %v1370_v10  ;;  %v1510_v57 = vadd.bf16 %v1502_v46, %v1478_v18  ;;  %v1323_v39 = vmul.bf16 %v1315_v24, %v12749_v8 }
 0x317   :  { %v1512_v30 = vadd.bf16 %v1504_v35, %v1480_v63  ;;  %v1380_v26 = vpack.c.bf16 %v12834_v59, %v12832_v61  ;;  %v1352_v58 = vsel %vm1345_vm5, %v1335_v60, %v1339_v38  ;;  %v1356_v53 = vsel %vm1345_vm5, %v15758_v25, %v1335_v60 }
 0x318   :  { %v1477_v41 = vadd.bf16 %v1469_v11, %v1433_v0  ;;  %v1289_v50 = vrot.slane %v12894_v2, 7  ;;  %v15883_v12 = vmov 0   ;;  %v1364_v21 = vpack.c.bf16 %v1352_v58, %v1356_v53 }
 0x319   :  { %v1520_v49 = vmax.bf16 %v15883_v12, %v1510_v57  ;;  %v1528_v46 = vmin.bf16 %v15883_v12, %v1510_v57  ;;  %v1522_v47 = vmax.bf16 %v15883_v12, %v1512_v30  ;;  %v1530_v11 = vmin.bf16 %v15883_v12, %v1512_v30 }
 0x31a   :  { %v1509_v35 = vadd.bf16 %v1501_v62, %v1477_v41  ;;  %v1435_v10 = vmul.bf16 %v12803_v20, %v1323_v39  ;;  %v1471_v9 = vmul.bf16 %v12783_v43, %v1380_v26  ;;  %v15884_v63 = vrot.slane %v12896_v6, 7 }
 0x31b   :  { %v1574_v55 = vmul.bf16 %v12793_v31, %v1528_v46  ;;  %v1576_v18 = vmul.bf16 %v12800_v56, %v1530_v11  ;;  %v15885_v0 = vrot.slane %v12822_v54, 7  ;;  %v1372_v30 = vmul.bf16 %v1364_v21, %v12751_v19 }
 0x31c   :  { %v1298_v24 = vsel %vm1296_vm4, %v1289_v50, %v15884_v63  ;;  %v1519_v62 = vmax.bf16 %v15883_v12, %v1509_v35  ;;  %v1527_v57 = vmin.bf16 %v15883_v12, %v1509_v35  ;;  %v1479_v39 = vadd.bf16 %v1471_v9, %v1435_v10 }
 0x31d   :  { %v1302_v60 = vsel %vm1296_vm4, %v15885_v0, %v1289_v50  ;;  %v1582_v26 = vadd.bf16 %v1574_v55, %v1520_v49  ;;  %v1584_v41 = vadd.bf16 %v1576_v18, %v1522_v47  ;;  %v1342_v53 = vrot.slane %v12896_v6, 1  ;;  %v11299_v49 = vld [vmem:[#allocation7 + $0x2e0] ss:$16 sps:$4 sm:$0xff]   ;;  %v11307_v18 = vld [vmem:[#allocation7 + $0x2c4] ss:$16 sps:$4 sm:$0xff]  }
 0x31e   :  { %v1318_v58 = vpack.c.bf16 %v1298_v24, %v1302_v60  ;;  %v1573_v46 = vmul.bf16 %v12790_v7, %v1527_v57  ;;  %v1503_v11 = vmul.bf16 %v12806_v33, %v1372_v30  ;;  %v1383_v54 = vpack.c.bf16 %v12896_v6, %v12894_v2 }
 0x31f   :  { %v1291_v50 = vrot.slane %v12898_v36, 7  ;;  %v1590_v63 = vunpack.c.l.bf16 %v1582_v26  ;;  %v1594_v0 = vunpack.c.h.bf16 %v1582_v26  ;;  %2183 = vmatprep.mubr.bf16.mxu1 %v1582_v26  ;;  %v13010_v35 = vunpack.c.l.bf16 %v1584_v41  ;;  %2236 = vmatprep.mubr.bf16.mxu0 %v1584_v41 }
 0x320   :  { %v13012_v21 = vunpack.c.h.bf16 %v1584_v41  ;;  %v13014_v47 = vadd.bf16 %v1573_v46, %v1519_v62  ;;  %v1511_v10 = vadd.bf16 %v1503_v11, %v1479_v39  ;;  %v1326_v9 = vmul.bf16 %v1318_v58, %v12749_v8 }
 0x321   :  { %v15886_v55 = vrot.slane %v12894_v2, 1  ;;  %v13021_v24 = vadd.f32 %v1594_v0, %v1590_v63  ;;  %v1672_v60 = vmul.f32 %v1590_v63, %v1590_v63  ;;  %v1676_v57 = vmul.f32 %v1594_v0, %v1594_v0  ;;  %v11305_v0 = vld [vmem:[#allocation7 + $0x2c0] ss:$16 sps:$4 sm:$0xff]  }
 0x322   :  { %v13025_v30 = vmul.f32 %v13010_v35, %v13010_v35  ;;  %v13029_v62 = vmul.f32 %v13012_v21, %v13012_v21  ;;  %2184 = vmatmul.mubr.bf16.vlgmr.msra.gmra.mxu1 %v13014_v47  ;;  %v1521_v2 = vmax.bf16 %v15883_v12, %v1511_v10  ;;  %v1529_v39 = vmin.bf16 %v15883_v12, %v1511_v10 }
 0x323   :  { %v1347_v6 = vsel %vm1345_vm5, %v15886_v55, %v1342_v53  ;;  %v15887_v26 = vrot.slane %v12820_v3, 1  ;;  %v1613_v58 = vrot.slane %v13021_v24, 4  ;;  %v13039_v46 = vadd.f32 %v1676_v57, %v1672_v60  ;;  %2799 = vmatpush1.bf16.msra.mxu1 %v11299_v49 }
 0x324   :  { %v1438_v63 = vmul.bf16 %v12754_v37, %v1326_v9  ;;  %v1575_v55 = vmul.bf16 %v12796_v42, %v1529_v39  ;;  %v1474_v25 = vmul.bf16 %v12757_v17, %v1383_v54  ;;  %v15888_v10 = vrot.slane %v12900_v52, 7  ;;  %2800 = vmatprep.subr.bf16.mxu1 %v11307_v18  ;;  %v11302_v17 = vld [vmem:[#allocation7 + $0x2e8] ss:$16 sps:$4 sm:$0xff]  }
 0x325   :  { %v1359_v41 = vsel %vm1345_vm5, %v1342_v53, %v15887_v26  ;;  %v15889_v53 = vrot.slane %v12826_v34, 7  ;;  %v1344_v49 = vrot.slane %v12900_v52, 1  ;;  %v1385_v9 = vpack.c.bf16 %v12900_v52, %v12898_v36  ;;  %v11310_v26 = vld [vmem:[#allocation7 + $0x2cc] ss:$16 sps:$4 sm:$0xff]  }
 0x326   :  { %v1367_v11 = vpack.c.bf16 %v1359_v41, %v1347_v6  ;;  %v1300_v3 = vsel %vm1296_vm4, %v1291_v50, %v15888_v10  ;;  %v13056_v54 = vadd.bf16 %v1575_v55, %v1521_v2  ;;  %v1482_v57 = vadd.bf16 %v1474_v25, %v1438_v63  ;;  %v11313_v41 = vld [vmem:[#allocation7 + $0x2a4] ss:$16 sps:$4 sm:$0xff]   ;;  %v11311_v2 = vld [vmem:[#allocation7 + $0x2a0] ss:$16 sps:$4 sm:$0xff]  }
 0x327   :  { %v1304_v60 = vsel %vm1296_vm4, %v15889_v53, %v1291_v50  ;;  %v1288_v39 = vrot.slane %v12902_v15, 7  ;;  %v1341_v34 = vrot.slane %v12904_v1, 1  ;;  %v15890_v52 = vrot.slane %v12824_v22, 1  ;;  %2801 = vmatpush1.bf16.msra.mxu1 %v11305_v0 }
 0x328   :  { %v1375_v6 = vmul.bf16 %v1367_v11, %v12751_v19  ;;  %v1320_v37 = vpack.c.bf16 %v1300_v3, %v1304_v60  ;;  %v1349_v11 = vsel %vm1345_vm5, %v1340_v13, %v1344_v49  ;;  %2237 = vmatmul.mubr.bf16.vlgmr.msra.gmra.mxu0 %v13056_v54  ;;  %v1476_v55 = vmul.bf16 %v12760_v48, %v1385_v9  ;;  %v11308_v48 = vld [vmem:[#allocation7 + $0x2c8] ss:$16 sps:$4 sm:$0xff]   ;;  %v11316_v9 = vld [vmem:[#allocation7 + $0x2ac] ss:$16 sps:$4 sm:$0xff]  }
 0x329   :  { %v1361_v25 = vsel %vm1345_vm5, %v1344_v49, %v15890_v52  ;;  %v15892_v10 = vrot.slane %v12830_v44, 7  ;;  %v15893_v53 = vrot.slane %v12902_v15, 1  ;;  %2852 = vmatpush1.bf16.msra.mxu0 %v11302_v17  ;;  %v1382_v49 = vpack.c.bf16 %v12904_v1, %v12902_v15  ;;  %2802 = vmatprep.subr.bf16.mxu1 %v11313_v41 }
 0x32a   :  { %v1506_v50 = vmul.bf16 %v12766_v29, %v1375_v6  ;;  %v1328_v18 = vmul.bf16 %v1320_v37, %v12749_v8  ;;  %v1369_v63 = vpack.c.bf16 %v1361_v25, %v1349_v11  ;;  %v15891_v29 = vrot.slane %v12904_v1, 7  ;;  %2853 = vmatprep.subr.bf16.mxu0 %v11310_v26 }
 0x32b   :  { %v1301_v22 = vsel %vm1296_vm4, %v15892_v10, %v1288_v39  ;;  %v1346_v60 = vsel %vm1345_vm5, %v15893_v53, %v1341_v34  ;;  %v15894_v37 = vrot.slane %v12828_v16, 1  ;;  %2803 = vmatpush1.bf16.msra.mxu1 %v11311_v2  ;;  %v1343_v11 = vrot.slane %v12945_v27, 1 }
 0x32c   :  { %v1297_v36 = vsel %vm1296_vm4, %v1288_v39, %v15891_v29  ;;  %v1514_v13 = vadd.bf16 %v1506_v50, %v1482_v57  ;;  %v1440_v3 = vmul.bf16 %v12769_v51, %v1328_v18  ;;  %v1377_v6 = vmul.bf16 %v1369_v63, %v12751_v19 }
 0x32d   :  { %v1317_v0 = vpack.c.bf16 %v1297_v36, %v1301_v22  ;;  %v1358_v44 = vsel %vm1345_vm5, %v1341_v34, %v15894_v37  ;;  %v1290_v51 = vrot.slane %v12943_v45, 7  ;;  %v1473_v34 = vmul.bf16 %v12763_v32, %v1382_v49  ;;  %2854 = vmatpush1.bf16.msra.mxu0 %v11308_v48 }
 0x32e   :  { %v1524_v57 = vmax.bf16 %v15883_v12, %v1514_v13  ;;  %v1532_v17 = vmin.bf16 %v15883_v12, %v1514_v13  ;;  %v1484_v39 = vadd.bf16 %v1476_v55, %v1440_v3  ;;  %v1508_v16 = vmul.bf16 %v12774_v14, %v1377_v6  ;;  %v11314_v14 = vld [vmem:[#allocation7 + $0x2a8] ss:$16 sps:$4 sm:$0xff]   ;;  %2855 = vmatprep.subr.bf16.mxu0 %v11316_v9 }
 0x32f   :  { %v1325_v50 = vmul.bf16 %v1317_v0, %v12749_v8  ;;  %v1366_v18 = vpack.c.bf16 %v1358_v44, %v1346_v60  ;;  %v1299_v15 = vsel %vm1296_vm4, %v1290_v51, %v1294_v5  ;;  %v1303_v41 = vsel %vm1296_vm4, %v1286_v40, %v1290_v51 }
 0x330   :  { %v1578_v1 = vmul.bf16 %v12793_v31, %v1532_v17  ;;  %v1516_v52 = vadd.bf16 %v1508_v16, %v1484_v39  ;;  %v1319_v25 = vpack.c.bf16 %v1299_v15, %v1303_v41  ;;  %v1384_v5 = vpack.c.bf16 %v12945_v27, %v12943_v45 }
 0x331   :  { %v1437_v26 = vmul.bf16 %v12777_v23, %v1325_v50  ;;  %v1374_v32 = vmul.bf16 %v1366_v18, %v12751_v19  ;;  %v1348_v23 = vsel %vm1345_vm5, %v1339_v38, %v1343_v11  ;;  %v15895_v59 = vrot.slane %v12832_v61, 1  ;;  %2856 = vmatpush1.bf16.msra.mxu0 %v11314_v14 }
 0x332   :  { %v1586_v31 = vadd.bf16 %v1578_v1, %v1524_v57  ;;  %v1526_v63 = vmax.bf16 %v15883_v12, %v1516_v52  ;;  %v1534_v55 = vmin.bf16 %v15883_v12, %v1516_v52  ;;  %v1327_v27 = vmul.bf16 %v1319_v25, %v12749_v8 }
 0x333   :  { %v1481_v2 = vadd.bf16 %v1473_v34, %v1437_v26  ;;  %v1360_v40 = vsel %vm1345_vm5, %v1343_v11, %v15895_v59  ;;  %v1505_v29 = vmul.bf16 %v12780_v28, %v1374_v32  ;;  %v1475_v22 = vmul.bf16 %v12783_v43, %v1384_v5 }
 0x334   :  { %v1598_v36 = vunpack.c.l.bf16 %v1586_v31  ;;  %v1602_v10 = vunpack.c.h.bf16 %v1586_v31  ;;  %2193 = vmatprep.mubr.bf16.mxu1 %v1586_v31  ;;  %v1368_v45 = vpack.c.bf16 %v1360_v40, %v1348_v23  ;;  %v1580_v61 = vmul.bf16 %v12800_v56, %v1534_v55 }
 0x335   :  { %v1513_v38 = vadd.bf16 %v1505_v29, %v1481_v2  ;;  %v1439_v13 = vmul.bf16 %v12803_v20, %v1327_v27  ;;  %v1589_v3 = vunpack.c.l.bf16 %v13014_v47  ;;  %v1591_v49 = vunpack.c.l.bf16 %v13056_v54 }
 0x336   :  { %v13128_v0 = vadd.f32 %v1602_v10, %v1598_v36  ;;  %v1680_v53 = vmul.f32 %v1598_v36, %v1598_v36  ;;  %v1684_v28 = vmul.f32 %v1602_v10, %v1602_v10  ;;  %v1376_v60 = vmul.bf16 %v1368_v45, %v12751_v19 }
 0x337   :  { %v1588_v48 = vadd.bf16 %v1580_v61, %v1526_v63  ;;  %v1523_v6 = vmax.bf16 %v15883_v12, %v1513_v38  ;;  %v1531_v37 = vmin.bf16 %v15883_v12, %v1513_v38  ;;  %v1483_v43 = vadd.bf16 %v1475_v22, %v1439_v13 }
 0x338   :  { %v1641_v44 = vrot.slane %v13128_v0, 4  ;;  %v13134_v56 = vadd.f32 %v1684_v28, %v1680_v53  ;;  %v1507_v20 = vmul.bf16 %v12806_v33, %v1376_v60  ;;  %v1593_v17 = vunpack.c.h.bf16 %v13014_v47 }
 0x339   :  { %v13138_v51 = vunpack.c.l.bf16 %v1588_v48  ;;  %v13140_v9 = vunpack.c.h.bf16 %v1588_v48  ;;  %2246 = vmatprep.mubr.bf16.mxu0 %v1588_v48  ;;  %v1577_v57 = vmul.bf16 %v12790_v7, %v1531_v37  ;;  %v1595_v50 = vunpack.c.h.bf16 %v13056_v54 }
 0x33a   :  { %v1515_v39 = vadd.bf16 %v1507_v20, %v1483_v43  ;;  %v1614_v16 = vadd.f32 %v1613_v58, %v13021_v24  ;;  %v1626_v33 = vadd.f32 %v13012_v21, %v13010_v35  ;;  %v1605_v47 = vadd.f32 %v1593_v17, %v1589_v3 }
 0x33b   :  { %v13152_v18 = vmul.f32 %v13138_v51, %v13138_v51  ;;  %v13156_v34 = vmul.f32 %v13140_v9, %v13140_v9  ;;  %v1585_v7 = vadd.bf16 %v1577_v57, %v1523_v6  ;;  %v1619_v26 = vadd.f32 %v1595_v50, %v1591_v49 }
 0x33c   :  { %v1525_v15 = vmax.bf16 %v15883_v12, %v1515_v39  ;;  %v1533_v54 = vmin.bf16 %v15883_v12, %v1515_v39  ;;  %v1615_v1 = vrot.slane %v1614_v16, 2  ;;  %v1606_v35 = vrot.slane %v1605_v47, 4 }
 0x33d   :  { %v1597_v24 = vunpack.c.l.bf16 %v1585_v7  ;;  %v1601_v58 = vunpack.c.h.bf16 %v1585_v7  ;;  %2194 = vmatmul.mubr.bf16.gmra.mxu1 %v1585_v7  ;;  %v1627_v21 = vrot.slane %v1626_v33, 4  ;;  %v1620_v14 = vrot.slane %v1619_v26, 4 }
 0x33e   :  { %v1579_v41 = vmul.bf16 %v12796_v42, %v1533_v54  ;;  %v1616_v11 = vadd.f32 %v1615_v1, %v1614_v16  ;;  %v1671_v52 = vmul.f32 %v1589_v3, %v1589_v3  ;;  %v1607_v31 = vadd.f32 %v1606_v35, %v1605_v47 }
 0x33f   :  { %v1633_v32 = vadd.f32 %v1601_v58, %v1597_v24  ;;  %v1679_v25 = vmul.f32 %v1597_v24, %v1597_v24  ;;  %v1683_v5 = vmul.f32 %v1601_v58, %v1601_v58  ;;  %v1621_v59 = vadd.f32 %v1620_v14, %v1619_v26 }
 0x340   :  { %v1587_v2 = vadd.bf16 %v1579_v41, %v1525_v15  ;;  %v1617_v23 = vrot.slane %v1616_v11, 1  ;;  %v1628_v40 = vadd.f32 %v1627_v21, %v1626_v33  ;;  %v1608_v29 = vrot.slane %v1607_v31, 2 }
 0x341   :  { %v1634_v63 = vrot.slane %v1633_v32, 4  ;;  %v13161_v55 = vadd.f32 %v1683_v5, %v1679_v25  ;;  %v1673_v27 = vmul.f32 %v1591_v49, %v1591_v49  ;;  %v1622_v45 = vrot.slane %v1621_v59, 2 }
 0x342   :  { %v1599_v36 = vunpack.c.l.bf16 %v1587_v2  ;;  %v1603_v10 = vunpack.c.h.bf16 %v1587_v2  ;;  %2247 = vmatmul.mubr.bf16.gmra.mxu0 %v1587_v2  ;;  %v1618_v42 = vadd.f32 %v1617_v23, %v1616_v11  ;;  %v1609_v22 = vadd.f32 %v1608_v29, %v1607_v31 }
 0x343   :  { %v1629_v61 = vrot.slane %v1628_v40, 2  ;;  %v1675_v38 = vmul.f32 %v1593_v17, %v1593_v17  ;;  %v1677_v13 = vmul.f32 %v1595_v50, %v1595_v50  ;;  %v1623_v60 = vadd.f32 %v1622_v45, %v1621_v59 }
 0x344   :  { %v1647_v3 = vadd.f32 %v1603_v10, %v1599_v36  ;;  %v13163_v53 = vmul.f32 %v1599_v36, %v1599_v36  ;;  %v13165_v28 = vmul.f32 %v1603_v10, %v1603_v10  ;;  %v1610_v48 = vrot.slane %v1609_v22, 1 }
 0x345   :  { %v1630_v6 = vadd.f32 %v1629_v61, %v1628_v40  ;;  %v1687_v37 = vadd.f32 %v1675_v38, %v1671_v52  ;;  %v1695_v43 = vrot.slane %v13039_v46, 4  ;;  %v1624_v20 = vrot.slane %v1623_v60, 1 }
 0x346   :  { %v1701_v49 = vadd.f32 %v1677_v13, %v1673_v27  ;;  %v1708_v57 = vadd.f32 %v13029_v62, %v13025_v30  ;;  %v1635_v39 = vadd.f32 %v1634_v63, %v1633_v32  ;;  %v1611_v16 = vadd.f32 %v1610_v48, %v1609_v22 }
 0x347   :  { %v1631_v17 = vrot.slane %v1630_v6, 1  ;;  %v1688_v50 = vrot.slane %v1687_v37, 4  ;;  %v1696_v33 = vadd.f32 %v1695_v43, %v13039_v46  ;;  %v1625_v7 = vadd.f32 %v1624_v20, %v1623_v60 }
 0x348   :  { %v1702_v47 = vrot.slane %v1701_v49, 4  ;;  %v1709_v15 = vrot.slane %v1708_v57, 4  ;;  %v1636_v54 = vrot.slane %v1635_v39, 2  ;;  %v1661_v26 = vadd.f32 %v1618_v42, %v1611_v16 }
 0x349   :  { %v1632_v1 = vadd.f32 %v1631_v17, %v1630_v6  ;;  %v1689_v24 = vadd.f32 %v1688_v50, %v1687_v37  ;;  %v1697_v58 = vrot.slane %v1696_v33, 2  ;;  %v1642_v30 = vadd.f32 %v1641_v44, %v13128_v0 }
 0x34a   :  { %v1703_v35 = vadd.f32 %v1702_v47, %v1701_v49  ;;  %v1710_v21 = vadd.f32 %v1709_v15, %v1708_v57  ;;  %v1637_v41 = vadd.f32 %v1636_v54, %v1635_v39  ;;  %v1662_v62 = vadd.f32 %v1661_v26, %v1625_v7 }
 0x34b   :  { %v1690_v11 = vrot.slane %v1689_v24, 2  ;;  %v1698_v14 = vadd.f32 %v1697_v58, %v1696_v33  ;;  %v1648_v52 = vrot.slane %v1647_v3, 4  ;;  %v1643_v5 = vrot.slane %v1642_v30, 2 }
 0x34c   :  { %v1704_v46 = vrot.slane %v1703_v35, 2  ;;  %v1711_v32 = vrot.slane %v1710_v21, 2  ;;  %v1638_v25 = vrot.slane %v1637_v41, 1  ;;  %v1663_v31 = vadd.f32 %v1662_v62, %v1632_v1 }
 0x34d   :  { %v1691_v2 = vadd.f32 %v1690_v11, %v1689_v24  ;;  %v1699_v23 = vrot.slane %v1698_v14, 1  ;;  %v1649_v59 = vadd.f32 %v1648_v52, %v1647_v3  ;;  %v1644_v27 = vadd.f32 %v1643_v5, %v1642_v30  ;;  %v11317_v11 = vld [vmem:[#allocation7 + $0x280] ss:$16 sps:$4 sm:$0xff]   ;;  %v11320_v52 = vld [vmem:[#allocation7 + $0x288] ss:$16 sps:$4 sm:$0xff]  }
 0x34e   :  { %v1705_v40 = vadd.f32 %v1704_v46, %v1703_v35  ;;  %v1712_v63 = vadd.f32 %v1711_v32, %v1710_v21  ;;  %v1639_v29 = vadd.f32 %v1638_v25, %v1637_v41  ;;  %1664 = vadd.xlane.f32.xlu0 %v1663_v31  ;;  %v1654_v44 = vadd.f32 %v13140_v9, %v13138_v51  ;;  %v11322_v25 = vld [vmem:[#allocation7 + $0x28c] ss:$16 sps:$4 sm:$0xff]  }
 0x34f   :  { %v1692_v36 = vrot.slane %v1691_v2, 1  ;;  %v1700_v10 = vadd.f32 %v1699_v23, %v1698_v14  ;;  %v1650_v0 = vrot.slane %v1649_v59, 2  ;;  %v1645_v22 = vrot.slane %v1644_v27, 1  ;;  %v11319_v14 = vld [vmem:[#allocation7 + $0x284] ss:$16 sps:$4 sm:$0xff]   ;;  %2857 = vmatprep.subr.bf16.mxu0 %v11322_v25 }
 0x350   :  { %v1706_v42 = vrot.slane %v1705_v40, 1  ;;  %v1713_v45 = vrot.slane %v1712_v63, 1  ;;  %v1716_v61 = vrot.slane %v13161_v55, 4  ;;  %v1655_v60 = vrot.slane %v1654_v44, 4  ;;  %2804 = vmatprep.subr.bf16.mxu1 %v11319_v14  ;;  %2858 = vmatpush1.bf16.msra.mxu0 %v11320_v52  ;;  %v11392_v14 = vld [vmem:[#allocation7 + $0x308] ss:$16 sps:$4 sm:$0xff]  }
 0x351   :  { %v1693_v38 = vadd.f32 %v1692_v36, %v1691_v2  ;;  %v1651_v13 = vadd.f32 %v1650_v0, %v1649_v59  ;;  %v1723_v3 = vrot.slane %v13134_v56, 4  ;;  %v1646_v6 = vadd.f32 %v1645_v22, %v1644_v27  ;;  %2805 = vmatpush1.bf16.msra.mxu1 %v11317_v11  ;;  %v11323_v27 = vld [vmem:[#allocation7 + $0x260] ss:$16 sps:$4 sm:$0xff]   ;;  %v11325_v36 = vld [vmem:[#allocation7 + $0x264] ss:$16 sps:$4 sm:$0xff]  }
 0x352   :  { %v1707_v48 = vadd.f32 %v1706_v42, %v1705_v40  ;;  %v1717_v37 = vadd.f32 %v1716_v61, %v13161_v55  ;;  %v1656_v49 = vadd.f32 %v1655_v60, %v1654_v44  ;;  %v1714_v51 = vadd.f32 %v1713_v45, %v1712_v63  ;;  %v11328_v0 = vld [vmem:[#allocation7 + $0x26c] ss:$16 sps:$4 sm:$0xff]   ;;  %2806 = vmatprep.subr.bf16.mxu1 %v11325_v36  ;;  %v11331_v44 = vld [vmem:[#allocation7 + $0x244] ss:$16 sps:$4 sm:$0xff]   ;;  %v11329_v45 = vld [vmem:[#allocation7 + $0x240] ss:$16 sps:$4 sm:$0xff]  }
 0x353   :  { %v1743_v43 = vadd.f32 %v1700_v10, %v1693_v38  ;;  %v1652_v20 = vrot.slane %v1651_v13, 1  ;;  %v1724_v57 = vadd.f32 %v1723_v3, %v13134_v56  ;;  %v1729_v39 = vadd.f32 %v13165_v28, %v13163_v53  ;;  %v11326_v10 = vld [vmem:[#allocation7 + $0x268] ss:$16 sps:$4 sm:$0xff]   ;;  %2859 = vmatprep.subr.bf16.mxu0 %v11328_v0  ;;  %v11334_v42 = vld [vmem:[#allocation7 + $0x24c] ss:$16 sps:$4 sm:$0xff]  }
 0x354   :  { %v1718_v9 = vrot.slane %v1717_v37, 2  ;;  %v1736_v16 = vadd.f32 %v13156_v34, %v13152_v18  ;;  %v1657_v50 = vrot.slane %v1656_v49, 2  ;;  %v1666_v33 = vadd.f32 %v1646_v6, %v1639_v29  ;;  %2860 = vmatpush1.bf16.msra.mxu0 %v11326_v10  ;;  %v11332_v22 = vld [vmem:[#allocation7 + $0x248] ss:$16 sps:$4 sm:$0xff]   ;;  %v11337_v61 = vld [vmem:[#allocation7 + $0x224] ss:$16 sps:$4 sm:$0xff]  }
 0x355   :  { %v1744_v17 = vadd.f32 %v1743_v43, %v1707_v48  ;;  %v1725_v7 = vrot.slane %v1724_v57, 2  ;;  %v1730_v15 = vrot.slane %v1729_v39, 4  ;;  %v1653_v1 = vadd.f32 %v1652_v20, %v1651_v13  ;;  %2807 = vmatpush1.bf16.msra.mxu1 %v11323_v27  ;;  %2861 = vmatprep.subr.bf16.mxu0 %v11334_v42  ;;  %v11340_v38 = vld [vmem:[#allocation7 + $0x22c] ss:$16 sps:$4 sm:$0xff]   ;;  %v11335_v13 = vld [vmem:[#allocation7 + $0x220] ss:$16 sps:$4 sm:$0xff]  }
 0x356   :  { %v1719_v47 = vadd.f32 %v1718_v9, %v1717_v37  ;;  %v1737_v55 = vrot.slane %v1736_v16, 4  ;;  %v1658_v26 = vadd.f32 %v1657_v50, %v1656_v49  ;;  %2808 = vmatprep.subr.bf16.mxu1 %v11331_v44  ;;  %v11338_v60 = vld [vmem:[#allocation7 + $0x228] ss:$16 sps:$4 sm:$0xff]   ;;  %v11343_v3 = vld [vmem:[#allocation7 + $0x204] ss:$16 sps:$4 sm:$0xff]  }
 0x357   :  { %v1745_v54 = vadd.f32 %v1744_v17, %v1714_v51  ;;  %v1726_v24 = vadd.f32 %v1725_v7, %v1724_v57  ;;  %v1731_v58 = vadd.f32 %v1730_v15, %v1729_v39  ;;  %v1667_v53 = vadd.f32 %v1666_v33, %v1653_v1  ;;  %v11346_v48 = vld [vmem:[#allocation7 + $0x20c] ss:$16 sps:$4 sm:$0xff]   ;;  %v11341_v6 = vld [vmem:[#allocation7 + $0x200] ss:$16 sps:$4 sm:$0xff]   ;;  %v11344_v37 = vld [vmem:[#allocation7 + $0x208] ss:$16 sps:$4 sm:$0xff]  }
 0x358   :  { %v1720_v56 = vrot.slane %v1719_v47, 1  ;;  %v1738_v35 = vadd.f32 %v1737_v55, %v1736_v16  ;;  %v1659_v21 = vrot.slane %v1658_v26, 1  ;;  %2862 = vmatpush1.bf16.msra.mxu0 %v11332_v22  ;;  %v11349_v43 = vld [vmem:[#allocation7 + $0x3e4] ss:$16 sps:$4 sm:$0xff]   ;;  %v11352_v20 = vld [vmem:[#allocation7 + $0x3ec] ss:$16 sps:$4 sm:$0xff]  }
 0x359   :  { %1746 = vadd.xlane.f32.xlu1 %v1745_v54  ;;  %v1727_v28 = vrot.slane %v1726_v24, 1  ;;  %v1732_v18 = vrot.slane %v1731_v58, 2  ;;  %2809 = vmatpush1.bf16.msra.mxu1 %v11329_v45  ;;  %v11347_v49 = vld [vmem:[#allocation7 + $0x3e0] ss:$16 sps:$4 sm:$0xff]   ;;  %v11350_v57 = vld [vmem:[#allocation7 + $0x3e8] ss:$16 sps:$4 sm:$0xff]  }
 0x35a   :  { %v1721_v41 = vadd.f32 %v1720_v56, %v1719_v47  ;;  %v1739_v34 = vrot.slane %v1738_v35, 2  ;;  %v1660_v30 = vadd.f32 %v1659_v21, %v1658_v26  ;;  %2810 = vmatprep.subr.bf16.mxu1 %v11337_v61  ;;  %2863 = vmatprep.subr.bf16.mxu0 %v11340_v38  ;;  %v11355_v51 = vld [vmem:[#allocation7 + $0x3c4] ss:$16 sps:$4 sm:$0xff]   ;;  %v11358_v9 = vld [vmem:[#allocation7 + $0x3cc] ss:$16 sps:$4 sm:$0xff]  }
 0x35b   :  { %v1728_v62 = vadd.f32 %v1727_v28, %v1726_v24  ;;  %v1733_v46 = vadd.f32 %v1732_v18, %v1731_v58  ;;  %v11353_v39 = vld [vmem:[#allocation7 + $0x3c0] ss:$16 sps:$4 sm:$0xff]   ;;  %v11356_v16 = vld [vmem:[#allocation7 + $0x3c8] ss:$16 sps:$4 sm:$0xff]   ;;  %v11361_v17 = vld [vmem:[#allocation7 + $0x3a4] ss:$16 sps:$4 sm:$0xff]  }
 0x35c   :  { %v1740_v32 = vadd.f32 %v1739_v34, %v1738_v35  ;;  %v1668_v5 = vadd.f32 %v1667_v53, %v1660_v30  ;;  %2864 = vmatpush1.bf16.msra.mxu0 %v11338_v60  ;;  %v11364_v50 = vld [vmem:[#allocation7 + $0x3ac] ss:$16 sps:$4 sm:$0xff]   ;;  %v11359_v33 = vld [vmem:[#allocation7 + $0x3a0] ss:$16 sps:$4 sm:$0xff]   ;;  %v11362_v7 = vld [vmem:[#allocation7 + $0x3a8] ss:$16 sps:$4 sm:$0xff]  }
 0x35d   :  { %v1734_v31 = vrot.slane %v1733_v46, 1  ;;  %v1748_v23 = vadd.f32 %v1728_v62, %v1721_v41  ;;  %2811 = vmatpush1.bf16.msra.mxu1 %v11335_v13  ;;  %2865 = vmatprep.subr.bf16.mxu0 %v11346_v48  ;;  %v11367_v47 = vld [vmem:[#allocation7 + $0x384] ss:$16 sps:$4 sm:$0xff]   ;;  %v11370_v15 = vld [vmem:[#allocation7 + $0x38c] ss:$16 sps:$4 sm:$0xff]  }
 0x35e   :  { %v1741_v2 = vrot.slane %v1740_v32, 1  ;;  %1669 = vadd.xlane.f32.xlu0 %v1668_v5  ;;  %2812 = vmatprep.subr.bf16.mxu1 %v11343_v3  ;;  %v11365_v55 = vld [vmem:[#allocation7 + $0x380] ss:$16 sps:$4 sm:$0xff]   ;;  %v11368_v54 = vld [vmem:[#allocation7 + $0x388] ss:$16 sps:$4 sm:$0xff]  }
 0x35f   :  { %v1735_v59 = vadd.f32 %v1734_v31, %v1733_v46  ;;  %v11373_v1 = vld [vmem:[#allocation7 + $0x364] ss:$16 sps:$4 sm:$0xff]   ;;  %v11376_v26 = vld [vmem:[#allocation7 + $0x36c] ss:$16 sps:$4 sm:$0xff]   ;;  %v11371_v24 = vld [vmem:[#allocation7 + $0x360] ss:$16 sps:$4 sm:$0xff]  }
 0x360   :  { %v1742_v40 = vadd.f32 %v1741_v2, %v1740_v32  ;;  %2866 = vmatpush1.bf16.msra.mxu0 %v11344_v37  ;;  %v11374_v56 = vld [vmem:[#allocation7 + $0x368] ss:$16 sps:$4 sm:$0xff]   ;;  %v11379_v58 = vld [vmem:[#allocation7 + $0x344] ss:$16 sps:$4 sm:$0xff]   ;;  %v11382_v35 = vld [vmem:[#allocation7 + $0x34c] ss:$16 sps:$4 sm:$0xff]  }
 0x361   :  { %v1749_v63 = vadd.f32 %v1748_v23, %v1735_v59  ;;  %2813 = vmatpush1.bf16.msra.mxu1 %v11341_v6  ;;  %2867 = vmatprep.subr.bf16.mxu0 %v11352_v20  ;;  %v11377_v21 = vld [vmem:[#allocation7 + $0x340] ss:$16 sps:$4 sm:$0xff]   ;;  %v11380_v53 = vld [vmem:[#allocation7 + $0x348] ss:$16 sps:$4 sm:$0xff]   ;;  %v11385_v28 = vld [vmem:[#allocation7 + $0x324] ss:$16 sps:$4 sm:$0xff]  }
 0x362   :  { %2814 = vmatprep.subr.bf16.mxu1 %v11349_v43  ;;  %v11388_v41 = vld [vmem:[#allocation7 + $0x32c] ss:$16 sps:$4 sm:$0xff]   ;;  %v11383_v18 = vld [vmem:[#allocation7 + $0x320] ss:$16 sps:$4 sm:$0xff]   ;;  %v11386_v34 = vld [vmem:[#allocation7 + $0x328] ss:$16 sps:$4 sm:$0xff]  }
 0x363   :  { %v1750_v29 = vadd.f32 %v1749_v63, %v1742_v40  ;;  %v11391_v30 = vld [vmem:[#allocation7 + $0x304] ss:$16 sps:$4 sm:$0xff]   ;;  %v11394_v62 = vld [vmem:[#allocation7 + $0x30c] ss:$16 sps:$4 sm:$0xff]   ;;  %v11389_v11 = vld [vmem:[#allocation7 + $0x300] ss:$16 sps:$4 sm:$0xff]  }
 0x364   :  { %2868 = vmatpush2.bf16.msra.mxu0 %v11350_v57  ;;  %v2257_v20 = vld [vmem:[#allocation19] ss:$8 sm:$0x3] }
 0x365   :  { %1751 = vadd.xlane.f32.xlu1 %v1750_v29  ;;  %2815 = vmatpush2.bf16.msra.mxu1 %v11347_v49 }
 0x366   :  { %2816 = vmatprep.subr.bf16.mxu1 %v11355_v51  ;;  %2869 = vmatprep.subr.bf16.mxu0 %v11358_v9 }
 0x368   :  { %2870 = vmatpush2.bf16.msra.mxu0 %v11356_v16 }
 0x369   :  { %2817 = vmatpush2.bf16.msra.mxu1 %v11353_v39  ;;  %2871 = vmatprep.subr.bf16.mxu0 %v11364_v50  ;;  %v2258_v39 = vld [vmem:[#allocation20] ss:$8 sm:$0x3]  ;;  %v15896_v50 = vld [vmem:[#allocation31_spill] sm:$0xff] }
 0x36a   :  { %2818 = vmatprep.subr.bf16.mxu1 %v11361_v17 }
 0x36c   :  { %2872 = vmatpush2.bf16.msra.mxu0 %v11362_v7 }
 0x36d   :  { %2819 = vmatpush2.bf16.msra.mxu1 %v11359_v33  ;;  %2873 = vmatprep.subr.bf16.mxu0 %v11370_v15 }
 0x36e   :  { %2820 = vmatprep.subr.bf16.mxu1 %v11367_v47  ;;  %v15897_v47 = vld [vmem:[#allocation32_spill] sm:$0xff] }
 0x370   :  { %2874 = vmatpush2.bf16.msra.mxu0 %v11368_v54 }
 0x371   :  { %2821 = vmatpush2.bf16.msra.mxu1 %v11365_v55  ;;  %2875 = vmatprep.subr.bf16.mxu0 %v11376_v26  ;;  %v15898_v55 = vld [vmem:[#allocation33_spill] sm:$0xff] }
 0x372   :  { %2822 = vmatprep.subr.bf16.mxu1 %v11373_v1  ;;  %v15899_v1 = vld [vmem:[#allocation34_spill] sm:$0xff] }
 0x374   :  { %2876 = vmatpush2.bf16.msra.mxu0 %v11374_v56  ;;  %v15900_v56 = vld [vmem:[#allocation39_spill] sm:$0xff] }
 0x375   :  { %2823 = vmatpush2.bf16.msra.mxu1 %v11371_v24  ;;  %2877 = vmatprep.subr.bf16.mxu0 %v11382_v35  ;;  %v15901_v35 = vld [vmem:[#allocation41_spill] sm:$0xff] }
 0x376   :  { %2824 = vmatprep.subr.bf16.mxu1 %v11379_v58 }
 0x378   :  { %2878 = vmatpush2.bf16.msra.mxu0 %v11380_v53 }
 0x379   :  { %2825 = vmatpush2.bf16.msra.mxu1 %v11377_v21  ;;  %2879 = vmatprep.subr.bf16.mxu0 %v11388_v41 }
 0x37a   :  { %2826 = vmatprep.subr.bf16.mxu1 %v11385_v28 }
 0x37c   :  { %2880 = vmatpush2.bf16.msra.mxu0 %v11386_v34 }
 0x37d   :  { %2827 = vmatpush2.bf16.msra.mxu1 %v11383_v18  ;;  %2881 = vmatprep.subr.bf16.mxu0 %v11394_v62 }
 0x37e   :  { %2828 = vmatprep.subr.bf16.mxu1 %v11391_v30 }
 0x380   :  { %2882 = vmatpush2.bf16.msra.mxu0 %v11392_v14 }
 0x381   :  { %2829 = vmatpush2.bf16.msra.mxu1 %v11389_v11 }
 0x3d7   :  { %v1665_v52 = vpop.xlane.xlu0 %1664 }
 0x3d8   :  { %v1753_v46 = vmul.f32 0.00012207031, %v1665_v52 }
 0x3da   :  { %v1757_v32 = vmul.f32 %v1753_v46, %v1753_v46 }
 0x3e2   :  { %v1747_v25 = vpop.xlane.xlu1 %1746  ;;  %v2185_v2 = vpop.f32.mrf.mxu1 }
 0x3e3   :  { %v1755_v5 = vmul.f32 0.00012207031, %v1747_v25 }
 0x3e4   :  { %v2187_v29 = vpop.f32.mrf.mxu1 }
 0x3e5   :  { %v1759_v31 = vsub.f32 %v1755_v5, %v1757_v32 }
 0x3e6   :  { %v2189_v0 = vpop.f32.mrf.mxu1 }
 0x3e7   :  { %v1761_v23 = vmax.f32 %v1759_v31, 0.0  ;;  %v1670_v59 = vpop.xlane.xlu0 %1669 }
 0x3e8   :  { %v1754_v63 = vmul.f32 0.00012207031, %v1670_v59  ;;  %v2238_v27 = vpop.f32.mrf.mxu0  ;;  %v2191_v61 = vpop.f32.mrf.mxu1 }
 0x3e9   :  { %v1763_v40 = vadd.f32 1e-08, %v1761_v23  ;;  %v2239_v60 = vadd.f32 %v2238_v27, %v2185_v2 }
 0x3ea   :  { %v2240_v36 = vpop.f32.mrf.mxu0  ;;  %v1758_v10 = vmul.f32 %v1754_v63, %v1754_v63 }
 0x3eb   :  { %12095 = vrsqrt.f32 %v1763_v40  ;;  %v2241_v3 = vadd.f32 %v2240_v36, %v2187_v29 }
 0x3ec   :  { %v2242_v42 = vpop.f32.mrf.mxu0 }
 0x3ed   :  { %v2243_v48 = vadd.f32 %v2242_v42, %v2189_v0 }
 0x3ee   :  { %v1752_v44 = vpop.xlane.xlu1 %1751  ;;  %v2244_v38 = vpop.f32.mrf.mxu0 }
 0x3ef   :  { %v1756_v45 = vmul.f32 0.00012207031, %v1752_v44  ;;  %v2245_v37 = vadd.f32 %v2244_v38, %v2191_v61  ;;  %v15906_v61 = vld [vmem:[#allocation35_spill] sm:$0xff] }
 0x3f1   :  { %v1760_v22 = vsub.f32 %v1756_v45, %v1758_v10 }
 0x3f3   :  { %v1762_v13 = vmax.f32 %v1760_v22, 0.0 }
 0x3f5   :  { %v1764_v6 = vadd.f32 1e-08, %v1762_v13 }
 0x3f7   :  { %12097 = vrsqrt.f32 %v1764_v6 }
 0x3f8   :  { %v12096_v43 = vpop.eup %12095 }
 0x3f9   :  { %v2259_v49 = vmul.f32 %v12096_v43, %v1753_v46  ;;  %v2265_v57 = vmul.f32 %v12096_v43, %v2239_v60  ;;  %v2266_v51 = vmul.f32 %v12096_v43, %v2241_v3  ;;  %v2267_v9 = vmul.f32 %v12096_v43, %v2243_v48  ;;  %v15907_v48 = vld [vmem:[#allocation36_spill] sm:$0xff] }
 0x3fa   :  { %v2268_v16 = vmul.f32 %v12096_v43, %v2245_v37 }
 0x3fb   :  { %v2261_v17 = vmul.f32 %v2259_v49, %v2257_v20  ;;  %v2273_v33 = vadd.f32 %v2265_v57, %v15896_v50  ;;  %v2274_v15 = vadd.f32 %v2266_v51, %v15897_v47  ;;  %v2275_v54 = vadd.f32 %v2267_v9, %v15898_v55  ;;  %v15908_v9 = vld [vmem:[#allocation37_spill] sm:$0xff]  ;;  %v15909_v55 = vld [vmem:[#allocation38_spill] sm:$0xff] }
 0x3fc   :  { %v2276_v26 = vadd.f32 %v2268_v16, %v15899_v1 }
 0x3fd   :  { %v2263_v7 = vsub.f32 %v2258_v39, %v2261_v17  ;;  %v2195_v24 = vpop.f32.mrf.mxu1 }
 0x3ff   :  { %v2286_v58 = vrot.slane %v2263_v7, %v15900_v56  ;;  %v2290_v21 = vrot.slane %v2263_v7, %v15901_v35  ;;  %v2197_v53 = vpop.f32.mrf.mxu1 }
 0x401   :  { %v13190_v28 = vadd.f32 %v2286_v58, %v2273_v33  ;;  %v13192_v41 = vadd.f32 %v2290_v21, %v2274_v15  ;;  %v13194_v18 = vadd.f32 %v2286_v58, %v2275_v54  ;;  %v13196_v34 = vadd.f32 %v2290_v21, %v2276_v26  ;;  %v2199_v62 = vpop.f32.mrf.mxu1 }
 0x402   :  { %v2248_v30 = vpop.f32.mrf.mxu0 }
 0x403   :  { %15902 = vst [vmem:[#allocation31_spill] sm:$0xff] %v13190_v28  ;;  %15903 = vst [vmem:[#allocation32_spill] sm:$0xff] %v13192_v41  ;;  %v2311_v11 = vmax.f32 %v13190_v28, 0.0  ;;  %v2313_v14 = vmax.f32 %v13194_v18, 0.0  ;;  %v2249_v52 = vadd.f32 %v2248_v30, %v2195_v24  ;;  %v2312_v32 = vmax.f32 %v13192_v41, 0.0  ;;  %v2201_v27 = vpop.f32.mrf.mxu1 }
 0x404   :  { %15904 = vst [vmem:[#allocation33_spill] sm:$0xff] %v13194_v18  ;;  %15905 = vst [vmem:[#allocation34_spill] sm:$0xff] %v13196_v34  ;;  %v2250_v46 = vpop.f32.mrf.mxu0  ;;  %v2314_v25 = vmax.f32 %v13196_v34, 0.0  ;;  %v12098_v5 = vpop.eup %12097 }
 0x405   :  { %v2251_v31 = vadd.f32 %v2250_v46, %v2197_v53  ;;  %v2409_v2 = vpack.c.bf16 %v2313_v14, %v2311_v11  ;;  %v2319_v23 = vadd.f32 %v2313_v14, %v2311_v11  ;;  %v2260_v59 = vmul.f32 %v12098_v5, %v1754_v63 }
 0x406   :  { %v2269_v40 = vmul.f32 %v12098_v5, %v2249_v52  ;;  %v2252_v29 = vpop.f32.mrf.mxu0  ;;  %v2410_v36 = vpack.c.bf16 %v2314_v25, %v2312_v32  ;;  %v2326_v10 = vadd.f32 %v2314_v25, %v2312_v32  ;;  %v2353_v45 = vmul.f32 %v2311_v11, %v2311_v11 }
 0x407   :  { %v2270_v0 = vmul.f32 %v12098_v5, %v2251_v31  ;;  %v2253_v44 = vadd.f32 %v2252_v29, %v2199_v62  ;;  %v2320_v42 = vrot.slane %v2319_v23, 4  ;;  %v2262_v22 = vmul.f32 %v2260_v59, %v2257_v20 }
 0x408   :  { %v2277_v38 = vadd.f32 %v2269_v40, %v15906_v61  ;;  %v2254_v13 = vpop.f32.mrf.mxu0  ;;  %2830 = vmatprep.mubr.bf16.mxu1 %v2410_v36  ;;  %2883 = vmatprep.mubr.bf16.mxu0 %v2410_v36  ;;  %v2327_v60 = vrot.slane %v2326_v10, 4  ;;  %v2355_v3 = vmul.f32 %v2313_v14, %v2313_v14  ;;  %v2356_v51 = vmul.f32 %v2314_v25, %v2314_v25 }
 0x409   :  { %v2278_v6 = vadd.f32 %v2270_v0, %v15907_v48  ;;  %v2271_v63 = vmul.f32 %v12098_v5, %v2253_v44  ;;  %v2255_v37 = vadd.f32 %v2254_v13, %v2201_v27  ;;  %2831 = vmatmul.mubr.bf16.vlgmr.msra.gmra.mxu1 %v2409_v2  ;;  %2884 = vmatmul.mubr.bf16.vlgmr.msra.gmra.mxu0 %v2409_v2 }
 0x40a   :  { %v2264_v43 = vsub.f32 %v2258_v39, %v2262_v22  ;;  %v2321_v49 = vadd.f32 %v2320_v42, %v2319_v23  ;;  %v2328_v57 = vadd.f32 %v2327_v60, %v2326_v10  ;;  %v2354_v17 = vmul.f32 %v2312_v32, %v2312_v32 }
 0x40b   :  { %v2279_v16 = vadd.f32 %v2271_v63, %v15908_v9  ;;  %v2272_v20 = vmul.f32 %v12098_v5, %v2255_v37  ;;  %v2361_v50 = vadd.f32 %v2355_v3, %v2353_v45 }
 0x40c   :  { %v2294_v33 = vrot.slane %v2264_v43, %v15900_v56  ;;  %v2298_v7 = vrot.slane %v2264_v43, %v15901_v35  ;;  %v2322_v47 = vrot.slane %v2321_v49, 2  ;;  %v2329_v15 = vrot.slane %v2328_v57, 2 }
 0x40d   :  { %v2280_v54 = vadd.f32 %v2272_v20, %v15909_v55  ;;  %v2362_v1 = vrot.slane %v2361_v50, 4  ;;  %v2368_v26 = vadd.f32 %v2356_v51, %v2354_v17 }
 0x40e   :  { %v13208_v24 = vadd.f32 %v2294_v33, %v2277_v38  ;;  %v13210_v39 = vadd.f32 %v2298_v7, %v2278_v6  ;;  %v13212_v58 = vadd.f32 %v2294_v33, %v2279_v16  ;;  %v2323_v21 = vadd.f32 %v2322_v47, %v2321_v49 }
 0x40f   :  { %v13214_v53 = vadd.f32 %v2298_v7, %v2280_v54  ;;  %v2330_v30 = vadd.f32 %v2329_v15, %v2328_v57  ;;  %v2363_v62 = vadd.f32 %v2362_v1, %v2361_v50  ;;  %v2369_v11 = vrot.slane %v2368_v26, 4 }
 0x410   :  { %15910 = vst [vmem:[#allocation35_spill] sm:$0xff] %v13208_v24  ;;  %15911 = vst [vmem:[#allocation36_spill] sm:$0xff] %v13210_v39  ;;  %v2316_v14 = vmax.f32 %v13210_v39, 0.0  ;;  %v2315_v52 = vmax.f32 %v13208_v24, 0.0  ;;  %v2317_v46 = vmax.f32 %v13212_v58, 0.0  ;;  %v2324_v32 = vrot.slane %v2323_v21, 1 }
 0x411   :  { %15912 = vst [vmem:[#allocation37_spill] sm:$0xff] %v13212_v58  ;;  %15913 = vst [vmem:[#allocation38_spill] sm:$0xff] %v13214_v53  ;;  %v2318_v25 = vmax.f32 %v13214_v53, 0.0  ;;  %v2331_v5 = vrot.slane %v2330_v30, 1  ;;  %v2364_v31 = vrot.slane %v2363_v62, 2  ;;  %v2370_v2 = vadd.f32 %v2369_v11, %v2368_v26 }
 0x412   :  { %v2411_v23 = vpack.c.bf16 %v2317_v46, %v2315_v52  ;;  %v2325_v59 = vadd.f32 %v2324_v32, %v2323_v21  ;;  %v2333_v40 = vadd.f32 %v2317_v46, %v2315_v52  ;;  %v2357_v29 = vmul.f32 %v2315_v52, %v2315_v52 }
 0x413   :  { %v2412_v27 = vpack.c.bf16 %v2318_v25, %v2316_v14  ;;  %v2332_v36 = vadd.f32 %v2331_v5, %v2330_v30  ;;  %v2365_v10 = vadd.f32 %v2364_v31, %v2363_v62  ;;  %v2371_v0 = vrot.slane %v2370_v2, 2 }
 0x414   :  { %v2334_v44 = vrot.slane %v2333_v40, 4  ;;  %v2340_v42 = vadd.f32 %v2318_v25, %v2316_v14  ;;  %v2358_v45 = vmul.f32 %v2316_v14, %v2316_v14  ;;  %v2359_v22 = vmul.f32 %v2317_v46, %v2317_v46 }
 0x415   :  { %2840 = vmatprep.mubr.bf16.mxu1 %v2412_v27  ;;  %2893 = vmatprep.mubr.bf16.mxu0 %v2412_v27  ;;  %v2347_v61 = vadd.f32 %v2332_v36, %v2325_v59  ;;  %v2366_v38 = vrot.slane %v2365_v10, 1  ;;  %v2372_v13 = vadd.f32 %v2371_v0, %v2370_v2  ;;  %v2360_v60 = vmul.f32 %v2318_v25, %v2318_v25 }
 0x416   :  { %2841 = vmatmul.mubr.bf16.gmra.mxu1 %v2411_v23  ;;  %2894 = vmatmul.mubr.bf16.gmra.mxu0 %v2411_v23  ;;  %v2335_v3 = vadd.f32 %v2334_v44, %v2333_v40  ;;  %v2341_v48 = vrot.slane %v2340_v42, 4  ;;  %v2375_v6 = vadd.f32 %v2359_v22, %v2357_v29 }
 0x417   :  { %2348 = vadd.xlane.f32.xlu0 %v2347_v61  ;;  %v2373_v63 = vrot.slane %v2372_v13, 1  ;;  %v2382_v37 = vadd.f32 %v2360_v60, %v2358_v45  ;;  %v2367_v51 = vadd.f32 %v2366_v38, %v2365_v10  ;;  %v2905_v60 = vld [vmem:[#allocation13 + $0x1] ss:$8 sm:$0xf] }
 0x418   :  { %v2336_v43 = vrot.slane %v2335_v3, 2  ;;  %v2342_v49 = vadd.f32 %v2341_v48, %v2340_v42  ;;  %v2376_v57 = vrot.slane %v2375_v6, 4  ;;  %v2907_v48 = vld [vmem:[#allocation14 + $0x1] ss:$8 sm:$0xf] }
 0x419   :  { %v2374_v9 = vadd.f32 %v2373_v63, %v2372_v13  ;;  %v2383_v16 = vrot.slane %v2382_v37, 4 }
 0x41a   :  { %v2337_v20 = vadd.f32 %v2336_v43, %v2335_v3  ;;  %v2343_v17 = vrot.slane %v2342_v49, 2  ;;  %v2377_v50 = vadd.f32 %v2376_v57, %v2375_v6 }
 0x41b   :  { %v2389_v33 = vadd.f32 %v2374_v9, %v2367_v51  ;;  %v2384_v7 = vadd.f32 %v2383_v16, %v2382_v37  ;;  %v15914_v16 = vld [vmem:[#allocation40_spill] sm:$0xff] }
 0x41c   :  { %v2338_v47 = vrot.slane %v2337_v20, 1  ;;  %v2344_v15 = vadd.f32 %v2343_v17, %v2342_v49  ;;  %v2378_v55 = vrot.slane %v2377_v50, 2 }
 0x41d   :  { %2390 = vadd.xlane.f32.xlu0 %v2389_v33  ;;  %v2385_v54 = vrot.slane %v2384_v7, 2 }
 0x41e   :  { %v2345_v1 = vrot.slane %v2344_v15, 1  ;;  %v2379_v26 = vadd.f32 %v2378_v55, %v2377_v50  ;;  %v2339_v30 = vadd.f32 %v2338_v47, %v2337_v20  ;;  %v15915_v47 = vld [vmem:[#allocation42_spill] sm:$0xff] }
 0x41f   :  { %v2386_v21 = vadd.f32 %v2385_v54, %v2384_v7 }
 0x420   :  { %v2346_v62 = vadd.f32 %v2345_v1, %v2344_v15  ;;  %v2380_v11 = vrot.slane %v2379_v26, 1 }
 0x421   :  { %v2387_v14 = vrot.slane %v2386_v21, 1 }
 0x422   :  { %v2350_v52 = vadd.f32 %v2346_v62, %v2339_v30  ;;  %v2381_v32 = vadd.f32 %v2380_v11, %v2379_v26 }
 0x423   :  { %v2388_v46 = vadd.f32 %v2387_v14, %v2386_v21 }
 0x424   :  { %2351 = vadd.xlane.f32.xlu1 %v2350_v52 }
 0x425   :  { %v2392_v25 = vadd.f32 %v2388_v46, %v2381_v32 }
 0x428   :  { %2393 = vadd.xlane.f32.xlu1 %v2392_v25 }
 0x4a0   :  { %v2349_v5 = vpop.xlane.xlu0 %2348 }
 0x4a1   :  { %v2395_v31 = vmul.f32 0.00024414063, %v2349_v5 }
 0x4a3   :  { %v2399_v23 = vmul.f32 %v2395_v31, %v2395_v31 }
 0x4a6   :  { %v2391_v2 = vpop.xlane.xlu0 %2390 }
 0x4a7   :  { %v2397_v59 = vmul.f32 0.00024414063, %v2391_v2 }
 0x4a9   :  { %v2401_v40 = vsub.f32 %v2397_v59, %v2399_v23 }
 0x4ab   :  { %v2403_v29 = vmax.f32 %v2401_v40, 0.0 }
 0x4ad   :  { %v2405_v27 = vadd.f32 1e-08, %v2403_v29  ;;  %v2352_v36 = vpop.xlane.xlu1 %2351 }
 0x4ae   :  { %v2396_v10 = vmul.f32 0.00024414063, %v2352_v36 }
 0x4af   :  { %12099 = vrsqrt.f32 %v2405_v27 }
 0x4b0   :  { %v2400_v44 = vmul.f32 %v2396_v10, %v2396_v10 }
 0x4b1   :  { %v2394_v0 = vpop.xlane.xlu1 %2393 }
 0x4b2   :  { %v2398_v42 = vmul.f32 0.00024414063, %v2394_v0 }
 0x4b4   :  { %v2402_v45 = vsub.f32 %v2398_v42, %v2400_v44 }
 0x4b6   :  { %v2404_v22 = vmax.f32 %v2402_v45, 0.0 }
 0x4b8   :  { %v2406_v61 = vadd.f32 1e-08, %v2404_v22 }
 0x4ba   :  { %12101 = vrsqrt.f32 %v2406_v61 }
 0x4bc   :  { %v12100_v38 = vpop.eup %12099 }
 0x4bd   :  { %v2908_v13 = vmul.f32 %v12100_v38, %v2395_v31 }
 0x4bf   :  { %v2910_v3 = vmul.f32 %v2908_v13, %v2905_v60 }
 0x4c1   :  { %v2912_v6 = vsub.f32 %v2907_v48, %v2910_v3 }
 0x4c3   :  { %v2935_v49 = vrot.slane %v2912_v6, %v15900_v56  ;;  %v2943_v20 = vrot.slane %v2912_v6, %v15914_v16  ;;  %v2939_v33 = vrot.slane %v2912_v6, %v15901_v35  ;;  %v2947_v15 = vrot.slane %v2912_v6, %v15915_v47 }
 0x4c7   :  { %v13220_v63 = vpop.eup %12101 }
 0x4c8   :  { %v2909_v37 = vmul.f32 %v13220_v63, %v2396_v10 }
 0x4c9   :  { %v2832_v43 = vpop.f32.mrf.mxu1  ;;  %v2885_v57 = vpop.f32.mrf.mxu0 }
 0x4ca   :  { %v2914_v51 = vmul.f32 %v12100_v38, %v2832_v43  ;;  %v2916_v9 = vmul.f32 %v12100_v38, %v2885_v57  ;;  %v2911_v17 = vmul.f32 %v2909_v37, %v2905_v60 }
 0x4cb   :  { %v2834_v50 = vpop.f32.mrf.mxu1  ;;  %v2887_v7 = vpop.f32.mrf.mxu0 }
 0x4cc   :  { %v2972_v55 = vadd.f32 %v2935_v49, %v2914_v51  ;;  %v2974_v54 = vadd.f32 %v2943_v20, %v2916_v9  ;;  %v2915_v1 = vmul.f32 %v12100_v38, %v2834_v50  ;;  %v2917_v26 = vmul.f32 %v12100_v38, %v2887_v7 }
 0x4cd   :  { %v2836_v21 = vpop.f32.mrf.mxu1  ;;  %v2889_v30 = vpop.f32.mrf.mxu0  ;;  %v2913_v14 = vsub.f32 %v2907_v48, %v2911_v17 }
 0x4ce   :  { %v2973_v62 = vadd.f32 %v2939_v33, %v2915_v1  ;;  %v2975_v11 = vadd.f32 %v2947_v15, %v2917_v26  ;;  %v2918_v52 = vmul.f32 %v12100_v38, %v2836_v21  ;;  %v2920_v46 = vmul.f32 %v12100_v38, %v2889_v30 }
 0x4cf   :  { %v2838_v32 = vpop.f32.mrf.mxu1  ;;  %v2891_v25 = vpop.f32.mrf.mxu0  ;;  %v13227_v5 = vmax.f32 %v2972_v55, 0.0  ;;  %v13229_v31 = vmax.f32 %v2974_v54, 0.0  ;;  %v2951_v36 = vrot.slane %v2913_v14, %v15900_v56  ;;  %v2959_v10 = vrot.slane %v2913_v14, %v15914_v16 }
 0x4d0   :  { %v13231_v2 = vmax.f32 %v2973_v62, 0.0  ;;  %v13233_v23 = vmax.f32 %v2975_v11, 0.0  ;;  %v2976_v59 = vadd.f32 %v2935_v49, %v2918_v52  ;;  %v2978_v40 = vadd.f32 %v2943_v20, %v2920_v46 }
 0x4d1   :  { %v2919_v29 = vmul.f32 %v12100_v38, %v2838_v32  ;;  %v2921_v27 = vmul.f32 %v12100_v38, %v2891_v25  ;;  %v3070_v22 = vmul.f32 %v13227_v5, %v13227_v5  ;;  %v3072_v61 = vmul.f32 %v13229_v31, %v13229_v31 }
 0x4d2   :  { %v13237_v0 = vmax.f32 %v2976_v59, 0.0  ;;  %v13239_v44 = vmax.f32 %v2978_v40, 0.0  ;;  %v3071_v13 = vmul.f32 %v13231_v2, %v13231_v2  ;;  %v13249_v38 = vmul.f32 %v13233_v23, %v13233_v23 }
 0x4d3   :  { %v2977_v42 = vadd.f32 %v2939_v33, %v2919_v29  ;;  %v2979_v45 = vadd.f32 %v2947_v15, %v2921_v27  ;;  %v2955_v51 = vrot.slane %v2913_v14, %v15901_v35  ;;  %v2963_v9 = vrot.slane %v2913_v14, %v15915_v47 }
 0x4d4   :  { %v3004_v60 = vadd.f32 %v13237_v0, %v13227_v5  ;;  %v3074_v3 = vmul.f32 %v13237_v0, %v13237_v0  ;;  %v13257_v48 = vadd.f32 %v13239_v44, %v13229_v31  ;;  %v3076_v6 = vmul.f32 %v13239_v44, %v13239_v44 }
 0x4d5   :  { %v13261_v37 = vmax.f32 %v2977_v42, 0.0  ;;  %v13263_v43 = vmax.f32 %v2979_v45, 0.0 }
 0x4d6   :  { %v2842_v49 = vpop.f32.mrf.mxu1  ;;  %v2895_v57 = vpop.f32.mrf.mxu0  ;;  %v3005_v20 = vrot.slane %v3004_v60, 4  ;;  %v13267_v17 = vadd.f32 %v3074_v3, %v3070_v22  ;;  %v3019_v50 = vrot.slane %v13257_v48, 4  ;;  %v13270_v33 = vadd.f32 %v3076_v6, %v3072_v61 }
 0x4d7   :  { %v3011_v7 = vadd.f32 %v13261_v37, %v13231_v2  ;;  %v3075_v15 = vmul.f32 %v13261_v37, %v13261_v37  ;;  %v13278_v55 = vadd.f32 %v13263_v43, %v13233_v23  ;;  %v13282_v54 = vmul.f32 %v13263_v43, %v13263_v43 }
 0x4d8   :  { %v2844_v1 = vpop.f32.mrf.mxu1  ;;  %v2897_v26 = vpop.f32.mrf.mxu0  ;;  %v3006_v21 = vadd.f32 %v3005_v20, %v3004_v60  ;;  %v3087_v30 = vrot.slane %v13267_v17, 4  ;;  %v2922_v62 = vmul.f32 %v13220_v63, %v2842_v49  ;;  %v2924_v11 = vmul.f32 %v13220_v63, %v2895_v57 }
 0x4d9   :  { %v3012_v14 = vrot.slane %v3011_v7, 4  ;;  %v3093_v52 = vadd.f32 %v3075_v15, %v3071_v13  ;;  %v2923_v46 = vmul.f32 %v13220_v63, %v2844_v1  ;;  %v2925_v32 = vmul.f32 %v13220_v63, %v2897_v26 }
 0x4da   :  { %v2846_v25 = vpop.f32.mrf.mxu1  ;;  %v2899_v59 = vpop.f32.mrf.mxu0  ;;  %v2980_v40 = vadd.f32 %v2951_v36, %v2922_v62  ;;  %v2982_v29 = vadd.f32 %v2959_v10, %v2924_v11  ;;  %v3020_v53 = vadd.f32 %v3019_v50, %v13257_v48  ;;  %v3026_v58 = vrot.slane %v13278_v55, 4 }
 0x4db   :  { %v2926_v27 = vmul.f32 %v13220_v63, %v2846_v25  ;;  %v2928_v42 = vmul.f32 %v13220_v63, %v2899_v59  ;;  %v3013_v45 = vadd.f32 %v3012_v14, %v3011_v7  ;;  %v3094_v22 = vrot.slane %v3093_v52, 4 }
 0x4dc   :  { %v2981_v61 = vadd.f32 %v2955_v51, %v2923_v46  ;;  %v2983_v60 = vadd.f32 %v2963_v9, %v2925_v32  ;;  %v2848_v3 = vpop.f32.mrf.mxu1  ;;  %v2901_v6 = vpop.f32.mrf.mxu0  ;;  %v13291_v49 = vmax.f32 %v2980_v40, 0.0  ;;  %v13293_v13 = vmax.f32 %v2982_v29, 0.0 }
 0x4dd   :  { %v2984_v57 = vadd.f32 %v2951_v36, %v2926_v27  ;;  %v2986_v20 = vadd.f32 %v2959_v10, %v2928_v42  ;;  %v2927_v26 = vmul.f32 %v13220_v63, %v2848_v3  ;;  %v2929_v62 = vmul.f32 %v13220_v63, %v2901_v6 }
 0x4de   :  { %v13295_v15 = vmax.f32 %v2981_v61, 0.0  ;;  %v13297_v1 = vmax.f32 %v2983_v60, 0.0  ;;  %v3078_v7 = vmul.f32 %v13291_v49, %v13291_v49  ;;  %v3080_v11 = vmul.f32 %v13293_v13, %v13293_v13 }
 0x4df   :  { %v13305_v14 = vmax.f32 %v2984_v57, 0.0  ;;  %v13307_v46 = vmax.f32 %v2986_v20, 0.0  ;;  %v2985_v32 = vadd.f32 %v2955_v51, %v2927_v26  ;;  %v2987_v25 = vadd.f32 %v2963_v9, %v2929_v62 }
 0x4e0   :  { %v3079_v36 = vmul.f32 %v13295_v15, %v13295_v15  ;;  %v13313_v10 = vmul.f32 %v13297_v1, %v13297_v1  ;;  %v3007_v61 = vrot.slane %v3006_v21, 2  ;;  %v3014_v51 = vrot.slane %v3013_v45, 2 }
 0x4e1   :  { %v3032_v63 = vadd.f32 %v13305_v14, %v13291_v49  ;;  %v3082_v59 = vmul.f32 %v13305_v14, %v13305_v14  ;;  %v13321_v40 = vadd.f32 %v13307_v46, %v13293_v13  ;;  %v3084_v29 = vmul.f32 %v13307_v46, %v13307_v46 }
 0x4e2   :  { %v13325_v27 = vmax.f32 %v2985_v32, 0.0  ;;  %v13327_v42 = vmax.f32 %v2987_v25, 0.0  ;;  %v3008_v25 = vadd.f32 %v3007_v61, %v3006_v21  ;;  %v3088_v34 = vadd.f32 %v3087_v30, %v13267_v17 }
 0x4e3   :  { %v3033_v9 = vrot.slane %v3032_v63, 4  ;;  %v13329_v60 = vadd.f32 %v3082_v59, %v3078_v7  ;;  %v3047_v3 = vrot.slane %v13321_v40, 4  ;;  %v13332_v6 = vadd.f32 %v3084_v29, %v3080_v11 }
 0x4e4   :  { %15916 = vst [vmem:[#allocation46_spill] sm:$0xff] %v13327_v42  ;;  %v3039_v57 = vadd.f32 %v13325_v27, %v13295_v15  ;;  %v3083_v20 = vmul.f32 %v13325_v27, %v13325_v27  ;;  %v13340_v26 = vadd.f32 %v13327_v42, %v13297_v1  ;;  %v13344_v62 = vmul.f32 %v13327_v42, %v13327_v42 }
 0x4e5   :  { %v3034_v7 = vadd.f32 %v3033_v9, %v3032_v63  ;;  %v3115_v32 = vrot.slane %v13329_v60, 4  ;;  %v3015_v11 = vadd.f32 %v3014_v51, %v3013_v45  ;;  %v3009_v39 = vrot.slane %v3008_v25, 1 }
 0x4e6   :  { %v3040_v59 = vrot.slane %v3039_v57, 4  ;;  %v3121_v29 = vadd.f32 %v3083_v20, %v3079_v36  ;;  %v3095_v18 = vadd.f32 %v3094_v22, %v3093_v52  ;;  %v3021_v63 = vrot.slane %v3020_v53, 2 }
 0x4e7   :  { %v3016_v24 = vrot.slane %v3015_v11, 1  ;;  %v3027_v9 = vadd.f32 %v3026_v58, %v13278_v55  ;;  %v3010_v21 = vadd.f32 %v3009_v39, %v3008_v25  ;;  %v3089_v61 = vrot.slane %v3088_v34, 2 }
 0x4e8   :  { %v3041_v41 = vadd.f32 %v3040_v59, %v3039_v57  ;;  %v3122_v28 = vrot.slane %v3121_v29, 4  ;;  %v3096_v36 = vrot.slane %v3095_v18, 2  ;;  %v3022_v51 = vadd.f32 %v3021_v63, %v3020_v53 }
 0x4e9   :  { %v3017_v45 = vadd.f32 %v3016_v24, %v3015_v11  ;;  %v3028_v20 = vrot.slane %v3027_v9, 2  ;;  %v3101_v48 = vrot.slane %v13270_v33, 4  ;;  %v3107_v50 = vadd.f32 %v13282_v54, %v13249_v38 }
 0x4ea   :  { %v3090_v19 = vadd.f32 %v3089_v61, %v3088_v34  ;;  %v3097_v17 = vadd.f32 %v3096_v36, %v3095_v18  ;;  %v3035_v30 = vrot.slane %v3034_v7, 2  ;;  %v3023_v52 = vrot.slane %v3022_v51, 1 }
 0x4eb   :  { %v3060_v12 = vadd.f32 %v3017_v45, %v3010_v21  ;;  %v3029_v22 = vadd.f32 %v3028_v20, %v3027_v9  ;;  %v3102_v57 = vadd.f32 %v3101_v48, %v13270_v33  ;;  %v3108_v58 = vrot.slane %v3107_v50, 4 }
 0x4ec   :  { %v3091_v39 = vrot.slane %v3090_v19, 1  ;;  %v3098_v24 = vrot.slane %v3097_v17, 1  ;;  %v3036_v55 = vadd.f32 %v3035_v30, %v3034_v7  ;;  %v3042_v25 = vrot.slane %v3041_v41, 2 }
 0x4ed   :  { %v3024_v53 = vadd.f32 %v3023_v52, %v3022_v51  ;;  %v3030_v11 = vrot.slane %v3029_v22, 1  ;;  %v3103_v59 = vrot.slane %v3102_v57, 2  ;;  %v3109_v63 = vadd.f32 %v3108_v58, %v3107_v50 }
 0x4ee   :  { %v3092_v8 = vadd.f32 %v3091_v39, %v3090_v19  ;;  %v3099_v42 = vadd.f32 %v3098_v24, %v3097_v17  ;;  %v3037_v38 = vrot.slane %v3036_v55, 1  ;;  %v3043_v54 = vadd.f32 %v3042_v25, %v3041_v41 }
 0x4ef   :  { %v3031_v34 = vadd.f32 %v3030_v11, %v3029_v22  ;;  %v3061_v18 = vadd.f32 %v3060_v12, %v3024_v53  ;;  %v3104_v21 = vadd.f32 %v3103_v59, %v3102_v57  ;;  %v3110_v45 = vrot.slane %v3109_v63, 2 }
 0x4f0   :  { %v3142_v9 = vadd.f32 %v3099_v42, %v3092_v8  ;;  %v3038_v61 = vadd.f32 %v3037_v38, %v3036_v55  ;;  %v3044_v33 = vrot.slane %v3043_v54, 1  ;;  %v3048_v36 = vadd.f32 %v3047_v3, %v13321_v40 }
 0x4f1   :  { %v3062_v20 = vadd.f32 %v3061_v18, %v3031_v34  ;;  %v3105_v7 = vrot.slane %v3104_v21, 1  ;;  %v3111_v48 = vadd.f32 %v3110_v45, %v3109_v63  ;;  %v3054_v51 = vrot.slane %v13340_v26, 4 }
 0x4f2   :  { %v3045_v30 = vadd.f32 %v3044_v33, %v3043_v54  ;;  %v3049_v50 = vrot.slane %v3048_v36, 2  ;;  %v3116_v19 = vadd.f32 %v3115_v32, %v13329_v60  ;;  %v3123_v17 = vadd.f32 %v3122_v28, %v3121_v29 }
 0x4f3   :  { %3063 = vadd.xlane.f32.xlu0 %v3062_v20  ;;  %v3106_v41 = vadd.f32 %v3105_v7, %v3104_v21  ;;  %v3112_v12 = vrot.slane %v3111_v48, 1  ;;  %v3055_v52 = vadd.f32 %v3054_v51, %v13340_v26  ;;  %v3129_v8 = vrot.slane %v13332_v6, 4  ;;  %v11395_v20 = vld [vmem:[#allocation8 + $0x270] ss:$8 sps:$4 sm:$0xff]   ;;  %v11397_v7 = vld [vmem:[#allocation8 + $0x274] ss:$8 sps:$4 sm:$0xff]  }
 0x4f4   :  { %v3050_v42 = vadd.f32 %v3049_v50, %v3048_v36  ;;  %v3065_v22 = vadd.f32 %v3045_v30, %v3038_v61  ;;  %v3117_v40 = vrot.slane %v3116_v19, 2  ;;  %v3124_v3 = vrot.slane %v3123_v17, 2  ;;  %v11400_v50 = vld [vmem:[#allocation8 + $0x374] ss:$8 sps:$4 sm:$0xff]   ;;  %4167 = vmatprep.subr.bf16.mxu1 %v11397_v7 }
 0x4f5   :  { %v3113_v57 = vadd.f32 %v3112_v12, %v3111_v48  ;;  %v3143_v58 = vadd.f32 %v3142_v9, %v3106_v41  ;;  %v3056_v39 = vrot.slane %v3055_v52, 2  ;;  %v3130_v24 = vadd.f32 %v3129_v8, %v13332_v6  ;;  %v11398_v48 = vld [vmem:[#allocation8 + $0x370] ss:$8 sps:$4 sm:$0xff]   ;;  %4220 = vmatprep.subr.bf16.mxu0 %v11400_v50  ;;  %4168 = vmatpush1.bf16.msra.mxu1 %v11395_v20  ;;  %v11403_v41 = vld [vmem:[#allocation8 + $0x264] ss:$8 sps:$4 sm:$0xff]  }
 0x4f6   :  { %v3051_v55 = vrot.slane %v3050_v42, 1  ;;  %v3118_v25 = vadd.f32 %v3117_v40, %v3116_v19  ;;  %v3125_v60 = vadd.f32 %v3124_v3, %v3123_v17  ;;  %v3135_v28 = vadd.f32 %v13344_v62, %v13313_v10  ;;  %4221 = vmatpush1.bf16.msra.mxu0 %v11398_v48  ;;  %v11406_v12 = vld [vmem:[#allocation8 + $0x364] ss:$8 sps:$4 sm:$0xff]   ;;  %v11404_v8 = vld [vmem:[#allocation8 + $0x360] ss:$8 sps:$4 sm:$0xff]   ;;  %4169 = vmatprep.subr.bf16.mxu1 %v11403_v41 }
 0x4f7   :  { %v3144_v32 = vadd.f32 %v3143_v58, %v3113_v57  ;;  %v3057_v29 = vadd.f32 %v3056_v39, %v3055_v52  ;;  %v3131_v26 = vrot.slane %v3130_v24, 2  ;;  %v11401_v52 = vld [vmem:[#allocation8 + $0x260] ss:$8 sps:$4 sm:$0xff]   ;;  %4222 = vmatprep.subr.bf16.mxu0 %v11406_v12  ;;  %v11407_v40 = vld [vmem:[#allocation8 + $0x250] ss:$8 sps:$4 sm:$0xff]  }
 0x4f8   :  { %v3052_v53 = vadd.f32 %v3051_v55, %v3050_v42  ;;  %v3119_v11 = vrot.slane %v3118_v25, 1  ;;  %v3126_v59 = vrot.slane %v3125_v60, 1  ;;  %v3136_v63 = vrot.slane %v3135_v28, 4  ;;  %v11409_v42 = vld [vmem:[#allocation8 + $0x254] ss:$8 sps:$4 sm:$0xff]  }
 0x4f9   :  { %3145 = vadd.xlane.f32.xlu0 %v3144_v32  ;;  %v3058_v38 = vrot.slane %v3057_v29, 1  ;;  %v3132_v54 = vadd.f32 %v3131_v26, %v3130_v24  ;;  %4170 = vmatpush1.bf16.msra.mxu1 %v11401_v52  ;;  %v11410_v3 = vld [vmem:[#allocation8 + $0x350] ss:$8 sps:$4 sm:$0xff]   ;;  %v11415_v57 = vld [vmem:[#allocation8 + $0x244] ss:$8 sps:$4 sm:$0xff]  }
 0x4fa   :  { %v3066_v34 = vadd.f32 %v3065_v22, %v3052_v53  ;;  %v3120_v18 = vadd.f32 %v3119_v11, %v3118_v25  ;;  %v3127_v21 = vadd.f32 %v3126_v59, %v3125_v60  ;;  %v3137_v6 = vadd.f32 %v3136_v63, %v3135_v28  ;;  %4223 = vmatpush1.bf16.msra.mxu0 %v11404_v8  ;;  %v11412_v22 = vld [vmem:[#allocation8 + $0x354] ss:$8 sps:$4 sm:$0xff]   ;;  %v11418_v58 = vld [vmem:[#allocation8 + $0x344] ss:$8 sps:$4 sm:$0xff]   ;;  %v11413_v39 = vld [vmem:[#allocation8 + $0x240] ss:$8 sps:$4 sm:$0xff]  }
 0x4fb   :  { %v3059_v45 = vadd.f32 %v3058_v38, %v3057_v29  ;;  %v3133_v9 = vrot.slane %v3132_v54, 1  ;;  %4171 = vmatprep.subr.bf16.mxu1 %v11409_v42  ;;  %4224 = vmatprep.subr.bf16.mxu0 %v11412_v22  ;;  %v11416_v24 = vld [vmem:[#allocation8 + $0x340] ss:$8 sps:$4 sm:$0xff]   ;;  %v11421_v55 = vld [vmem:[#allocation8 + $0x234] ss:$8 sps:$4 sm:$0xff]  }
 0x4fc   :  { %v3138_v61 = vrot.slane %v3137_v6, 2  ;;  %v3147_v33 = vadd.f32 %v3127_v21, %v3120_v18  ;;  %v11424_v25 = vld [vmem:[#allocation8 + $0x334] ss:$8 sps:$4 sm:$0xff]   ;;  %v11419_v60 = vld [vmem:[#allocation8 + $0x230] ss:$8 sps:$4 sm:$0xff]  }
 0x4fd   :  { %v3067_v36 = vadd.f32 %v3066_v34, %v3059_v45  ;;  %v3134_v10 = vadd.f32 %v3133_v9, %v3132_v54  ;;  %4172 = vmatpush1.bf16.msra.mxu1 %v11407_v40  ;;  %v11422_v28 = vld [vmem:[#allocation8 + $0x330] ss:$8 sps:$4 sm:$0xff]   ;;  %v11427_v32 = vld [vmem:[#allocation8 + $0x224] ss:$8 sps:$4 sm:$0xff]   ;;  %v11425_v26 = vld [vmem:[#allocation8 + $0x220] ss:$8 sps:$4 sm:$0xff]  }
 0x4fe   :  { %v3139_v62 = vadd.f32 %v3138_v61, %v3137_v6  ;;  %4225 = vmatpush1.bf16.msra.mxu0 %v11410_v3  ;;  %4173 = vmatprep.subr.bf16.mxu1 %v11415_v57  ;;  %v11430_v29 = vld [vmem:[#allocation8 + $0x324] ss:$8 sps:$4 sm:$0xff]   ;;  %v11428_v53 = vld [vmem:[#allocation8 + $0x320] ss:$8 sps:$4 sm:$0xff]   ;;  %v11433_v11 = vld [vmem:[#allocation8 + $0x214] ss:$8 sps:$4 sm:$0xff]  }
 0x4ff   :  { %3068 = vadd.xlane.f32.xlu1 %v3067_v36  ;;  %v3148_v30 = vadd.f32 %v3147_v33, %v3134_v10  ;;  %4226 = vmatprep.subr.bf16.mxu0 %v11418_v58  ;;  %v11436_v59 = vld [vmem:[#allocation8 + $0x314] ss:$8 sps:$4 sm:$0xff]   ;;  %v11431_v63 = vld [vmem:[#allocation8 + $0x210] ss:$8 sps:$4 sm:$0xff]   ;;  %v11439_v54 = vld [vmem:[#allocation8 + $0x204] ss:$8 sps:$4 sm:$0xff]  }
 0x500   :  { %v3140_v51 = vrot.slane %v3139_v62, 1  ;;  %v11434_v38 = vld [vmem:[#allocation8 + $0x310] ss:$8 sps:$4 sm:$0xff]   ;;  %v11442_v34 = vld [vmem:[#allocation8 + $0x304] ss:$8 sps:$4 sm:$0xff]  }
 0x501   :  { %4174 = vmatpush1.bf16.msra.mxu1 %v11413_v39  ;;  %v11437_v18 = vld [vmem:[#allocation8 + $0x200] ss:$8 sps:$4 sm:$0xff]   ;;  %v11445_v6 = vld [vmem:[#allocation8 + $0x2f4] ss:$8 sps:$4 sm:$0xff]   ;;  %v11443_v9 = vld [vmem:[#allocation8 + $0x2f0] ss:$8 sps:$4 sm:$0xff]  }
 0x502   :  { %v3141_v19 = vadd.f32 %v3140_v51, %v3139_v62  ;;  %4227 = vmatpush1.bf16.msra.mxu0 %v11416_v24  ;;  %4175 = vmatprep.subr.bf16.mxu1 %v11421_v55  ;;  %v11440_v21 = vld [vmem:[#allocation8 + $0x300] ss:$8 sps:$4 sm:$0xff]   ;;  %v11448_v45 = vld [vmem:[#allocation8 + $0x3f4] ss:$8 sps:$4 sm:$0xff]   ;;  %v11446_v61 = vld [vmem:[#allocation8 + $0x3f0] ss:$8 sps:$4 sm:$0xff]  }
 0x503   :  { %4228 = vmatprep.subr.bf16.mxu0 %v11424_v25  ;;  %v11451_v33 = vld [vmem:[#allocation8 + $0x2e4] ss:$8 sps:$4 sm:$0xff]   ;;  %v11449_v10 = vld [vmem:[#allocation8 + $0x2e0] ss:$8 sps:$4 sm:$0xff]   ;;  %v11457_v20 = vld [vmem:[#allocation8 + $0x2d4] ss:$8 sps:$4 sm:$0xff]  }
 0x504   :  { %v3149_v17 = vadd.f32 %v3148_v30, %v3141_v19  ;;  %v11454_v36 = vld [vmem:[#allocation8 + $0x3e4] ss:$8 sps:$4 sm:$0xff]   ;;  %v11452_v62 = vld [vmem:[#allocation8 + $0x3e0] ss:$8 sps:$4 sm:$0xff]   ;;  %v11460_v7 = vld [vmem:[#allocation8 + $0x3d4] ss:$8 sps:$4 sm:$0xff]  }
 0x505   :  { %4176 = vmatpush1.bf16.msra.mxu1 %v11419_v60  ;;  %v11455_v48 = vld [vmem:[#allocation8 + $0x2d0] ss:$8 sps:$4 sm:$0xff]   ;;  %v11463_v30 = vld [vmem:[#allocation8 + $0x2c4] ss:$8 sps:$4 sm:$0xff]   ;;  %v11461_v19 = vld [vmem:[#allocation8 + $0x2c0] ss:$8 sps:$4 sm:$0xff]  }
 0x506   :  { %3150 = vadd.xlane.f32.xlu1 %v3149_v17  ;;  %4229 = vmatpush1.bf16.msra.mxu0 %v11422_v28  ;;  %v11458_v51 = vld [vmem:[#allocation8 + $0x3d0] ss:$8 sps:$4 sm:$0xff]   ;;  %v11466_v50 = vld [vmem:[#allocation8 + $0x3c4] ss:$8 sps:$4 sm:$0xff]   ;;  %v11464_v17 = vld [vmem:[#allocation8 + $0x3c0] ss:$8 sps:$4 sm:$0xff]  }
 0x507   :  { %4177 = vmatprep.subr.bf16.mxu1 %v11427_v32  ;;  %4230 = vmatprep.subr.bf16.mxu0 %v11430_v29  ;;  %v11469_v41 = vld [vmem:[#allocation8 + $0x2b4] ss:$8 sps:$4 sm:$0xff]   ;;  %v11467_v52 = vld [vmem:[#allocation8 + $0x2b0] ss:$8 sps:$4 sm:$0xff]   ;;  %v11475_v42 = vld [vmem:[#allocation8 + $0x2a4] ss:$8 sps:$4 sm:$0xff]  }
 0x508   :  { %v11472_v12 = vld [vmem:[#allocation8 + $0x3b4] ss:$8 sps:$4 sm:$0xff]   ;;  %v11470_v8 = vld [vmem:[#allocation8 + $0x3b0] ss:$8 sps:$4 sm:$0xff]   ;;  %v11478_v22 = vld [vmem:[#allocation8 + $0x3a4] ss:$8 sps:$4 sm:$0xff]  }
 0x509   :  { %4178 = vmatpush1.bf16.msra.mxu1 %v11425_v26  ;;  %v11473_v40 = vld [vmem:[#allocation8 + $0x2a0] ss:$8 sps:$4 sm:$0xff]   ;;  %v11481_v57 = vld [vmem:[#allocation8 + $0x294] ss:$8 sps:$4 sm:$0xff]   ;;  %v11479_v39 = vld [vmem:[#allocation8 + $0x290] ss:$8 sps:$4 sm:$0xff]  }
 0x50a   :  { %4231 = vmatpush1.bf16.msra.mxu0 %v11428_v53  ;;  %4179 = vmatprep.subr.bf16.mxu1 %v11433_v11  ;;  %v11476_v3 = vld [vmem:[#allocation8 + $0x3a0] ss:$8 sps:$4 sm:$0xff]   ;;  %v11484_v58 = vld [vmem:[#allocation8 + $0x394] ss:$8 sps:$4 sm:$0xff]   ;;  %v11482_v24 = vld [vmem:[#allocation8 + $0x390] ss:$8 sps:$4 sm:$0xff]  }
 0x50b   :  { %4232 = vmatprep.subr.bf16.mxu0 %v11436_v59  ;;  %v11487_v55 = vld [vmem:[#allocation8 + $0x284] ss:$8 sps:$4 sm:$0xff]   ;;  %v11485_v60 = vld [vmem:[#allocation8 + $0x280] ss:$8 sps:$4 sm:$0xff]  }
 0x50c   :  { %v11490_v25 = vld [vmem:[#allocation8 + $0x384] ss:$8 sps:$4 sm:$0xff]   ;;  %v11488_v28 = vld [vmem:[#allocation8 + $0x380] ss:$8 sps:$4 sm:$0xff]  }
 0x50d   :  { %4180 = vmatpush1.bf16.msra.mxu1 %v11431_v63  ;;  %v3397_v26 = vld [vmem:[#allocation10 + $0x8] sm:$0xff] }
 0x50e   :  { %4233 = vmatpush1.bf16.msra.mxu0 %v11434_v38  ;;  %4181 = vmatprep.subr.bf16.mxu1 %v11439_v54  ;;  %v3399_v63 = vcombine.high %v3397_v26, %v3397_v26  ;;  %v11498_v54 = vld [vmem:[#allocation7 + $0x4e4] ss:$16 sps:$4 sm:$0xff]  }
 0x50f   :  { %4234 = vmatprep.subr.bf16.mxu0 %v11442_v34 }
 0x511   :  { %4182 = vmatpush1.bf16.msra.mxu1 %v11437_v18  ;;  %v15917_v18 = vld [vmem:[#allocation43_spill] sm:$0xff] }
 0x512   :  { %4235 = vmatpush1.bf16.msra.mxu0 %v11440_v21  ;;  %4183 = vmatprep.subr.bf16.mxu1 %v11445_v6  ;;  %v3406_v21 = vrot.slane %v3397_v26, %v15917_v18  ;;  %v3413_v6 = vrot.slane %v3399_v63, %v15917_v18 }
 0x513   :  { %4236 = vmatprep.subr.bf16.mxu0 %v11448_v45  ;;  %v11501_v45 = vld [vmem:[#allocation7 + $0x4ec] ss:$16 sps:$4 sm:$0xff]  }
 0x515   :  { %4184 = vmatpush2.bf16.msra.mxu1 %v11443_v9 }
 0x516   :  { %4237 = vmatpush2.bf16.msra.mxu0 %v11446_v61  ;;  %4185 = vmatprep.subr.bf16.mxu1 %v11451_v33  ;;  %v3414_v33 = vcombine.high %v3406_v21, %v3406_v21 }
 0x517   :  { %4238 = vmatprep.subr.bf16.mxu0 %v11454_v36  ;;  %v3415_v36 = vcombine.high %v3413_v6, %v3413_v6 }
 0x519   :  { %4186 = vmatpush2.bf16.msra.mxu1 %v11449_v10 }
 0x51a   :  { %4239 = vmatpush2.bf16.msra.mxu0 %v11452_v62  ;;  %4187 = vmatprep.subr.bf16.mxu1 %v11457_v20  ;;  %v3528_v62 = vld [vmem:[#allocation11] sm:$0x11]  ;;  %v3529_v20 = vld [vmem:[#allocation11 + $0x8] sm:$0x11] }
 0x51b   :  { %4240 = vmatprep.subr.bf16.mxu0 %v11460_v7 }
 0x51d   :  { %4188 = vmatpush2.bf16.msra.mxu1 %v11455_v48  ;;  %v3459_v48 = vshrl.u32 %v3414_v33, 16 }
 0x51e   :  { %4241 = vmatpush2.bf16.msra.mxu0 %v11458_v51  ;;  %4189 = vmatprep.subr.bf16.mxu1 %v11463_v30  ;;  %v3473_v51 = vshrl.u32 %v3415_v36, 16  ;;  %v3452_v30 = vshrl.u32 %v3406_v21, 16 }
 0x51f   :  { %4242 = vmatprep.subr.bf16.mxu0 %v11466_v50 }
 0x521   :  { %4190 = vmatpush2.bf16.msra.mxu1 %v11461_v19 }
 0x522   :  { %4243 = vmatpush2.bf16.msra.mxu0 %v11464_v17  ;;  %4191 = vmatprep.subr.bf16.mxu1 %v11469_v41  ;;  %v10612_v17 = vcombine.high %v3528_v62, %v3528_v62  ;;  %v3466_v41 = vshrl.u32 %v3413_v6, 16 }
 0x523   :  { %4244 = vmatprep.subr.bf16.mxu0 %v11472_v12  ;;  %v10611_v12 = vcombine.low %v3528_v62, %v3528_v62 }
 0x525   :  { %4192 = vmatpush2.bf16.msra.mxu1 %v11467_v52  ;;  %v10613_v52 = vcombine.low %v3529_v20, %v3529_v20 }
 0x526   :  { %4245 = vmatpush2.bf16.msra.mxu0 %v11470_v8  ;;  %4193 = vmatprep.subr.bf16.mxu1 %v11475_v42  ;;  %v10614_v8 = vcombine.high %v3529_v20, %v3529_v20  ;;  %v13396_v20 = vld [vmem:[#allocation17 + $0x1] ss:$8 sm:$0xf] }
 0x527   :  { %4246 = vmatprep.subr.bf16.mxu0 %v11478_v22  ;;  %v3424_v22 = vpack.i.b16 %v3414_v33, %v3414_v33 }
 0x529   :  { %4194 = vmatpush2.bf16.msra.mxu1 %v11473_v40  ;;  %v3460_v40 = vpack.i.b16 %v3459_v48, %v3459_v48  ;;  %v13378_v26 = vrot.slane %v3424_v22, %v15900_v56  ;;  %v13384_v63 = vrot.slane %v3424_v22, %v15901_v35 }
 0x52a   :  { %4247 = vmatpush2.bf16.msra.mxu0 %v11476_v3  ;;  %4195 = vmatprep.subr.bf16.mxu1 %v11481_v57  ;;  %v3474_v3 = vpack.i.b16 %v3473_v51, %v3473_v51  ;;  %v3453_v57 = vpack.i.b16 %v3452_v30, %v3452_v30 }
 0x52b   :  { %4248 = vmatprep.subr.bf16.mxu0 %v11484_v58 }
 0x52d   :  { %4196 = vmatpush2.bf16.msra.mxu1 %v11479_v39  ;;  %v3565_v39 = vshrl.u32 %v10612_v17, 16 }
 0x52e   :  { %4249 = vmatpush2.bf16.msra.mxu0 %v11482_v24  ;;  %4197 = vmatprep.subr.bf16.mxu1 %v11487_v55  ;;  %v3467_v24 = vpack.i.b16 %v3466_v41, %v3466_v41  ;;  %v3557_v55 = vshrl.u32 %v10611_v12, 16 }
 0x52f   :  { %4250 = vmatprep.subr.bf16.mxu0 %v11490_v25  ;;  %v3573_v25 = vshrl.u32 %v10613_v52, 16 }
 0x530   :  { %v3558_v33 = vpack.i.b16 %v3557_v55, %v3557_v55 }
 0x531   :  { %4198 = vmatpush2.bf16.msra.mxu1 %v11485_v60  ;;  %v3581_v60 = vshrl.u32 %v10614_v8, 16 }
 0x532   :  { %4251 = vmatpush2.bf16.msra.mxu0 %v11488_v28  ;;  %4816 = vmatprep.subr.bf16.mxu1 %v11498_v54  ;;  %v13375_v28 = vld [vmem:[#allocation16 + $0x1] ss:$8 sm:$0xf]  ;;  %v13390_v54 = vrot.slane %v3453_v57, %v15900_v56  ;;  %v13429_v22 = vrot.slane %v3558_v33, %v15900_v56 }
 0x533   :  { %4869 = vmatprep.subr.bf16.mxu0 %v11501_v45  ;;  %v3566_v45 = vpack.i.b16 %v3565_v39, %v3565_v39  ;;  %v3582_v62 = vpack.i.b16 %v3581_v60, %v3581_v60 }
 0x535   :  { %v13415_v41 = vrot.slane %v3566_v45, %v15900_v56 }
 0x57c   :  { %v3064_v32 = vpop.xlane.xlu0 %3063 }
 0x57d   :  { %v13365_v29 = vmul.f32 0.00012207031, %v3064_v32 }
 0x57f   :  { %v3156_v11 = vmul.f32 %v13365_v29, %v13365_v29 }
 0x582   :  { %v3146_v53 = vpop.xlane.xlu0 %3145 }
 0x583   :  { %v3154_v59 = vmul.f32 0.00012207031, %v3146_v53  ;;  %v3438_v53 = vpack.i.b16 %v3415_v36, %v3415_v36  ;;  %v3574_v36 = vpack.i.b16 %v3573_v25, %v3573_v25 }
 0x585   :  { %v3158_v38 = vsub.f32 %v3154_v59, %v3156_v11  ;;  %v3417_v11 = vpack.i.b16 %v3406_v21, %v3406_v21  ;;  %v13381_v59 = vrot.slane %v3460_v40, %v15900_v56  ;;  %v13402_v48 = vrot.slane %v3438_v53, %v15901_v35 }
 0x586   :  { %v13432_v40 = vrot.slane %v3574_v36, %v15900_v56 }
 0x587   :  { %v3160_v34 = vmax.f32 %v3158_v38, 0.0  ;;  %v13387_v38 = vrot.slane %v3474_v3, %v15900_v56  ;;  %v13405_v51 = vrot.slane %v3417_v11, %v15900_v56 }
 0x588   :  { %v3069_v61 = vpop.xlane.xlu1 %3068 }
 0x589   :  { %v3162_v9 = vadd.f32 1e-08, %v3160_v34  ;;  %v13371_v10 = vmul.f32 0.00012207031, %v3069_v61  ;;  %v13393_v61 = vrot.slane %v3467_v24, %v15900_v56 }
 0x58b   :  { %12103 = vrsqrt.f32 %v3162_v9  ;;  %v3157_v50 = vmul.f32 %v13371_v10, %v13371_v10  ;;  %v3431_v9 = vpack.i.b16 %v3413_v6, %v3413_v6  ;;  %v13408_v6 = vrot.slane %v3417_v11, %v15901_v35 }
 0x58d   :  { %v13419_v52 = vrot.slane %v3431_v9, %v15900_v56  ;;  %v13422_v8 = vrot.slane %v3431_v9, %v15901_v35 }
 0x58f   :  { %v3151_v7 = vpop.xlane.xlu1 %3150 }
 0x590   :  { %v3155_v19 = vmul.f32 0.00012207031, %v3151_v7  ;;  %v13399_v7 = vrot.slane %v3438_v53, %v15900_v56 }
 0x592   :  { %v3159_v42 = vsub.f32 %v3155_v19, %v3157_v50 }
 0x594   :  { %v3161_v58 = vmax.f32 %v3159_v42, 0.0 }
 0x596   :  { %v3163_v32 = vadd.f32 1e-08, %v3161_v58 }
 0x598   :  { %v12104_v34 = vpop.eup %12103  ;;  %12105 = vrsqrt.f32 %v3163_v32 }
 0x599   :  { %v3168_v21 = vmul.f32 %v12104_v34, %v13375_v28 }
 0x59b   :  { %v3172_v30 = vmul.f32 %v3168_v21, %v13365_v29  ;;  %v3185_v50 = vrot.slane %v3168_v21, %v15901_v35  ;;  %v3193_v19 = vrot.slane %v3168_v21, %v15915_v47  ;;  %v3181_v17 = vrot.slane %v3168_v21, %v15900_v56 }
 0x59c   :  { %v3189_v12 = vrot.slane %v3168_v21, %v15914_v16  ;;  %v13426_v29 = vrot.slane %v3582_v62, %v15900_v56 }
 0x59d   :  { %v3174_v42 = vsub.f32 %v13396_v20, %v3172_v30  ;;  %v3219_v3 = vmul.f32 %v3185_v50, %v13231_v2  ;;  %v3223_v57 = vmul.f32 %v3185_v50, %v13261_v37  ;;  %v3221_v58 = vmul.f32 %v3193_v19, %v13233_v23 }
 0x59e   :  { %v3225_v39 = vmul.f32 %v3193_v19, %v13263_v43  ;;  %v3218_v25 = vmul.f32 %v3181_v17, %v13227_v5  ;;  %v3222_v32 = vmul.f32 %v3181_v17, %v13237_v0  ;;  %v3220_v53 = vmul.f32 %v3189_v12, %v13229_v31 }
 0x59f   :  { %v3243_v24 = vrot.slane %v3174_v42, %v15901_v35  ;;  %v3251_v55 = vrot.slane %v3174_v42, %v15915_v47  ;;  %v3239_v60 = vrot.slane %v3174_v42, %v15900_v56  ;;  %v3224_v2 = vmul.f32 %v3189_v12, %v13239_v44 }
 0x5a0   :  { %v3247_v37 = vrot.slane %v3174_v42, %v15914_v16 }
 0x5a1   :  { %v13446_v11 = vadd.f32 %v3243_v24, %v3219_v3  ;;  %v13448_v23 = vadd.f32 %v3243_v24, %v3223_v57  ;;  %v13450_v43 = vadd.f32 %v3251_v55, %v3221_v58  ;;  %v13452_v34 = vadd.f32 %v3251_v55, %v3225_v39 }
 0x5a2   :  { %v13454_v45 = vadd.f32 %v3239_v60, %v3218_v25  ;;  %v13456_v5 = vadd.f32 %v3239_v60, %v3222_v32  ;;  %v13458_v9 = vadd.f32 %v3247_v37, %v3220_v53  ;;  %v13460_v0 = vadd.f32 %v3247_v37, %v3224_v2 }
 0x5a3   :  { %v15780_v31 = vrot.slane %v13446_v11, 7  ;;  %v15776_v44 = vrot.slane %v13448_v23, 7  ;;  %v15775_v21 = vrot.slane %v13446_v11, 1  ;;  %v15779_v33 = vrot.slane %v13448_v23, 1 }
 0x5a4   :  { %v3389_v36 = vpack.c.bf16 %v13448_v23, %v13446_v11  ;;  %v15777_v62 = vrot.slane %v13450_v43, 7  ;;  %v15774_v30 = vrot.slane %v13452_v34, 7  ;;  %v15773_v50 = vrot.slane %v13450_v43, 1 }
 0x5a5   :  { %v12106_v19 = vpop.eup %12105  ;;  %v13477_v17 = vsel %vm1296_vm4, %v15780_v31, %v15776_v44  ;;  %v13485_v12 = vsel %vm1345_vm5, %v15775_v21, %v15779_v33  ;;  %v3347_v42 = vrot.slane %v13452_v34, 1  ;;  %v3391_v3 = vpack.c.bf16 %v13452_v34, %v13450_v43  ;;  %v15918_v31 = vld [vmem:[#allocation46_spill] sm:$0xff] }
 0x5a6   :  { %v3169_v57 = vmul.f32 %v12106_v19, %v13375_v28  ;;  %v13492_v58 = vmul.bf16 %v13381_v59, %v3389_v36  ;;  %v13500_v39 = vsel %vm1296_vm4, %v15777_v62, %v15774_v30  ;;  %v3292_v24 = vrot.slane %v13454_v45, 7 }
 0x5a7   :  { %v13507_v55 = vsel %vm1345_vm5, %v15773_v50, %v3347_v42  ;;  %v13510_v28 = vmul.bf16 %v13387_v38, %v3391_v3  ;;  %v15778_v25 = vrot.slane %v13456_v5, 7  ;;  %v3344_v3 = vrot.slane %v13456_v5, 1 }
 0x5a8   :  { %v3173_v32 = vmul.f32 %v3169_v57, %v13371_v10  ;;  %v3197_v53 = vrot.slane %v3169_v57, %v15900_v56  ;;  %v3205_v2 = vrot.slane %v3169_v57, %v15914_v16  ;;  %v3201_v37 = vrot.slane %v3169_v57, %v15901_v35 }
 0x5a9   :  { %v3209_v36 = vrot.slane %v3169_v57, %v15915_v47  ;;  %v13523_v19 = vsel %vm1296_vm4, %v3292_v24, %v15778_v25  ;;  %v3388_v50 = vpack.c.bf16 %v13456_v5, %v13454_v45  ;;  %v15919_v18 = vrot.slane %v13454_v45, 1 }
 0x5aa   :  { %v3226_v10 = vmul.f32 %v3197_v53, %v13291_v49  ;;  %v3228_v30 = vmul.f32 %v3205_v2, %v13293_v13  ;;  %v3230_v21 = vmul.f32 %v3197_v53, %v13305_v14  ;;  %v3232_v44 = vmul.f32 %v3205_v2, %v13307_v46 }
 0x5ab   :  { %v3175_v57 = vsub.f32 %v13396_v20, %v3173_v32  ;;  %v3227_v62 = vmul.f32 %v3201_v37, %v13295_v15  ;;  %v3231_v25 = vmul.f32 %v3201_v37, %v13325_v27  ;;  %v3229_v33 = vmul.f32 %v3209_v36, %v13297_v1 }
 0x5ac   :  { %v3233_v60 = vmul.f32 %v3209_v36, %v15918_v31  ;;  %v3364_v49 = vsel %vm1345_vm5, %v15919_v18, %v3344_v3  ;;  %v13542_v13 = vmul.bf16 %v13390_v54, %v3388_v50  ;;  %v3294_v14 = vrot.slane %v13458_v9, 7 }
 0x5ad   :  { %v3259_v46 = vrot.slane %v3175_v57, %v15901_v35  ;;  %v3267_v15 = vrot.slane %v3175_v57, %v15915_v47  ;;  %v3255_v27 = vrot.slane %v3175_v57, %v15900_v56  ;;  %v3263_v1 = vrot.slane %v3175_v57, %v15914_v16 }
 0x5ae   :  { %v3346_v32 = vrot.slane %v13460_v0, 1  ;;  %v3390_v18 = vpack.c.bf16 %v13460_v0, %v13458_v9 }
 0x5af   :  { %v13554_v50 = vadd.f32 %v3259_v46, %v3227_v62  ;;  %v13556_v53 = vadd.f32 %v3259_v46, %v3231_v25  ;;  %v13558_v2 = vadd.f32 %v3267_v15, %v3229_v33  ;;  %v13560_v37 = vadd.f32 %v3267_v15, %v3233_v60 }
 0x5b0   :  { %v13562_v36 = vadd.f32 %v3255_v27, %v3226_v10  ;;  %v13564_v57 = vadd.f32 %v3255_v27, %v3230_v21  ;;  %v13566_v20 = vadd.f32 %v3263_v1, %v3228_v30  ;;  %v13568_v31 = vadd.f32 %v3263_v1, %v3232_v44 }
 0x5b1   :  { %v3305_v47 = vrot.slane %v13556_v53, 7  ;;  %v3349_v16 = vrot.slane %v13554_v50, 1  ;;  %v15786_v62 = vrot.slane %v13560_v37, 7  ;;  %v15787_v25 = vrot.slane %v13558_v2, 1 }
 0x5b2   :  { %v15920_v21 = vrot.slane %v13460_v0, 7  ;;  %v15921_v30 = vrot.slane %v13446_v11, 7  ;;  %v15922_v15 = vrot.slane %v13448_v23, 1  ;;  %v15923_v1 = vrot.slane %v13450_v43, 7 }
 0x5b3   :  { %v15924_v35 = vrot.slane %v13564_v57, 7 }
 0x5b4   :  { %v3318_v44 = vsel %vm1296_vm4, %v3294_v14, %v15920_v21  ;;  %v3321_v46 = vsel %vm1296_vm4, %v3305_v47, %v15921_v30  ;;  %v3361_v27 = vsel %vm1345_vm5, %v15922_v15, %v3349_v16  ;;  %v3323_v10 = vsel %vm1296_vm4, %v15786_v62, %v15923_v1 }
 0x5b5   :  { %v3363_v21 = vsel %vm1345_vm5, %v3347_v42, %v15787_v25  ;;  %v3325_v60 = vpack.c.bf16 %v13477_v17, %v3321_v46  ;;  %v3373_v30 = vpack.c.bf16 %v3361_v27, %v13485_v12  ;;  %v3327_v33 = vpack.c.bf16 %v13500_v39, %v3323_v10  ;;  %v15927_v39 = vld [vmem:[#allocation44_spill] sm:$0xff] }
 0x5b6   :  { %v3375_v15 = vpack.c.bf16 %v3363_v21, %v13507_v55  ;;  %v3320_v56 = vsel %vm1296_vm4, %v15924_v35, %v3292_v24  ;;  %v15925_v1 = vrot.slane %v13562_v36, 1  ;;  %v15926_v42 = vrot.slane %v13568_v31, 7  ;;  %v15928_v55 = vld [vmem:[#allocation45_spill] sm:$0xff] }
 0x5b7   :  { %v3350_v12 = vrot.slane %v13566_v20, 1  ;;  %v3333_v10 = vmul.bf16 %v3325_v60, %v15927_v39  ;;  %v3381_v46 = vmul.bf16 %v3373_v30, %v15928_v55  ;;  %v3335_v27 = vmul.bf16 %v3327_v33, %v15927_v39 }
 0x5b8   :  { %v3360_v62 = vsel %vm1345_vm5, %v3344_v3, %v15925_v1  ;;  %v3322_v17 = vsel %vm1296_vm4, %v15926_v42, %v3294_v14  ;;  %v3383_v35 = vmul.bf16 %v3375_v15, %v15928_v55  ;;  %v3324_v24 = vpack.c.bf16 %v13523_v19, %v3320_v56 }
 0x5b9   :  { %v3372_v21 = vpack.c.bf16 %v3360_v62, %v3364_v49  ;;  %v3326_v25 = vpack.c.bf16 %v3318_v44, %v3322_v17  ;;  %v3362_v3 = vsel %vm1345_vm5, %v3346_v32, %v3350_v12  ;;  %v3445_v14 = vmul.bf16 %v13378_v26, %v3333_v10 }
 0x5ba   :  { %v3513_v1 = vmul.bf16 %v13384_v63, %v3381_v46  ;;  %v3447_v60 = vmul.bf16 %v13399_v7, %v3335_v27  ;;  %v3515_v30 = vmul.bf16 %v13402_v48, %v3383_v35  ;;  %v3332_v33 = vmul.bf16 %v3324_v24, %v15927_v39 }
 0x5bb   :  { %v3380_v15 = vmul.bf16 %v3372_v21, %v15928_v55  ;;  %v3334_v56 = vmul.bf16 %v3326_v25, %v15927_v39  ;;  %v15929_v19 = vrot.slane %v13458_v9, 1  ;;  %v3489_v62 = vadd.bf16 %v13492_v58, %v3445_v14 }
 0x5bc   :  { %v3491_v44 = vadd.bf16 %v13510_v28, %v3447_v60  ;;  %v3482_v17 = vmul.bf16 %v13393_v61, %v3390_v18  ;;  %v3444_v10 = vmul.bf16 %v13405_v51, %v3332_v33  ;;  %v3301_v25 = vrot.slane %v13554_v50, 7 }
 0x5bd   :  { %v3366_v49 = vsel %vm1345_vm5, %v15929_v19, %v3346_v32  ;;  %v3512_v46 = vmul.bf16 %v13408_v6, %v3380_v15  ;;  %v3446_v27 = vmul.bf16 %v13419_v52, %v3334_v56  ;;  %v3521_v35 = vadd.bf16 %v3513_v1, %v3489_v62 }
 0x5be   :  { %v3374_v42 = vpack.c.bf16 %v3362_v3, %v3366_v49  ;;  %v3523_v24 = vadd.bf16 %v3515_v30, %v3491_v44  ;;  %v3353_v32 = vrot.slane %v13556_v53, 1  ;;  %v3488_v58 = vadd.bf16 %v13542_v13, %v3444_v10 }
 0x5bf   :  { %v3490_v28 = vadd.bf16 %v3482_v17, %v3446_v27  ;;  %v3309_v18 = vsel %vm1296_vm4, %v3301_v25, %v3305_v47  ;;  %v15930_v3 = vrot.slane %v13448_v23, 7  ;;  %v15931_v60 = vmov 0  }
 0x5c0   :  { %v3382_v21 = vmul.bf16 %v3374_v42, %v15928_v55  ;;  %v3531_v33 = vmax.bf16 %v15931_v60, %v3521_v35  ;;  %v3539_v1 = vmin.bf16 %v15931_v60, %v3521_v35  ;;  %v3533_v30 = vmax.bf16 %v15931_v60, %v3523_v24 }
 0x5c1   :  { %v3313_v14 = vsel %vm1296_vm4, %v15930_v3, %v3301_v25  ;;  %v3541_v15 = vmin.bf16 %v15931_v60, %v3523_v24  ;;  %v3520_v56 = vadd.bf16 %v3512_v46, %v3488_v58  ;;  %v3357_v47 = vsel %vm1345_vm5, %v3349_v16, %v3353_v32  ;;  %v11496_v3 = vld [vmem:[#allocation7 + $0x4e0] ss:$16 sps:$4 sm:$0xff]  }
 0x5c2   :  { %v3514_v13 = vmul.bf16 %v13422_v8, %v3382_v21  ;;  %v3329_v19 = vpack.c.bf16 %v3309_v18, %v3313_v14  ;;  %v3589_v23 = vmul.bf16 %v13415_v41, %v3539_v1  ;;  %v15932_v62 = vrot.slane %v13446_v11, 1 }
 0x5c3   :  { %v3591_v49 = vmul.bf16 %v13426_v29, %v3541_v15  ;;  %v3393_v42 = vpack.c.bf16 %v13556_v53, %v13554_v50  ;;  %v3530_v17 = vmax.bf16 %v15931_v60, %v3520_v56  ;;  %v3538_v10 = vmin.bf16 %v15931_v60, %v3520_v56 }
 0x5c4   :  { %v3369_v44 = vsel %vm1345_vm5, %v3353_v32, %v15932_v62  ;;  %v3522_v46 = vadd.bf16 %v3514_v13, %v3490_v28  ;;  %v3337_v27 = vmul.bf16 %v3329_v19, %v15927_v39  ;;  %v3597_v16 = vadd.bf16 %v3589_v23, %v3531_v33  ;;  %v11499_v19 = vld [vmem:[#allocation7 + $0x4e8] ss:$16 sps:$4 sm:$0xff]  }
 0x5c5   :  { %v3599_v25 = vadd.bf16 %v3591_v49, %v3533_v30  ;;  %v3377_v35 = vpack.c.bf16 %v3369_v44, %v3357_v47  ;;  %v3485_v24 = vmul.bf16 %v13381_v59, %v3393_v42  ;;  %v3588_v11 = vmul.bf16 %v13429_v22, %v3538_v10  ;;  %v11504_v30 = vld [vmem:[#allocation7 + $0x4c4] ss:$16 sps:$4 sm:$0xff]   ;;  %v11507_v44 = vld [vmem:[#allocation7 + $0x4cc] ss:$16 sps:$4 sm:$0xff]  }
 0x5c6   :  { %v3532_v21 = vmax.bf16 %v15931_v60, %v3522_v46  ;;  %v3540_v32 = vmin.bf16 %v15931_v60, %v3522_v46  ;;  %v3449_v50 = vmul.bf16 %v13378_v26, %v3337_v27  ;;  %v3605_v53 = vunpack.c.l.bf16 %v3597_v16  ;;  %4199 = vmatprep.mubr.bf16.mxu1 %v3597_v16  ;;  %v11502_v27 = vld [vmem:[#allocation7 + $0x4c0] ss:$16 sps:$4 sm:$0xff]  }
 0x5c7   :  { %v3609_v58 = vunpack.c.h.bf16 %v3597_v16  ;;  %v13675_v18 = vunpack.c.l.bf16 %v3599_v25  ;;  %v13677_v28 = vunpack.c.h.bf16 %v3599_v25  ;;  %4252 = vmatprep.mubr.bf16.mxu0 %v3599_v25  ;;  %v13679_v14 = vadd.bf16 %v3588_v11, %v3530_v17 }
 0x5c8   :  { %v3590_v59 = vmul.bf16 %v13432_v40, %v3540_v32  ;;  %v3385_v33 = vmul.bf16 %v3377_v35, %v15928_v55  ;;  %v3493_v1 = vadd.bf16 %v3485_v24, %v3449_v50  ;;  %v3687_v26 = vmul.f32 %v3605_v53, %v3605_v53 }
 0x5c9   :  { %v13683_v15 = vadd.f32 %v3609_v58, %v3605_v53  ;;  %v3691_v56 = vmul.f32 %v3609_v58, %v3609_v58  ;;  %v13687_v13 = vmul.f32 %v13675_v18, %v13675_v18  ;;  %v13691_v47 = vmul.f32 %v13677_v28, %v13677_v28  ;;  %4200 = vmatmul.mubr.bf16.vlgmr.msra.gmra.mxu1 %v13679_v14 }
 0x5ca   :  { %v13694_v23 = vadd.bf16 %v3590_v59, %v3532_v21  ;;  %v3517_v49 = vmul.bf16 %v13384_v63, %v3385_v33  ;;  %v3303_v62 = vrot.slane %v13558_v2, 7  ;;  %v3355_v10 = vrot.slane %v13560_v37, 1  ;;  %4817 = vmatpush1.bf16.msra.mxu1 %v11496_v3  ;;  %v11510_v21 = vld [vmem:[#allocation7 + $0x4a4] ss:$16 sps:$4 sm:$0xff]   ;;  %v11505_v3 = vld [vmem:[#allocation7 + $0x4c8] ss:$16 sps:$4 sm:$0xff]  }
 0x5cb   :  { %v3628_v42 = vrot.slane %v13683_v15, 4  ;;  %v13699_v17 = vadd.f32 %v3691_v56, %v3687_v26  ;;  %v3395_v46 = vpack.c.bf16 %v13560_v37, %v13558_v2  ;;  %v15933_v25 = vrot.slane %v13560_v37, 7  ;;  %4818 = vmatprep.subr.bf16.mxu1 %v11504_v30  ;;  %v11513_v26 = vld [vmem:[#allocation7 + $0x4ac] ss:$16 sps:$4 sm:$0xff]  }
 0x5cc   :  { %4253 = vmatmul.mubr.bf16.vlgmr.msra.gmra.mxu0 %v13694_v23  ;;  %v3525_v16 = vadd.bf16 %v3517_v49, %v3493_v1  ;;  %v15934_v35 = vrot.slane %v13452_v34, 7  ;;  %v3300_v11 = vrot.slane %v13562_v36, 7  ;;  %v15935_v50 = vrot.slane %v13558_v2, 1 }
 0x5cd   :  { %v3311_v63 = vsel %vm1296_vm4, %v3303_v62, %v15933_v25  ;;  %v15936_v37 = vrot.slane %v13450_v43, 1  ;;  %v3487_v34 = vmul.bf16 %v13387_v38, %v3395_v46  ;;  %4870 = vmatpush1.bf16.msra.mxu0 %v11499_v19  ;;  %v15937_v30 = vrot.slane %v13564_v57, 7 }
 0x5ce   :  { %v3315_v24 = vsel %vm1296_vm4, %v15934_v35, %v3303_v62  ;;  %v3359_v53 = vsel %vm1345_vm5, %v15935_v50, %v3355_v10  ;;  %v3535_v59 = vmax.bf16 %v15931_v60, %v3525_v16  ;;  %v3543_v33 = vmin.bf16 %v15931_v60, %v3525_v16  ;;  %4871 = vmatprep.subr.bf16.mxu0 %v11507_v44  ;;  %v11508_v62 = vld [vmem:[#allocation7 + $0x4a0] ss:$16 sps:$4 sm:$0xff]  }
 0x5cf   :  { %v3331_v32 = vpack.c.bf16 %v3311_v63, %v3315_v24  ;;  %v3371_v58 = vsel %vm1345_vm5, %v3355_v10, %v15936_v37  ;;  %v3308_v2 = vsel %vm1296_vm4, %v3300_v11, %v15937_v30  ;;  %v15938_v56 = vrot.slane %v13456_v5, 7  ;;  %4819 = vmatpush1.bf16.msra.mxu1 %v11502_v27  ;;  %v11511_v27 = vld [vmem:[#allocation7 + $0x4a8] ss:$16 sps:$4 sm:$0xff]  }
 0x5d0   :  { %v3379_v1 = vpack.c.bf16 %v3371_v58, %v3359_v53  ;;  %v3352_v19 = vrot.slane %v13564_v57, 1  ;;  %v3392_v49 = vpack.c.bf16 %v13564_v57, %v13562_v36  ;;  %v3593_v10 = vmul.bf16 %v13415_v41, %v3543_v33  ;;  %4820 = vmatprep.subr.bf16.mxu1 %v11510_v21 }
 0x5d1   :  { %v3339_v43 = vmul.bf16 %v3331_v32, %v15927_v39  ;;  %v3312_v38 = vsel %vm1296_vm4, %v15938_v56, %v3300_v11  ;;  %v3302_v16 = vrot.slane %v13566_v20, 7  ;;  %v15939_v25 = vrot.slane %v13562_v36, 1  ;;  %4872 = vmatpush1.bf16.msra.mxu0 %v11505_v3 }
 0x5d2   :  { %v3387_v46 = vmul.bf16 %v3379_v1, %v15928_v55  ;;  %v3328_v44 = vpack.c.bf16 %v3308_v2, %v3312_v38  ;;  %v15940_v35 = vrot.slane %v13454_v45, 1  ;;  %v3484_v41 = vmul.bf16 %v13390_v54, %v3392_v49  ;;  %4873 = vmatprep.subr.bf16.mxu0 %v11513_v26 }
 0x5d3   :  { %v3451_v5 = vmul.bf16 %v13399_v7, %v3339_v43  ;;  %v3356_v63 = vsel %vm1345_vm5, %v15939_v25, %v3352_v19  ;;  %v3601_v24 = vadd.bf16 %v3593_v10, %v3535_v59  ;;  %v15941_v32 = vrot.slane %v13568_v31, 7  ;;  %4821 = vmatpush1.bf16.msra.mxu1 %v11508_v62 }
 0x5d4   :  { %v3368_v57 = vsel %vm1345_vm5, %v3352_v19, %v15940_v35  ;;  %v3519_v11 = vmul.bf16 %v13402_v48, %v3387_v46  ;;  %v3336_v21 = vmul.bf16 %v3328_v44, %v15927_v39  ;;  %v15942_v50 = vrot.slane %v13460_v0, 7 }
 0x5d5   :  { %v3376_v7 = vpack.c.bf16 %v3368_v57, %v3356_v63  ;;  %v3495_v36 = vadd.bf16 %v3487_v34, %v3451_v5  ;;  %v3310_v45 = vsel %vm1296_vm4, %v3302_v16, %v15941_v32  ;;  %v3354_v53 = vrot.slane %v13568_v31, 1  ;;  %4209 = vmatprep.mubr.bf16.mxu1 %v3601_v24  ;;  %4874 = vmatpush1.bf16.msra.mxu0 %v11511_v27 }
 0x5d6   :  { %v3314_v54 = vsel %vm1296_vm4, %v15942_v50, %v3302_v16  ;;  %v3613_v37 = vunpack.c.l.bf16 %v3601_v24  ;;  %v3617_v48 = vunpack.c.h.bf16 %v3601_v24  ;;  %v3448_v34 = vmul.bf16 %v13405_v51, %v3336_v21 }
 0x5d7   :  { %v3384_v58 = vmul.bf16 %v3376_v7, %v15928_v55  ;;  %v3527_v3 = vadd.bf16 %v3519_v11, %v3495_v36  ;;  %v3330_v59 = vpack.c.bf16 %v3310_v45, %v3314_v54  ;;  %v3358_v0 = vsel %vm1345_vm5, %v3350_v12, %v3354_v53 }
 0x5d8   :  { %v15943_v33 = vrot.slane %v13458_v9, 1  ;;  %v13771_v30 = vadd.f32 %v3617_v48, %v3613_v37  ;;  %v3695_v2 = vmul.f32 %v3613_v37, %v3613_v37  ;;  %v3699_v26 = vmul.f32 %v3617_v48, %v3617_v48 }
 0x5d9   :  { %v3492_v43 = vadd.bf16 %v3484_v41, %v3448_v34  ;;  %v3537_v51 = vmax.bf16 %v15931_v60, %v3527_v3  ;;  %v3545_v56 = vmin.bf16 %v15931_v60, %v3527_v3  ;;  %v3516_v38 = vmul.bf16 %v13408_v6, %v3384_v58 }
 0x5da   :  { %v3370_v1 = vsel %vm1345_vm5, %v3354_v53, %v15943_v33  ;;  %v3338_v19 = vmul.bf16 %v3330_v59, %v15927_v39  ;;  %v3656_v12 = vrot.slane %v13771_v30, 4  ;;  %v13778_v9 = vadd.f32 %v3699_v26, %v3695_v2 }
 0x5db   :  { %v3378_v49 = vpack.c.bf16 %v3370_v1, %v3358_v0  ;;  %v3394_v62 = vpack.c.bf16 %v13568_v31, %v13566_v20  ;;  %v3595_v10 = vmul.bf16 %v13426_v29, %v3545_v56  ;;  %v3524_v46 = vadd.bf16 %v3516_v38, %v3492_v43 }
 0x5dc   :  { %v3450_v44 = vmul.bf16 %v13419_v52, %v3338_v19  ;;  %v3604_v16 = vunpack.c.l.bf16 %v13679_v14  ;;  %v3606_v25 = vunpack.c.l.bf16 %v13694_v23  ;;  %v3608_v63 = vunpack.c.h.bf16 %v13679_v14 }
 0x5dd   :  { %v3386_v5 = vmul.bf16 %v3378_v49, %v15928_v55  ;;  %v3486_v6 = vmul.bf16 %v13393_v61, %v3394_v62  ;;  %v3603_v35 = vadd.bf16 %v3595_v10, %v3537_v51  ;;  %v3534_v57 = vmax.bf16 %v15931_v60, %v3524_v46 }
 0x5de   :  { %v3542_v20 = vmin.bf16 %v15931_v60, %v3524_v46  ;;  %v3610_v29 = vunpack.c.h.bf16 %v13694_v23  ;;  %v3620_v41 = vadd.f32 %v3608_v63, %v3604_v16  ;;  %v3629_v27 = vadd.f32 %v3628_v42, %v13683_v15 }
 0x5df   :  { %v3494_v31 = vadd.bf16 %v3486_v6, %v3450_v44  ;;  %v3518_v52 = vmul.bf16 %v13422_v8, %v3386_v5  ;;  %v13796_v61 = vunpack.c.l.bf16 %v3603_v35  ;;  %v13798_v24 = vunpack.c.h.bf16 %v3603_v35  ;;  %4262 = vmatprep.mubr.bf16.mxu0 %v3603_v35 }
 0x5e0   :  { %v3592_v14 = vmul.bf16 %v13429_v22, %v3542_v20  ;;  %v3634_v11 = vadd.f32 %v3610_v29, %v3606_v25  ;;  %v3621_v7 = vrot.slane %v3620_v41, 4  ;;  %v3630_v36 = vrot.slane %v3629_v27, 2 }
 0x5e1   :  { %v3526_v21 = vadd.bf16 %v3518_v52, %v3494_v31  ;;  %v3641_v23 = vadd.f32 %v13677_v28, %v13675_v18  ;;  %v13805_v8 = vmul.f32 %v13796_v61, %v13796_v61  ;;  %v13809_v15 = vmul.f32 %v13798_v24, %v13798_v24 }
 0x5e2   :  { %v3600_v42 = vadd.bf16 %v3592_v14, %v3534_v57  ;;  %v3635_v32 = vrot.slane %v3634_v11, 4  ;;  %v3622_v50 = vadd.f32 %v3621_v7, %v3620_v41  ;;  %v3631_v54 = vadd.f32 %v3630_v36, %v3629_v27 }
 0x5e3   :  { %v3536_v45 = vmax.bf16 %v15931_v60, %v3526_v21  ;;  %v3544_v22 = vmin.bf16 %v15931_v60, %v3526_v21  ;;  %v3642_v28 = vrot.slane %v3641_v23, 4  ;;  %v3686_v3 = vmul.f32 %v3604_v16, %v3604_v16 }
 0x5e4   :  { %v3612_v53 = vunpack.c.l.bf16 %v3600_v42  ;;  %v3616_v37 = vunpack.c.h.bf16 %v3600_v42  ;;  %4210 = vmatmul.mubr.bf16.gmra.mxu1 %v3600_v42  ;;  %v3636_v18 = vadd.f32 %v3635_v32, %v3634_v11  ;;  %v3623_v58 = vrot.slane %v3622_v50, 2 }
 0x5e5   :  { %v3594_v48 = vmul.bf16 %v13432_v40, %v3544_v22  ;;  %v3632_v34 = vrot.slane %v3631_v54, 1  ;;  %v3643_v51 = vadd.f32 %v3642_v28, %v3641_v23  ;;  %v3688_v49 = vmul.f32 %v3606_v25, %v3606_v25 }
 0x5e6   :  { %v3648_v59 = vadd.f32 %v3616_v37, %v3612_v53  ;;  %v3694_v0 = vmul.f32 %v3612_v53, %v3612_v53  ;;  %v3698_v33 = vmul.f32 %v3616_v37, %v3616_v37  ;;  %v3637_v1 = vrot.slane %v3636_v18, 2 }
 0x5e7   :  { %v3602_v2 = vadd.bf16 %v3594_v48, %v3536_v45  ;;  %v3624_v26 = vadd.f32 %v3623_v58, %v3622_v50  ;;  %v3633_v43 = vadd.f32 %v3632_v34, %v3631_v54  ;;  %v3644_v46 = vrot.slane %v3643_v51, 2 }
 0x5e8   :  { %v3649_v56 = vrot.slane %v3648_v59, 4  ;;  %v13814_v38 = vadd.f32 %v3698_v33, %v3694_v0  ;;  %v3638_v19 = vadd.f32 %v3637_v1, %v3636_v18  ;;  %v3690_v16 = vmul.f32 %v3608_v63, %v3608_v63 }
 0x5e9   :  { %v3614_v62 = vunpack.c.l.bf16 %v3602_v2  ;;  %v3618_v10 = vunpack.c.h.bf16 %v3602_v2  ;;  %4263 = vmatmul.mubr.bf16.gmra.mxu0 %v3602_v2  ;;  %v3625_v40 = vrot.slane %v3624_v26, 1  ;;  %v3692_v5 = vmul.f32 %v3610_v29, %v3610_v29 }
 0x5ea   :  { %v3639_v44 = vrot.slane %v3638_v19, 1  ;;  %v3710_v6 = vrot.slane %v13699_v17, 4  ;;  %v3645_v41 = vadd.f32 %v3644_v46, %v3643_v51  ;;  %v3702_v27 = vadd.f32 %v3690_v16, %v3686_v3 }
 0x5eb   :  { %v3662_v35 = vadd.f32 %v3618_v10, %v3614_v62  ;;  %v3696_v57 = vmul.f32 %v3614_v62, %v3614_v62  ;;  %v3700_v20 = vmul.f32 %v3618_v10, %v3618_v10  ;;  %v3626_v31 = vadd.f32 %v3625_v40, %v3624_v26 }
 0x5ec   :  { %v3640_v52 = vadd.f32 %v3639_v44, %v3638_v19  ;;  %v3711_v14 = vadd.f32 %v3710_v6, %v13699_v17  ;;  %v3716_v11 = vadd.f32 %v3692_v5, %v3688_v49  ;;  %v3723_v21 = vadd.f32 %v13691_v47, %v13687_v13 }
 0x5ed   :  { %v3676_v25 = vadd.f32 %v3633_v43, %v3626_v31  ;;  %v3650_v7 = vadd.f32 %v3649_v56, %v3648_v59  ;;  %v3646_v36 = vrot.slane %v3645_v41, 1  ;;  %v3703_v63 = vrot.slane %v3702_v27, 4 }
 0x5ee   :  { %v3712_v29 = vrot.slane %v3711_v14, 2  ;;  %v3657_v23 = vadd.f32 %v3656_v12, %v13771_v30  ;;  %v3717_v32 = vrot.slane %v3716_v11, 4  ;;  %v3724_v45 = vrot.slane %v3723_v21, 4 }
 0x5ef   :  { %v3677_v42 = vadd.f32 %v3676_v25, %v3640_v52  ;;  %v3651_v22 = vrot.slane %v3650_v7, 2  ;;  %v3647_v50 = vadd.f32 %v3646_v36, %v3645_v41  ;;  %v3704_v54 = vadd.f32 %v3703_v63, %v3702_v27 }
 0x5f0   :  { %v3713_v17 = vadd.f32 %v3712_v29, %v3711_v14  ;;  %v3658_v53 = vrot.slane %v3657_v23, 2  ;;  %v3718_v37 = vadd.f32 %v3717_v32, %v3716_v11  ;;  %v3725_v18 = vadd.f32 %v3724_v45, %v3723_v21 }
 0x5f1   :  { %v3652_v28 = vadd.f32 %v3651_v22, %v3650_v7  ;;  %v3663_v13 = vrot.slane %v3662_v35, 4  ;;  %v3678_v47 = vadd.f32 %v3677_v42, %v3647_v50  ;;  %v3705_v48 = vrot.slane %v3704_v54, 2 }
 0x5f2   :  { %v3714_v58 = vrot.slane %v3713_v17, 1  ;;  %v3659_v34 = vadd.f32 %v3658_v53, %v3657_v23  ;;  %v3719_v3 = vrot.slane %v3718_v37, 2  ;;  %v3726_v59 = vrot.slane %v3725_v18, 2 }
 0x5f3   :  { %v3653_v0 = vrot.slane %v3652_v28, 1  ;;  %v3664_v30 = vadd.f32 %v3663_v13, %v3662_v35  ;;  %3679 = vadd.xlane.f32.xlu0 %v3678_v47  ;;  %v3706_v12 = vadd.f32 %v3705_v48, %v3704_v54  ;;  %v3669_v2 = vadd.f32 %v13798_v24, %v13796_v61  ;;  %v11517_v13 = vld [vmem:[#allocation7 + $0x488] ss:$16 sps:$4 sm:$0xff]   ;;  %v11519_v47 = vld [vmem:[#allocation7 + $0x48c] ss:$16 sps:$4 sm:$0xff]  }
 0x5f4   :  { %v3715_v33 = vadd.f32 %v3714_v58, %v3713_v17  ;;  %v3660_v1 = vrot.slane %v3659_v34, 1  ;;  %v3720_v26 = vadd.f32 %v3719_v3, %v3718_v37  ;;  %v3727_v43 = vadd.f32 %v3726_v59, %v3725_v18  ;;  %v11514_v18 = vld [vmem:[#allocation7 + $0x480] ss:$16 sps:$4 sm:$0xff]   ;;  %4875 = vmatprep.subr.bf16.mxu0 %v11519_v47 }
 0x5f5   :  { %v3654_v51 = vadd.f32 %v3653_v0, %v3652_v28  ;;  %v3665_v56 = vrot.slane %v3664_v30, 2  ;;  %v3707_v19 = vrot.slane %v3706_v12, 1  ;;  %v3670_v62 = vrot.slane %v3669_v2, 4  ;;  %v11516_v28 = vld [vmem:[#allocation7 + $0x484] ss:$16 sps:$4 sm:$0xff]   ;;  %4876 = vmatpush1.bf16.msra.mxu0 %v11517_v13 }
 0x5f6   :  { %v3661_v49 = vadd.f32 %v3660_v1, %v3659_v34  ;;  %v3731_v10 = vrot.slane %v13814_v38, 4  ;;  %v3721_v40 = vrot.slane %v3720_v26, 1  ;;  %v3728_v46 = vrot.slane %v3727_v43, 1  ;;  %4822 = vmatprep.subr.bf16.mxu1 %v11516_v28  ;;  %v11591_v28 = vld [vmem:[#allocation7 + $0x50c] ss:$16 sps:$4 sm:$0xff]  }
 0x5f7   :  { %v3666_v44 = vadd.f32 %v3665_v56, %v3664_v30  ;;  %v3738_v16 = vrot.slane %v13778_v9, 4  ;;  %v3708_v5 = vadd.f32 %v3707_v19, %v3706_v12  ;;  %v3671_v6 = vadd.f32 %v3670_v62, %v3669_v2  ;;  %4823 = vmatpush1.bf16.msra.mxu1 %v11514_v18  ;;  %v11520_v2 = vld [vmem:[#allocation7 + $0x460] ss:$16 sps:$4 sm:$0xff]   ;;  %v11528_v19 = vld [vmem:[#allocation7 + $0x444] ss:$16 sps:$4 sm:$0xff]  }
 0x5f8   :  { %v3732_v35 = vadd.f32 %v3731_v10, %v13814_v38  ;;  %v3722_v31 = vadd.f32 %v3721_v40, %v3720_v26  ;;  %v3681_v24 = vadd.f32 %v3661_v49, %v3654_v51  ;;  %v3744_v25 = vadd.f32 %v3700_v20, %v3696_v57  ;;  %v11522_v26 = vld [vmem:[#allocation7 + $0x464] ss:$16 sps:$4 sm:$0xff]   ;;  %v11525_v51 = vld [vmem:[#allocation7 + $0x46c] ss:$16 sps:$4 sm:$0xff]   ;;  %v11526_v56 = vld [vmem:[#allocation7 + $0x440] ss:$16 sps:$4 sm:$0xff]  }
 0x5f9   :  { %v3667_v61 = vrot.slane %v3666_v44, 1  ;;  %v3739_v52 = vadd.f32 %v3738_v16, %v13778_v9  ;;  %v3758_v41 = vadd.f32 %v3715_v33, %v3708_v5  ;;  %v3672_v27 = vrot.slane %v3671_v6, 2  ;;  %4824 = vmatprep.subr.bf16.mxu1 %v11522_v26  ;;  %4877 = vmatprep.subr.bf16.mxu0 %v11525_v51  ;;  %v11529_v49 = vld [vmem:[#allocation7 + $0x448] ss:$16 sps:$4 sm:$0xff]   ;;  %v11531_v62 = vld [vmem:[#allocation7 + $0x44c] ss:$16 sps:$4 sm:$0xff]  }
 0x5fa   :  { %v3733_v14 = vrot.slane %v3732_v35, 2  ;;  %v3729_v11 = vadd.f32 %v3728_v46, %v3727_v43  ;;  %v3751_v36 = vadd.f32 %v13809_v15, %v13805_v8  ;;  %v3745_v42 = vrot.slane %v3744_v25, 4  ;;  %v11523_v43 = vld [vmem:[#allocation7 + $0x468] ss:$16 sps:$4 sm:$0xff]   ;;  %v11534_v10 = vld [vmem:[#allocation7 + $0x424] ss:$16 sps:$4 sm:$0xff]  }
 0x5fb   :  { %v3668_v21 = vadd.f32 %v3667_v61, %v3666_v44  ;;  %v3740_v7 = vrot.slane %v3739_v52, 2  ;;  %v3759_v63 = vadd.f32 %v3758_v41, %v3722_v31  ;;  %v3673_v29 = vadd.f32 %v3672_v27, %v3671_v6  ;;  %4825 = vmatpush1.bf16.msra.mxu1 %v11520_v2  ;;  %4878 = vmatpush1.bf16.msra.mxu0 %v11523_v43  ;;  %v11537_v40 = vld [vmem:[#allocation7 + $0x42c] ss:$16 sps:$4 sm:$0xff]   ;;  %v11532_v46 = vld [vmem:[#allocation7 + $0x420] ss:$16 sps:$4 sm:$0xff]  }
 0x5fc   :  { %v3734_v23 = vadd.f32 %v3733_v14, %v3732_v35  ;;  %v3752_v45 = vrot.slane %v3751_v36, 4  ;;  %v3746_v54 = vadd.f32 %v3745_v42, %v3744_v25  ;;  %4826 = vmatprep.subr.bf16.mxu1 %v11528_v19  ;;  %4879 = vmatprep.subr.bf16.mxu0 %v11531_v62  ;;  %v11535_v44 = vld [vmem:[#allocation7 + $0x428] ss:$16 sps:$4 sm:$0xff]   ;;  %v11540_v16 = vld [vmem:[#allocation7 + $0x404] ss:$16 sps:$4 sm:$0xff]  }
 0x5fd   :  { %v3682_v38 = vadd.f32 %v3681_v24, %v3668_v21  ;;  %v3741_v32 = vadd.f32 %v3740_v7, %v3739_v52  ;;  %v3760_v22 = vadd.f32 %v3759_v63, %v3729_v11  ;;  %v3674_v50 = vrot.slane %v3673_v29, 1  ;;  %v11543_v5 = vld [vmem:[#allocation7 + $0x40c] ss:$16 sps:$4 sm:$0xff]   ;;  %v11538_v6 = vld [vmem:[#allocation7 + $0x400] ss:$16 sps:$4 sm:$0xff]  }
 0x5fe   :  { %v3735_v9 = vrot.slane %v3734_v23, 1  ;;  %v3753_v53 = vadd.f32 %v3752_v45, %v3751_v36  ;;  %v3747_v37 = vrot.slane %v3746_v54, 2  ;;  %v11541_v35 = vld [vmem:[#allocation7 + $0x408] ss:$16 sps:$4 sm:$0xff]   ;;  %v11546_v31 = vld [vmem:[#allocation7 + $0x5e4] ss:$16 sps:$4 sm:$0xff]  }
 0x5ff   :  { %v3742_v17 = vrot.slane %v3741_v32, 1  ;;  %3761 = vadd.xlane.f32.xlu1 %v3760_v22  ;;  %v3675_v57 = vadd.f32 %v3674_v50, %v3673_v29  ;;  %4827 = vmatpush1.bf16.msra.mxu1 %v11526_v56  ;;  %v11549_v61 = vld [vmem:[#allocation7 + $0x5ec] ss:$16 sps:$4 sm:$0xff]   ;;  %v11544_v24 = vld [vmem:[#allocation7 + $0x5e0] ss:$16 sps:$4 sm:$0xff]  }
 0x600   :  { %v3736_v20 = vadd.f32 %v3735_v9, %v3734_v23  ;;  %v3754_v15 = vrot.slane %v3753_v53, 2  ;;  %v3748_v58 = vadd.f32 %v3747_v37, %v3746_v54  ;;  %4880 = vmatpush1.bf16.msra.mxu0 %v11529_v49  ;;  %4828 = vmatprep.subr.bf16.mxu1 %v11534_v10  ;;  %v11547_v52 = vld [vmem:[#allocation7 + $0x5e8] ss:$16 sps:$4 sm:$0xff]   ;;  %v11552_v41 = vld [vmem:[#allocation7 + $0x5c4] ss:$16 sps:$4 sm:$0xff]  }
 0x601   :  { %v3743_v8 = vadd.f32 %v3742_v17, %v3741_v32  ;;  %v3683_v48 = vadd.f32 %v3682_v38, %v3675_v57  ;;  %4881 = vmatprep.subr.bf16.mxu0 %v11537_v40  ;;  %v11555_v27 = vld [vmem:[#allocation7 + $0x5cc] ss:$16 sps:$4 sm:$0xff]   ;;  %v11550_v14 = vld [vmem:[#allocation7 + $0x5c0] ss:$16 sps:$4 sm:$0xff]   ;;  %v11553_v25 = vld [vmem:[#allocation7 + $0x5c8] ss:$16 sps:$4 sm:$0xff]  }
 0x602   :  { %v3755_v34 = vadd.f32 %v3754_v15, %v3753_v53  ;;  %v3749_v3 = vrot.slane %v3748_v58, 1  ;;  %v11558_v11 = vld [vmem:[#allocation7 + $0x5a4] ss:$16 sps:$4 sm:$0xff]   ;;  %v11561_v21 = vld [vmem:[#allocation7 + $0x5ac] ss:$16 sps:$4 sm:$0xff]  }
 0x603   :  { %3684 = vadd.xlane.f32.xlu0 %v3683_v48  ;;  %v3763_v59 = vadd.f32 %v3743_v8, %v3736_v20  ;;  %4829 = vmatpush1.bf16.msra.mxu1 %v11532_v46  ;;  %v11556_v7 = vld [vmem:[#allocation7 + $0x5a0] ss:$16 sps:$4 sm:$0xff]   ;;  %v11559_v36 = vld [vmem:[#allocation7 + $0x5a8] ss:$16 sps:$4 sm:$0xff]   ;;  %v11564_v63 = vld [vmem:[#allocation7 + $0x584] ss:$16 sps:$4 sm:$0xff]  }
 0x604   :  { %v3756_v0 = vrot.slane %v3755_v34, 1  ;;  %v3750_v30 = vadd.f32 %v3749_v3, %v3748_v58  ;;  %4882 = vmatpush1.bf16.msra.mxu0 %v11535_v44  ;;  %4830 = vmatprep.subr.bf16.mxu1 %v11540_v16  ;;  %v11567_v29 = vld [vmem:[#allocation7 + $0x58c] ss:$16 sps:$4 sm:$0xff]   ;;  %v11562_v23 = vld [vmem:[#allocation7 + $0x580] ss:$16 sps:$4 sm:$0xff]  }
 0x605   :  { %4883 = vmatprep.subr.bf16.mxu0 %v11543_v5  ;;  %v11565_v42 = vld [vmem:[#allocation7 + $0x588] ss:$16 sps:$4 sm:$0xff]   ;;  %v11570_v38 = vld [vmem:[#allocation7 + $0x564] ss:$16 sps:$4 sm:$0xff]   ;;  %v11573_v32 = vld [vmem:[#allocation7 + $0x56c] ss:$16 sps:$4 sm:$0xff]  }
 0x606   :  { %v3757_v12 = vadd.f32 %v3756_v0, %v3755_v34  ;;  %v3764_v33 = vadd.f32 %v3763_v59, %v3750_v30  ;;  %v11568_v45 = vld [vmem:[#allocation7 + $0x560] ss:$16 sps:$4 sm:$0xff]   ;;  %v11571_v22 = vld [vmem:[#allocation7 + $0x568] ss:$16 sps:$4 sm:$0xff]   ;;  %v11576_v50 = vld [vmem:[#allocation7 + $0x544] ss:$16 sps:$4 sm:$0xff]  }
 0x607   :  { %4831 = vmatpush1.bf16.msra.mxu1 %v11538_v6  ;;  %v11579_v9 = vld [vmem:[#allocation7 + $0x54c] ss:$16 sps:$4 sm:$0xff]   ;;  %v11574_v54 = vld [vmem:[#allocation7 + $0x540] ss:$16 sps:$4 sm:$0xff]   ;;  %v11577_v17 = vld [vmem:[#allocation7 + $0x548] ss:$16 sps:$4 sm:$0xff]  }
 0x608   :  { %v3765_v1 = vadd.f32 %v3764_v33, %v3757_v12  ;;  %4884 = vmatpush1.bf16.msra.mxu0 %v11541_v35  ;;  %4832 = vmatprep.subr.bf16.mxu1 %v11546_v31  ;;  %v11582_v53 = vld [vmem:[#allocation7 + $0x524] ss:$16 sps:$4 sm:$0xff]   ;;  %v11585_v57 = vld [vmem:[#allocation7 + $0x52c] ss:$16 sps:$4 sm:$0xff]   ;;  %v11580_v20 = vld [vmem:[#allocation7 + $0x520] ss:$16 sps:$4 sm:$0xff]  }
 0x609   :  { %4885 = vmatprep.subr.bf16.mxu0 %v11549_v61  ;;  %v11583_v37 = vld [vmem:[#allocation7 + $0x528] ss:$16 sps:$4 sm:$0xff]   ;;  %v11588_v18 = vld [vmem:[#allocation7 + $0x504] ss:$16 sps:$4 sm:$0xff]   ;;  %v11586_v8 = vld [vmem:[#allocation7 + $0x500] ss:$16 sps:$4 sm:$0xff]  }
 0x60a   :  { %3766 = vadd.xlane.f32.xlu1 %v3765_v1  ;;  %v11589_v15 = vld [vmem:[#allocation7 + $0x508] ss:$16 sps:$4 sm:$0xff]  }
 0x60b   :  { %4833 = vmatpush2.bf16.msra.mxu1 %v11544_v24  ;;  %v4274_v61 = vld [vmem:[#allocation19 + $0x1] ss:$8 sm:$0x3] }
 0x60c   :  { %4886 = vmatpush2.bf16.msra.mxu0 %v11547_v52  ;;  %4834 = vmatprep.subr.bf16.mxu1 %v11552_v41 }
 0x60d   :  { %4887 = vmatprep.subr.bf16.mxu0 %v11555_v27 }
 0x60f   :  { %4835 = vmatpush2.bf16.msra.mxu1 %v11550_v14  ;;  %v4276_v14 = vld [vmem:[#allocation20 + $0x1] ss:$8 sm:$0x3] }
 0x610   :  { %4888 = vmatpush2.bf16.msra.mxu0 %v11553_v25  ;;  %4836 = vmatprep.subr.bf16.mxu1 %v11558_v11 }
 0x611   :  { %4889 = vmatprep.subr.bf16.mxu0 %v11561_v21  ;;  %v15944_v21 = vld [vmem:[#allocation31_spill] sm:$0xff] }
 0x613   :  { %4837 = vmatpush2.bf16.msra.mxu1 %v11556_v7 }
 0x614   :  { %4890 = vmatpush2.bf16.msra.mxu0 %v11559_v36  ;;  %4838 = vmatprep.subr.bf16.mxu1 %v11564_v63  ;;  %v15945_v63 = vld [vmem:[#allocation32_spill] sm:$0xff] }
 0x615   :  { %4891 = vmatprep.subr.bf16.mxu0 %v11567_v29 }
 0x617   :  { %4839 = vmatpush2.bf16.msra.mxu1 %v11562_v23  ;;  %v15946_v23 = vld [vmem:[#allocation33_spill] sm:$0xff] }
 0x618   :  { %4892 = vmatpush2.bf16.msra.mxu0 %v11565_v42  ;;  %4840 = vmatprep.subr.bf16.mxu1 %v11570_v38  ;;  %v15947_v38 = vld [vmem:[#allocation34_spill] sm:$0xff] }
 0x619   :  { %4893 = vmatprep.subr.bf16.mxu0 %v11573_v32 }
 0x61b   :  { %4841 = vmatpush2.bf16.msra.mxu1 %v11568_v45 }
 0x61c   :  { %4894 = vmatpush2.bf16.msra.mxu0 %v11571_v22  ;;  %4842 = vmatprep.subr.bf16.mxu1 %v11576_v50  ;;  %v15948_v22 = vld [vmem:[#allocation39_spill] sm:$0xff] }
 0x61d   :  { %4895 = vmatprep.subr.bf16.mxu0 %v11579_v9  ;;  %v15949_v9 = vld [vmem:[#allocation41_spill] sm:$0xff] }
 0x61f   :  { %4843 = vmatpush2.bf16.msra.mxu1 %v11574_v54 }
 0x620   :  { %4896 = vmatpush2.bf16.msra.mxu0 %v11577_v17  ;;  %4844 = vmatprep.subr.bf16.mxu1 %v11582_v53 }
 0x621   :  { %4897 = vmatprep.subr.bf16.mxu0 %v11585_v57 }
 0x623   :  { %4845 = vmatpush2.bf16.msra.mxu1 %v11580_v20 }
 0x624   :  { %4898 = vmatpush2.bf16.msra.mxu0 %v11583_v37  ;;  %4846 = vmatprep.subr.bf16.mxu1 %v11588_v18 }
 0x625   :  { %4899 = vmatprep.subr.bf16.mxu0 %v11591_v28 }
 0x627   :  { %4847 = vmatpush2.bf16.msra.mxu1 %v11586_v8 }
 0x628   :  { %4900 = vmatpush2.bf16.msra.mxu0 %v11589_v15 }
 0x67c   :  { %v3680_v13 = vpop.xlane.xlu0 %3679 }
 0x67d   :  { %v3768_v47 = vmul.f32 0.00012207031, %v3680_v13 }
 0x67f   :  { %v3772_v48 = vmul.f32 %v3768_v47, %v3768_v47 }
 0x688   :  { %v3762_v58 = vpop.xlane.xlu1 %3761 }
 0x689   :  { %v3770_v34 = vmul.f32 0.00012207031, %v3762_v58  ;;  %v4201_v30 = vpop.f32.mrf.mxu1 }
 0x68b   :  { %v3774_v3 = vsub.f32 %v3770_v34, %v3772_v48  ;;  %v4203_v2 = vpop.f32.mrf.mxu1 }
 0x68c   :  { %v3685_v59 = vpop.xlane.xlu0 %3684  ;;  %v4254_v12 = vpop.f32.mrf.mxu0 }
 0x68d   :  { %v3776_v0 = vmax.f32 %v3774_v3, 0.0  ;;  %v3769_v1 = vmul.f32 0.00012207031, %v3685_v59  ;;  %v4205_v19 = vpop.f32.mrf.mxu1  ;;  %v4255_v16 = vadd.f32 %v4254_v12, %v4201_v30 }
 0x68e   :  { %v4256_v26 = vpop.f32.mrf.mxu0 }
 0x68f   :  { %v3778_v33 = vadd.f32 1e-08, %v3776_v0  ;;  %v3773_v43 = vmul.f32 %v3769_v1, %v3769_v1  ;;  %v4207_v40 = vpop.f32.mrf.mxu1  ;;  %v4257_v5 = vadd.f32 %v4256_v26, %v4203_v2 }
 0x690   :  { %v4258_v49 = vpop.f32.mrf.mxu0 }
 0x691   :  { %12107 = vrsqrt.f32 %v3778_v33  ;;  %v4259_v6 = vadd.f32 %v4258_v49, %v4205_v19  ;;  %v15954_v19 = vld [vmem:[#allocation35_spill] sm:$0xff] }
 0x692   :  { %v4260_v46 = vpop.f32.mrf.mxu0 }
 0x693   :  { %v3767_v51 = vpop.xlane.xlu1 %3766  ;;  %v4261_v35 = vadd.f32 %v4260_v46, %v4207_v40 }
 0x694   :  { %v3771_v56 = vmul.f32 0.00012207031, %v3767_v51 }
 0x696   :  { %v3775_v62 = vsub.f32 %v3771_v56, %v3773_v43 }
 0x698   :  { %v3777_v10 = vmax.f32 %v3775_v62, 0.0 }
 0x69a   :  { %v3779_v44 = vadd.f32 1e-08, %v3777_v10 }
 0x69c   :  { %12109 = vrsqrt.f32 %v3779_v44 }
 0x69e   :  { %v12108_v31 = vpop.eup %12107 }
 0x69f   :  { %v4277_v24 = vmul.f32 %v12108_v31, %v3768_v47  ;;  %v4283_v52 = vmul.f32 %v12108_v31, %v4255_v16  ;;  %v4284_v41 = vmul.f32 %v12108_v31, %v4257_v5  ;;  %v4285_v27 = vmul.f32 %v12108_v31, %v4259_v6  ;;  %v15955_v6 = vld [vmem:[#allocation36_spill] sm:$0xff] }
 0x6a0   :  { %v4286_v25 = vmul.f32 %v12108_v31, %v4261_v35 }
 0x6a1   :  { %v4279_v11 = vmul.f32 %v4277_v24, %v4274_v61  ;;  %v4291_v7 = vadd.f32 %v4283_v52, %v15944_v21  ;;  %v4292_v29 = vadd.f32 %v4284_v41, %v15945_v63  ;;  %v4293_v42 = vadd.f32 %v4285_v27, %v15946_v23  ;;  %v15956_v21 = vld [vmem:[#allocation37_spill] sm:$0xff] }
 0x6a2   :  { %v4294_v32 = vadd.f32 %v4286_v25, %v15947_v38 }
 0x6a3   :  { %v4281_v36 = vsub.f32 %v4276_v14, %v4279_v11 }
 0x6a4   :  { %v4211_v45 = vpop.f32.mrf.mxu1 }
 0x6a5   :  { %v4304_v50 = vrot.slane %v4281_v36, %v15948_v22  ;;  %v4308_v54 = vrot.slane %v4281_v36, %v15949_v9 }
 0x6a6   :  { %v4213_v17 = vpop.f32.mrf.mxu1 }
 0x6a7   :  { %v13837_v53 = vadd.f32 %v4304_v50, %v4291_v7  ;;  %v13839_v57 = vadd.f32 %v4308_v54, %v4292_v29  ;;  %v13841_v20 = vadd.f32 %v4304_v50, %v4293_v42  ;;  %v13843_v37 = vadd.f32 %v4308_v54, %v4294_v32 }
 0x6a8   :  { %v4215_v28 = vpop.f32.mrf.mxu1 }
 0x6a9   :  { %15950 = vst [vmem:[#allocation46_spill] sm:$0xff] %v13837_v53  ;;  %15951 = vst [vmem:[#allocation31_spill] sm:$0xff] %v13839_v57  ;;  %v4264_v18 = vpop.f32.mrf.mxu0  ;;  %v4329_v8 = vmax.f32 %v13837_v53, 0.0  ;;  %v4331_v15 = vmax.f32 %v13841_v20, 0.0  ;;  %v12110_v47 = vpop.eup %12109  ;;  %v4330_v58 = vmax.f32 %v13839_v57, 0.0  ;;  %v4332_v34 = vmax.f32 %v13843_v37, 0.0 }
 0x6aa   :  { %15952 = vst [vmem:[#allocation32_spill] sm:$0xff] %v13841_v20  ;;  %15953 = vst [vmem:[#allocation33_spill] sm:$0xff] %v13843_v37  ;;  %v4265_v13 = vadd.f32 %v4264_v18, %v4211_v45  ;;  %v4278_v3 = vmul.f32 %v12110_v47, %v3769_v1  ;;  %v4217_v33 = vpop.f32.mrf.mxu1  ;;  %v15960_v45 = vld [vmem:[#allocation38_spill] sm:$0xff] }
 0x6ab   :  { %v4266_v48 = vpop.f32.mrf.mxu0  ;;  %v4427_v30 = vpack.c.bf16 %v4331_v15, %v4329_v8  ;;  %v4428_v2 = vpack.c.bf16 %v4332_v34, %v4330_v58  ;;  %v4337_v26 = vadd.f32 %v4331_v15, %v4329_v8  ;;  %v4344_v43 = vadd.f32 %v4332_v34, %v4330_v58 }
 0x6ac   :  { %v4287_v59 = vmul.f32 %v12110_v47, %v4265_v13  ;;  %v4267_v0 = vadd.f32 %v4266_v48, %v4213_v17  ;;  %v4371_v51 = vmul.f32 %v4329_v8, %v4329_v8  ;;  %v4280_v56 = vmul.f32 %v4278_v3, %v4274_v61 }
 0x6ad   :  { %v4268_v12 = vpop.f32.mrf.mxu0  ;;  %4848 = vmatprep.mubr.bf16.mxu1 %v4428_v2  ;;  %4901 = vmatprep.mubr.bf16.mxu0 %v4428_v2  ;;  %v4338_v46 = vrot.slane %v4337_v26, 4  ;;  %v4345_v44 = vrot.slane %v4344_v43, 4  ;;  %v4372_v1 = vmul.f32 %v4330_v58, %v4330_v58  ;;  %v4373_v16 = vmul.f32 %v4331_v15, %v4331_v15 }
 0x6ae   :  { %v4295_v49 = vadd.f32 %v4287_v59, %v15954_v19  ;;  %v4288_v62 = vmul.f32 %v12110_v47, %v4267_v0  ;;  %v4269_v10 = vadd.f32 %v4268_v12, %v4215_v28  ;;  %v4282_v5 = vsub.f32 %v4276_v14, %v4280_v56  ;;  %4849 = vmatmul.mubr.bf16.vlgmr.msra.gmra.mxu1 %v4427_v30 }
 0x6af   :  { %v4270_v40 = vpop.f32.mrf.mxu0  ;;  %4902 = vmatmul.mubr.bf16.vlgmr.msra.gmra.mxu0 %v4427_v30  ;;  %v4339_v52 = vadd.f32 %v4338_v46, %v4337_v26  ;;  %v4346_v61 = vadd.f32 %v4345_v44, %v4344_v43  ;;  %v4374_v41 = vmul.f32 %v4332_v34, %v4332_v34  ;;  %v4379_v27 = vadd.f32 %v4373_v16, %v4371_v51 }
 0x6b0   :  { %v4296_v35 = vadd.f32 %v4288_v62, %v15955_v6  ;;  %v4289_v31 = vmul.f32 %v12110_v47, %v4269_v10  ;;  %v4271_v24 = vadd.f32 %v4270_v40, %v4217_v33  ;;  %v4312_v25 = vrot.slane %v4282_v5, %v15948_v22 }
 0x6b1   :  { %v4316_v11 = vrot.slane %v4282_v5, %v15949_v9  ;;  %v4340_v63 = vrot.slane %v4339_v52, 2  ;;  %v4347_v29 = vrot.slane %v4346_v61, 2  ;;  %v4380_v14 = vrot.slane %v4379_v27, 4 }
 0x6b2   :  { %v4297_v7 = vadd.f32 %v4289_v31, %v15956_v21  ;;  %v4290_v36 = vmul.f32 %v12110_v47, %v4271_v24  ;;  %v4386_v23 = vadd.f32 %v4374_v41, %v4372_v1  ;;  %v13854_v42 = vadd.f32 %v4312_v25, %v4295_v49 }
 0x6b3   :  { %v13856_v38 = vadd.f32 %v4316_v11, %v4296_v35  ;;  %v4341_v54 = vadd.f32 %v4340_v63, %v4339_v52  ;;  %v4348_v17 = vadd.f32 %v4347_v29, %v4346_v61  ;;  %v4381_v18 = vadd.f32 %v4380_v14, %v4379_v27 }
 0x6b4   :  { %15957 = vst [vmem:[#allocation34_spill] sm:$0xff] %v13854_v42  ;;  %v13858_v32 = vadd.f32 %v4312_v25, %v4297_v7  ;;  %v4298_v50 = vadd.f32 %v4290_v36, %v15960_v45  ;;  %v4387_v28 = vrot.slane %v4386_v23, 4  ;;  %v4333_v15 = vmax.f32 %v13854_v42, 0.0 }
 0x6b5   :  { %15958 = vst [vmem:[#allocation35_spill] sm:$0xff] %v13856_v38  ;;  %v4342_v47 = vrot.slane %v4341_v54, 1  ;;  %v4349_v48 = vrot.slane %v4348_v17, 1  ;;  %v4382_v58 = vrot.slane %v4381_v18, 2  ;;  %v4334_v3 = vmax.f32 %v13856_v38, 0.0 }
 0x6b6   :  { %15959 = vst [vmem:[#allocation36_spill] sm:$0xff] %v13858_v32  ;;  %v13861_v8 = vadd.f32 %v4316_v11, %v4298_v50  ;;  %v4335_v13 = vmax.f32 %v13858_v32, 0.0  ;;  %v4388_v34 = vadd.f32 %v4387_v28, %v4386_v23  ;;  %v4375_v19 = vmul.f32 %v4333_v15, %v4333_v15 }
 0x6b7   :  { %v4343_v12 = vadd.f32 %v4342_v47, %v4341_v54  ;;  %v4350_v33 = vadd.f32 %v4349_v48, %v4348_v17  ;;  %v4383_v2 = vadd.f32 %v4382_v58, %v4381_v18  ;;  %v4376_v1 = vmul.f32 %v4334_v3, %v4334_v3 }
 0x6b8   :  { %15961 = vst [vmem:[#allocation37_spill] sm:$0xff] %v13861_v8  ;;  %v4336_v59 = vmax.f32 %v13861_v8, 0.0  ;;  %v4429_v0 = vpack.c.bf16 %v4335_v13, %v4333_v15  ;;  %v4351_v30 = vadd.f32 %v4335_v13, %v4333_v15  ;;  %v4389_v26 = vrot.slane %v4388_v34, 2 }
 0x6b9   :  { %v4365_v49 = vadd.f32 %v4350_v33, %v4343_v12  ;;  %v4384_v62 = vrot.slane %v4383_v2, 1  ;;  %v4377_v40 = vmul.f32 %v4335_v13, %v4335_v13 }
 0x6ba   :  { %v4430_v43 = vpack.c.bf16 %v4336_v59, %v4334_v3  ;;  %v4352_v51 = vrot.slane %v4351_v30, 4  ;;  %v4358_v56 = vadd.f32 %v4336_v59, %v4334_v3  ;;  %v4390_v10 = vadd.f32 %v4389_v26, %v4388_v34 }
 0x6bb   :  { %v4378_v16 = vmul.f32 %v4336_v59, %v4336_v59  ;;  %v4393_v6 = vadd.f32 %v4377_v40, %v4375_v19  ;;  %4366 = vadd.xlane.f32.xlu0 %v4365_v49  ;;  %v4385_v52 = vadd.f32 %v4384_v62, %v4383_v2 }
 0x6bc   :  { %4858 = vmatprep.mubr.bf16.mxu1 %v4430_v43  ;;  %4911 = vmatprep.mubr.bf16.mxu0 %v4430_v43  ;;  %v4353_v46 = vadd.f32 %v4352_v51, %v4351_v30  ;;  %v4359_v44 = vrot.slane %v4358_v56, 4  ;;  %v4391_v5 = vrot.slane %v4390_v10, 1 }
 0x6bd   :  { %4859 = vmatmul.mubr.bf16.gmra.mxu1 %v4429_v0  ;;  %4912 = vmatmul.mubr.bf16.gmra.mxu0 %v4429_v0  ;;  %v4400_v24 = vadd.f32 %v4378_v16, %v4376_v1  ;;  %v4394_v41 = vrot.slane %v4393_v6, 4  ;;  %v4925_v16 = vld [vmem:[#allocation14 + $0x2] ss:$8 sm:$0xf] }
 0x6be   :  { %v4354_v35 = vrot.slane %v4353_v46, 2  ;;  %v4360_v31 = vadd.f32 %v4359_v44, %v4358_v56  ;;  %v4392_v61 = vadd.f32 %v4391_v5, %v4390_v10  ;;  %v4923_v44 = vld [vmem:[#allocation13 + $0x2] ss:$8 sm:$0xf] }
 0x6bf   :  { %v4401_v11 = vrot.slane %v4400_v24, 4  ;;  %v4395_v7 = vadd.f32 %v4394_v41, %v4393_v6 }
 0x6c0   :  { %v4355_v27 = vadd.f32 %v4354_v35, %v4353_v46  ;;  %v4361_v25 = vrot.slane %v4360_v31, 2  ;;  %v4407_v21 = vadd.f32 %v4392_v61, %v4385_v52 }
 0x6c1   :  { %v4402_v29 = vadd.f32 %v4401_v11, %v4400_v24  ;;  %v4396_v14 = vrot.slane %v4395_v7, 2 }
 0x6c2   :  { %v4356_v36 = vrot.slane %v4355_v27, 1  ;;  %v4362_v63 = vadd.f32 %v4361_v25, %v4360_v31  ;;  %4408 = vadd.xlane.f32.xlu0 %v4407_v21  ;;  %v15962_v25 = vld [vmem:[#allocation40_spill] sm:$0xff] }
 0x6c3   :  { %v4403_v45 = vrot.slane %v4402_v29, 2  ;;  %v4397_v50 = vadd.f32 %v4396_v14, %v4395_v7 }
 0x6c4   :  { %v4363_v23 = vrot.slane %v4362_v63, 1  ;;  %v4357_v54 = vadd.f32 %v4356_v36, %v4355_v27 }
 0x6c5   :  { %v4404_v18 = vadd.f32 %v4403_v45, %v4402_v29  ;;  %v4398_v28 = vrot.slane %v4397_v50, 1 }
 0x6c6   :  { %v4364_v17 = vadd.f32 %v4363_v23, %v4362_v63 }
 0x6c7   :  { %v4405_v13 = vrot.slane %v4404_v18, 1  ;;  %v4399_v47 = vadd.f32 %v4398_v28, %v4397_v50  ;;  %v15963_v50 = vld [vmem:[#allocation42_spill] sm:$0xff] }
 0x6c8   :  { %v4368_v15 = vadd.f32 %v4364_v17, %v4357_v54 }
 0x6c9   :  { %v4406_v48 = vadd.f32 %v4405_v13, %v4404_v18 }
 0x6ca   :  { %4369 = vadd.xlane.f32.xlu1 %v4368_v15 }
 0x6cb   :  { %v4410_v58 = vadd.f32 %v4406_v48, %v4399_v47 }
 0x6ce   :  { %4411 = vadd.xlane.f32.xlu1 %v4410_v58 }
 0x744   :  { %v4367_v34 = vpop.xlane.xlu0 %4366 }
 0x745   :  { %v4413_v3 = vmul.f32 0.00024414063, %v4367_v34 }
 0x747   :  { %v4417_v0 = vmul.f32 %v4413_v3, %v4413_v3 }
 0x74b   :  { %v4409_v59 = vpop.xlane.xlu0 %4408 }
 0x74c   :  { %v4415_v30 = vmul.f32 0.00024414063, %v4409_v59 }
 0x74e   :  { %v4419_v12 = vsub.f32 %v4415_v30, %v4417_v0 }
 0x750   :  { %v4421_v33 = vmax.f32 %v4419_v12, 0.0 }
 0x752   :  { %v4423_v2 = vadd.f32 1e-08, %v4421_v33 }
 0x753   :  { %v4370_v26 = vpop.xlane.xlu1 %4369 }
 0x754   :  { %v4414_v43 = vmul.f32 0.00024414063, %v4370_v26  ;;  %12111 = vrsqrt.f32 %v4423_v2 }
 0x756   :  { %v4418_v56 = vmul.f32 %v4414_v43, %v4414_v43 }
 0x757   :  { %v4412_v51 = vpop.xlane.xlu1 %4411 }
 0x758   :  { %v4416_v19 = vmul.f32 0.00024414063, %v4412_v51 }
 0x75a   :  { %v4420_v49 = vsub.f32 %v4416_v19, %v4418_v56 }
 0x75c   :  { %v4422_v62 = vmax.f32 %v4420_v49, 0.0 }
 0x75e   :  { %v4424_v10 = vadd.f32 1e-08, %v4422_v62 }
 0x760   :  { %12113 = vrsqrt.f32 %v4424_v10 }
 0x761   :  { %v12112_v40 = vpop.eup %12111 }
 0x762   :  { %v4926_v46 = vmul.f32 %v12112_v40, %v4413_v3 }
 0x764   :  { %v4928_v1 = vmul.f32 %v4926_v46, %v4923_v44 }
 0x766   :  { %v4930_v6 = vsub.f32 %v4925_v16, %v4928_v1 }
 0x768   :  { %v4953_v61 = vrot.slane %v4930_v6, %v15948_v22  ;;  %v4961_v11 = vrot.slane %v4930_v6, %v15962_v25  ;;  %v4957_v63 = vrot.slane %v4930_v6, %v15949_v9  ;;  %v4965_v54 = vrot.slane %v4930_v6, %v15963_v50 }
 0x76d   :  { %v13867_v5 = vpop.eup %12113 }
 0x76e   :  { %v4927_v35 = vmul.f32 %v13867_v5, %v4414_v43  ;;  %v4850_v31 = vpop.f32.mrf.mxu1 }
 0x76f   :  { %v4932_v52 = vmul.f32 %v12112_v40, %v4850_v31  ;;  %v4903_v41 = vpop.f32.mrf.mxu0 }
 0x770   :  { %v4929_v24 = vmul.f32 %v4927_v35, %v4923_v44  ;;  %v4934_v27 = vmul.f32 %v12112_v40, %v4903_v41  ;;  %v4852_v21 = vpop.f32.mrf.mxu1 }
 0x771   :  { %v4990_v7 = vadd.f32 %v4953_v61, %v4932_v52  ;;  %v4933_v36 = vmul.f32 %v12112_v40, %v4852_v21  ;;  %v4905_v29 = vpop.f32.mrf.mxu0 }
 0x772   :  { %v4931_v14 = vsub.f32 %v4925_v16, %v4929_v24  ;;  %v4992_v23 = vadd.f32 %v4961_v11, %v4934_v27  ;;  %v4935_v45 = vmul.f32 %v12112_v40, %v4905_v29  ;;  %v4854_v17 = vpop.f32.mrf.mxu1 }
 0x773   :  { %v4991_v18 = vadd.f32 %v4957_v63, %v4933_v36  ;;  %v4936_v28 = vmul.f32 %v12112_v40, %v4854_v17  ;;  %v4907_v15 = vpop.f32.mrf.mxu0  ;;  %v13874_v13 = vmax.f32 %v4990_v7, 0.0 }
 0x774   :  { %v13876_v47 = vmax.f32 %v4992_v23, 0.0  ;;  %v4993_v48 = vadd.f32 %v4965_v54, %v4935_v45  ;;  %v4938_v58 = vmul.f32 %v12112_v40, %v4907_v15  ;;  %v4856_v34 = vpop.f32.mrf.mxu1  ;;  %v4969_v12 = vrot.slane %v4931_v14, %v15948_v22 }
 0x775   :  { %v13878_v3 = vmax.f32 %v4991_v18, 0.0  ;;  %v4994_v59 = vadd.f32 %v4953_v61, %v4936_v28  ;;  %v4937_v0 = vmul.f32 %v12112_v40, %v4856_v34  ;;  %v4909_v30 = vpop.f32.mrf.mxu0  ;;  %v4977_v43 = vrot.slane %v4931_v14, %v15962_v25 }
 0x776   :  { %v13881_v33 = vmax.f32 %v4993_v48, 0.0  ;;  %v4996_v2 = vadd.f32 %v4961_v11, %v4938_v58  ;;  %v4939_v26 = vmul.f32 %v12112_v40, %v4909_v30  ;;  %v13887_v19 = vrot.slane %v4931_v14, %v15949_v9 }
 0x777   :  { %v13884_v51 = vmax.f32 %v4994_v59, 0.0  ;;  %v4995_v56 = vadd.f32 %v4957_v63, %v4937_v0  ;;  %v13890_v49 = vrot.slane %v4931_v14, %v15963_v50  ;;  %v5088_v62 = vmul.f32 %v13874_v13, %v13874_v13 }
 0x778   :  { %v5090_v10 = vmul.f32 %v13876_v47, %v13876_v47  ;;  %v13896_v46 = vmax.f32 %v4996_v2, 0.0  ;;  %v4997_v40 = vadd.f32 %v4965_v54, %v4939_v26  ;;  %v5089_v44 = vmul.f32 %v13878_v3, %v13878_v3 }
 0x779   :  { %v5022_v1 = vadd.f32 %v13884_v51, %v13874_v13  ;;  %v5092_v16 = vmul.f32 %v13884_v51, %v13884_v51  ;;  %v13904_v6 = vmax.f32 %v4995_v56, 0.0  ;;  %v13908_v35 = vmul.f32 %v13881_v33, %v13881_v33 }
 0x77a   :  { %v5036_v31 = vadd.f32 %v13896_v46, %v13876_v47  ;;  %v5094_v24 = vmul.f32 %v13896_v46, %v13896_v46  ;;  %v13914_v52 = vmax.f32 %v4997_v40, 0.0 }
 0x77b   :  { %v5023_v61 = vrot.slane %v5022_v1, 4  ;;  %v13916_v41 = vadd.f32 %v5092_v16, %v5088_v62  ;;  %v5029_v27 = vadd.f32 %v13904_v6, %v13878_v3  ;;  %v5093_v11 = vmul.f32 %v13904_v6, %v13904_v6 }
 0x77c   :  { %v5037_v36 = vrot.slane %v5036_v31, 4  ;;  %v13922_v63 = vadd.f32 %v5094_v24, %v5090_v10  ;;  %v13926_v29 = vadd.f32 %v13914_v52, %v13881_v33  ;;  %v13930_v14 = vmul.f32 %v13914_v52, %v13914_v52 }
 0x77d   :  { %v4860_v21 = vpop.f32.mrf.mxu1  ;;  %v4913_v7 = vpop.f32.mrf.mxu0  ;;  %v5024_v23 = vadd.f32 %v5023_v61, %v5022_v1  ;;  %v5030_v54 = vrot.slane %v5029_v27, 4  ;;  %v13933_v17 = vadd.f32 %v5093_v11, %v5089_v44  ;;  %v15965_v8 = vrot.slane %v13916_v41, 4 }
 0x77e   :  { %v4940_v15 = vmul.f32 %v13867_v5, %v4860_v21  ;;  %v4942_v48 = vmul.f32 %v13867_v5, %v4913_v7  ;;  %v5038_v56 = vadd.f32 %v5037_v36, %v5036_v31  ;;  %v5119_v20 = vrot.slane %v13922_v63, 4 }
 0x77f   :  { %v4862_v18 = vpop.f32.mrf.mxu1  ;;  %v4915_v28 = vpop.f32.mrf.mxu0  ;;  %v5031_v59 = vadd.f32 %v5030_v54, %v5029_v27  ;;  %v5112_v0 = vrot.slane %v13933_v17, 4  ;;  %v5025_v26 = vrot.slane %v5024_v23, 2  ;;  %v5106_v32 = vadd.f32 %v15965_v8, %v13916_v41 }
 0x780   :  { %v4941_v58 = vmul.f32 %v13867_v5, %v4862_v18  ;;  %v4943_v34 = vmul.f32 %v13867_v5, %v4915_v28  ;;  %v4998_v62 = vadd.f32 %v4969_v12, %v4940_v15  ;;  %v5000_v10 = vadd.f32 %v4977_v43, %v4942_v48 }
 0x781   :  { %v4864_v30 = vpop.f32.mrf.mxu1  ;;  %v4917_v2 = vpop.f32.mrf.mxu0  ;;  %v5026_v11 = vadd.f32 %v5025_v26, %v5024_v23  ;;  %v5032_v27 = vrot.slane %v5031_v59, 2  ;;  %v5113_v37 = vadd.f32 %v5112_v0, %v13933_v17 }
 0x782   :  { %v4999_v40 = vadd.f32 %v13887_v19, %v4941_v58  ;;  %v5001_v44 = vadd.f32 %v13890_v49, %v4943_v34  ;;  %v4944_v1 = vmul.f32 %v13867_v5, %v4864_v30  ;;  %v4946_v16 = vmul.f32 %v13867_v5, %v4917_v2 }
 0x783   :  { %v4866_v24 = vpop.f32.mrf.mxu1  ;;  %v4919_v61 = vpop.f32.mrf.mxu0  ;;  %v13944_v21 = vmax.f32 %v4998_v62, 0.0  ;;  %v13946_v7 = vmax.f32 %v5000_v10, 0.0  ;;  %v5027_v2 = vrot.slane %v5026_v11, 1  ;;  %v5033_v26 = vadd.f32 %v5032_v27, %v5031_v59 }
 0x784   :  { %v13948_v54 = vmax.f32 %v4999_v40, 0.0  ;;  %v13950_v31 = vmax.f32 %v5001_v44, 0.0  ;;  %v5002_v36 = vadd.f32 %v4969_v12, %v4944_v1  ;;  %v5004_v18 = vadd.f32 %v4977_v43, %v4946_v16 }
 0x785   :  { %v4945_v28 = vmul.f32 %v13867_v5, %v4866_v24  ;;  %v4947_v15 = vmul.f32 %v13867_v5, %v4919_v61  ;;  %v5096_v48 = vmul.f32 %v13944_v21, %v13944_v21  ;;  %v5098_v23 = vmul.f32 %v13946_v7, %v13946_v7 }
 0x786   :  { %v5097_v58 = vmul.f32 %v13948_v54, %v13948_v54  ;;  %v13962_v34 = vmul.f32 %v13950_v31, %v13950_v31  ;;  %v13964_v30 = vmax.f32 %v5002_v36, 0.0  ;;  %v13966_v12 = vmax.f32 %v5004_v18, 0.0 }
 0x787   :  { %v5003_v43 = vadd.f32 %v13887_v19, %v4945_v28  ;;  %v5005_v5 = vadd.f32 %v13890_v49, %v4947_v15  ;;  %v5039_v62 = vrot.slane %v5038_v56, 2  ;;  %v5044_v10 = vrot.slane %v13926_v29, 4 }
 0x788   :  { %v5050_v40 = vadd.f32 %v13964_v30, %v13944_v21  ;;  %v5100_v44 = vmul.f32 %v13964_v30, %v13964_v30  ;;  %v5064_v1 = vadd.f32 %v13966_v12, %v13946_v7  ;;  %v5102_v16 = vmul.f32 %v13966_v12, %v13966_v12 }
 0x789   :  { %v13979_v19 = vmax.f32 %v5003_v43, 0.0  ;;  %v13981_v49 = vmax.f32 %v5005_v5, 0.0  ;;  %v5028_v59 = vadd.f32 %v5027_v2, %v5026_v11  ;;  %v5034_v24 = vrot.slane %v5033_v26, 1 }
 0x78a   :  { %v5051_v61 = vrot.slane %v5050_v40, 4  ;;  %v5132_v27 = vadd.f32 %v5100_v44, %v5096_v48  ;;  %v5065_v36 = vrot.slane %v5064_v1, 4  ;;  %v13983_v18 = vadd.f32 %v5102_v16, %v5098_v23 }
 0x78b   :  { %15964 = vst [vmem:[#allocation38_spill] sm:$0xff] %v13981_v49  ;;  %v5057_v28 = vadd.f32 %v13979_v19, %v13948_v54  ;;  %v5101_v15 = vmul.f32 %v13979_v19, %v13979_v19  ;;  %v5071_v45 = vadd.f32 %v13981_v49, %v13950_v31  ;;  %v13993_v43 = vmul.f32 %v13981_v49, %v13981_v49 }
 0x78c   :  { %v5052_v11 = vadd.f32 %v5051_v61, %v5050_v40  ;;  %v5133_v5 = vrot.slane %v5132_v27, 4  ;;  %v5035_v2 = vadd.f32 %v5034_v24, %v5033_v26  ;;  %v5040_v48 = vadd.f32 %v5039_v62, %v5038_v56 }
 0x78d   :  { %v5058_v44 = vrot.slane %v5057_v28, 4  ;;  %v5139_v23 = vadd.f32 %v5101_v15, %v5097_v58  ;;  %v5045_v16 = vadd.f32 %v5044_v10, %v13926_v29  ;;  %v5107_v61 = vrot.slane %v5106_v32, 2 }
 0x78e   :  { %v5041_v38 = vrot.slane %v5040_v48, 1  ;;  %v5078_v42 = vadd.f32 %v5035_v2, %v5028_v59  ;;  %v5114_v56 = vrot.slane %v5113_v37, 2  ;;  %v5120_v58 = vadd.f32 %v5119_v20, %v13922_v63 }
 0x78f   :  { %v5059_v57 = vadd.f32 %v5058_v44, %v5057_v28  ;;  %v5140_v53 = vrot.slane %v5139_v23, 4  ;;  %v5046_v40 = vrot.slane %v5045_v16, 2  ;;  %v5125_v29 = vadd.f32 %v13930_v14, %v13908_v35 }
 0x790   :  { %v5042_v26 = vadd.f32 %v5041_v38, %v5040_v48  ;;  %v5108_v10 = vadd.f32 %v5107_v61, %v5106_v32  ;;  %v5053_v8 = vrot.slane %v5052_v11, 2  ;;  %v5115_v24 = vadd.f32 %v5114_v56, %v5113_v37 }
 0x791   :  { %v5047_v62 = vadd.f32 %v5046_v40, %v5045_v16  ;;  %v5060_v41 = vrot.slane %v5059_v57, 2  ;;  %v5121_v17 = vrot.slane %v5120_v58, 2  ;;  %v5126_v0 = vrot.slane %v5125_v29, 4 }
 0x792   :  { %v5079_v59 = vadd.f32 %v5078_v42, %v5042_v26  ;;  %v5109_v28 = vrot.slane %v5108_v10, 1  ;;  %v5054_v2 = vadd.f32 %v5053_v8, %v5052_v11  ;;  %v5116_v60 = vrot.slane %v5115_v24, 1 }
 0x793   :  { %v5048_v15 = vrot.slane %v5047_v62, 1  ;;  %v5061_v44 = vadd.f32 %v5060_v41, %v5059_v57  ;;  %v5122_v38 = vadd.f32 %v5121_v17, %v5120_v58  ;;  %v5127_v48 = vadd.f32 %v5126_v0, %v5125_v29 }
 0x794   :  { %v5066_v55 = vadd.f32 %v5065_v36, %v5064_v1  ;;  %v5110_v63 = vadd.f32 %v5109_v28, %v5108_v10  ;;  %v5055_v39 = vrot.slane %v5054_v2, 1  ;;  %v5117_v14 = vadd.f32 %v5116_v60, %v5115_v24 }
 0x795   :  { %v5049_v20 = vadd.f32 %v5048_v15, %v5047_v62  ;;  %v5062_v35 = vrot.slane %v5061_v44, 1  ;;  %v5123_v32 = vrot.slane %v5122_v38, 1  ;;  %v5128_v16 = vrot.slane %v5127_v48, 2 }
 0x796   :  { %v5067_v40 = vrot.slane %v5066_v55, 2  ;;  %v5056_v37 = vadd.f32 %v5055_v39, %v5054_v2  ;;  %v5072_v26 = vrot.slane %v5071_v45, 4  ;;  %v5160_v11 = vadd.f32 %v5117_v14, %v5110_v63 }
 0x797   :  { %v5080_v42 = vadd.f32 %v5079_v59, %v5049_v20  ;;  %v5063_v61 = vadd.f32 %v5062_v35, %v5061_v44  ;;  %v5124_v56 = vadd.f32 %v5123_v32, %v5122_v38  ;;  %v5129_v49 = vadd.f32 %v5128_v16, %v5127_v48 }
 0x798   :  { %v5068_v57 = vadd.f32 %v5067_v40, %v5066_v55  ;;  %v5073_v58 = vadd.f32 %v5072_v26, %v5071_v45  ;;  %v5134_v1 = vadd.f32 %v5133_v5, %v5132_v27  ;;  %v5141_v36 = vadd.f32 %v5140_v53, %v5139_v23  ;;  %v11595_v26 = vld [vmem:[#allocation8 + $0x570] ss:$8 sps:$4 sm:$0xff]  }
 0x799   :  { %5081 = vadd.xlane.f32.xlu0 %v5080_v42  ;;  %v5083_v29 = vadd.f32 %v5063_v61, %v5056_v37  ;;  %v5130_v62 = vrot.slane %v5129_v49, 1  ;;  %v5161_v10 = vadd.f32 %v5160_v11, %v5124_v56  ;;  %v5147_v60 = vrot.slane %v13983_v18, 4  ;;  %v11592_v42 = vld [vmem:[#allocation8 + $0x470] ss:$8 sps:$4 sm:$0xff]   ;;  %v11594_v37 = vld [vmem:[#allocation8 + $0x474] ss:$8 sps:$4 sm:$0xff]  }
 0x79a   :  { %v5069_v8 = vrot.slane %v5068_v57, 1  ;;  %v5074_v41 = vrot.slane %v5073_v58, 2  ;;  %v5135_v24 = vrot.slane %v5134_v1, 2  ;;  %v5142_v59 = vrot.slane %v5141_v36, 2  ;;  %v11597_v56 = vld [vmem:[#allocation8 + $0x574] ss:$8 sps:$4 sm:$0xff]   ;;  %6181 = vmatprep.subr.bf16.mxu1 %v11594_v37 }
 0x79b   :  { %v5153_v39 = vadd.f32 %v13993_v43, %v13962_v34  ;;  %v5131_v17 = vadd.f32 %v5130_v62, %v5129_v49  ;;  %v5148_v55 = vadd.f32 %v5147_v60, %v13983_v18  ;;  %6234 = vmatprep.subr.bf16.mxu0 %v11597_v56  ;;  %6182 = vmatpush1.bf16.msra.mxu1 %v11592_v42  ;;  %v11606_v62 = vld [vmem:[#allocation8 + $0x454] ss:$8 sps:$4 sm:$0xff]   ;;  %v11607_v60 = vld [vmem:[#allocation8 + $0x550] ss:$8 sps:$4 sm:$0xff]   ;;  %v11663_v56 = vld [vmem:[#allocation8 + $0x5c4] ss:$8 sps:$4 sm:$0xff]  }
 0x79c   :  { %v5070_v0 = vadd.f32 %v5069_v8, %v5068_v57  ;;  %v5075_v15 = vadd.f32 %v5074_v41, %v5073_v58  ;;  %v5136_v45 = vadd.f32 %v5135_v24, %v5134_v1  ;;  %v5143_v28 = vadd.f32 %v5142_v59, %v5141_v36  ;;  %6235 = vmatpush1.bf16.msra.mxu0 %v11595_v26  ;;  %v11600_v58 = vld [vmem:[#allocation8 + $0x464] ss:$8 sps:$4 sm:$0xff]   ;;  %v11598_v1 = vld [vmem:[#allocation8 + $0x460] ss:$8 sps:$4 sm:$0xff]   ;;  %v11604_v8 = vld [vmem:[#allocation8 + $0x450] ss:$8 sps:$4 sm:$0xff]  }
 0x79d   :  { %v5154_v27 = vrot.slane %v5153_v39, 4  ;;  %v5162_v53 = vadd.f32 %v5161_v10, %v5131_v17  ;;  %v5149_v23 = vrot.slane %v5148_v55, 2  ;;  %v11601_v36 = vld [vmem:[#allocation8 + $0x560] ss:$8 sps:$4 sm:$0xff]   ;;  %6183 = vmatprep.subr.bf16.mxu1 %v11600_v58  ;;  %v11609_v10 = vld [vmem:[#allocation8 + $0x554] ss:$8 sps:$4 sm:$0xff]  }
 0x79e   :  { %v5084_v5 = vadd.f32 %v5083_v29, %v5070_v0  ;;  %v5076_v2 = vrot.slane %v5075_v15, 1  ;;  %v5137_v44 = vrot.slane %v5136_v45, 1  ;;  %v5144_v38 = vrot.slane %v5143_v28, 1  ;;  %v11603_v29 = vld [vmem:[#allocation8 + $0x564] ss:$8 sps:$4 sm:$0xff]  }
 0x79f   :  { %v5155_v48 = vadd.f32 %v5154_v27, %v5153_v39  ;;  %5163 = vadd.xlane.f32.xlu0 %v5162_v53  ;;  %v5150_v20 = vadd.f32 %v5149_v23, %v5148_v55  ;;  %6236 = vmatprep.subr.bf16.mxu0 %v11603_v29  ;;  %v11612_v41 = vld [vmem:[#allocation8 + $0x444] ss:$8 sps:$4 sm:$0xff]   ;;  %v11610_v59 = vld [vmem:[#allocation8 + $0x440] ss:$8 sps:$4 sm:$0xff]   ;;  %v11618_v17 = vld [vmem:[#allocation8 + $0x434] ss:$8 sps:$4 sm:$0xff]  }
 0x7a0   :  { %v5077_v63 = vadd.f32 %v5076_v2, %v5075_v15  ;;  %v5138_v35 = vadd.f32 %v5137_v44, %v5136_v45  ;;  %v5145_v34 = vadd.f32 %v5144_v38, %v5143_v28  ;;  %6184 = vmatpush1.bf16.msra.mxu1 %v11598_v1  ;;  %6237 = vmatpush1.bf16.msra.mxu0 %v11601_v36  ;;  %v11615_v24 = vld [vmem:[#allocation8 + $0x544] ss:$8 sps:$4 sm:$0xff]   ;;  %v11613_v39 = vld [vmem:[#allocation8 + $0x540] ss:$8 sps:$4 sm:$0xff]   ;;  %v11621_v0 = vld [vmem:[#allocation8 + $0x534] ss:$8 sps:$4 sm:$0xff]  }
 0x7a1   :  { %v5156_v49 = vrot.slane %v5155_v48, 2  ;;  %v5151_v43 = vrot.slane %v5150_v20, 1  ;;  %6185 = vmatprep.subr.bf16.mxu1 %v11606_v62  ;;  %6238 = vmatprep.subr.bf16.mxu0 %v11609_v10  ;;  %v11616_v55 = vld [vmem:[#allocation8 + $0x430] ss:$8 sps:$4 sm:$0xff]   ;;  %v11624_v45 = vld [vmem:[#allocation8 + $0x424] ss:$8 sps:$4 sm:$0xff]  }
 0x7a2   :  { %v5085_v14 = vadd.f32 %v5084_v5, %v5077_v63  ;;  %v5165_v32 = vadd.f32 %v5145_v34, %v5138_v35  ;;  %v11619_v15 = vld [vmem:[#allocation8 + $0x530] ss:$8 sps:$4 sm:$0xff]   ;;  %v11627_v28 = vld [vmem:[#allocation8 + $0x524] ss:$8 sps:$4 sm:$0xff]   ;;  %v11622_v27 = vld [vmem:[#allocation8 + $0x420] ss:$8 sps:$4 sm:$0xff]  }
 0x7a3   :  { %v5157_v18 = vadd.f32 %v5156_v49, %v5155_v48  ;;  %v5152_v16 = vadd.f32 %v5151_v43, %v5150_v20  ;;  %v11625_v53 = vld [vmem:[#allocation8 + $0x520] ss:$8 sps:$4 sm:$0xff]   ;;  %v11630_v5 = vld [vmem:[#allocation8 + $0x414] ss:$8 sps:$4 sm:$0xff]   ;;  %v11628_v2 = vld [vmem:[#allocation8 + $0x410] ss:$8 sps:$4 sm:$0xff]  }
 0x7a4   :  { %5086 = vadd.xlane.f32.xlu1 %v5085_v14  ;;  %6186 = vmatpush1.bf16.msra.mxu1 %v11604_v8  ;;  %v11633_v23 = vld [vmem:[#allocation8 + $0x514] ss:$8 sps:$4 sm:$0xff]   ;;  %v11631_v44 = vld [vmem:[#allocation8 + $0x510] ss:$8 sps:$4 sm:$0xff]   ;;  %v11634_v38 = vld [vmem:[#allocation8 + $0x400] ss:$8 sps:$4 sm:$0xff]  }
 0x7a5   :  { %v5158_v40 = vrot.slane %v5157_v18, 1  ;;  %v5166_v61 = vadd.f32 %v5165_v32, %v5152_v16  ;;  %6239 = vmatpush1.bf16.msra.mxu0 %v11607_v60  ;;  %6187 = vmatprep.subr.bf16.mxu1 %v11612_v41  ;;  %v11636_v48 = vld [vmem:[#allocation8 + $0x404] ss:$8 sps:$4 sm:$0xff]   ;;  %v11637_v20 = vld [vmem:[#allocation8 + $0x500] ss:$8 sps:$4 sm:$0xff]  }
 0x7a6   :  { %6240 = vmatprep.subr.bf16.mxu0 %v11615_v24  ;;  %v11639_v63 = vld [vmem:[#allocation8 + $0x504] ss:$8 sps:$4 sm:$0xff]   ;;  %v11642_v35 = vld [vmem:[#allocation8 + $0x4f4] ss:$8 sps:$4 sm:$0xff]   ;;  %v11640_v49 = vld [vmem:[#allocation8 + $0x4f0] ss:$8 sps:$4 sm:$0xff]  }
 0x7a7   :  { %v5159_v11 = vadd.f32 %v5158_v40, %v5157_v18  ;;  %v11645_v34 = vld [vmem:[#allocation8 + $0x5f4] ss:$8 sps:$4 sm:$0xff]   ;;  %v11643_v43 = vld [vmem:[#allocation8 + $0x5f0] ss:$8 sps:$4 sm:$0xff]   ;;  %v11648_v14 = vld [vmem:[#allocation8 + $0x4e4] ss:$8 sps:$4 sm:$0xff]  }
 0x7a8   :  { %6188 = vmatpush1.bf16.msra.mxu1 %v11610_v59  ;;  %v11651_v18 = vld [vmem:[#allocation8 + $0x5e4] ss:$8 sps:$4 sm:$0xff]   ;;  %v11646_v32 = vld [vmem:[#allocation8 + $0x4e0] ss:$8 sps:$4 sm:$0xff]   ;;  %v11654_v40 = vld [vmem:[#allocation8 + $0x4d4] ss:$8 sps:$4 sm:$0xff]  }
 0x7a9   :  { %v5167_v57 = vadd.f32 %v5166_v61, %v5159_v11  ;;  %6241 = vmatpush1.bf16.msra.mxu0 %v11613_v39  ;;  %6189 = vmatprep.subr.bf16.mxu1 %v11618_v17  ;;  %v11649_v16 = vld [vmem:[#allocation8 + $0x5e0] ss:$8 sps:$4 sm:$0xff]   ;;  %v11657_v42 = vld [vmem:[#allocation8 + $0x5d4] ss:$8 sps:$4 sm:$0xff]   ;;  %v11652_v37 = vld [vmem:[#allocation8 + $0x4d0] ss:$8 sps:$4 sm:$0xff]  }
 0x7aa   :  { %6242 = vmatprep.subr.bf16.mxu0 %v11621_v0  ;;  %v11655_v61 = vld [vmem:[#allocation8 + $0x5d0] ss:$8 sps:$4 sm:$0xff]   ;;  %v11660_v26 = vld [vmem:[#allocation8 + $0x4c4] ss:$8 sps:$4 sm:$0xff]   ;;  %v11658_v11 = vld [vmem:[#allocation8 + $0x4c0] ss:$8 sps:$4 sm:$0xff]  }
 0x7ab   :  { %5168 = vadd.xlane.f32.xlu1 %v5167_v57  ;;  %v11661_v57 = vld [vmem:[#allocation8 + $0x5c0] ss:$8 sps:$4 sm:$0xff]   ;;  %v11666_v58 = vld [vmem:[#allocation8 + $0x4b4] ss:$8 sps:$4 sm:$0xff]   ;;  %v11664_v1 = vld [vmem:[#allocation8 + $0x4b0] ss:$8 sps:$4 sm:$0xff]  }
 0x7ac   :  { %6190 = vmatpush1.bf16.msra.mxu1 %v11616_v55  ;;  %v11669_v29 = vld [vmem:[#allocation8 + $0x5b4] ss:$8 sps:$4 sm:$0xff]   ;;  %v11667_v36 = vld [vmem:[#allocation8 + $0x5b0] ss:$8 sps:$4 sm:$0xff]   ;;  %v11672_v62 = vld [vmem:[#allocation8 + $0x4a4] ss:$8 sps:$4 sm:$0xff]  }
 0x7ad   :  { %6243 = vmatpush1.bf16.msra.mxu0 %v11619_v15  ;;  %6191 = vmatprep.subr.bf16.mxu1 %v11624_v45  ;;  %v11675_v10 = vld [vmem:[#allocation8 + $0x5a4] ss:$8 sps:$4 sm:$0xff]   ;;  %v11670_v8 = vld [vmem:[#allocation8 + $0x4a0] ss:$8 sps:$4 sm:$0xff]   ;;  %v11678_v41 = vld [vmem:[#allocation8 + $0x494] ss:$8 sps:$4 sm:$0xff]  }
 0x7ae   :  { %6244 = vmatprep.subr.bf16.mxu0 %v11627_v28  ;;  %v11673_v60 = vld [vmem:[#allocation8 + $0x5a0] ss:$8 sps:$4 sm:$0xff]   ;;  %v11681_v24 = vld [vmem:[#allocation8 + $0x594] ss:$8 sps:$4 sm:$0xff]   ;;  %v11676_v59 = vld [vmem:[#allocation8 + $0x490] ss:$8 sps:$4 sm:$0xff]  }
 0x7af   :  { %v11679_v39 = vld [vmem:[#allocation8 + $0x590] ss:$8 sps:$4 sm:$0xff]   ;;  %v11684_v17 = vld [vmem:[#allocation8 + $0x484] ss:$8 sps:$4 sm:$0xff]   ;;  %v11682_v55 = vld [vmem:[#allocation8 + $0x480] ss:$8 sps:$4 sm:$0xff]  }
 0x7b0   :  { %6192 = vmatpush1.bf16.msra.mxu1 %v11622_v27  ;;  %v11687_v0 = vld [vmem:[#allocation8 + $0x584] ss:$8 sps:$4 sm:$0xff]   ;;  %v11685_v15 = vld [vmem:[#allocation8 + $0x580] ss:$8 sps:$4 sm:$0xff]   ;;  %v5415_v27 = vld [vmem:[#allocation10 + $0x10] sm:$0xff] }
 0x7b1   :  { %6245 = vmatpush1.bf16.msra.mxu0 %v11625_v53  ;;  %6193 = vmatprep.subr.bf16.mxu1 %v11630_v5 }
 0x7b2   :  { %6246 = vmatprep.subr.bf16.mxu0 %v11633_v23 }
 0x7b4   :  { %6194 = vmatpush1.bf16.msra.mxu1 %v11628_v2  ;;  %v5417_v2 = vcombine.high %v5415_v27, %v5415_v27 }
 0x7b5   :  { %6247 = vmatpush1.bf16.msra.mxu0 %v11631_v44  ;;  %6195 = vmatprep.subr.bf16.mxu1 %v11636_v48 }
 0x7b6   :  { %6248 = vmatprep.subr.bf16.mxu0 %v11639_v63  ;;  %v11698_v63 = vld [vmem:[#allocation7 + $0x6ec] ss:$16 sps:$4 sm:$0xff]  }
 0x7b8   :  { %6196 = vmatpush1.bf16.msra.mxu1 %v11634_v38  ;;  %v11695_v38 = vld [vmem:[#allocation7 + $0x6e4] ss:$16 sps:$4 sm:$0xff]  }
 0x7b9   :  { %6249 = vmatpush1.bf16.msra.mxu0 %v11637_v20  ;;  %6197 = vmatprep.subr.bf16.mxu1 %v11642_v35  ;;  %v15966_v35 = vld [vmem:[#allocation43_spill] sm:$0xff] }
 0x7ba   :  { %6250 = vmatprep.subr.bf16.mxu0 %v11645_v34  ;;  %v5424_v34 = vrot.slane %v5415_v27, %v15966_v35 }
 0x7bc   :  { %6198 = vmatpush2.bf16.msra.mxu1 %v11640_v49  ;;  %v5431_v49 = vrot.slane %v5417_v2, %v15966_v35 }
 0x7bd   :  { %6251 = vmatpush2.bf16.msra.mxu0 %v11643_v43  ;;  %6199 = vmatprep.subr.bf16.mxu1 %v11648_v14 }
 0x7be   :  { %6252 = vmatprep.subr.bf16.mxu0 %v11651_v18  ;;  %v5432_v18 = vcombine.high %v5424_v34, %v5424_v34 }
 0x7c0   :  { %6200 = vmatpush2.bf16.msra.mxu1 %v11646_v32  ;;  %v5433_v32 = vcombine.high %v5431_v49, %v5431_v49 }
 0x7c1   :  { %6253 = vmatpush2.bf16.msra.mxu0 %v11649_v16  ;;  %6201 = vmatprep.subr.bf16.mxu1 %v11654_v40 }
 0x7c2   :  { %6254 = vmatprep.subr.bf16.mxu0 %v11657_v42 }
 0x7c4   :  { %6202 = vmatpush2.bf16.msra.mxu1 %v11652_v37  ;;  %v5546_v37 = vld [vmem:[#allocation11] sm:$0x22] }
 0x7c5   :  { %6255 = vmatpush2.bf16.msra.mxu0 %v11655_v61  ;;  %6203 = vmatprep.subr.bf16.mxu1 %v11660_v26  ;;  %v5470_v61 = vshrl.u32 %v5424_v34, 16 }
 0x7c6   :  { %6256 = vmatprep.subr.bf16.mxu0 %v11663_v56  ;;  %v5477_v56 = vshrl.u32 %v5432_v18, 16 }
 0x7c8   :  { %6204 = vmatpush2.bf16.msra.mxu1 %v11658_v11  ;;  %v5491_v11 = vshrl.u32 %v5433_v32, 16 }
 0x7c9   :  { %6257 = vmatpush2.bf16.msra.mxu0 %v11661_v57  ;;  %6205 = vmatprep.subr.bf16.mxu1 %v11666_v58  ;;  %v5484_v57 = vshrl.u32 %v5431_v49, 16 }
 0x7ca   :  { %6258 = vmatprep.subr.bf16.mxu0 %v11669_v29  ;;  %v10743_v29 = vcombine.low %v5546_v37, %v5546_v37 }
 0x7cc   :  { %6206 = vmatpush2.bf16.msra.mxu1 %v11664_v1  ;;  %v10744_v1 = vcombine.high %v5546_v37, %v5546_v37 }
 0x7cd   :  { %6259 = vmatpush2.bf16.msra.mxu0 %v11667_v36  ;;  %6207 = vmatprep.subr.bf16.mxu1 %v11672_v62  ;;  %v5547_v36 = vld [vmem:[#allocation11 + $0x8] sm:$0x22]  ;;  %v5442_v62 = vpack.i.b16 %v5432_v18, %v5432_v18  ;;  %v5189_v18 = vld [vmem:[#allocation17 + $0x2] ss:$8 sm:$0xf] }
 0x7ce   :  { %6260 = vmatprep.subr.bf16.mxu0 %v11675_v10  ;;  %v5471_v10 = vpack.i.b16 %v5470_v61, %v5470_v61 }
 0x7cf   :  { %v14022_v27 = vrot.slane %v5442_v62, %v15949_v9 }
 0x7d0   :  { %6208 = vmatpush2.bf16.msra.mxu1 %v11670_v8 }
 0x7d1   :  { %6261 = vmatpush2.bf16.msra.mxu0 %v11673_v60  ;;  %6209 = vmatprep.subr.bf16.mxu1 %v11678_v41  ;;  %v5478_v60 = vpack.i.b16 %v5477_v56, %v5477_v56  ;;  %v5492_v41 = vpack.i.b16 %v5491_v11, %v5491_v11 }
 0x7d2   :  { %6262 = vmatprep.subr.bf16.mxu0 %v11681_v24  ;;  %v10745_v24 = vcombine.low %v5547_v36, %v5547_v36 }
 0x7d3   :  { %v14031_v2 = vrot.slane %v5492_v41, %v15948_v22 }
 0x7d4   :  { %6210 = vmatpush2.bf16.msra.mxu1 %v11676_v59  ;;  %v10746_v59 = vcombine.high %v5547_v36, %v5547_v36 }
 0x7d5   :  { %6263 = vmatpush2.bf16.msra.mxu0 %v11679_v39  ;;  %6211 = vmatprep.subr.bf16.mxu1 %v11684_v17  ;;  %v5485_v39 = vpack.i.b16 %v5484_v57, %v5484_v57  ;;  %v5185_v17 = vld [vmem:[#allocation16 + $0x2] ss:$8 sm:$0xf] }
 0x7d6   :  { %6264 = vmatprep.subr.bf16.mxu0 %v11687_v0  ;;  %v5575_v0 = vpack.i.b16 %v10743_v29, %v10743_v29 }
 0x7d8   :  { %6212 = vmatpush2.bf16.msra.mxu1 %v11682_v55  ;;  %v5582_v55 = vpack.i.b16 %v10744_v1, %v10744_v1 }
 0x7d9   :  { %6265 = vmatpush2.bf16.msra.mxu0 %v11685_v15  ;;  %6830 = vmatprep.subr.bf16.mxu1 %v11695_v38  ;;  %v5456_v15 = vpack.i.b16 %v5433_v32, %v5433_v32  ;;  %v5449_v38 = vpack.i.b16 %v5431_v49, %v5431_v49  ;;  %v14037_v32 = vrot.slane %v5575_v0, %v15949_v9 }
 0x7da   :  { %6883 = vmatprep.subr.bf16.mxu0 %v11698_v63  ;;  %v5596_v63 = vpack.i.b16 %v10746_v59, %v10746_v59 }
 0x7db   :  { %v14060_v57 = vrot.slane %v5449_v38, %v15948_v22  ;;  %v14069_v1 = vrot.slane %v5449_v38, %v15949_v9 }
 0x7dc   :  { %v14066_v29 = vrot.slane %v5596_v63, %v15949_v9 }
 0x822   :  { %v5082_v45 = vpop.xlane.xlu0 %5081 }
 0x823   :  { %v14008_v28 = vmul.f32 0.00012207031, %v5082_v45  ;;  %v14019_v45 = vrot.slane %v5442_v62, %v15948_v22 }
 0x825   :  { %v5174_v5 = vmul.f32 %v14008_v28, %v14008_v28 }
 0x828   :  { %v5164_v53 = vpop.xlane.xlu0 %5163 }
 0x829   :  { %v5172_v23 = vmul.f32 0.00012207031, %v5164_v53  ;;  %v14025_v53 = vrot.slane %v5471_v10, %v15948_v22 }
 0x82b   :  { %v5176_v44 = vsub.f32 %v5172_v23, %v5174_v5  ;;  %v14028_v23 = vrot.slane %v5478_v60, %v15948_v22 }
 0x82d   :  { %v5178_v48 = vmax.f32 %v5176_v44, 0.0  ;;  %v5087_v20 = vpop.xlane.xlu1 %5086  ;;  %v5435_v44 = vpack.i.b16 %v5424_v34, %v5424_v34 }
 0x82e   :  { %v14014_v14 = vmul.f32 0.00012207031, %v5087_v20  ;;  %v5589_v20 = vpack.i.b16 %v10745_v24, %v10745_v24 }
 0x82f   :  { %v5180_v43 = vadd.f32 1e-08, %v5178_v48  ;;  %v14056_v56 = vrot.slane %v5435_v44, %v15949_v9 }
 0x830   :  { %v5175_v40 = vmul.f32 %v14014_v14, %v14014_v14 }
 0x831   :  { %12115 = vrsqrt.f32 %v5180_v43  ;;  %v14034_v43 = vrot.slane %v5485_v39, %v15948_v22 }
 0x834   :  { %v5169_v16 = vpop.xlane.xlu1 %5168 }
 0x835   :  { %v5173_v42 = vmul.f32 0.00012207031, %v5169_v16  ;;  %v14040_v16 = vrot.slane %v5582_v55, %v15949_v9 }
 0x837   :  { %v5177_v26 = vsub.f32 %v5173_v42, %v5175_v40  ;;  %v14043_v40 = vrot.slane %v5456_v15, %v15948_v22  ;;  %v14046_v42 = vrot.slane %v5456_v15, %v15949_v9 }
 0x839   :  { %v5179_v58 = vmax.f32 %v5177_v26, 0.0  ;;  %v14053_v26 = vrot.slane %v5435_v44, %v15948_v22 }
 0x83b   :  { %v5181_v8 = vadd.f32 1e-08, %v5179_v58 }
 0x83d   :  { %12117 = vrsqrt.f32 %v5181_v8 }
 0x83e   :  { %v12116_v5 = vpop.eup %12115 }
 0x83f   :  { %v5186_v48 = vmul.f32 %v12116_v5, %v5185_v17 }
 0x841   :  { %v5190_v34 = vmul.f32 %v5186_v48, %v14008_v28  ;;  %v5203_v49 = vrot.slane %v5186_v48, %v15949_v9  ;;  %v5211_v37 = vrot.slane %v5186_v48, %v15963_v50  ;;  %v5199_v61 = vrot.slane %v5186_v48, %v15948_v22 }
 0x842   :  { %v5207_v11 = vrot.slane %v5186_v48, %v15962_v25  ;;  %v14063_v28 = vrot.slane %v5589_v20, %v15949_v9 }
 0x843   :  { %v5192_v58 = vsub.f32 %v5189_v18, %v5190_v34  ;;  %v5237_v36 = vmul.f32 %v5203_v49, %v13878_v3  ;;  %v5241_v62 = vmul.f32 %v5203_v49, %v13904_v6  ;;  %v5239_v10 = vmul.f32 %v5211_v37, %v13881_v33 }
 0x844   :  { %v5243_v8 = vmul.f32 %v5211_v37, %v13914_v52  ;;  %v5236_v24 = vmul.f32 %v5199_v61, %v13874_v13  ;;  %v5240_v39 = vmul.f32 %v5199_v61, %v13884_v51  ;;  %v5238_v0 = vmul.f32 %v5207_v11, %v13876_v47 }
 0x845   :  { %v5261_v60 = vrot.slane %v5192_v58, %v15949_v9  ;;  %v5269_v41 = vrot.slane %v5192_v58, %v15963_v50  ;;  %v5257_v59 = vrot.slane %v5192_v58, %v15948_v22  ;;  %v5242_v3 = vmul.f32 %v5207_v11, %v13896_v46 }
 0x846   :  { %v5265_v6 = vrot.slane %v5192_v58, %v15962_v25 }
 0x847   :  { %v14083_v55 = vadd.f32 %v5261_v60, %v5237_v36  ;;  %v14085_v33 = vadd.f32 %v5261_v60, %v5241_v62  ;;  %v14087_v52 = vadd.f32 %v5269_v41, %v5239_v10  ;;  %v14089_v15 = vadd.f32 %v5269_v41, %v5243_v8 }
 0x848   :  { %v14091_v5 = vadd.f32 %v5257_v59, %v5236_v24  ;;  %v14093_v13 = vadd.f32 %v5257_v59, %v5240_v39  ;;  %v14095_v44 = vadd.f32 %v5265_v6, %v5238_v0  ;;  %v14097_v51 = vadd.f32 %v5265_v6, %v5242_v3 }
 0x849   :  { %v5311_v46 = vrot.slane %v14083_v55, 7  ;;  %v15803_v38 = vrot.slane %v14085_v33, 7  ;;  %v15801_v48 = vrot.slane %v14083_v55, 1  ;;  %v5363_v20 = vrot.slane %v14085_v33, 1 }
 0x84a   :  { %v12118_v47 = vpop.eup %12117  ;;  %v5407_v34 = vpack.c.bf16 %v14085_v33, %v14083_v55  ;;  %v5313_v49 = vrot.slane %v14087_v52, 7  ;;  %v15800_v37 = vrot.slane %v14089_v15, 7  ;;  %v15802_v58 = vrot.slane %v14087_v52, 1 }
 0x84b   :  { %v5187_v63 = vmul.f32 %v12118_v47, %v5185_v17  ;;  %v5335_v61 = vsel %vm1296_vm4, %v5311_v46, %v15803_v38  ;;  %v5383_v11 = vsel %vm1345_vm5, %v15801_v48, %v5363_v20  ;;  %v5365_v17 = vrot.slane %v14089_v15, 1 }
 0x84c   :  { %v14122_v60 = vmul.bf16 %v14028_v23, %v5407_v34  ;;  %v5337_v24 = vsel %vm1296_vm4, %v5313_v49, %v15800_v37  ;;  %v15967_v37 = vld [vmem:[#allocation38_spill] sm:$0xff] }
 0x84d   :  { %v5191_v36 = vmul.f32 %v5187_v63, %v14014_v14  ;;  %v5215_v62 = vrot.slane %v5187_v63, %v15948_v22  ;;  %v5223_v10 = vrot.slane %v5187_v63, %v15962_v25  ;;  %v5219_v8 = vrot.slane %v5187_v63, %v15949_v9 }
 0x84e   :  { %v5227_v41 = vrot.slane %v5187_v63, %v15963_v50  ;;  %v5385_v14 = vsel %vm1345_vm5, %v15802_v58, %v5365_v17  ;;  %v5409_v58 = vpack.c.bf16 %v14089_v15, %v14087_v52 }
 0x84f   :  { %v5244_v59 = vmul.f32 %v5215_v62, %v13944_v21  ;;  %v5246_v39 = vmul.f32 %v5223_v10, %v13946_v7  ;;  %v5248_v0 = vmul.f32 %v5215_v62, %v13964_v30  ;;  %v5250_v3 = vmul.f32 %v5223_v10, %v13966_v12 }
 0x850   :  { %v5193_v6 = vsub.f32 %v5189_v18, %v5191_v36  ;;  %v5245_v47 = vmul.f32 %v5219_v8, %v13948_v54  ;;  %v5249_v63 = vmul.f32 %v5219_v8, %v13979_v19  ;;  %v5247_v34 = vmul.f32 %v5227_v41, %v13950_v31 }
 0x851   :  { %v5251_v48 = vmul.f32 %v5227_v41, %v15967_v37  ;;  %v5310_v21 = vrot.slane %v14091_v5, 7  ;;  %v15804_v7 = vrot.slane %v14093_v13, 7  ;;  %v15806_v54 = vrot.slane %v14091_v5, 1 }
 0x852   :  { %v5277_v30 = vrot.slane %v5193_v6, %v15949_v9  ;;  %v5285_v12 = vrot.slane %v5193_v6, %v15963_v50  ;;  %v5273_v18 = vrot.slane %v5193_v6, %v15948_v22  ;;  %v5501_v19 = vmul.bf16 %v14031_v2, %v5409_v58  ;;  %v15970_v9 = vld [vmem:[#allocation44_spill] sm:$0xff] }
 0x853   :  { %v5334_v31 = vsel %vm1296_vm4, %v5310_v21, %v15804_v7  ;;  %v5362_v37 = vrot.slane %v14093_v13, 1  ;;  %v5406_v36 = vpack.c.bf16 %v14093_v13, %v14091_v5 }
 0x854   :  { %v14157_v62 = vadd.f32 %v5277_v30, %v5245_v47  ;;  %v14159_v10 = vadd.f32 %v5277_v30, %v5249_v63  ;;  %v14161_v8 = vadd.f32 %v5285_v12, %v5247_v34  ;;  %v14163_v41 = vadd.f32 %v5285_v12, %v5251_v48 }
 0x855   :  { %v14165_v38 = vadd.f32 %v5273_v18, %v5244_v59  ;;  %v14167_v58 = vadd.f32 %v5273_v18, %v5248_v0  ;;  %v5382_v7 = vsel %vm1345_vm5, %v15806_v54, %v5362_v37  ;;  %v5498_v35 = vmul.bf16 %v14025_v53, %v5406_v36 }
 0x856   :  { %v15809_v47 = vrot.slane %v14159_v10, 7  ;;  %v15810_v63 = vrot.slane %v14157_v62, 1  ;;  %v15811_v34 = vrot.slane %v14163_v41, 7  ;;  %v5369_v48 = vrot.slane %v14161_v8, 1 }
 0x857   :  { %v5281_v30 = vrot.slane %v5193_v6, %v15962_v25  ;;  %v5312_v12 = vrot.slane %v14095_v44, 7 }
 0x858   :  { %v5339_v18 = vsel %vm1296_vm4, %v15809_v47, %v5311_v46  ;;  %v5379_v36 = vsel %vm1345_vm5, %v5363_v20, %v15810_v63  ;;  %v5341_v54 = vsel %vm1296_vm4, %v15811_v34, %v5313_v49  ;;  %v5381_v6 = vsel %vm1345_vm5, %v5365_v17, %v5369_v48 }
 0x859   :  { %v5343_v0 = vpack.c.bf16 %v5335_v61, %v5339_v18  ;;  %v5391_v59 = vpack.c.bf16 %v5379_v36, %v5383_v11  ;;  %v5345_v50 = vpack.c.bf16 %v5337_v24, %v5341_v54  ;;  %v5393_v25 = vpack.c.bf16 %v5381_v6, %v5385_v14  ;;  %v15971_v61 = vld [vmem:[#allocation45_spill] sm:$0xff] }
 0x85a   :  { %v15968_v46 = vrot.slane %v14167_v58, 7  ;;  %v15969_v20 = vrot.slane %v14165_v38, 1  ;;  %v14206_v49 = vadd.f32 %v5281_v30, %v5246_v39  ;;  %v14208_v34 = vadd.f32 %v5281_v30, %v5250_v3 }
 0x85b   :  { %v5351_v17 = vmul.bf16 %v5343_v0, %v15970_v9  ;;  %v5399_v11 = vmul.bf16 %v5391_v59, %v15971_v61  ;;  %v5353_v24 = vmul.bf16 %v5345_v50, %v15970_v9  ;;  %v5401_v14 = vmul.bf16 %v5393_v25, %v15971_v61 }
 0x85c   :  { %v5338_v47 = vsel %vm1296_vm4, %v15968_v46, %v5310_v21  ;;  %v5378_v63 = vsel %vm1345_vm5, %v5362_v37, %v15969_v20  ;;  %v5316_v21 = vrot.slane %v14097_v51, 7  ;;  %v5324_v36 = vrot.slane %v14208_v34, 7 }
 0x85d   :  { %v5342_v54 = vpack.c.bf16 %v5334_v31, %v5338_v47  ;;  %v5390_v18 = vpack.c.bf16 %v5378_v63, %v5382_v7  ;;  %v5463_v37 = vmul.bf16 %v14019_v45, %v5351_v17  ;;  %v5531_v39 = vmul.bf16 %v14022_v27, %v5399_v11 }
 0x85e   :  { %v5465_v3 = vmul.bf16 %v14043_v40, %v5353_v24  ;;  %v5533_v0 = vmul.bf16 %v14046_v42, %v5401_v14  ;;  %v5336_v25 = vsel %vm1296_vm4, %v5312_v12, %v5316_v21  ;;  %v5340_v7 = vsel %vm1296_vm4, %v5324_v36, %v5312_v12 }
 0x85f   :  { %v5350_v59 = vmul.bf16 %v5342_v54, %v15970_v9  ;;  %v5398_v50 = vmul.bf16 %v5390_v18, %v15971_v61  ;;  %v5507_v31 = vadd.bf16 %v14122_v60, %v5463_v37  ;;  %v5344_v63 = vpack.c.bf16 %v5336_v25, %v5340_v7 }
 0x860   :  { %v5509_v47 = vadd.bf16 %v5501_v19, %v5465_v3  ;;  %v15813_v30 = vrot.slane %v14095_v44, 1  ;;  %v5364_v20 = vrot.slane %v14097_v51, 1  ;;  %v15814_v17 = vrot.slane %v14206_v49, 1 }
 0x861   :  { %v5462_v6 = vmul.bf16 %v14053_v26, %v5350_v59  ;;  %v5530_v46 = vmul.bf16 %v14056_v56, %v5398_v50  ;;  %v5539_v11 = vadd.bf16 %v5531_v39, %v5507_v31  ;;  %v5352_v14 = vmul.bf16 %v5344_v63, %v15970_v9 }
 0x862   :  { %v5541_v24 = vadd.bf16 %v5533_v0, %v5509_v47  ;;  %v5408_v12 = vpack.c.bf16 %v14097_v51, %v14095_v44  ;;  %v5380_v19 = vsel %vm1345_vm5, %v5364_v20, %v15814_v17  ;;  %v5384_v54 = vsel %vm1345_vm5, %v15813_v30, %v5364_v20 }
 0x863   :  { %v5506_v60 = vadd.bf16 %v5498_v35, %v5462_v6  ;;  %v5319_v18 = vrot.slane %v14157_v62, 7  ;;  %v15972_v37 = vmov 0   ;;  %v5392_v50 = vpack.c.bf16 %v5380_v19, %v5384_v54 }
 0x864   :  { %v5549_v39 = vmax.bf16 %v15972_v37, %v5539_v11  ;;  %v5557_v3 = vmin.bf16 %v15972_v37, %v5539_v11  ;;  %v5551_v0 = vmax.bf16 %v15972_v37, %v5541_v24  ;;  %v5559_v35 = vmin.bf16 %v15972_v37, %v5541_v24 }
 0x865   :  { %v5538_v59 = vadd.bf16 %v5530_v46, %v5506_v60  ;;  %v5464_v25 = vmul.bf16 %v14060_v57, %v5352_v14  ;;  %v5500_v7 = vmul.bf16 %v14034_v43, %v5408_v12  ;;  %v15973_v63 = vrot.slane %v14159_v10, 7 }
 0x866   :  { %v5603_v31 = vmul.bf16 %v14040_v16, %v5557_v3  ;;  %v5605_v47 = vmul.bf16 %v14066_v29, %v5559_v35  ;;  %v15974_v20 = vrot.slane %v14085_v33, 7  ;;  %v5400_v14 = vmul.bf16 %v5392_v50, %v15971_v61 }
 0x867   :  { %v5327_v6 = vsel %vm1296_vm4, %v5319_v18, %v15973_v63  ;;  %v5548_v46 = vmax.bf16 %v15972_v37, %v5538_v59  ;;  %v5556_v24 = vmin.bf16 %v15972_v37, %v5538_v59  ;;  %v5508_v12 = vadd.bf16 %v5500_v7, %v5464_v25 }
 0x868   :  { %v5331_v11 = vsel %vm1296_vm4, %v15974_v20, %v5319_v18  ;;  %v5611_v60 = vadd.bf16 %v5603_v31, %v5549_v39  ;;  %v5613_v19 = vadd.bf16 %v5605_v47, %v5551_v0  ;;  %v5371_v3 = vrot.slane %v14159_v10, 1  ;;  %v11693_v39 = vld [vmem:[#allocation7 + $0x6e0] ss:$16 sps:$4 sm:$0xff]   ;;  %v11701_v47 = vld [vmem:[#allocation7 + $0x6c4] ss:$16 sps:$4 sm:$0xff]  }
 0x869   :  { %v5347_v54 = vpack.c.bf16 %v5327_v6, %v5331_v11  ;;  %v5602_v35 = vmul.bf16 %v14037_v32, %v5556_v24  ;;  %v5532_v63 = vmul.bf16 %v14069_v1, %v5400_v14  ;;  %v5411_v33 = vpack.c.bf16 %v14159_v10, %v14157_v62 }
 0x86a   :  { %v5321_v18 = vrot.slane %v14161_v8, 7  ;;  %v5619_v20 = vunpack.c.l.bf16 %v5611_v60  ;;  %v5623_v30 = vunpack.c.h.bf16 %v5611_v60  ;;  %6213 = vmatprep.mubr.bf16.mxu1 %v5611_v60  ;;  %v14273_v59 = vunpack.c.l.bf16 %v5613_v19  ;;  %6266 = vmatprep.mubr.bf16.mxu0 %v5613_v19 }
 0x86b   :  { %v14275_v50 = vunpack.c.h.bf16 %v5613_v19  ;;  %v14277_v0 = vadd.bf16 %v5602_v35, %v5548_v46  ;;  %v5540_v25 = vadd.bf16 %v5532_v63, %v5508_v12  ;;  %v5355_v7 = vmul.bf16 %v5347_v54, %v15970_v9 }
 0x86c   :  { %v15975_v31 = vrot.slane %v14157_v62, 1  ;;  %v14284_v6 = vadd.f32 %v5623_v30, %v5619_v20  ;;  %v5701_v11 = vmul.f32 %v5619_v20, %v5619_v20  ;;  %v5705_v24 = vmul.f32 %v5623_v30, %v5623_v30  ;;  %v11699_v20 = vld [vmem:[#allocation7 + $0x6c0] ss:$16 sps:$4 sm:$0xff]  }
 0x86d   :  { %v14288_v14 = vmul.f32 %v14273_v59, %v14273_v59  ;;  %v14292_v46 = vmul.f32 %v14275_v50, %v14275_v50  ;;  %6214 = vmatmul.mubr.bf16.vlgmr.msra.gmra.mxu1 %v14277_v0  ;;  %v5550_v62 = vmax.bf16 %v15972_v37, %v5540_v25  ;;  %v5558_v12 = vmin.bf16 %v15972_v37, %v5540_v25 }
 0x86e   :  { %v5375_v10 = vsel %vm1345_vm5, %v15975_v31, %v5371_v3  ;;  %v15976_v60 = vrot.slane %v14083_v55, 1  ;;  %v5642_v30 = vrot.slane %v14284_v6, 4  ;;  %v14302_v54 = vadd.f32 %v5705_v24, %v5701_v11  ;;  %6831 = vmatpush1.bf16.msra.mxu1 %v11693_v39 }
 0x86f   :  { %v5467_v63 = vmul.bf16 %v14019_v45, %v5355_v7  ;;  %v5604_v31 = vmul.bf16 %v14063_v28, %v5558_v12  ;;  %v5503_v17 = vmul.bf16 %v14028_v23, %v5411_v33  ;;  %v15977_v25 = vrot.slane %v14163_v41, 7  ;;  %6832 = vmatprep.subr.bf16.mxu1 %v11701_v47  ;;  %v11696_v23 = vld [vmem:[#allocation7 + $0x6e8] ss:$16 sps:$4 sm:$0xff]  }
 0x870   :  { %v5387_v19 = vsel %vm1345_vm5, %v5371_v3, %v15976_v60  ;;  %v15978_v3 = vrot.slane %v14089_v15, 7  ;;  %v5373_v39 = vrot.slane %v14163_v41, 1  ;;  %v5413_v7 = vpack.c.bf16 %v14163_v41, %v14161_v8  ;;  %v11704_v60 = vld [vmem:[#allocation7 + $0x6cc] ss:$16 sps:$4 sm:$0xff]  }
 0x871   :  { %v5395_v35 = vpack.c.bf16 %v5387_v19, %v5375_v10  ;;  %v5329_v55 = vsel %vm1296_vm4, %v5321_v18, %v15977_v25  ;;  %v14319_v33 = vadd.bf16 %v5604_v31, %v5550_v62  ;;  %v5511_v24 = vadd.bf16 %v5503_v17, %v5467_v63  ;;  %v11707_v19 = vld [vmem:[#allocation7 + $0x6a4] ss:$16 sps:$4 sm:$0xff]   ;;  %v11705_v62 = vld [vmem:[#allocation7 + $0x6a0] ss:$16 sps:$4 sm:$0xff]  }
 0x872   :  { %v5333_v11 = vsel %vm1296_vm4, %v15978_v3, %v5321_v18  ;;  %v5318_v12 = vrot.slane %v14165_v38, 7  ;;  %v5370_v15 = vrot.slane %v14167_v58, 1  ;;  %v15979_v41 = vrot.slane %v14087_v52, 1  ;;  %6833 = vmatpush1.bf16.msra.mxu1 %v11699_v20 }
 0x873   :  { %v5403_v10 = vmul.bf16 %v5395_v35, %v15971_v61  ;;  %v5349_v45 = vpack.c.bf16 %v5329_v55, %v5333_v11  ;;  %v5377_v35 = vsel %vm1345_vm5, %v5369_v48, %v5373_v39  ;;  %6267 = vmatmul.mubr.bf16.vlgmr.msra.gmra.mxu0 %v14319_v33  ;;  %v5505_v31 = vmul.bf16 %v14031_v2, %v5413_v7  ;;  %v11702_v2 = vld [vmem:[#allocation7 + $0x6c8] ss:$16 sps:$4 sm:$0xff]   ;;  %v11710_v7 = vld [vmem:[#allocation7 + $0x6ac] ss:$16 sps:$4 sm:$0xff]  }
 0x874   :  { %v5389_v17 = vsel %vm1345_vm5, %v5373_v39, %v15979_v41  ;;  %v15981_v25 = vrot.slane %v14093_v13, 7  ;;  %v15982_v3 = vrot.slane %v14165_v38, 1  ;;  %6884 = vmatpush1.bf16.msra.mxu0 %v11696_v23  ;;  %v5410_v39 = vpack.c.bf16 %v14167_v58, %v14165_v38  ;;  %6834 = vmatprep.subr.bf16.mxu1 %v11707_v19 }
 0x875   :  { %v5535_v18 = vmul.bf16 %v14022_v27, %v5403_v10  ;;  %v5357_v47 = vmul.bf16 %v5349_v45, %v15970_v9  ;;  %v5397_v63 = vpack.c.bf16 %v5389_v17, %v5377_v35  ;;  %v15980_v27 = vrot.slane %v14167_v58, 7  ;;  %6885 = vmatprep.subr.bf16.mxu0 %v11704_v60 }
 0x876   :  { %v5330_v52 = vsel %vm1296_vm4, %v15981_v25, %v5318_v12  ;;  %v5374_v11 = vsel %vm1345_vm5, %v15982_v3, %v5370_v15  ;;  %v15983_v45 = vrot.slane %v14091_v5, 1  ;;  %6835 = vmatpush1.bf16.msra.mxu1 %v11705_v62  ;;  %v5372_v35 = vrot.slane %v14208_v34, 1 }
 0x877   :  { %v5326_v8 = vsel %vm1296_vm4, %v5318_v12, %v15980_v27  ;;  %v5543_v48 = vadd.bf16 %v5535_v18, %v5511_v24  ;;  %v5469_v55 = vmul.bf16 %v14043_v40, %v5357_v47  ;;  %v5405_v10 = vmul.bf16 %v5397_v63, %v15971_v61 }
 0x878   :  { %v5346_v20 = vpack.c.bf16 %v5326_v8, %v5330_v52  ;;  %v5386_v13 = vsel %vm1345_vm5, %v5370_v15, %v15983_v45  ;;  %v5320_v40 = vrot.slane %v14206_v49, 7  ;;  %v5502_v15 = vmul.bf16 %v14025_v53, %v5410_v39  ;;  %6886 = vmatpush1.bf16.msra.mxu0 %v11702_v2 }
 0x879   :  { %v5553_v24 = vmax.bf16 %v15972_v37, %v5543_v48  ;;  %v5561_v23 = vmin.bf16 %v15972_v37, %v5543_v48  ;;  %v5513_v12 = vadd.bf16 %v5505_v31, %v5469_v55  ;;  %v5537_v5 = vmul.bf16 %v14046_v42, %v5405_v10  ;;  %v11708_v42 = vld [vmem:[#allocation7 + $0x6a8] ss:$16 sps:$4 sm:$0xff]   ;;  %6887 = vmatprep.subr.bf16.mxu0 %v11710_v7 }
 0x87a   :  { %v5354_v18 = vmul.bf16 %v5346_v20, %v15970_v9  ;;  %v5394_v47 = vpack.c.bf16 %v5386_v13, %v5374_v11  ;;  %v5328_v38 = vsel %vm1296_vm4, %v5320_v40, %v5324_v36  ;;  %v5332_v19 = vsel %vm1296_vm4, %v5316_v21, %v5320_v40 }
 0x87b   :  { %v5607_v58 = vmul.bf16 %v14040_v16, %v5561_v23  ;;  %v5545_v41 = vadd.bf16 %v5537_v5, %v5513_v12  ;;  %v5348_v17 = vpack.c.bf16 %v5328_v38, %v5332_v19  ;;  %v5412_v36 = vpack.c.bf16 %v14208_v34, %v14206_v49 }
 0x87c   :  { %v5466_v60 = vmul.bf16 %v14053_v26, %v5354_v18  ;;  %v5402_v53 = vmul.bf16 %v5394_v47, %v15971_v61  ;;  %v15984_v26 = vrot.slane %v14206_v49, 1  ;;  %v15985_v21 = vrot.slane %v14095_v44, 1  ;;  %6888 = vmatpush1.bf16.msra.mxu0 %v11708_v42 }
 0x87d   :  { %v5615_v16 = vadd.bf16 %v5607_v58, %v5553_v24  ;;  %v5555_v31 = vmax.bf16 %v15972_v37, %v5545_v41  ;;  %v5563_v27 = vmin.bf16 %v15972_v37, %v5545_v41  ;;  %v5356_v34 = vmul.bf16 %v5348_v17, %v15970_v9 }
 0x87e   :  { %v5510_v62 = vadd.bf16 %v5502_v15, %v5466_v60  ;;  %v5376_v51 = vsel %vm1345_vm5, %v15984_v26, %v5372_v35  ;;  %v5388_v63 = vsel %vm1345_vm5, %v5372_v35, %v15985_v21  ;;  %v5534_v8 = vmul.bf16 %v14056_v56, %v5402_v53 }
 0x87f   :  { %v5627_v25 = vunpack.c.l.bf16 %v5615_v16  ;;  %v5631_v52 = vunpack.c.h.bf16 %v5615_v16  ;;  %6223 = vmatprep.mubr.bf16.mxu1 %v5615_v16  ;;  %v5396_v49 = vpack.c.bf16 %v5388_v63, %v5376_v51  ;;  %v5504_v48 = vmul.bf16 %v14034_v43, %v5412_v36 }
 0x880   :  { %v5609_v44 = vmul.bf16 %v14066_v29, %v5563_v27  ;;  %v5542_v55 = vadd.bf16 %v5534_v8, %v5510_v62  ;;  %v5468_v20 = vmul.bf16 %v14060_v57, %v5356_v34  ;;  %v5618_v3 = vunpack.c.l.bf16 %v14277_v0 }
 0x881   :  { %v14391_v11 = vadd.f32 %v5631_v52, %v5627_v25  ;;  %v5709_v2 = vmul.f32 %v5627_v25, %v5627_v25  ;;  %v5713_v56 = vmul.f32 %v5631_v52, %v5631_v52  ;;  %v5404_v10 = vmul.bf16 %v5396_v49, %v15971_v61 }
 0x882   :  { %v5617_v45 = vadd.bf16 %v5609_v44, %v5555_v31  ;;  %v5552_v13 = vmax.bf16 %v15972_v37, %v5542_v55  ;;  %v5560_v39 = vmin.bf16 %v15972_v37, %v5542_v55  ;;  %v5512_v43 = vadd.bf16 %v5504_v48, %v5468_v20 }
 0x883   :  { %v5670_v40 = vrot.slane %v14391_v11, 4  ;;  %v14397_v29 = vadd.f32 %v5713_v56, %v5709_v2  ;;  %v5536_v57 = vmul.bf16 %v14069_v1, %v5404_v10  ;;  %v5620_v7 = vunpack.c.l.bf16 %v14319_v33 }
 0x884   :  { %v14401_v24 = vunpack.c.l.bf16 %v5617_v45  ;;  %v14403_v23 = vunpack.c.h.bf16 %v5617_v45  ;;  %6276 = vmatprep.mubr.bf16.mxu0 %v5617_v45  ;;  %v5606_v12 = vmul.bf16 %v14037_v32, %v5560_v39  ;;  %v5622_v18 = vunpack.c.h.bf16 %v14277_v0 }
 0x885   :  { %v5544_v5 = vadd.bf16 %v5536_v57, %v5512_v43  ;;  %v5624_v47 = vunpack.c.h.bf16 %v14319_v33  ;;  %v5643_v15 = vadd.f32 %v5642_v30, %v14284_v6  ;;  %v5655_v1 = vadd.f32 %v14275_v50, %v14273_v59 }
 0x886   :  { %v14415_v38 = vmul.f32 %v14401_v24, %v14401_v24  ;;  %v14419_v58 = vmul.f32 %v14403_v23, %v14403_v23  ;;  %v5614_v32 = vadd.bf16 %v5606_v12, %v5552_v13  ;;  %v5634_v0 = vadd.f32 %v5622_v18, %v5618_v3 }
 0x887   :  { %v5554_v60 = vmax.bf16 %v15972_v37, %v5544_v5  ;;  %v5562_v33 = vmin.bf16 %v15972_v37, %v5544_v5  ;;  %v5644_v19 = vrot.slane %v5643_v15, 2  ;;  %v5648_v35 = vadd.f32 %v5624_v47, %v5620_v7 }
 0x888   :  { %v5626_v6 = vunpack.c.l.bf16 %v5614_v32  ;;  %v5630_v30 = vunpack.c.h.bf16 %v5614_v32  ;;  %6224 = vmatmul.mubr.bf16.gmra.mxu1 %v5614_v32  ;;  %v5635_v59 = vrot.slane %v5634_v0, 4  ;;  %v5656_v50 = vrot.slane %v5655_v1, 4 }
 0x889   :  { %v5608_v42 = vmul.bf16 %v14063_v28, %v5562_v33  ;;  %v5645_v41 = vadd.f32 %v5644_v19, %v5643_v15  ;;  %v5649_v53 = vrot.slane %v5648_v35, 4  ;;  %v5700_v17 = vmul.f32 %v5618_v3, %v5618_v3 }
 0x88a   :  { %v5662_v36 = vadd.f32 %v5630_v30, %v5626_v6  ;;  %v5708_v16 = vmul.f32 %v5626_v6, %v5626_v6  ;;  %v5712_v62 = vmul.f32 %v5630_v30, %v5630_v30  ;;  %v5636_v26 = vadd.f32 %v5635_v59, %v5634_v0 }
 0x88b   :  { %v5616_v51 = vadd.bf16 %v5608_v42, %v5554_v60  ;;  %v5646_v21 = vrot.slane %v5645_v41, 1  ;;  %v5650_v63 = vadd.f32 %v5649_v53, %v5648_v35  ;;  %v5657_v31 = vadd.f32 %v5656_v50, %v5655_v1 }
 0x88c   :  { %v5663_v27 = vrot.slane %v5662_v36, 4  ;;  %v14424_v8 = vadd.f32 %v5712_v62, %v5708_v16  ;;  %v5637_v34 = vrot.slane %v5636_v26, 2  ;;  %v5702_v25 = vmul.f32 %v5620_v7, %v5620_v7 }
 0x88d   :  { %v5628_v52 = vunpack.c.l.bf16 %v5616_v51  ;;  %v5632_v49 = vunpack.c.h.bf16 %v5616_v51  ;;  %6277 = vmatmul.mubr.bf16.gmra.mxu0 %v5616_v51  ;;  %v5647_v28 = vadd.f32 %v5646_v21, %v5645_v41  ;;  %v5651_v48 = vrot.slane %v5650_v63, 2 }
 0x88e   :  { %v5638_v44 = vadd.f32 %v5637_v34, %v5636_v26  ;;  %v5658_v55 = vrot.slane %v5657_v31, 2  ;;  %v5704_v20 = vmul.f32 %v5622_v18, %v5622_v18  ;;  %v5706_v3 = vmul.f32 %v5624_v47, %v5624_v47 }
 0x88f   :  { %v5676_v2 = vadd.f32 %v5632_v49, %v5628_v52  ;;  %v14426_v56 = vmul.f32 %v5628_v52, %v5628_v52  ;;  %v14428_v10 = vmul.f32 %v5632_v49, %v5632_v49  ;;  %v5652_v45 = vadd.f32 %v5651_v48, %v5650_v63 }
 0x890   :  { %v5639_v13 = vrot.slane %v5638_v44, 1  ;;  %v5659_v39 = vadd.f32 %v5658_v55, %v5657_v31  ;;  %v5716_v43 = vadd.f32 %v5704_v20, %v5700_v17  ;;  %v5724_v57 = vrot.slane %v14302_v54, 4 }
 0x891   :  { %v5653_v7 = vrot.slane %v5652_v45, 1  ;;  %v5730_v12 = vadd.f32 %v5706_v3, %v5702_v25  ;;  %v5737_v5 = vadd.f32 %v14292_v46, %v14288_v14  ;;  %v5664_v15 = vadd.f32 %v5663_v27, %v5662_v36 }
 0x892   :  { %v5640_v1 = vadd.f32 %v5639_v13, %v5638_v44  ;;  %v5660_v18 = vrot.slane %v5659_v39, 1  ;;  %v5717_v47 = vrot.slane %v5716_v43, 4  ;;  %v5725_v32 = vadd.f32 %v5724_v57, %v14302_v54 }
 0x893   :  { %v5654_v0 = vadd.f32 %v5653_v7, %v5652_v45  ;;  %v5731_v60 = vrot.slane %v5730_v12, 4  ;;  %v5738_v33 = vrot.slane %v5737_v5, 4  ;;  %v5665_v19 = vrot.slane %v5664_v15, 2 }
 0x894   :  { %v5661_v35 = vadd.f32 %v5660_v18, %v5659_v39  ;;  %v5690_v6 = vadd.f32 %v5647_v28, %v5640_v1  ;;  %v5718_v30 = vadd.f32 %v5717_v47, %v5716_v43  ;;  %v5726_v59 = vrot.slane %v5725_v32, 2 }
 0x895   :  { %v5732_v50 = vadd.f32 %v5731_v60, %v5730_v12  ;;  %v5739_v42 = vadd.f32 %v5738_v33, %v5737_v5  ;;  %v5666_v41 = vadd.f32 %v5665_v19, %v5664_v15  ;;  %v5671_v14 = vadd.f32 %v5670_v40, %v14391_v11 }
 0x896   :  { %v5691_v46 = vadd.f32 %v5690_v6, %v5654_v0  ;;  %v5719_v53 = vrot.slane %v5718_v30, 2  ;;  %v5727_v17 = vadd.f32 %v5726_v59, %v5725_v32  ;;  %v5677_v36 = vrot.slane %v5676_v2, 4 }
 0x897   :  { %v5733_v54 = vrot.slane %v5732_v50, 2  ;;  %v5740_v16 = vrot.slane %v5739_v42, 2  ;;  %v5667_v62 = vrot.slane %v5666_v41, 1  ;;  %v5672_v26 = vrot.slane %v5671_v14, 2 }
 0x898   :  { %v5692_v51 = vadd.f32 %v5691_v46, %v5661_v35  ;;  %v5720_v21 = vadd.f32 %v5719_v53, %v5718_v30  ;;  %v5728_v63 = vrot.slane %v5727_v17, 1  ;;  %v5678_v31 = vadd.f32 %v5677_v36, %v5676_v2  ;;  %v11713_v36 = vld [vmem:[#allocation7 + $0x684] ss:$16 sps:$4 sm:$0xff]  }
 0x899   :  { %v5734_v27 = vadd.f32 %v5733_v54, %v5732_v50  ;;  %v5741_v34 = vadd.f32 %v5740_v16, %v5739_v42  ;;  %v5668_v25 = vadd.f32 %v5667_v62, %v5666_v41  ;;  %v5673_v52 = vadd.f32 %v5672_v26, %v5671_v14  ;;  %v11714_v54 = vld [vmem:[#allocation7 + $0x688] ss:$16 sps:$4 sm:$0xff]   ;;  %v11716_v26 = vld [vmem:[#allocation7 + $0x68c] ss:$16 sps:$4 sm:$0xff]   ;;  %6836 = vmatprep.subr.bf16.mxu1 %v11713_v36  ;;  %v11783_v36 = vld [vmem:[#allocation7 + $0x700] ss:$16 sps:$4 sm:$0xff]  }
 0x89a   :  { %5693 = vadd.xlane.f32.xlu0 %v5692_v51  ;;  %v5721_v49 = vrot.slane %v5720_v21, 1  ;;  %v5729_v28 = vadd.f32 %v5728_v63, %v5727_v17  ;;  %v5679_v11 = vrot.slane %v5678_v31, 2  ;;  %v5683_v40 = vadd.f32 %v14403_v23, %v14401_v24  ;;  %v11711_v17 = vld [vmem:[#allocation7 + $0x680] ss:$16 sps:$4 sm:$0xff]   ;;  %6889 = vmatprep.subr.bf16.mxu0 %v11716_v26 }
 0x89b   :  { %v5735_v48 = vrot.slane %v5734_v27, 1  ;;  %v5742_v44 = vrot.slane %v5741_v34, 1  ;;  %v5674_v55 = vrot.slane %v5673_v52, 1  ;;  %v5745_v20 = vrot.slane %v14424_v8, 4  ;;  %6837 = vmatpush1.bf16.msra.mxu1 %v11711_v17  ;;  %6890 = vmatpush1.bf16.msra.mxu0 %v11714_v54  ;;  %v11788_v17 = vld [vmem:[#allocation7 + $0x70c] ss:$16 sps:$4 sm:$0xff]  }
 0x89c   :  { %v5722_v3 = vadd.f32 %v5721_v49, %v5720_v21  ;;  %v5680_v45 = vadd.f32 %v5679_v11, %v5678_v31  ;;  %v5684_v13 = vrot.slane %v5683_v40, 4  ;;  %v5752_v2 = vrot.slane %v14397_v29, 4  ;;  %v11717_v49 = vld [vmem:[#allocation7 + $0x660] ss:$16 sps:$4 sm:$0xff]   ;;  %v11720_v11 = vld [vmem:[#allocation7 + $0x668] ss:$16 sps:$4 sm:$0xff]  }
 0x89d   :  { %v5736_v39 = vadd.f32 %v5735_v48, %v5734_v27  ;;  %v5675_v43 = vadd.f32 %v5674_v55, %v5673_v52  ;;  %v5746_v57 = vadd.f32 %v5745_v20, %v14424_v8  ;;  %v5743_v24 = vadd.f32 %v5742_v44, %v5741_v34  ;;  %v11725_v48 = vld [vmem:[#allocation7 + $0x644] ss:$16 sps:$4 sm:$0xff]   ;;  %v11728_v44 = vld [vmem:[#allocation7 + $0x64c] ss:$16 sps:$4 sm:$0xff]   ;;  %v11723_v55 = vld [vmem:[#allocation7 + $0x640] ss:$16 sps:$4 sm:$0xff]  }
 0x89e   :  { %v5772_v7 = vadd.f32 %v5729_v28, %v5722_v3  ;;  %v5681_v12 = vrot.slane %v5680_v45, 1  ;;  %v5685_v5 = vadd.f32 %v5684_v13, %v5683_v40  ;;  %v5753_v15 = vadd.f32 %v5752_v2, %v14397_v29  ;;  %v11719_v28 = vld [vmem:[#allocation7 + $0x664] ss:$16 sps:$4 sm:$0xff]   ;;  %v11722_v40 = vld [vmem:[#allocation7 + $0x66c] ss:$16 sps:$4 sm:$0xff]  }
 0x89f   :  { %v5747_v23 = vrot.slane %v5746_v57, 2  ;;  %v5758_v1 = vadd.f32 %v14428_v10, %v14426_v56  ;;  %v5765_v18 = vadd.f32 %v14419_v58, %v14415_v38  ;;  %v5695_v0 = vadd.f32 %v5675_v43, %v5668_v25  ;;  %6838 = vmatprep.subr.bf16.mxu1 %v11719_v28  ;;  %6891 = vmatprep.subr.bf16.mxu0 %v11722_v40  ;;  %v11726_v20 = vld [vmem:[#allocation7 + $0x648] ss:$16 sps:$4 sm:$0xff]   ;;  %v11731_v3 = vld [vmem:[#allocation7 + $0x624] ss:$16 sps:$4 sm:$0xff]  }
 0x8a0   :  { %v5773_v47 = vadd.f32 %v5772_v7, %v5736_v39  ;;  %v5686_v32 = vrot.slane %v5685_v5, 2  ;;  %v5754_v60 = vrot.slane %v5753_v15, 2  ;;  %v5682_v6 = vadd.f32 %v5681_v12, %v5680_v45  ;;  %6839 = vmatpush1.bf16.msra.mxu1 %v11717_v49  ;;  %6892 = vmatpush1.bf16.msra.mxu0 %v11720_v11  ;;  %v11734_v45 = vld [vmem:[#allocation7 + $0x62c] ss:$16 sps:$4 sm:$0xff]   ;;  %v11729_v13 = vld [vmem:[#allocation7 + $0x620] ss:$16 sps:$4 sm:$0xff]  }
 0x8a1   :  { %v5748_v33 = vadd.f32 %v5747_v23, %v5746_v57  ;;  %v5759_v19 = vrot.slane %v5758_v1, 4  ;;  %v5766_v8 = vrot.slane %v5765_v18, 4  ;;  %6840 = vmatprep.subr.bf16.mxu1 %v11725_v48  ;;  %6893 = vmatprep.subr.bf16.mxu0 %v11728_v44  ;;  %v11732_v2 = vld [vmem:[#allocation7 + $0x628] ss:$16 sps:$4 sm:$0xff]   ;;  %v11737_v39 = vld [vmem:[#allocation7 + $0x604] ss:$16 sps:$4 sm:$0xff]  }
 0x8a2   :  { %v5774_v35 = vadd.f32 %v5773_v47, %v5743_v24  ;;  %v5687_v30 = vadd.f32 %v5686_v32, %v5685_v5  ;;  %v5755_v59 = vadd.f32 %v5754_v60, %v5753_v15  ;;  %v5696_v56 = vadd.f32 %v5695_v0, %v5682_v6  ;;  %v11740_v43 = vld [vmem:[#allocation7 + $0x60c] ss:$16 sps:$4 sm:$0xff]   ;;  %v11735_v57 = vld [vmem:[#allocation7 + $0x600] ss:$16 sps:$4 sm:$0xff]   ;;  %v11738_v7 = vld [vmem:[#allocation7 + $0x608] ss:$16 sps:$4 sm:$0xff]  }
 0x8a3   :  { %v5749_v29 = vrot.slane %v5748_v33, 1  ;;  %v5760_v50 = vadd.f32 %v5759_v19, %v5758_v1  ;;  %v5767_v42 = vadd.f32 %v5766_v8, %v5765_v18  ;;  %v11743_v12 = vld [vmem:[#allocation7 + $0x7e4] ss:$16 sps:$4 sm:$0xff]   ;;  %v11746_v5 = vld [vmem:[#allocation7 + $0x7ec] ss:$16 sps:$4 sm:$0xff]  }
 0x8a4   :  { %5775 = vadd.xlane.f32.xlu1 %v5774_v35  ;;  %v5688_v41 = vrot.slane %v5687_v30, 1  ;;  %v5756_v10 = vrot.slane %v5755_v59, 1  ;;  %6841 = vmatpush1.bf16.msra.mxu1 %v11723_v55  ;;  %v11741_v15 = vld [vmem:[#allocation7 + $0x7e0] ss:$16 sps:$4 sm:$0xff]   ;;  %v11744_v24 = vld [vmem:[#allocation7 + $0x7e8] ss:$16 sps:$4 sm:$0xff]  }
 0x8a5   :  { %v5750_v14 = vadd.f32 %v5749_v29, %v5748_v33  ;;  %v5761_v38 = vrot.slane %v5760_v50, 2  ;;  %v5768_v58 = vrot.slane %v5767_v42, 2  ;;  %6894 = vmatpush1.bf16.msra.mxu0 %v11726_v20  ;;  %6842 = vmatprep.subr.bf16.mxu1 %v11731_v3  ;;  %v11749_v23 = vld [vmem:[#allocation7 + $0x7c4] ss:$16 sps:$4 sm:$0xff]   ;;  %v11752_v1 = vld [vmem:[#allocation7 + $0x7cc] ss:$16 sps:$4 sm:$0xff]  }
 0x8a6   :  { %v5689_v46 = vadd.f32 %v5688_v41, %v5687_v30  ;;  %v5757_v53 = vadd.f32 %v5756_v10, %v5755_v59  ;;  %6895 = vmatprep.subr.bf16.mxu0 %v11734_v45  ;;  %v11747_v18 = vld [vmem:[#allocation7 + $0x7c0] ss:$16 sps:$4 sm:$0xff]   ;;  %v11750_v47 = vld [vmem:[#allocation7 + $0x7c8] ss:$16 sps:$4 sm:$0xff]   ;;  %v11755_v32 = vld [vmem:[#allocation7 + $0x7a4] ss:$16 sps:$4 sm:$0xff]  }
 0x8a7   :  { %v5762_v16 = vadd.f32 %v5761_v38, %v5760_v50  ;;  %v5769_v62 = vadd.f32 %v5768_v58, %v5767_v42  ;;  %v11758_v0 = vld [vmem:[#allocation7 + $0x7ac] ss:$16 sps:$4 sm:$0xff]   ;;  %v11753_v60 = vld [vmem:[#allocation7 + $0x7a0] ss:$16 sps:$4 sm:$0xff]   ;;  %v11756_v33 = vld [vmem:[#allocation7 + $0x7a8] ss:$16 sps:$4 sm:$0xff]  }
 0x8a8   :  { %v5697_v51 = vadd.f32 %v5696_v56, %v5689_v46  ;;  %v5777_v31 = vadd.f32 %v5757_v53, %v5750_v14  ;;  %6843 = vmatpush1.bf16.msra.mxu1 %v11729_v13  ;;  %v11761_v19 = vld [vmem:[#allocation7 + $0x784] ss:$16 sps:$4 sm:$0xff]   ;;  %v11764_v8 = vld [vmem:[#allocation7 + $0x78c] ss:$16 sps:$4 sm:$0xff]   ;;  %v11759_v35 = vld [vmem:[#allocation7 + $0x780] ss:$16 sps:$4 sm:$0xff]  }
 0x8a9   :  { %v5763_v21 = vrot.slane %v5762_v16, 1  ;;  %v5770_v63 = vrot.slane %v5769_v62, 1  ;;  %6896 = vmatpush1.bf16.msra.mxu0 %v11732_v2  ;;  %6844 = vmatprep.subr.bf16.mxu1 %v11737_v39  ;;  %v11762_v6 = vld [vmem:[#allocation7 + $0x788] ss:$16 sps:$4 sm:$0xff]   ;;  %v11767_v30 = vld [vmem:[#allocation7 + $0x764] ss:$16 sps:$4 sm:$0xff]  }
 0x8aa   :  { %5698 = vadd.xlane.f32.xlu0 %v5697_v51  ;;  %6897 = vmatprep.subr.bf16.mxu0 %v11740_v43  ;;  %v11770_v59 = vld [vmem:[#allocation7 + $0x76c] ss:$16 sps:$4 sm:$0xff]   ;;  %v11765_v29 = vld [vmem:[#allocation7 + $0x760] ss:$16 sps:$4 sm:$0xff]   ;;  %v11768_v50 = vld [vmem:[#allocation7 + $0x768] ss:$16 sps:$4 sm:$0xff]  }
 0x8ab   :  { %v5764_v27 = vadd.f32 %v5763_v21, %v5762_v16  ;;  %v5771_v34 = vadd.f32 %v5770_v63, %v5769_v62  ;;  %v11773_v42 = vld [vmem:[#allocation7 + $0x744] ss:$16 sps:$4 sm:$0xff]   ;;  %v11776_v41 = vld [vmem:[#allocation7 + $0x74c] ss:$16 sps:$4 sm:$0xff]   ;;  %v11771_v56 = vld [vmem:[#allocation7 + $0x740] ss:$16 sps:$4 sm:$0xff]  }
 0x8ac   :  { %6845 = vmatpush1.bf16.msra.mxu1 %v11735_v57  ;;  %v11774_v10 = vld [vmem:[#allocation7 + $0x748] ss:$16 sps:$4 sm:$0xff]   ;;  %v11779_v14 = vld [vmem:[#allocation7 + $0x724] ss:$16 sps:$4 sm:$0xff]   ;;  %v11782_v38 = vld [vmem:[#allocation7 + $0x72c] ss:$16 sps:$4 sm:$0xff]  }
 0x8ad   :  { %v5778_v25 = vadd.f32 %v5777_v31, %v5764_v27  ;;  %6898 = vmatpush1.bf16.msra.mxu0 %v11738_v7  ;;  %6846 = vmatprep.subr.bf16.mxu1 %v11743_v12  ;;  %v11777_v58 = vld [vmem:[#allocation7 + $0x720] ss:$16 sps:$4 sm:$0xff]   ;;  %v11780_v46 = vld [vmem:[#allocation7 + $0x728] ss:$16 sps:$4 sm:$0xff]   ;;  %v11785_v53 = vld [vmem:[#allocation7 + $0x704] ss:$16 sps:$4 sm:$0xff]  }
 0x8ae   :  { %6899 = vmatprep.subr.bf16.mxu0 %v11746_v5  ;;  %v11786_v54 = vld [vmem:[#allocation7 + $0x708] ss:$16 sps:$4 sm:$0xff]  }
 0x8af   :  { %v5779_v52 = vadd.f32 %v5778_v25, %v5771_v34 }
 0x8b0   :  { %6847 = vmatpush2.bf16.msra.mxu1 %v11741_v15  ;;  %v6288_v15 = vld [vmem:[#allocation19 + $0x2] ss:$8 sm:$0x3] }
 0x8b1   :  { %5780 = vadd.xlane.f32.xlu1 %v5779_v52  ;;  %6900 = vmatpush2.bf16.msra.mxu0 %v11744_v24 }
 0x8b2   :  { %6848 = vmatprep.subr.bf16.mxu1 %v11749_v23  ;;  %6901 = vmatprep.subr.bf16.mxu0 %v11752_v1 }
 0x8b4   :  { %6849 = vmatpush2.bf16.msra.mxu1 %v11747_v18 }
 0x8b5   :  { %6902 = vmatpush2.bf16.msra.mxu0 %v11750_v47  ;;  %6850 = vmatprep.subr.bf16.mxu1 %v11755_v32  ;;  %v6290_v47 = vld [vmem:[#allocation20 + $0x2] ss:$8 sm:$0x3] }
 0x8b6   :  { %6903 = vmatprep.subr.bf16.mxu0 %v11758_v0 }
 0x8b8   :  { %6851 = vmatpush2.bf16.msra.mxu1 %v11753_v60  ;;  %v15986_v60 = vld [vmem:[#allocation46_spill] sm:$0xff] }
 0x8b9   :  { %6904 = vmatpush2.bf16.msra.mxu0 %v11756_v33  ;;  %6852 = vmatprep.subr.bf16.mxu1 %v11761_v19 }
 0x8ba   :  { %6905 = vmatprep.subr.bf16.mxu0 %v11764_v8  ;;  %v15987_v8 = vld [vmem:[#allocation31_spill] sm:$0xff] }
 0x8bc   :  { %6853 = vmatpush2.bf16.msra.mxu1 %v11759_v35 }
 0x8bd   :  { %6906 = vmatpush2.bf16.msra.mxu0 %v11762_v6  ;;  %6854 = vmatprep.subr.bf16.mxu1 %v11767_v30  ;;  %v15988_v6 = vld [vmem:[#allocation32_spill] sm:$0xff] }
 0x8be   :  { %6907 = vmatprep.subr.bf16.mxu0 %v11770_v59  ;;  %v15989_v59 = vld [vmem:[#allocation33_spill] sm:$0xff] }
 0x8c0   :  { %6855 = vmatpush2.bf16.msra.mxu1 %v11765_v29 }
 0x8c1   :  { %6908 = vmatpush2.bf16.msra.mxu0 %v11768_v50  ;;  %6856 = vmatprep.subr.bf16.mxu1 %v11773_v42 }
 0x8c2   :  { %6909 = vmatprep.subr.bf16.mxu0 %v11776_v41  ;;  %v15990_v41 = vld [vmem:[#allocation41_spill] sm:$0xff] }
 0x8c4   :  { %6857 = vmatpush2.bf16.msra.mxu1 %v11771_v56 }
 0x8c5   :  { %6910 = vmatpush2.bf16.msra.mxu0 %v11774_v10  ;;  %6858 = vmatprep.subr.bf16.mxu1 %v11779_v14 }
 0x8c6   :  { %6911 = vmatprep.subr.bf16.mxu0 %v11782_v38 }
 0x8c8   :  { %6859 = vmatpush2.bf16.msra.mxu1 %v11777_v58 }
 0x8c9   :  { %6912 = vmatpush2.bf16.msra.mxu0 %v11780_v46  ;;  %6860 = vmatprep.subr.bf16.mxu1 %v11785_v53 }
 0x8ca   :  { %6913 = vmatprep.subr.bf16.mxu0 %v11788_v17 }
 0x8cc   :  { %6861 = vmatpush2.bf16.msra.mxu1 %v11783_v36 }
 0x8cd   :  { %6914 = vmatpush2.bf16.msra.mxu0 %v11786_v54 }
 0x923   :  { %v5694_v16 = vpop.xlane.xlu0 %5693 }
 0x924   :  { %v5782_v62 = vmul.f32 0.00012207031, %v5694_v16 }
 0x926   :  { %v5786_v26 = vmul.f32 %v5782_v62, %v5782_v62 }
 0x92d   :  { %v5776_v51 = vpop.xlane.xlu1 %5775  ;;  %v6215_v31 = vpop.f32.mrf.mxu1 }
 0x92e   :  { %v5784_v21 = vmul.f32 0.00012207031, %v5776_v51 }
 0x92f   :  { %v6217_v49 = vpop.f32.mrf.mxu1 }
 0x930   :  { %v5788_v63 = vsub.f32 %v5784_v21, %v5786_v26 }
 0x931   :  { %v6219_v48 = vpop.f32.mrf.mxu1 }
 0x932   :  { %v5790_v27 = vmax.f32 %v5788_v63, 0.0 }
 0x933   :  { %v5699_v34 = vpop.xlane.xlu0 %5698  ;;  %v6268_v28 = vpop.f32.mrf.mxu0 }
 0x934   :  { %v5792_v25 = vadd.f32 1e-08, %v5790_v27  ;;  %v5783_v52 = vmul.f32 0.00012207031, %v5699_v34  ;;  %v6221_v45 = vpop.f32.mrf.mxu1  ;;  %v6269_v39 = vadd.f32 %v6268_v28, %v6215_v31 }
 0x935   :  { %v6270_v11 = vpop.f32.mrf.mxu0 }
 0x936   :  { %12119 = vrsqrt.f32 %v5792_v25  ;;  %v5787_v40 = vmul.f32 %v5783_v52, %v5783_v52  ;;  %v6271_v43 = vadd.f32 %v6270_v11, %v6217_v49 }
 0x937   :  { %v6272_v55 = vpop.f32.mrf.mxu0 }
 0x938   :  { %v6273_v57 = vadd.f32 %v6272_v55, %v6219_v48 }
 0x939   :  { %v6274_v13 = vpop.f32.mrf.mxu0 }
 0x93a   :  { %v5781_v44 = vpop.xlane.xlu1 %5780  ;;  %v6275_v12 = vadd.f32 %v6274_v13, %v6221_v45  ;;  %v15995_v45 = vld [vmem:[#allocation34_spill] sm:$0xff] }
 0x93b   :  { %v5785_v20 = vmul.f32 0.00012207031, %v5781_v44 }
 0x93d   :  { %v5789_v3 = vsub.f32 %v5785_v20, %v5787_v40 }
 0x93f   :  { %v5791_v2 = vmax.f32 %v5789_v3, 0.0 }
 0x941   :  { %v5793_v7 = vadd.f32 1e-08, %v5791_v2 }
 0x943   :  { %v12120_v5 = vpop.eup %12119  ;;  %12121 = vrsqrt.f32 %v5793_v7 }
 0x944   :  { %v6291_v24 = vmul.f32 %v12120_v5, %v5782_v62  ;;  %v6297_v23 = vmul.f32 %v12120_v5, %v6269_v39  ;;  %v6298_v1 = vmul.f32 %v12120_v5, %v6271_v43  ;;  %v6299_v18 = vmul.f32 %v12120_v5, %v6273_v57  ;;  %v15996_v57 = vld [vmem:[#allocation35_spill] sm:$0xff] }
 0x945   :  { %v6300_v32 = vmul.f32 %v12120_v5, %v6275_v12 }
 0x946   :  { %v6293_v0 = vmul.f32 %v6291_v24, %v6288_v15  ;;  %v6305_v33 = vadd.f32 %v6297_v23, %v15986_v60  ;;  %v6306_v35 = vadd.f32 %v6298_v1, %v15987_v8  ;;  %v6307_v30 = vadd.f32 %v6299_v18, %v15988_v6  ;;  %v15997_v18 = vld [vmem:[#allocation36_spill] sm:$0xff]  ;;  %v15998_v6 = vld [vmem:[#allocation37_spill] sm:$0xff] }
 0x947   :  { %v6308_v29 = vadd.f32 %v6300_v32, %v15989_v59 }
 0x948   :  { %v6295_v19 = vsub.f32 %v6290_v47, %v6293_v0  ;;  %v6225_v50 = vpop.f32.mrf.mxu1 }
 0x94a   :  { %v6318_v42 = vrot.slane %v6295_v19, %v15948_v22  ;;  %v6322_v56 = vrot.slane %v6295_v19, %v15990_v41  ;;  %v6227_v10 = vpop.f32.mrf.mxu1 }
 0x94c   :  { %v14453_v14 = vadd.f32 %v6318_v42, %v6305_v33  ;;  %v14455_v38 = vadd.f32 %v6322_v56, %v6306_v35  ;;  %v14457_v58 = vadd.f32 %v6318_v42, %v6307_v30  ;;  %v14459_v46 = vadd.f32 %v6322_v56, %v6308_v29  ;;  %v6229_v17 = vpop.f32.mrf.mxu1 }
 0x94d   :  { %v6278_v53 = vpop.f32.mrf.mxu0 }
 0x94e   :  { %15991 = vst [vmem:[#allocation38_spill] sm:$0xff] %v14453_v14  ;;  %15992 = vst [vmem:[#allocation46_spill] sm:$0xff] %v14455_v38  ;;  %v6343_v36 = vmax.f32 %v14453_v14, 0.0  ;;  %v6345_v54 = vmax.f32 %v14457_v58, 0.0  ;;  %v6279_v16 = vadd.f32 %v6278_v53, %v6225_v50  ;;  %v6344_v26 = vmax.f32 %v14455_v38, 0.0  ;;  %v6231_v28 = vpop.f32.mrf.mxu1 }
 0x94f   :  { %15993 = vst [vmem:[#allocation31_spill] sm:$0xff] %v14457_v58  ;;  %15994 = vst [vmem:[#allocation32_spill] sm:$0xff] %v14459_v46  ;;  %v6280_v62 = vpop.f32.mrf.mxu0  ;;  %v6346_v51 = vmax.f32 %v14459_v46, 0.0 }
 0x950   :  { %v12122_v21 = vpop.eup %12121  ;;  %v6281_v63 = vadd.f32 %v6280_v62, %v6227_v10  ;;  %v6441_v31 = vpack.c.bf16 %v6345_v54, %v6343_v36  ;;  %v6351_v27 = vadd.f32 %v6345_v54, %v6343_v36  ;;  %v6385_v20 = vmul.f32 %v6343_v36, %v6343_v36 }
 0x951   :  { %v6292_v34 = vmul.f32 %v12122_v21, %v5783_v52  ;;  %v6301_v25 = vmul.f32 %v12122_v21, %v6279_v16  ;;  %v6282_v49 = vpop.f32.mrf.mxu0  ;;  %v6442_v11 = vpack.c.bf16 %v6346_v51, %v6344_v26  ;;  %v6358_v40 = vadd.f32 %v6346_v51, %v6344_v26 }
 0x952   :  { %v6302_v48 = vmul.f32 %v12122_v21, %v6281_v63  ;;  %v6283_v44 = vadd.f32 %v6282_v49, %v6229_v17  ;;  %v6352_v55 = vrot.slane %v6351_v27, 4  ;;  %v6387_v43 = vmul.f32 %v6345_v54, %v6345_v54 }
 0x953   :  { %v6294_v3 = vmul.f32 %v6292_v34, %v6288_v15  ;;  %v6309_v13 = vadd.f32 %v6301_v25, %v15995_v45  ;;  %v6284_v2 = vpop.f32.mrf.mxu0  ;;  %6862 = vmatprep.mubr.bf16.mxu1 %v6442_v11  ;;  %6915 = vmatprep.mubr.bf16.mxu0 %v6442_v11  ;;  %v6359_v39 = vrot.slane %v6358_v40, 4  ;;  %v6388_v1 = vmul.f32 %v6346_v51, %v6346_v51 }
 0x954   :  { %v6310_v7 = vadd.f32 %v6302_v48, %v15996_v57  ;;  %v6303_v52 = vmul.f32 %v12122_v21, %v6283_v44  ;;  %v6285_v12 = vadd.f32 %v6284_v2, %v6231_v28  ;;  %6863 = vmatmul.mubr.bf16.vlgmr.msra.gmra.mxu1 %v6441_v31  ;;  %6916 = vmatmul.mubr.bf16.vlgmr.msra.gmra.mxu0 %v6441_v31 }
 0x955   :  { %v6296_v5 = vsub.f32 %v6290_v47, %v6294_v3  ;;  %v6353_v24 = vadd.f32 %v6352_v55, %v6351_v27  ;;  %v6360_v23 = vadd.f32 %v6359_v39, %v6358_v40  ;;  %v6386_v0 = vmul.f32 %v6344_v26, %v6344_v26 }
 0x956   :  { %v6311_v32 = vadd.f32 %v6303_v52, %v15997_v18  ;;  %v6304_v15 = vmul.f32 %v12122_v21, %v6285_v12  ;;  %v6393_v60 = vadd.f32 %v6387_v43, %v6385_v20 }
 0x957   :  { %v6326_v33 = vrot.slane %v6296_v5, %v15948_v22  ;;  %v6330_v19 = vrot.slane %v6296_v5, %v15990_v41  ;;  %v6354_v8 = vrot.slane %v6353_v24, 2  ;;  %v6361_v35 = vrot.slane %v6360_v23, 2 }
 0x958   :  { %v6312_v30 = vadd.f32 %v6304_v15, %v15998_v6  ;;  %v6394_v59 = vrot.slane %v6393_v60, 4  ;;  %v6400_v29 = vadd.f32 %v6388_v1, %v6386_v0 }
 0x959   :  { %v14471_v50 = vadd.f32 %v6326_v33, %v6309_v13  ;;  %v14473_v47 = vadd.f32 %v6330_v19, %v6310_v7  ;;  %v14475_v42 = vadd.f32 %v6326_v33, %v6311_v32  ;;  %v6355_v56 = vadd.f32 %v6354_v8, %v6353_v24 }
 0x95a   :  { %v14477_v10 = vadd.f32 %v6330_v19, %v6312_v30  ;;  %v6362_v53 = vadd.f32 %v6361_v35, %v6360_v23  ;;  %v6395_v17 = vadd.f32 %v6394_v59, %v6393_v60  ;;  %v6401_v36 = vrot.slane %v6400_v29, 4 }
 0x95b   :  { %15999 = vst [vmem:[#allocation33_spill] sm:$0xff] %v14471_v50  ;;  %16000 = vst [vmem:[#allocation34_spill] sm:$0xff] %v14473_v47  ;;  %v6348_v54 = vmax.f32 %v14473_v47, 0.0  ;;  %v6347_v16 = vmax.f32 %v14471_v50, 0.0  ;;  %v6349_v62 = vmax.f32 %v14475_v42, 0.0  ;;  %v6356_v26 = vrot.slane %v6355_v56, 1 }
 0x95c   :  { %16001 = vst [vmem:[#allocation35_spill] sm:$0xff] %v14475_v42  ;;  %16002 = vst [vmem:[#allocation36_spill] sm:$0xff] %v14477_v10  ;;  %v6350_v51 = vmax.f32 %v14477_v10, 0.0  ;;  %v6363_v21 = vrot.slane %v6362_v53, 1  ;;  %v6396_v63 = vrot.slane %v6395_v17, 2  ;;  %v6402_v31 = vadd.f32 %v6401_v36, %v6400_v29 }
 0x95d   :  { %v6443_v27 = vpack.c.bf16 %v6349_v62, %v6347_v16  ;;  %v6357_v34 = vadd.f32 %v6356_v26, %v6355_v56  ;;  %v6365_v25 = vadd.f32 %v6349_v62, %v6347_v16  ;;  %v6389_v49 = vmul.f32 %v6347_v16, %v6347_v16 }
 0x95e   :  { %v6444_v28 = vpack.c.bf16 %v6350_v51, %v6348_v54  ;;  %v6364_v11 = vadd.f32 %v6363_v21, %v6362_v53  ;;  %v6397_v40 = vadd.f32 %v6396_v63, %v6395_v17  ;;  %v6403_v48 = vrot.slane %v6402_v31, 2 }
 0x95f   :  { %v6366_v44 = vrot.slane %v6365_v25, 4  ;;  %v6372_v55 = vadd.f32 %v6350_v51, %v6348_v54  ;;  %v6390_v20 = vmul.f32 %v6348_v54, %v6348_v54  ;;  %v6391_v3 = vmul.f32 %v6349_v62, %v6349_v62 }
 0x960   :  { %6872 = vmatprep.mubr.bf16.mxu1 %v6444_v28  ;;  %6925 = vmatprep.mubr.bf16.mxu0 %v6444_v28  ;;  %v6379_v45 = vadd.f32 %v6364_v11, %v6357_v34  ;;  %v6398_v13 = vrot.slane %v6397_v40, 1  ;;  %v6404_v2 = vadd.f32 %v6403_v48, %v6402_v31  ;;  %v6392_v39 = vmul.f32 %v6350_v51, %v6350_v51 }
 0x961   :  { %6873 = vmatmul.mubr.bf16.gmra.mxu1 %v6443_v27  ;;  %6926 = vmatmul.mubr.bf16.gmra.mxu0 %v6443_v27  ;;  %v6367_v43 = vadd.f32 %v6366_v44, %v6365_v25  ;;  %v6373_v57 = vrot.slane %v6372_v55, 4  ;;  %v6407_v7 = vadd.f32 %v6391_v3, %v6389_v49 }
 0x962   :  { %6380 = vadd.xlane.f32.xlu0 %v6379_v45  ;;  %v6405_v52 = vrot.slane %v6404_v2, 1  ;;  %v6414_v12 = vadd.f32 %v6392_v39, %v6390_v20  ;;  %v6399_v1 = vadd.f32 %v6398_v13, %v6397_v40  ;;  %v6937_v39 = vld [vmem:[#allocation13 + $0x3] ss:$8 sm:$0xf] }
 0x963   :  { %v6368_v5 = vrot.slane %v6367_v43, 2  ;;  %v6374_v24 = vadd.f32 %v6373_v57, %v6372_v55  ;;  %v6408_v23 = vrot.slane %v6407_v7, 4  ;;  %v6939_v57 = vld [vmem:[#allocation14 + $0x3] ss:$8 sm:$0xf] }
 0x964   :  { %v6406_v18 = vadd.f32 %v6405_v52, %v6404_v2  ;;  %v6415_v32 = vrot.slane %v6414_v12, 4 }
 0x965   :  { %v6369_v15 = vadd.f32 %v6368_v5, %v6367_v43  ;;  %v6375_v0 = vrot.slane %v6374_v24, 2  ;;  %v6409_v60 = vadd.f32 %v6408_v23, %v6407_v7 }
 0x966   :  { %v6421_v33 = vadd.f32 %v6406_v18, %v6399_v1  ;;  %v6416_v19 = vadd.f32 %v6415_v32, %v6414_v12  ;;  %v16003_v32 = vld [vmem:[#allocation40_spill] sm:$0xff] }
 0x967   :  { %v6370_v8 = vrot.slane %v6369_v15, 1  ;;  %v6376_v35 = vadd.f32 %v6375_v0, %v6374_v24  ;;  %v6410_v6 = vrot.slane %v6409_v60, 2 }
 0x968   :  { %6422 = vadd.xlane.f32.xlu0 %v6421_v33  ;;  %v6417_v30 = vrot.slane %v6416_v19, 2 }
 0x969   :  { %v6377_v59 = vrot.slane %v6376_v35, 1  ;;  %v6411_v29 = vadd.f32 %v6410_v6, %v6409_v60  ;;  %v6371_v53 = vadd.f32 %v6370_v8, %v6369_v15  ;;  %v16004_v8 = vld [vmem:[#allocation42_spill] sm:$0xff] }
 0x96a   :  { %v6418_v56 = vadd.f32 %v6417_v30, %v6416_v19 }
 0x96b   :  { %v6378_v17 = vadd.f32 %v6377_v59, %v6376_v35  ;;  %v6412_v36 = vrot.slane %v6411_v29, 1 }
 0x96c   :  { %v6419_v54 = vrot.slane %v6418_v56, 1 }
 0x96d   :  { %v6382_v16 = vadd.f32 %v6378_v17, %v6371_v53  ;;  %v6413_v26 = vadd.f32 %v6412_v36, %v6411_v29 }
 0x96e   :  { %v6420_v62 = vadd.f32 %v6419_v54, %v6418_v56 }
 0x96f   :  { %6383 = vadd.xlane.f32.xlu1 %v6382_v16 }
 0x970   :  { %v6424_v51 = vadd.f32 %v6420_v62, %v6413_v26 }
 0x973   :  { %6425 = vadd.xlane.f32.xlu1 %v6424_v51 }
 0x9eb   :  { %v6381_v21 = vpop.xlane.xlu0 %6380 }
 0x9ec   :  { %v6427_v63 = vmul.f32 0.00024414063, %v6381_v21 }
 0x9ee   :  { %v6431_v27 = vmul.f32 %v6427_v63, %v6427_v63 }
 0x9f1   :  { %v6423_v31 = vpop.xlane.xlu0 %6422 }
 0x9f2   :  { %v6429_v34 = vmul.f32 0.00024414063, %v6423_v31 }
 0x9f4   :  { %v6433_v25 = vsub.f32 %v6429_v34, %v6431_v27 }
 0x9f6   :  { %v6435_v49 = vmax.f32 %v6433_v25, 0.0 }
 0x9f8   :  { %v6437_v28 = vadd.f32 1e-08, %v6435_v49  ;;  %v6384_v11 = vpop.xlane.xlu1 %6383 }
 0x9f9   :  { %v6428_v40 = vmul.f32 0.00024414063, %v6384_v11 }
 0x9fa   :  { %12123 = vrsqrt.f32 %v6437_v28 }
 0x9fb   :  { %v6432_v44 = vmul.f32 %v6428_v40, %v6428_v40 }
 0x9fc   :  { %v6426_v48 = vpop.xlane.xlu1 %6425 }
 0x9fd   :  { %v6430_v55 = vmul.f32 0.00024414063, %v6426_v48 }
 0x9ff   :  { %v6434_v20 = vsub.f32 %v6430_v55, %v6432_v44 }
 0xa01   :  { %v6436_v3 = vmax.f32 %v6434_v20, 0.0 }
 0xa03   :  { %v6438_v45 = vadd.f32 1e-08, %v6436_v3 }
 0xa05   :  { %12125 = vrsqrt.f32 %v6438_v45 }
 0xa07   :  { %v12124_v13 = vpop.eup %12123 }
 0xa08   :  { %v6940_v2 = vmul.f32 %v12124_v13, %v6427_v63 }
 0xa0a   :  { %v6942_v43 = vmul.f32 %v6940_v2, %v6937_v39 }
 0xa0c   :  { %v6944_v7 = vsub.f32 %v6939_v57, %v6942_v43 }
 0xa0e   :  { %v6967_v24 = vrot.slane %v6944_v7, %v15948_v22  ;;  %v6975_v15 = vrot.slane %v6944_v7, %v16003_v32  ;;  %v6971_v33 = vrot.slane %v6944_v7, %v15990_v41  ;;  %v6979_v35 = vrot.slane %v6944_v7, %v16004_v8 }
 0xa12   :  { %v14483_v52 = vpop.eup %12125 }
 0xa13   :  { %v6941_v12 = vmul.f32 %v14483_v52, %v6428_v40 }
 0xa14   :  { %v6864_v5 = vpop.f32.mrf.mxu1  ;;  %v6917_v23 = vpop.f32.mrf.mxu0 }
 0xa15   :  { %v6946_v1 = vmul.f32 %v12124_v13, %v6864_v5  ;;  %v6948_v18 = vmul.f32 %v12124_v13, %v6917_v23  ;;  %v6943_v0 = vmul.f32 %v6941_v12, %v6937_v39 }
 0xa16   :  { %v6866_v60 = vpop.f32.mrf.mxu1  ;;  %v6919_v19 = vpop.f32.mrf.mxu0 }
 0xa17   :  { %v7004_v6 = vadd.f32 %v6967_v24, %v6946_v1  ;;  %v7006_v30 = vadd.f32 %v6975_v15, %v6948_v18  ;;  %v6947_v59 = vmul.f32 %v12124_v13, %v6866_v60  ;;  %v6949_v29 = vmul.f32 %v12124_v13, %v6919_v19 }
 0xa18   :  { %v6868_v56 = vpop.f32.mrf.mxu1  ;;  %v6921_v53 = vpop.f32.mrf.mxu0  ;;  %v6945_v54 = vsub.f32 %v6939_v57, %v6943_v0 }
 0xa19   :  { %v7005_v17 = vadd.f32 %v6971_v33, %v6947_v59  ;;  %v7007_v36 = vadd.f32 %v6979_v35, %v6949_v29  ;;  %v6950_v16 = vmul.f32 %v12124_v13, %v6868_v56  ;;  %v6952_v62 = vmul.f32 %v12124_v13, %v6921_v53 }
 0xa1a   :  { %v6870_v26 = vpop.f32.mrf.mxu1  ;;  %v6923_v51 = vpop.f32.mrf.mxu0  ;;  %v14490_v21 = vmax.f32 %v7004_v6, 0.0  ;;  %v14492_v63 = vmax.f32 %v7006_v30, 0.0  ;;  %v6983_v11 = vrot.slane %v6945_v54, %v15948_v22  ;;  %v6991_v40 = vrot.slane %v6945_v54, %v16003_v32 }
 0xa1b   :  { %v14494_v31 = vmax.f32 %v7005_v17, 0.0  ;;  %v14496_v27 = vmax.f32 %v7007_v36, 0.0  ;;  %v7008_v34 = vadd.f32 %v6967_v24, %v6950_v16  ;;  %v7010_v25 = vadd.f32 %v6975_v15, %v6952_v62 }
 0xa1c   :  { %v6951_v49 = vmul.f32 %v12124_v13, %v6870_v26  ;;  %v6953_v28 = vmul.f32 %v12124_v13, %v6923_v51  ;;  %v7102_v3 = vmul.f32 %v14490_v21, %v14490_v21  ;;  %v7104_v45 = vmul.f32 %v14492_v63, %v14492_v63 }
 0xa1d   :  { %v14500_v48 = vmax.f32 %v7008_v34, 0.0  ;;  %v14502_v44 = vmax.f32 %v7010_v25, 0.0  ;;  %v7103_v2 = vmul.f32 %v14494_v31, %v14494_v31  ;;  %v14512_v13 = vmul.f32 %v14496_v27, %v14496_v27 }
 0xa1e   :  { %v7009_v55 = vadd.f32 %v6971_v33, %v6951_v49  ;;  %v7011_v20 = vadd.f32 %v6979_v35, %v6953_v28  ;;  %v6987_v1 = vrot.slane %v6945_v54, %v15990_v41  ;;  %v6995_v18 = vrot.slane %v6945_v54, %v16004_v8 }
 0xa1f   :  { %v7036_v39 = vadd.f32 %v14500_v48, %v14490_v21  ;;  %v7106_v43 = vmul.f32 %v14500_v48, %v14500_v48  ;;  %v14520_v57 = vadd.f32 %v14502_v44, %v14492_v63  ;;  %v7108_v7 = vmul.f32 %v14502_v44, %v14502_v44 }
 0xa20   :  { %v14524_v12 = vmax.f32 %v7009_v55, 0.0  ;;  %v14526_v5 = vmax.f32 %v7011_v20, 0.0 }
 0xa21   :  { %v6874_v24 = vpop.f32.mrf.mxu1  ;;  %v6927_v23 = vpop.f32.mrf.mxu0  ;;  %v7037_v15 = vrot.slane %v7036_v39, 4  ;;  %v14530_v0 = vadd.f32 %v7106_v43, %v7102_v3  ;;  %v7051_v60 = vrot.slane %v14520_v57, 4  ;;  %v14533_v33 = vadd.f32 %v7108_v7, %v7104_v45 }
 0xa22   :  { %v7043_v19 = vadd.f32 %v14524_v12, %v14494_v31  ;;  %v7107_v35 = vmul.f32 %v14524_v12, %v14524_v12  ;;  %v14541_v6 = vadd.f32 %v14526_v5, %v14496_v27  ;;  %v14545_v30 = vmul.f32 %v14526_v5, %v14526_v5 }
 0xa23   :  { %v6876_v59 = vpop.f32.mrf.mxu1  ;;  %v6929_v29 = vpop.f32.mrf.mxu0  ;;  %v7038_v56 = vadd.f32 %v7037_v15, %v7036_v39  ;;  %v7119_v53 = vrot.slane %v14530_v0, 4  ;;  %v6954_v17 = vmul.f32 %v14483_v52, %v6874_v24  ;;  %v6956_v36 = vmul.f32 %v14483_v52, %v6927_v23 }
 0xa24   :  { %v7044_v54 = vrot.slane %v7043_v19, 4  ;;  %v7125_v16 = vadd.f32 %v7107_v35, %v7103_v2  ;;  %v6955_v62 = vmul.f32 %v14483_v52, %v6876_v59  ;;  %v6957_v26 = vmul.f32 %v14483_v52, %v6929_v29 }
 0xa25   :  { %v6878_v51 = vpop.f32.mrf.mxu1  ;;  %v6931_v34 = vpop.f32.mrf.mxu0  ;;  %v7012_v25 = vadd.f32 %v6983_v11, %v6954_v17  ;;  %v7014_v49 = vadd.f32 %v6991_v40, %v6956_v36  ;;  %v7052_v10 = vadd.f32 %v7051_v60, %v14520_v57  ;;  %v7058_v42 = vrot.slane %v14541_v6, 4 }
 0xa26   :  { %v6958_v28 = vmul.f32 %v14483_v52, %v6878_v51  ;;  %v6960_v55 = vmul.f32 %v14483_v52, %v6931_v34  ;;  %v7045_v20 = vadd.f32 %v7044_v54, %v7043_v19  ;;  %v7126_v3 = vrot.slane %v7125_v16, 4 }
 0xa27   :  { %v7013_v45 = vadd.f32 %v6987_v1, %v6955_v62  ;;  %v7015_v39 = vadd.f32 %v6995_v18, %v6957_v26  ;;  %v6880_v43 = vpop.f32.mrf.mxu1  ;;  %v6933_v7 = vpop.f32.mrf.mxu0  ;;  %v14554_v24 = vmax.f32 %v7012_v25, 0.0  ;;  %v14556_v2 = vmax.f32 %v7014_v49, 0.0 }
 0xa28   :  { %v7016_v23 = vadd.f32 %v6983_v11, %v6958_v28  ;;  %v7018_v15 = vadd.f32 %v6991_v40, %v6960_v55  ;;  %v6959_v29 = vmul.f32 %v14483_v52, %v6880_v43  ;;  %v6961_v17 = vmul.f32 %v14483_v52, %v6933_v7 }
 0xa29   :  { %v14558_v35 = vmax.f32 %v7013_v45, 0.0  ;;  %v14560_v59 = vmax.f32 %v7015_v39, 0.0  ;;  %v7110_v19 = vmul.f32 %v14554_v24, %v14554_v24  ;;  %v7112_v36 = vmul.f32 %v14556_v2, %v14556_v2 }
 0xa2a   :  { %v14568_v54 = vmax.f32 %v7016_v23, 0.0  ;;  %v14570_v62 = vmax.f32 %v7018_v15, 0.0  ;;  %v7017_v26 = vadd.f32 %v6987_v1, %v6959_v29  ;;  %v7019_v51 = vadd.f32 %v6995_v18, %v6961_v17 }
 0xa2b   :  { %v7111_v11 = vmul.f32 %v14558_v35, %v14558_v35  ;;  %v14576_v40 = vmul.f32 %v14560_v59, %v14560_v59  ;;  %v7039_v45 = vrot.slane %v7038_v56, 2  ;;  %v7046_v1 = vrot.slane %v7045_v20, 2 }
 0xa2c   :  { %v7064_v52 = vadd.f32 %v14568_v54, %v14554_v24  ;;  %v7114_v34 = vmul.f32 %v14568_v54, %v14568_v54  ;;  %v14584_v25 = vadd.f32 %v14570_v62, %v14556_v2  ;;  %v7116_v49 = vmul.f32 %v14570_v62, %v14570_v62 }
 0xa2d   :  { %v14588_v28 = vmax.f32 %v7017_v26, 0.0  ;;  %v14590_v55 = vmax.f32 %v7019_v51, 0.0  ;;  %v7040_v51 = vadd.f32 %v7039_v45, %v7038_v56  ;;  %v7120_v46 = vadd.f32 %v7119_v53, %v14530_v0 }
 0xa2e   :  { %v7065_v18 = vrot.slane %v7064_v52, 4  ;;  %v14592_v39 = vadd.f32 %v7114_v34, %v7110_v19  ;;  %v7079_v43 = vrot.slane %v14584_v25, 4  ;;  %v14595_v7 = vadd.f32 %v7116_v49, %v7112_v36 }
 0xa2f   :  { %16005 = vst [vmem:[#allocation37_spill] sm:$0xff] %v14590_v55  ;;  %v7071_v23 = vadd.f32 %v14588_v28, %v14558_v35  ;;  %v7115_v15 = vmul.f32 %v14588_v28, %v14588_v28  ;;  %v14603_v29 = vadd.f32 %v14590_v55, %v14560_v59  ;;  %v14607_v17 = vmul.f32 %v14590_v55, %v14590_v55 }
 0xa30   :  { %v7066_v19 = vadd.f32 %v7065_v18, %v7064_v52  ;;  %v7147_v26 = vrot.slane %v14592_v39, 4  ;;  %v7047_v36 = vadd.f32 %v7046_v1, %v7045_v20  ;;  %v7041_v47 = vrot.slane %v7040_v51, 1 }
 0xa31   :  { %v7072_v34 = vrot.slane %v7071_v23, 4  ;;  %v7153_v49 = vadd.f32 %v7115_v15, %v7111_v11  ;;  %v7127_v58 = vadd.f32 %v7126_v3, %v7125_v16  ;;  %v7053_v52 = vrot.slane %v7052_v10, 2 }
 0xa32   :  { %v7048_v50 = vrot.slane %v7047_v36, 1  ;;  %v7059_v18 = vadd.f32 %v7058_v42, %v14541_v6  ;;  %v7042_v56 = vadd.f32 %v7041_v47, %v7040_v51  ;;  %v7121_v45 = vrot.slane %v7120_v46, 2 }
 0xa33   :  { %v7073_v38 = vadd.f32 %v7072_v34, %v7071_v23  ;;  %v7154_v14 = vrot.slane %v7153_v49, 4  ;;  %v7128_v11 = vrot.slane %v7127_v58, 2  ;;  %v7054_v1 = vadd.f32 %v7053_v52, %v7052_v10 }
 0xa34   :  { %v7049_v20 = vadd.f32 %v7048_v50, %v7047_v36  ;;  %v7060_v15 = vrot.slane %v7059_v18, 2  ;;  %v7133_v57 = vrot.slane %v14533_v33, 4  ;;  %v7139_v60 = vadd.f32 %v14545_v30, %v14512_v13 }
 0xa35   :  { %v7122_v61 = vadd.f32 %v7121_v45, %v7120_v46  ;;  %v7129_v0 = vadd.f32 %v7128_v11, %v7127_v58  ;;  %v7067_v53 = vrot.slane %v7066_v19, 2  ;;  %v7055_v16 = vrot.slane %v7054_v1, 1 }
 0xa36   :  { %v7092_v37 = vadd.f32 %v7049_v20, %v7042_v56  ;;  %v7061_v3 = vadd.f32 %v7060_v15, %v7059_v18  ;;  %v7134_v23 = vadd.f32 %v7133_v57, %v14533_v33  ;;  %v7140_v42 = vrot.slane %v7139_v60, 4 }
 0xa37   :  { %v7123_v47 = vrot.slane %v7122_v61, 1  ;;  %v7130_v50 = vrot.slane %v7129_v0, 1  ;;  %v7068_v6 = vadd.f32 %v7067_v53, %v7066_v19  ;;  %v7074_v51 = vrot.slane %v7073_v38, 2 }
 0xa38   :  { %v7056_v10 = vadd.f32 %v7055_v16, %v7054_v1  ;;  %v7062_v36 = vrot.slane %v7061_v3, 1  ;;  %v7135_v34 = vrot.slane %v7134_v23, 2  ;;  %v7141_v52 = vadd.f32 %v7140_v42, %v7139_v60 }
 0xa39   :  { %v7124_v9 = vadd.f32 %v7123_v47, %v7122_v61  ;;  %v7131_v55 = vadd.f32 %v7130_v50, %v7129_v0  ;;  %v7069_v13 = vrot.slane %v7068_v6, 1  ;;  %v7075_v30 = vadd.f32 %v7074_v51, %v7073_v38 }
 0xa3a   :  { %v7063_v46 = vadd.f32 %v7062_v36, %v7061_v3  ;;  %v7093_v58 = vadd.f32 %v7092_v37, %v7056_v10  ;;  %v7136_v56 = vadd.f32 %v7135_v34, %v7134_v23  ;;  %v7142_v20 = vrot.slane %v7141_v52, 2 }
 0xa3b   :  { %v7174_v18 = vadd.f32 %v7131_v55, %v7124_v9  ;;  %v7070_v45 = vadd.f32 %v7069_v13, %v7068_v6  ;;  %v7076_v33 = vrot.slane %v7075_v30, 1  ;;  %v7080_v11 = vadd.f32 %v7079_v43, %v14584_v25 }
 0xa3c   :  { %v7094_v15 = vadd.f32 %v7093_v58, %v7063_v46  ;;  %v7137_v19 = vrot.slane %v7136_v56, 1  ;;  %v7143_v57 = vadd.f32 %v7142_v20, %v7141_v52  ;;  %v7086_v1 = vrot.slane %v14603_v29, 4 }
 0xa3d   :  { %v7077_v53 = vadd.f32 %v7076_v33, %v7075_v30  ;;  %v7081_v60 = vrot.slane %v7080_v11, 2  ;;  %v7148_v61 = vadd.f32 %v7147_v26, %v14592_v39  ;;  %v7155_v0 = vadd.f32 %v7154_v14, %v7153_v49 }
 0xa3e   :  { %7095 = vadd.xlane.f32.xlu0 %v7094_v15  ;;  %v7138_v38 = vadd.f32 %v7137_v19, %v7136_v56  ;;  %v7144_v37 = vrot.slane %v7143_v57, 1  ;;  %v7087_v16 = vadd.f32 %v7086_v1, %v14603_v29  ;;  %v7161_v9 = vrot.slane %v14595_v7, 4  ;;  %v11789_v15 = vld [vmem:[#allocation8 + $0x670] ss:$8 sps:$4 sm:$0xff]   ;;  %v11791_v19 = vld [vmem:[#allocation8 + $0x674] ss:$8 sps:$4 sm:$0xff]  }
 0xa3f   :  { %v7082_v55 = vadd.f32 %v7081_v60, %v7080_v11  ;;  %v7097_v3 = vadd.f32 %v7077_v53, %v7070_v45  ;;  %v7149_v25 = vrot.slane %v7148_v61, 2  ;;  %v7156_v43 = vrot.slane %v7155_v0, 2  ;;  %v11794_v60 = vld [vmem:[#allocation8 + $0x774] ss:$8 sps:$4 sm:$0xff]   ;;  %8199 = vmatprep.subr.bf16.mxu1 %v11791_v19 }
 0xa40   :  { %v7145_v23 = vadd.f32 %v7144_v37, %v7143_v57  ;;  %v7175_v42 = vadd.f32 %v7174_v18, %v7138_v38  ;;  %v7088_v47 = vrot.slane %v7087_v16, 2  ;;  %v7162_v50 = vadd.f32 %v7161_v9, %v14595_v7  ;;  %v11792_v57 = vld [vmem:[#allocation8 + $0x770] ss:$8 sps:$4 sm:$0xff]   ;;  %8252 = vmatprep.subr.bf16.mxu0 %v11794_v60  ;;  %8200 = vmatpush1.bf16.msra.mxu1 %v11789_v15  ;;  %v11797_v38 = vld [vmem:[#allocation8 + $0x664] ss:$8 sps:$4 sm:$0xff]  }
 0xa41   :  { %v7083_v6 = vrot.slane %v7082_v55, 1  ;;  %v7150_v51 = vadd.f32 %v7149_v25, %v7148_v61  ;;  %v7157_v39 = vadd.f32 %v7156_v43, %v7155_v0  ;;  %v7167_v14 = vadd.f32 %v14607_v17, %v14576_v40  ;;  %8253 = vmatpush1.bf16.msra.mxu0 %v11792_v57  ;;  %v11800_v37 = vld [vmem:[#allocation8 + $0x764] ss:$8 sps:$4 sm:$0xff]   ;;  %v11798_v9 = vld [vmem:[#allocation8 + $0x760] ss:$8 sps:$4 sm:$0xff]   ;;  %8201 = vmatprep.subr.bf16.mxu1 %v11797_v38 }
 0xa42   :  { %v7176_v26 = vadd.f32 %v7175_v42, %v7145_v23  ;;  %v7089_v49 = vadd.f32 %v7088_v47, %v7087_v16  ;;  %v7163_v29 = vrot.slane %v7162_v50, 2  ;;  %v11795_v16 = vld [vmem:[#allocation8 + $0x660] ss:$8 sps:$4 sm:$0xff]   ;;  %8254 = vmatprep.subr.bf16.mxu0 %v11800_v37  ;;  %v11801_v25 = vld [vmem:[#allocation8 + $0x650] ss:$8 sps:$4 sm:$0xff]  }
 0xa43   :  { %v7084_v10 = vadd.f32 %v7083_v6, %v7082_v55  ;;  %v7151_v36 = vrot.slane %v7150_v51, 1  ;;  %v7158_v34 = vrot.slane %v7157_v39, 1  ;;  %v7168_v52 = vrot.slane %v7167_v14, 4  ;;  %v11803_v55 = vld [vmem:[#allocation8 + $0x654] ss:$8 sps:$4 sm:$0xff]  }
 0xa44   :  { %7177 = vadd.xlane.f32.xlu0 %v7176_v26  ;;  %v7090_v13 = vrot.slane %v7089_v49, 1  ;;  %v7164_v30 = vadd.f32 %v7163_v29, %v7162_v50  ;;  %8202 = vmatpush1.bf16.msra.mxu1 %v11795_v16  ;;  %v11804_v43 = vld [vmem:[#allocation8 + $0x750] ss:$8 sps:$4 sm:$0xff]   ;;  %v11809_v23 = vld [vmem:[#allocation8 + $0x644] ss:$8 sps:$4 sm:$0xff]  }
 0xa45   :  { %v7098_v46 = vadd.f32 %v7097_v3, %v7084_v10  ;;  %v7152_v58 = vadd.f32 %v7151_v36, %v7150_v51  ;;  %v7159_v56 = vadd.f32 %v7158_v34, %v7157_v39  ;;  %v7169_v7 = vadd.f32 %v7168_v52, %v7167_v14  ;;  %8255 = vmatpush1.bf16.msra.mxu0 %v11798_v9  ;;  %v11806_v3 = vld [vmem:[#allocation8 + $0x754] ss:$8 sps:$4 sm:$0xff]   ;;  %v11812_v42 = vld [vmem:[#allocation8 + $0x744] ss:$8 sps:$4 sm:$0xff]   ;;  %v11807_v47 = vld [vmem:[#allocation8 + $0x640] ss:$8 sps:$4 sm:$0xff]  }
 0xa46   :  { %v7091_v20 = vadd.f32 %v7090_v13, %v7089_v49  ;;  %v7165_v18 = vrot.slane %v7164_v30, 1  ;;  %8203 = vmatprep.subr.bf16.mxu1 %v11803_v55  ;;  %8256 = vmatprep.subr.bf16.mxu0 %v11806_v3  ;;  %v11810_v50 = vld [vmem:[#allocation8 + $0x740] ss:$8 sps:$4 sm:$0xff]   ;;  %v11815_v6 = vld [vmem:[#allocation8 + $0x634] ss:$8 sps:$4 sm:$0xff]  }
 0xa47   :  { %v7170_v45 = vrot.slane %v7169_v7, 2  ;;  %v7179_v33 = vadd.f32 %v7159_v56, %v7152_v58  ;;  %v11818_v51 = vld [vmem:[#allocation8 + $0x734] ss:$8 sps:$4 sm:$0xff]   ;;  %v11813_v39 = vld [vmem:[#allocation8 + $0x630] ss:$8 sps:$4 sm:$0xff]  }
 0xa48   :  { %v7099_v11 = vadd.f32 %v7098_v46, %v7091_v20  ;;  %v7166_v40 = vadd.f32 %v7165_v18, %v7164_v30  ;;  %8204 = vmatpush1.bf16.msra.mxu1 %v11801_v25  ;;  %v11816_v14 = vld [vmem:[#allocation8 + $0x730] ss:$8 sps:$4 sm:$0xff]   ;;  %v11821_v26 = vld [vmem:[#allocation8 + $0x624] ss:$8 sps:$4 sm:$0xff]   ;;  %v11819_v29 = vld [vmem:[#allocation8 + $0x620] ss:$8 sps:$4 sm:$0xff]  }
 0xa49   :  { %v7171_v17 = vadd.f32 %v7170_v45, %v7169_v7  ;;  %8257 = vmatpush1.bf16.msra.mxu0 %v11804_v43  ;;  %8205 = vmatprep.subr.bf16.mxu1 %v11809_v23  ;;  %v11824_v49 = vld [vmem:[#allocation8 + $0x724] ss:$8 sps:$4 sm:$0xff]   ;;  %v11822_v10 = vld [vmem:[#allocation8 + $0x720] ss:$8 sps:$4 sm:$0xff]   ;;  %v11827_v36 = vld [vmem:[#allocation8 + $0x614] ss:$8 sps:$4 sm:$0xff]  }
 0xa4a   :  { %7100 = vadd.xlane.f32.xlu1 %v7099_v11  ;;  %v7180_v53 = vadd.f32 %v7179_v33, %v7166_v40  ;;  %8258 = vmatprep.subr.bf16.mxu0 %v11812_v42  ;;  %v11830_v34 = vld [vmem:[#allocation8 + $0x714] ss:$8 sps:$4 sm:$0xff]   ;;  %v11825_v52 = vld [vmem:[#allocation8 + $0x610] ss:$8 sps:$4 sm:$0xff]   ;;  %v11833_v30 = vld [vmem:[#allocation8 + $0x604] ss:$8 sps:$4 sm:$0xff]  }
 0xa4b   :  { %v7172_v1 = vrot.slane %v7171_v17, 1  ;;  %v11828_v13 = vld [vmem:[#allocation8 + $0x710] ss:$8 sps:$4 sm:$0xff]   ;;  %v11836_v46 = vld [vmem:[#allocation8 + $0x704] ss:$8 sps:$4 sm:$0xff]  }
 0xa4c   :  { %8206 = vmatpush1.bf16.msra.mxu1 %v11807_v47  ;;  %v11831_v58 = vld [vmem:[#allocation8 + $0x600] ss:$8 sps:$4 sm:$0xff]   ;;  %v11839_v7 = vld [vmem:[#allocation8 + $0x6f4] ss:$8 sps:$4 sm:$0xff]   ;;  %v11837_v18 = vld [vmem:[#allocation8 + $0x6f0] ss:$8 sps:$4 sm:$0xff]  }
 0xa4d   :  { %v7173_v61 = vadd.f32 %v7172_v1, %v7171_v17  ;;  %8259 = vmatpush1.bf16.msra.mxu0 %v11810_v50  ;;  %8207 = vmatprep.subr.bf16.mxu1 %v11815_v6  ;;  %v11834_v56 = vld [vmem:[#allocation8 + $0x700] ss:$8 sps:$4 sm:$0xff]   ;;  %v11842_v20 = vld [vmem:[#allocation8 + $0x7f4] ss:$8 sps:$4 sm:$0xff]   ;;  %v11840_v45 = vld [vmem:[#allocation8 + $0x7f0] ss:$8 sps:$4 sm:$0xff]  }
 0xa4e   :  { %8260 = vmatprep.subr.bf16.mxu0 %v11818_v51  ;;  %v11845_v33 = vld [vmem:[#allocation8 + $0x6e4] ss:$8 sps:$4 sm:$0xff]   ;;  %v11843_v40 = vld [vmem:[#allocation8 + $0x6e0] ss:$8 sps:$4 sm:$0xff]   ;;  %v11851_v15 = vld [vmem:[#allocation8 + $0x6d4] ss:$8 sps:$4 sm:$0xff]  }
 0xa4f   :  { %v7181_v0 = vadd.f32 %v7180_v53, %v7173_v61  ;;  %v11848_v11 = vld [vmem:[#allocation8 + $0x7e4] ss:$8 sps:$4 sm:$0xff]   ;;  %v11846_v17 = vld [vmem:[#allocation8 + $0x7e0] ss:$8 sps:$4 sm:$0xff]   ;;  %v11854_v19 = vld [vmem:[#allocation8 + $0x7d4] ss:$8 sps:$4 sm:$0xff]  }
 0xa50   :  { %8208 = vmatpush1.bf16.msra.mxu1 %v11813_v39  ;;  %v11849_v57 = vld [vmem:[#allocation8 + $0x6d0] ss:$8 sps:$4 sm:$0xff]   ;;  %v11857_v53 = vld [vmem:[#allocation8 + $0x6c4] ss:$8 sps:$4 sm:$0xff]   ;;  %v11855_v61 = vld [vmem:[#allocation8 + $0x6c0] ss:$8 sps:$4 sm:$0xff]  }
 0xa51   :  { %7182 = vadd.xlane.f32.xlu1 %v7181_v0  ;;  %8261 = vmatpush1.bf16.msra.mxu0 %v11816_v14  ;;  %v11852_v1 = vld [vmem:[#allocation8 + $0x7d0] ss:$8 sps:$4 sm:$0xff]   ;;  %v11860_v60 = vld [vmem:[#allocation8 + $0x7c4] ss:$8 sps:$4 sm:$0xff]   ;;  %v11858_v0 = vld [vmem:[#allocation8 + $0x7c0] ss:$8 sps:$4 sm:$0xff]  }
 0xa52   :  { %8209 = vmatprep.subr.bf16.mxu1 %v11821_v26  ;;  %8262 = vmatprep.subr.bf16.mxu0 %v11824_v49  ;;  %v11863_v38 = vld [vmem:[#allocation8 + $0x6b4] ss:$8 sps:$4 sm:$0xff]   ;;  %v11861_v16 = vld [vmem:[#allocation8 + $0x6b0] ss:$8 sps:$4 sm:$0xff]   ;;  %v11869_v55 = vld [vmem:[#allocation8 + $0x6a4] ss:$8 sps:$4 sm:$0xff]  }
 0xa53   :  { %v11866_v37 = vld [vmem:[#allocation8 + $0x7b4] ss:$8 sps:$4 sm:$0xff]   ;;  %v11864_v9 = vld [vmem:[#allocation8 + $0x7b0] ss:$8 sps:$4 sm:$0xff]   ;;  %v11872_v3 = vld [vmem:[#allocation8 + $0x7a4] ss:$8 sps:$4 sm:$0xff]  }
 0xa54   :  { %8210 = vmatpush1.bf16.msra.mxu1 %v11819_v29  ;;  %v11867_v25 = vld [vmem:[#allocation8 + $0x6a0] ss:$8 sps:$4 sm:$0xff]   ;;  %v11875_v23 = vld [vmem:[#allocation8 + $0x694] ss:$8 sps:$4 sm:$0xff]   ;;  %v11873_v47 = vld [vmem:[#allocation8 + $0x690] ss:$8 sps:$4 sm:$0xff]  }
 0xa55   :  { %8263 = vmatpush1.bf16.msra.mxu0 %v11822_v10  ;;  %8211 = vmatprep.subr.bf16.mxu1 %v11827_v36  ;;  %v11870_v43 = vld [vmem:[#allocation8 + $0x7a0] ss:$8 sps:$4 sm:$0xff]   ;;  %v11878_v42 = vld [vmem:[#allocation8 + $0x794] ss:$8 sps:$4 sm:$0xff]   ;;  %v11876_v50 = vld [vmem:[#allocation8 + $0x790] ss:$8 sps:$4 sm:$0xff]  }
 0xa56   :  { %8264 = vmatprep.subr.bf16.mxu0 %v11830_v34  ;;  %v11881_v6 = vld [vmem:[#allocation8 + $0x684] ss:$8 sps:$4 sm:$0xff]   ;;  %v11879_v39 = vld [vmem:[#allocation8 + $0x680] ss:$8 sps:$4 sm:$0xff]   ;;  %v7429_v29 = vld [vmem:[#allocation10 + $0x18] sm:$0xff] }
 0xa57   :  { %v11884_v51 = vld [vmem:[#allocation8 + $0x784] ss:$8 sps:$4 sm:$0xff]   ;;  %v11882_v14 = vld [vmem:[#allocation8 + $0x780] ss:$8 sps:$4 sm:$0xff]  }
 0xa58   :  { %8212 = vmatpush1.bf16.msra.mxu1 %v11825_v52  ;;  %v7431_v52 = vcombine.high %v7429_v29, %v7429_v29 }
 0xa59   :  { %8265 = vmatpush1.bf16.msra.mxu0 %v11828_v13  ;;  %8213 = vmatprep.subr.bf16.mxu1 %v11833_v30  ;;  %v11892_v30 = vld [vmem:[#allocation7 + $0x8e4] ss:$16 sps:$4 sm:$0xff]  }
 0xa5a   :  { %8266 = vmatprep.subr.bf16.mxu0 %v11836_v46 }
 0xa5c   :  { %8214 = vmatpush1.bf16.msra.mxu1 %v11831_v58  ;;  %v16006_v58 = vld [vmem:[#allocation43_spill] sm:$0xff] }
 0xa5d   :  { %8267 = vmatpush1.bf16.msra.mxu0 %v11834_v56  ;;  %8215 = vmatprep.subr.bf16.mxu1 %v11839_v7  ;;  %v7438_v56 = vrot.slane %v7429_v29, %v16006_v58  ;;  %v7445_v7 = vrot.slane %v7431_v52, %v16006_v58 }
 0xa5e   :  { %8268 = vmatprep.subr.bf16.mxu0 %v11842_v20  ;;  %v11895_v20 = vld [vmem:[#allocation7 + $0x8ec] ss:$16 sps:$4 sm:$0xff]  }
 0xa60   :  { %8216 = vmatpush2.bf16.msra.mxu1 %v11837_v18 }
 0xa61   :  { %8269 = vmatpush2.bf16.msra.mxu0 %v11840_v45  ;;  %8217 = vmatprep.subr.bf16.mxu1 %v11845_v33  ;;  %v7446_v33 = vcombine.high %v7438_v56, %v7438_v56 }
 0xa62   :  { %8270 = vmatprep.subr.bf16.mxu0 %v11848_v11  ;;  %v7447_v11 = vcombine.high %v7445_v7, %v7445_v7 }
 0xa64   :  { %8218 = vmatpush2.bf16.msra.mxu1 %v11843_v40 }
 0xa65   :  { %8271 = vmatpush2.bf16.msra.mxu0 %v11846_v17  ;;  %8219 = vmatprep.subr.bf16.mxu1 %v11851_v15  ;;  %v7560_v17 = vld [vmem:[#allocation11] sm:$0x22]  ;;  %v7561_v15 = vld [vmem:[#allocation11 + $0x8] sm:$0x22] }
 0xa66   :  { %8272 = vmatprep.subr.bf16.mxu0 %v11854_v19 }
 0xa68   :  { %8220 = vmatpush2.bf16.msra.mxu1 %v11849_v57  ;;  %v7491_v57 = vshrl.u32 %v7446_v33, 16 }
 0xa69   :  { %8273 = vmatpush2.bf16.msra.mxu0 %v11852_v1  ;;  %8221 = vmatprep.subr.bf16.mxu1 %v11857_v53  ;;  %v7505_v1 = vshrl.u32 %v7447_v11, 16  ;;  %v7484_v53 = vshrl.u32 %v7438_v56, 16 }
 0xa6a   :  { %8274 = vmatprep.subr.bf16.mxu0 %v11860_v60 }
 0xa6c   :  { %8222 = vmatpush2.bf16.msra.mxu1 %v11855_v61 }
 0xa6d   :  { %8275 = vmatpush2.bf16.msra.mxu0 %v11858_v0  ;;  %8223 = vmatprep.subr.bf16.mxu1 %v11863_v38  ;;  %v10876_v0 = vcombine.high %v7560_v17, %v7560_v17  ;;  %v7498_v38 = vshrl.u32 %v7445_v7, 16 }
 0xa6e   :  { %8276 = vmatprep.subr.bf16.mxu0 %v11866_v37  ;;  %v10875_v37 = vcombine.low %v7560_v17, %v7560_v17 }
 0xa70   :  { %8224 = vmatpush2.bf16.msra.mxu1 %v11861_v16  ;;  %v10877_v16 = vcombine.low %v7561_v15, %v7561_v15 }
 0xa71   :  { %8277 = vmatpush2.bf16.msra.mxu0 %v11864_v9  ;;  %8225 = vmatprep.subr.bf16.mxu1 %v11869_v55  ;;  %v10878_v9 = vcombine.high %v7561_v15, %v7561_v15  ;;  %v14659_v15 = vld [vmem:[#allocation17 + $0x3] ss:$8 sm:$0xf] }
 0xa72   :  { %8278 = vmatprep.subr.bf16.mxu0 %v11872_v3  ;;  %v7456_v3 = vpack.i.b16 %v7446_v33, %v7446_v33 }
 0xa74   :  { %8226 = vmatpush2.bf16.msra.mxu1 %v11867_v25  ;;  %v7492_v25 = vpack.i.b16 %v7491_v57, %v7491_v57  ;;  %v14641_v29 = vrot.slane %v7456_v3, %v15948_v22  ;;  %v14647_v52 = vrot.slane %v7456_v3, %v15990_v41 }
 0xa75   :  { %8279 = vmatpush2.bf16.msra.mxu0 %v11870_v43  ;;  %8227 = vmatprep.subr.bf16.mxu1 %v11875_v23  ;;  %v7506_v43 = vpack.i.b16 %v7505_v1, %v7505_v1  ;;  %v7485_v23 = vpack.i.b16 %v7484_v53, %v7484_v53 }
 0xa76   :  { %8280 = vmatprep.subr.bf16.mxu0 %v11878_v42 }
 0xa78   :  { %8228 = vmatpush2.bf16.msra.mxu1 %v11873_v47  ;;  %v7597_v47 = vshrl.u32 %v10876_v0, 16 }
 0xa79   :  { %8281 = vmatpush2.bf16.msra.mxu0 %v11876_v50  ;;  %8229 = vmatprep.subr.bf16.mxu1 %v11881_v6  ;;  %v7499_v50 = vpack.i.b16 %v7498_v38, %v7498_v38  ;;  %v7589_v6 = vshrl.u32 %v10875_v37, 16 }
 0xa7a   :  { %8282 = vmatprep.subr.bf16.mxu0 %v11884_v51  ;;  %v7605_v51 = vshrl.u32 %v10877_v16, 16 }
 0xa7b   :  { %v7590_v33 = vpack.i.b16 %v7589_v6, %v7589_v6 }
 0xa7c   :  { %8230 = vmatpush2.bf16.msra.mxu1 %v11879_v39  ;;  %v7613_v39 = vshrl.u32 %v10878_v9, 16 }
 0xa7d   :  { %8283 = vmatpush2.bf16.msra.mxu0 %v11882_v14  ;;  %8848 = vmatprep.subr.bf16.mxu1 %v11892_v30  ;;  %v14638_v14 = vld [vmem:[#allocation16 + $0x3] ss:$8 sm:$0xf]  ;;  %v14653_v30 = vrot.slane %v7485_v23, %v15948_v22  ;;  %v14692_v3 = vrot.slane %v7590_v33, %v15990_v41 }
 0xa7e   :  { %8901 = vmatprep.subr.bf16.mxu0 %v11895_v20  ;;  %v7598_v20 = vpack.i.b16 %v7597_v47, %v7597_v47  ;;  %v7614_v17 = vpack.i.b16 %v7613_v39, %v7613_v39 }
 0xa80   :  { %v14678_v38 = vrot.slane %v7598_v20, %v15990_v41 }
 0xac7   :  { %v7096_v26 = vpop.xlane.xlu0 %7095 }
 0xac8   :  { %v14628_v49 = vmul.f32 0.00012207031, %v7096_v26 }
 0xaca   :  { %v7188_v36 = vmul.f32 %v14628_v49, %v14628_v49 }
 0xacd   :  { %v7178_v10 = vpop.xlane.xlu0 %7177 }
 0xace   :  { %v7186_v34 = vmul.f32 0.00012207031, %v7178_v10  ;;  %v7470_v10 = vpack.i.b16 %v7447_v11, %v7447_v11  ;;  %v7606_v11 = vpack.i.b16 %v7605_v51, %v7605_v51 }
 0xad0   :  { %v7190_v13 = vsub.f32 %v7186_v34, %v7188_v36  ;;  %v7449_v36 = vpack.i.b16 %v7438_v56, %v7438_v56  ;;  %v14644_v34 = vrot.slane %v7492_v25, %v15948_v22  ;;  %v14665_v57 = vrot.slane %v7470_v10, %v15990_v41 }
 0xad1   :  { %v14695_v25 = vrot.slane %v7606_v11, %v15990_v41 }
 0xad2   :  { %v7192_v46 = vmax.f32 %v7190_v13, 0.0  ;;  %v14650_v13 = vrot.slane %v7506_v43, %v15948_v22  ;;  %v14668_v1 = vrot.slane %v7449_v36, %v15948_v22 }
 0xad3   :  { %v7101_v45 = vpop.xlane.xlu1 %7100 }
 0xad4   :  { %v7194_v18 = vadd.f32 1e-08, %v7192_v46  ;;  %v14634_v40 = vmul.f32 0.00012207031, %v7101_v45  ;;  %v14656_v45 = vrot.slane %v7499_v50, %v15948_v22 }
 0xad6   :  { %12127 = vrsqrt.f32 %v7194_v18  ;;  %v7189_v60 = vmul.f32 %v14634_v40, %v14634_v40  ;;  %v7463_v18 = vpack.i.b16 %v7445_v7, %v7445_v7  ;;  %v14671_v7 = vrot.slane %v7449_v36, %v15990_v41 }
 0xad8   :  { %v14682_v16 = vrot.slane %v7463_v18, %v15948_v22  ;;  %v14685_v9 = vrot.slane %v7463_v18, %v15990_v41 }
 0xada   :  { %v7183_v19 = vpop.xlane.xlu1 %7182 }
 0xadb   :  { %v7187_v61 = vmul.f32 0.00012207031, %v7183_v19  ;;  %v14662_v19 = vrot.slane %v7470_v10, %v15948_v22 }
 0xadd   :  { %v7191_v55 = vsub.f32 %v7187_v61, %v7189_v60 }
 0xadf   :  { %v7193_v42 = vmax.f32 %v7191_v55, 0.0 }
 0xae1   :  { %v7195_v26 = vadd.f32 1e-08, %v7193_v42 }
 0xae3   :  { %v12128_v46 = vpop.eup %12127  ;;  %12129 = vrsqrt.f32 %v7195_v26 }
 0xae4   :  { %v7200_v56 = vmul.f32 %v12128_v46, %v14638_v14 }
 0xae6   :  { %v7204_v53 = vmul.f32 %v7200_v56, %v14628_v49  ;;  %v7217_v60 = vrot.slane %v7200_v56, %v15990_v41  ;;  %v7225_v61 = vrot.slane %v7200_v56, %v16004_v8  ;;  %v7213_v0 = vrot.slane %v7200_v56, %v15948_v22 }
 0xae7   :  { %v7221_v37 = vrot.slane %v7200_v56, %v16003_v32  ;;  %v14689_v49 = vrot.slane %v7614_v17, %v15990_v41 }
 0xae8   :  { %v7206_v55 = vsub.f32 %v14659_v15, %v7204_v53  ;;  %v7251_v43 = vmul.f32 %v7217_v60, %v14494_v31  ;;  %v7255_v23 = vmul.f32 %v7217_v60, %v14524_v12  ;;  %v7253_v42 = vmul.f32 %v7225_v61, %v14496_v27 }
 0xae9   :  { %v7257_v47 = vmul.f32 %v7225_v61, %v14526_v5  ;;  %v7250_v51 = vmul.f32 %v7213_v0, %v14490_v21  ;;  %v7254_v26 = vmul.f32 %v7213_v0, %v14500_v48  ;;  %v7252_v10 = vmul.f32 %v7221_v37, %v14492_v63 }
 0xaea   :  { %v7275_v50 = vrot.slane %v7206_v55, %v15990_v41  ;;  %v7283_v6 = vrot.slane %v7206_v55, %v16004_v8  ;;  %v7271_v39 = vrot.slane %v7206_v55, %v15948_v22  ;;  %v7256_v31 = vmul.f32 %v7221_v37, %v14502_v44 }
 0xaeb   :  { %v7279_v12 = vrot.slane %v7206_v55, %v16003_v32 }
 0xaec   :  { %v14709_v36 = vadd.f32 %v7275_v50, %v7251_v43  ;;  %v14711_v27 = vadd.f32 %v7275_v50, %v7255_v23  ;;  %v14713_v5 = vadd.f32 %v7283_v6, %v7253_v42  ;;  %v14715_v46 = vadd.f32 %v7283_v6, %v7257_v47 }
 0xaed   :  { %v14717_v20 = vadd.f32 %v7271_v39, %v7250_v51  ;;  %v14719_v21 = vadd.f32 %v7271_v39, %v7254_v26  ;;  %v14721_v18 = vadd.f32 %v7279_v12, %v7252_v10  ;;  %v14723_v48 = vadd.f32 %v7279_v12, %v7256_v31 }
 0xaee   :  { %v15834_v63 = vrot.slane %v14709_v36, 7  ;;  %v15830_v44 = vrot.slane %v14711_v27, 7  ;;  %v15829_v56 = vrot.slane %v14709_v36, 1  ;;  %v15833_v33 = vrot.slane %v14711_v27, 1 }
 0xaef   :  { %v7421_v11 = vpack.c.bf16 %v14711_v27, %v14709_v36  ;;  %v15831_v17 = vrot.slane %v14713_v5, 7  ;;  %v15828_v53 = vrot.slane %v14715_v46, 7  ;;  %v15827_v60 = vrot.slane %v14713_v5, 1 }
 0xaf0   :  { %v12130_v61 = vpop.eup %12129  ;;  %v14740_v0 = vsel %vm1296_vm4, %v15834_v63, %v15830_v44  ;;  %v14748_v37 = vsel %vm1345_vm5, %v15829_v56, %v15833_v33  ;;  %v7379_v55 = vrot.slane %v14715_v46, 1  ;;  %v7423_v43 = vpack.c.bf16 %v14715_v46, %v14713_v5  ;;  %v16007_v63 = vld [vmem:[#allocation37_spill] sm:$0xff] }
 0xaf1   :  { %v7201_v23 = vmul.f32 %v12130_v61, %v14638_v14  ;;  %v14755_v42 = vmul.bf16 %v14644_v34, %v7421_v11  ;;  %v14763_v47 = vsel %vm1296_vm4, %v15831_v17, %v15828_v53  ;;  %v7324_v50 = vrot.slane %v14717_v20, 7 }
 0xaf2   :  { %v14770_v6 = vsel %vm1345_vm5, %v15827_v60, %v7379_v55  ;;  %v14773_v14 = vmul.bf16 %v14650_v13, %v7423_v43  ;;  %v15832_v51 = vrot.slane %v14719_v21, 7  ;;  %v7376_v43 = vrot.slane %v14719_v21, 1 }
 0xaf3   :  { %v7205_v26 = vmul.f32 %v7201_v23, %v14634_v40  ;;  %v7229_v10 = vrot.slane %v7201_v23, %v15948_v22  ;;  %v7237_v31 = vrot.slane %v7201_v23, %v16003_v32  ;;  %v7233_v12 = vrot.slane %v7201_v23, %v15990_v41 }
 0xaf4   :  { %v7241_v11 = vrot.slane %v7201_v23, %v16004_v8  ;;  %v14786_v61 = vsel %vm1296_vm4, %v7324_v50, %v15832_v51  ;;  %v7420_v60 = vpack.c.bf16 %v14719_v21, %v14717_v20  ;;  %v16008_v58 = vrot.slane %v14717_v20, 1 }
 0xaf5   :  { %v7258_v40 = vmul.f32 %v7229_v10, %v14554_v24  ;;  %v7260_v53 = vmul.f32 %v7237_v31, %v14556_v2  ;;  %v7262_v56 = vmul.f32 %v7229_v10, %v14568_v54  ;;  %v7264_v44 = vmul.f32 %v7237_v31, %v14570_v62 }
 0xaf6   :  { %v7207_v23 = vsub.f32 %v14659_v15, %v7205_v26  ;;  %v7259_v17 = vmul.f32 %v7233_v12, %v14558_v35  ;;  %v7263_v51 = vmul.f32 %v7233_v12, %v14588_v28  ;;  %v7261_v33 = vmul.f32 %v7241_v11, %v14560_v59 }
 0xaf7   :  { %v7265_v39 = vmul.f32 %v7241_v11, %v16007_v63  ;;  %v7396_v24 = vsel %vm1345_vm5, %v16008_v58, %v7376_v43  ;;  %v14805_v2 = vmul.bf16 %v14653_v30, %v7420_v60  ;;  %v7326_v54 = vrot.slane %v14721_v18, 7 }
 0xaf8   :  { %v7291_v62 = vrot.slane %v7207_v23, %v15990_v41  ;;  %v7299_v35 = vrot.slane %v7207_v23, %v16004_v8  ;;  %v7287_v28 = vrot.slane %v7207_v23, %v15948_v22  ;;  %v7295_v59 = vrot.slane %v7207_v23, %v16003_v32 }
 0xaf9   :  { %v7378_v26 = vrot.slane %v14723_v48, 1  ;;  %v7422_v58 = vpack.c.bf16 %v14723_v48, %v14721_v18 }
 0xafa   :  { %v14817_v60 = vadd.f32 %v7291_v62, %v7259_v17  ;;  %v14819_v10 = vadd.f32 %v7291_v62, %v7263_v51  ;;  %v14821_v31 = vadd.f32 %v7299_v35, %v7261_v33  ;;  %v14823_v12 = vadd.f32 %v7299_v35, %v7265_v39 }
 0xafb   :  { %v14825_v11 = vadd.f32 %v7287_v28, %v7258_v40  ;;  %v14827_v23 = vadd.f32 %v7287_v28, %v7262_v56  ;;  %v14829_v15 = vadd.f32 %v7295_v59, %v7260_v53  ;;  %v14831_v63 = vadd.f32 %v7295_v59, %v7264_v44 }
 0xafc   :  { %v7337_v8 = vrot.slane %v14819_v10, 7  ;;  %v7381_v32 = vrot.slane %v14817_v60, 1  ;;  %v15840_v17 = vrot.slane %v14823_v12, 7  ;;  %v15841_v51 = vrot.slane %v14821_v31, 1 }
 0xafd   :  { %v16009_v56 = vrot.slane %v14723_v48, 7  ;;  %v16010_v53 = vrot.slane %v14709_v36, 7  ;;  %v16011_v35 = vrot.slane %v14711_v27, 1  ;;  %v16012_v59 = vrot.slane %v14713_v5, 7 }
 0xafe   :  { %v16013_v41 = vrot.slane %v14827_v23, 7 }
 0xaff   :  { %v7350_v44 = vsel %vm1296_vm4, %v7326_v54, %v16009_v56  ;;  %v7353_v62 = vsel %vm1296_vm4, %v7337_v8, %v16010_v53  ;;  %v7393_v28 = vsel %vm1345_vm5, %v16011_v35, %v7381_v32  ;;  %v7355_v40 = vsel %vm1296_vm4, %v15840_v17, %v16012_v59 }
 0xb00   :  { %v7395_v56 = vsel %vm1345_vm5, %v7379_v55, %v15841_v51  ;;  %v7357_v39 = vpack.c.bf16 %v14740_v0, %v7353_v62  ;;  %v7405_v53 = vpack.c.bf16 %v7393_v28, %v14748_v37  ;;  %v7359_v33 = vpack.c.bf16 %v14763_v47, %v7355_v40  ;;  %v16016_v47 = vld [vmem:[#allocation44_spill] sm:$0xff] }
 0xb01   :  { %v7407_v35 = vpack.c.bf16 %v7395_v56, %v14770_v6  ;;  %v7352_v22 = vsel %vm1296_vm4, %v16013_v41, %v7324_v50  ;;  %v16014_v59 = vrot.slane %v14825_v11, 1  ;;  %v16015_v55 = vrot.slane %v14831_v63, 7  ;;  %v16017_v6 = vld [vmem:[#allocation45_spill] sm:$0xff] }
 0xb02   :  { %v7382_v37 = vrot.slane %v14829_v15, 1  ;;  %v7365_v40 = vmul.bf16 %v7357_v39, %v16016_v47  ;;  %v7413_v62 = vmul.bf16 %v7405_v53, %v16017_v6  ;;  %v7367_v28 = vmul.bf16 %v7359_v33, %v16016_v47 }
 0xb03   :  { %v7392_v17 = vsel %vm1345_vm5, %v7376_v43, %v16014_v59  ;;  %v7354_v0 = vsel %vm1296_vm4, %v16015_v55, %v7326_v54  ;;  %v7415_v41 = vmul.bf16 %v7407_v35, %v16017_v6  ;;  %v7356_v50 = vpack.c.bf16 %v14786_v61, %v7352_v22 }
 0xb04   :  { %v7404_v56 = vpack.c.bf16 %v7392_v17, %v7396_v24  ;;  %v7358_v51 = vpack.c.bf16 %v7350_v44, %v7354_v0  ;;  %v7394_v43 = vsel %vm1345_vm5, %v7378_v26, %v7382_v37  ;;  %v7477_v54 = vmul.bf16 %v14641_v29, %v7365_v40 }
 0xb05   :  { %v7545_v59 = vmul.bf16 %v14647_v52, %v7413_v62  ;;  %v7479_v39 = vmul.bf16 %v14662_v19, %v7367_v28  ;;  %v7547_v53 = vmul.bf16 %v14665_v57, %v7415_v41  ;;  %v7364_v33 = vmul.bf16 %v7356_v50, %v16016_v47 }
 0xb06   :  { %v7412_v35 = vmul.bf16 %v7404_v56, %v16017_v6  ;;  %v7366_v22 = vmul.bf16 %v7358_v51, %v16016_v47  ;;  %v16018_v61 = vrot.slane %v14721_v18, 1  ;;  %v7521_v17 = vadd.bf16 %v14755_v42, %v7477_v54 }
 0xb07   :  { %v7523_v44 = vadd.bf16 %v14773_v14, %v7479_v39  ;;  %v7514_v0 = vmul.bf16 %v14656_v45, %v7422_v58  ;;  %v7476_v40 = vmul.bf16 %v14668_v1, %v7364_v33  ;;  %v7333_v51 = vrot.slane %v14817_v60, 7 }
 0xb08   :  { %v7398_v24 = vsel %vm1345_vm5, %v16018_v61, %v7378_v26  ;;  %v7544_v62 = vmul.bf16 %v14671_v7, %v7412_v35  ;;  %v7478_v28 = vmul.bf16 %v14682_v16, %v7366_v22  ;;  %v7553_v41 = vadd.bf16 %v7545_v59, %v7521_v17 }
 0xb09   :  { %v7406_v55 = vpack.c.bf16 %v7394_v43, %v7398_v24  ;;  %v7555_v50 = vadd.bf16 %v7547_v53, %v7523_v44  ;;  %v7385_v26 = vrot.slane %v14819_v10, 1  ;;  %v7520_v42 = vadd.bf16 %v14805_v2, %v7476_v40 }
 0xb0a   :  { %v7522_v14 = vadd.bf16 %v7514_v0, %v7478_v28  ;;  %v7341_v58 = vsel %vm1296_vm4, %v7333_v51, %v7337_v8  ;;  %v16019_v43 = vrot.slane %v14711_v27, 7  ;;  %v16020_v39 = vmov 0  }
 0xb0b   :  { %v7414_v56 = vmul.bf16 %v7406_v55, %v16017_v6  ;;  %v7563_v33 = vmax.bf16 %v16020_v39, %v7553_v41  ;;  %v7571_v59 = vmin.bf16 %v16020_v39, %v7553_v41  ;;  %v7565_v53 = vmax.bf16 %v16020_v39, %v7555_v50 }
 0xb0c   :  { %v7345_v54 = vsel %vm1296_vm4, %v16019_v43, %v7333_v51  ;;  %v7573_v35 = vmin.bf16 %v16020_v39, %v7555_v50  ;;  %v7552_v22 = vadd.bf16 %v7544_v62, %v7520_v42  ;;  %v7389_v8 = vsel %vm1345_vm5, %v7381_v32, %v7385_v26  ;;  %v11890_v43 = vld [vmem:[#allocation7 + $0x8e0] ss:$16 sps:$4 sm:$0xff]  }
 0xb0d   :  { %v7546_v2 = vmul.bf16 %v14685_v9, %v7414_v56  ;;  %v7361_v61 = vpack.c.bf16 %v7341_v58, %v7345_v54  ;;  %v7621_v27 = vmul.bf16 %v14678_v38, %v7571_v59  ;;  %v16021_v17 = vrot.slane %v14709_v36, 1 }
 0xb0e   :  { %v7623_v24 = vmul.bf16 %v14689_v49, %v7573_v35  ;;  %v7425_v55 = vpack.c.bf16 %v14819_v10, %v14817_v60  ;;  %v7562_v0 = vmax.bf16 %v16020_v39, %v7552_v22  ;;  %v7570_v40 = vmin.bf16 %v16020_v39, %v7552_v22 }
 0xb0f   :  { %v7401_v44 = vsel %vm1345_vm5, %v7385_v26, %v16021_v17  ;;  %v7554_v62 = vadd.bf16 %v7546_v2, %v7522_v14  ;;  %v7369_v28 = vmul.bf16 %v7361_v61, %v16016_v47  ;;  %v7629_v32 = vadd.bf16 %v7621_v27, %v7563_v33  ;;  %v11893_v61 = vld [vmem:[#allocation7 + $0x8e8] ss:$16 sps:$4 sm:$0xff]  }
 0xb10   :  { %v7631_v51 = vadd.bf16 %v7623_v24, %v7565_v53  ;;  %v7409_v41 = vpack.c.bf16 %v7401_v44, %v7389_v8  ;;  %v7517_v50 = vmul.bf16 %v14644_v34, %v7425_v55  ;;  %v7620_v36 = vmul.bf16 %v14692_v3, %v7570_v40  ;;  %v11898_v53 = vld [vmem:[#allocation7 + $0x8c4] ss:$16 sps:$4 sm:$0xff]   ;;  %v11901_v44 = vld [vmem:[#allocation7 + $0x8cc] ss:$16 sps:$4 sm:$0xff]  }
 0xb11   :  { %v7564_v56 = vmax.bf16 %v16020_v39, %v7554_v62  ;;  %v7572_v26 = vmin.bf16 %v16020_v39, %v7554_v62  ;;  %v7481_v60 = vmul.bf16 %v14641_v29, %v7369_v28  ;;  %v7637_v10 = vunpack.c.l.bf16 %v7629_v32  ;;  %8231 = vmatprep.mubr.bf16.mxu1 %v7629_v32  ;;  %v11896_v28 = vld [vmem:[#allocation7 + $0x8c0] ss:$16 sps:$4 sm:$0xff]  }
 0xb12   :  { %v7641_v42 = vunpack.c.h.bf16 %v7629_v32  ;;  %v14938_v58 = vunpack.c.l.bf16 %v7631_v51  ;;  %v14940_v14 = vunpack.c.h.bf16 %v7631_v51  ;;  %8284 = vmatprep.mubr.bf16.mxu0 %v7631_v51  ;;  %v14942_v54 = vadd.bf16 %v7620_v36, %v7562_v0 }
 0xb13   :  { %v7622_v34 = vmul.bf16 %v14695_v25, %v7572_v26  ;;  %v7417_v33 = vmul.bf16 %v7409_v41, %v16017_v6  ;;  %v7525_v59 = vadd.bf16 %v7517_v50, %v7481_v60  ;;  %v7719_v29 = vmul.f32 %v7637_v10, %v7637_v10 }
 0xb14   :  { %v14946_v35 = vadd.f32 %v7641_v42, %v7637_v10  ;;  %v7723_v22 = vmul.f32 %v7641_v42, %v7641_v42  ;;  %v14950_v2 = vmul.f32 %v14938_v58, %v14938_v58  ;;  %v14954_v8 = vmul.f32 %v14940_v14, %v14940_v14  ;;  %8232 = vmatmul.mubr.bf16.vlgmr.msra.gmra.mxu1 %v14942_v54 }
 0xb15   :  { %v14957_v27 = vadd.bf16 %v7622_v34, %v7564_v56  ;;  %v7549_v24 = vmul.bf16 %v14647_v52, %v7417_v33  ;;  %v7335_v17 = vrot.slane %v14821_v31, 7  ;;  %v7387_v40 = vrot.slane %v14823_v12, 1  ;;  %8849 = vmatpush1.bf16.msra.mxu1 %v11890_v43  ;;  %v11904_v56 = vld [vmem:[#allocation7 + $0x8a4] ss:$16 sps:$4 sm:$0xff]   ;;  %v11899_v43 = vld [vmem:[#allocation7 + $0x8c8] ss:$16 sps:$4 sm:$0xff]  }
 0xb16   :  { %v7660_v55 = vrot.slane %v14946_v35, 4  ;;  %v14962_v0 = vadd.f32 %v7723_v22, %v7719_v29  ;;  %v7427_v62 = vpack.c.bf16 %v14823_v12, %v14821_v31  ;;  %v16022_v51 = vrot.slane %v14823_v12, 7  ;;  %8850 = vmatprep.subr.bf16.mxu1 %v11898_v53  ;;  %v11907_v29 = vld [vmem:[#allocation7 + $0x8ac] ss:$16 sps:$4 sm:$0xff]  }
 0xb17   :  { %8285 = vmatmul.mubr.bf16.vlgmr.msra.gmra.mxu0 %v14957_v27  ;;  %v7557_v32 = vadd.bf16 %v7549_v24, %v7525_v59  ;;  %v16023_v41 = vrot.slane %v14715_v46, 7  ;;  %v7332_v36 = vrot.slane %v14825_v11, 7  ;;  %v16024_v60 = vrot.slane %v14821_v31, 1 }
 0xb18   :  { %v7343_v52 = vsel %vm1296_vm4, %v7335_v17, %v16022_v51  ;;  %v16025_v12 = vrot.slane %v14713_v5, 1  ;;  %v7519_v46 = vmul.bf16 %v14650_v13, %v7427_v62  ;;  %8902 = vmatpush1.bf16.msra.mxu0 %v11893_v61  ;;  %v16026_v53 = vrot.slane %v14827_v23, 7 }
 0xb19   :  { %v7347_v50 = vsel %vm1296_vm4, %v16023_v41, %v7335_v17  ;;  %v7391_v10 = vsel %vm1345_vm5, %v16024_v60, %v7387_v40  ;;  %v7567_v34 = vmax.bf16 %v16020_v39, %v7557_v32  ;;  %v7575_v33 = vmin.bf16 %v16020_v39, %v7557_v32  ;;  %8903 = vmatprep.subr.bf16.mxu0 %v11901_v44  ;;  %v11902_v17 = vld [vmem:[#allocation7 + $0x8a0] ss:$16 sps:$4 sm:$0xff]  }
 0xb1a   :  { %v7363_v26 = vpack.c.bf16 %v7343_v52, %v7347_v50  ;;  %v7403_v42 = vsel %vm1345_vm5, %v7387_v40, %v16025_v12  ;;  %v7340_v31 = vsel %vm1296_vm4, %v7332_v36, %v16026_v53  ;;  %v16027_v22 = vrot.slane %v14719_v21, 7  ;;  %8851 = vmatpush1.bf16.msra.mxu1 %v11896_v28  ;;  %v11905_v28 = vld [vmem:[#allocation7 + $0x8a8] ss:$16 sps:$4 sm:$0xff]  }
 0xb1b   :  { %v7411_v59 = vpack.c.bf16 %v7403_v42, %v7391_v10  ;;  %v7384_v61 = vrot.slane %v14827_v23, 1  ;;  %v7424_v24 = vpack.c.bf16 %v14827_v23, %v14825_v11  ;;  %v7625_v40 = vmul.bf16 %v14678_v38, %v7575_v33  ;;  %8852 = vmatprep.subr.bf16.mxu1 %v11904_v56 }
 0xb1c   :  { %v7371_v5 = vmul.bf16 %v7363_v26, %v16016_v47  ;;  %v7344_v13 = vsel %vm1296_vm4, %v16027_v22, %v7332_v36  ;;  %v7334_v32 = vrot.slane %v14829_v15, 7  ;;  %v16028_v51 = vrot.slane %v14825_v11, 1  ;;  %8904 = vmatpush1.bf16.msra.mxu0 %v11899_v43 }
 0xb1d   :  { %v7419_v62 = vmul.bf16 %v7411_v59, %v16017_v6  ;;  %v7360_v44 = vpack.c.bf16 %v7340_v31, %v7344_v13  ;;  %v16029_v41 = vrot.slane %v14717_v20, 1  ;;  %v7516_v38 = vmul.bf16 %v14653_v30, %v7424_v24  ;;  %8905 = vmatprep.subr.bf16.mxu0 %v11907_v29 }
 0xb1e   :  { %v7483_v21 = vmul.bf16 %v14662_v19, %v7371_v5  ;;  %v7388_v52 = vsel %vm1345_vm5, %v16028_v51, %v7384_v61  ;;  %v7633_v50 = vadd.bf16 %v7625_v40, %v7567_v34  ;;  %v16030_v26 = vrot.slane %v14831_v63, 7  ;;  %8853 = vmatpush1.bf16.msra.mxu1 %v11902_v17 }
 0xb1f   :  { %v7400_v23 = vsel %vm1345_vm5, %v7384_v61, %v16029_v41  ;;  %v7551_v36 = vmul.bf16 %v14665_v57, %v7419_v62  ;;  %v7368_v56 = vmul.bf16 %v7360_v44, %v16016_v47  ;;  %v16031_v60 = vrot.slane %v14723_v48, 7 }
 0xb20   :  { %v7408_v19 = vpack.c.bf16 %v7400_v23, %v7388_v52  ;;  %v7527_v11 = vadd.bf16 %v7519_v46, %v7483_v21  ;;  %v7342_v20 = vsel %vm1296_vm4, %v7334_v32, %v16030_v26  ;;  %v7386_v10 = vrot.slane %v14831_v63, 1  ;;  %8241 = vmatprep.mubr.bf16.mxu1 %v7633_v50  ;;  %8906 = vmatpush1.bf16.msra.mxu0 %v11905_v28 }
 0xb21   :  { %v7346_v30 = vsel %vm1296_vm4, %v16031_v60, %v7334_v32  ;;  %v7645_v12 = vunpack.c.l.bf16 %v7633_v50  ;;  %v7649_v57 = vunpack.c.h.bf16 %v7633_v50  ;;  %v7480_v46 = vmul.bf16 %v14668_v1, %v7368_v56 }
 0xb22   :  { %v7416_v42 = vmul.bf16 %v7408_v19, %v16017_v6  ;;  %v7559_v43 = vadd.bf16 %v7551_v36, %v7527_v11  ;;  %v7362_v34 = vpack.c.bf16 %v7342_v20, %v7346_v30  ;;  %v7390_v48 = vsel %vm1345_vm5, %v7382_v37, %v7386_v10 }
 0xb23   :  { %v16032_v33 = vrot.slane %v14721_v18, 1  ;;  %v15034_v53 = vadd.f32 %v7649_v57, %v7645_v12  ;;  %v7727_v31 = vmul.f32 %v7645_v12, %v7645_v12  ;;  %v7731_v29 = vmul.f32 %v7649_v57, %v7649_v57 }
 0xb24   :  { %v7524_v5 = vadd.bf16 %v7516_v38, %v7480_v46  ;;  %v7569_v1 = vmax.bf16 %v16020_v39, %v7559_v43  ;;  %v7577_v22 = vmin.bf16 %v16020_v39, %v7559_v43  ;;  %v7548_v13 = vmul.bf16 %v14671_v7, %v7416_v42 }
 0xb25   :  { %v7402_v59 = vsel %vm1345_vm5, %v7386_v10, %v16032_v33  ;;  %v7370_v61 = vmul.bf16 %v7362_v34, %v16016_v47  ;;  %v7688_v37 = vrot.slane %v15034_v53, 4  ;;  %v15041_v18 = vadd.f32 %v7731_v29, %v7727_v31 }
 0xb26   :  { %v7410_v24 = vpack.c.bf16 %v7402_v59, %v7390_v48  ;;  %v7426_v17 = vpack.c.bf16 %v14831_v63, %v14829_v15  ;;  %v7627_v40 = vmul.bf16 %v14689_v49, %v7577_v22  ;;  %v7556_v62 = vadd.bf16 %v7548_v13, %v7524_v5 }
 0xb27   :  { %v7482_v44 = vmul.bf16 %v14682_v16, %v7370_v61  ;;  %v7636_v32 = vunpack.c.l.bf16 %v14942_v54  ;;  %v7638_v51 = vunpack.c.l.bf16 %v14957_v27  ;;  %v7640_v52 = vunpack.c.h.bf16 %v14942_v54 }
 0xb28   :  { %v7418_v21 = vmul.bf16 %v7410_v24, %v16017_v6  ;;  %v7518_v7 = vmul.bf16 %v14656_v45, %v7426_v17  ;;  %v7635_v41 = vadd.bf16 %v7627_v40, %v7569_v1  ;;  %v7566_v23 = vmax.bf16 %v16020_v39, %v7556_v62 }
 0xb29   :  { %v7574_v15 = vmin.bf16 %v16020_v39, %v7556_v62  ;;  %v7642_v49 = vunpack.c.h.bf16 %v14957_v27  ;;  %v7652_v38 = vadd.f32 %v7640_v52, %v7636_v32  ;;  %v7661_v28 = vadd.f32 %v7660_v55, %v14946_v35 }
 0xb2a   :  { %v7526_v63 = vadd.bf16 %v7518_v7, %v7482_v44  ;;  %v7550_v16 = vmul.bf16 %v14685_v9, %v7418_v21  ;;  %v15059_v45 = vunpack.c.l.bf16 %v7635_v41  ;;  %v15061_v50 = vunpack.c.h.bf16 %v7635_v41  ;;  %8294 = vmatprep.mubr.bf16.mxu0 %v7635_v41 }
 0xb2b   :  { %v7624_v54 = vmul.bf16 %v14692_v3, %v7574_v15  ;;  %v7666_v36 = vadd.f32 %v7642_v49, %v7638_v51  ;;  %v7653_v19 = vrot.slane %v7652_v38, 4  ;;  %v7662_v11 = vrot.slane %v7661_v28, 2 }
 0xb2c   :  { %v7558_v56 = vadd.bf16 %v7550_v16, %v7526_v63  ;;  %v7673_v27 = vadd.f32 %v14940_v14, %v14938_v58  ;;  %v15068_v9 = vmul.f32 %v15059_v45, %v15059_v45  ;;  %v15072_v35 = vmul.f32 %v15061_v50, %v15061_v50 }
 0xb2d   :  { %v7632_v55 = vadd.bf16 %v7624_v54, %v7566_v23  ;;  %v7667_v26 = vrot.slane %v7666_v36, 4  ;;  %v7654_v60 = vadd.f32 %v7653_v19, %v7652_v38  ;;  %v7663_v30 = vadd.f32 %v7662_v11, %v7661_v28 }
 0xb2e   :  { %v7568_v20 = vmax.bf16 %v16020_v39, %v7558_v56  ;;  %v7576_v3 = vmin.bf16 %v16020_v39, %v7558_v56  ;;  %v7674_v14 = vrot.slane %v7673_v27, 4  ;;  %v7718_v43 = vmul.f32 %v7636_v32, %v7636_v32 }
 0xb2f   :  { %v7644_v10 = vunpack.c.l.bf16 %v7632_v55  ;;  %v7648_v12 = vunpack.c.h.bf16 %v7632_v55  ;;  %8242 = vmatmul.mubr.bf16.gmra.mxu1 %v7632_v55  ;;  %v7668_v58 = vadd.f32 %v7667_v26, %v7666_v36  ;;  %v7655_v42 = vrot.slane %v7654_v60, 2 }
 0xb30   :  { %v7626_v57 = vmul.bf16 %v14695_v25, %v7576_v3  ;;  %v7664_v46 = vrot.slane %v7663_v30, 1  ;;  %v7675_v1 = vadd.f32 %v7674_v14, %v7673_v27  ;;  %v7720_v24 = vmul.f32 %v7638_v51, %v7638_v51 }
 0xb31   :  { %v7680_v34 = vadd.f32 %v7648_v12, %v7644_v10  ;;  %v7726_v48 = vmul.f32 %v7644_v10, %v7644_v10  ;;  %v7730_v33 = vmul.f32 %v7648_v12, %v7648_v12  ;;  %v7669_v59 = vrot.slane %v7668_v58, 2 }
 0xb32   :  { %v7634_v31 = vadd.bf16 %v7626_v57, %v7568_v20  ;;  %v7656_v29 = vadd.f32 %v7655_v42, %v7654_v60  ;;  %v7665_v5 = vadd.f32 %v7664_v46, %v7663_v30  ;;  %v7676_v62 = vrot.slane %v7675_v1, 2 }
 0xb33   :  { %v7681_v22 = vrot.slane %v7680_v34, 4  ;;  %v15077_v13 = vadd.f32 %v7730_v33, %v7726_v48  ;;  %v7670_v61 = vadd.f32 %v7669_v59, %v7668_v58  ;;  %v7722_v32 = vmul.f32 %v7640_v52, %v7640_v52 }
 0xb34   :  { %v7646_v17 = vunpack.c.l.bf16 %v7634_v31  ;;  %v7650_v40 = vunpack.c.h.bf16 %v7634_v31  ;;  %8295 = vmatmul.mubr.bf16.gmra.mxu0 %v7634_v31  ;;  %v7657_v25 = vrot.slane %v7656_v29, 1  ;;  %v7724_v21 = vmul.f32 %v7642_v49, %v7642_v49 }
 0xb35   :  { %v7671_v44 = vrot.slane %v7670_v61, 1  ;;  %v7742_v7 = vrot.slane %v14962_v0, 4  ;;  %v7677_v38 = vadd.f32 %v7676_v62, %v7675_v1  ;;  %v7734_v28 = vadd.f32 %v7722_v32, %v7718_v43 }
 0xb36   :  { %v7694_v41 = vadd.f32 %v7650_v40, %v7646_v17  ;;  %v7728_v23 = vmul.f32 %v7646_v17, %v7646_v17  ;;  %v7732_v15 = vmul.f32 %v7650_v40, %v7650_v40  ;;  %v7658_v63 = vadd.f32 %v7657_v25, %v7656_v29 }
 0xb37   :  { %v7672_v16 = vadd.f32 %v7671_v44, %v7670_v61  ;;  %v7743_v54 = vadd.f32 %v7742_v7, %v14962_v0  ;;  %v7748_v36 = vadd.f32 %v7724_v21, %v7720_v24  ;;  %v7755_v56 = vadd.f32 %v14954_v8, %v14950_v2 }
 0xb38   :  { %v7708_v51 = vadd.f32 %v7665_v5, %v7658_v63  ;;  %v7682_v19 = vadd.f32 %v7681_v22, %v7680_v34  ;;  %v7678_v11 = vrot.slane %v7677_v38, 1  ;;  %v7735_v52 = vrot.slane %v7734_v28, 4 }
 0xb39   :  { %v7744_v49 = vrot.slane %v7743_v54, 2  ;;  %v7689_v27 = vadd.f32 %v7688_v37, %v15034_v53  ;;  %v7749_v26 = vrot.slane %v7748_v36, 4  ;;  %v7756_v20 = vrot.slane %v7755_v56, 4 }
 0xb3a   :  { %v7709_v55 = vadd.f32 %v7708_v51, %v7672_v16  ;;  %v7683_v3 = vrot.slane %v7682_v19, 2  ;;  %v7679_v60 = vadd.f32 %v7678_v11, %v7677_v38  ;;  %v7736_v30 = vadd.f32 %v7735_v52, %v7734_v28 }
 0xb3b   :  { %v7745_v0 = vadd.f32 %v7744_v49, %v7743_v54  ;;  %v7690_v10 = vrot.slane %v7689_v27, 2  ;;  %v7750_v12 = vadd.f32 %v7749_v26, %v7748_v36  ;;  %v7757_v58 = vadd.f32 %v7756_v20, %v7755_v56 }
 0xb3c   :  { %v7684_v14 = vadd.f32 %v7683_v3, %v7682_v19  ;;  %v7695_v2 = vrot.slane %v7694_v41, 4  ;;  %v7710_v8 = vadd.f32 %v7709_v55, %v7679_v60  ;;  %v7737_v57 = vrot.slane %v7736_v30, 2 }
 0xb3d   :  { %v7746_v42 = vrot.slane %v7745_v0, 1  ;;  %v7691_v46 = vadd.f32 %v7690_v10, %v7689_v27  ;;  %v7751_v43 = vrot.slane %v7750_v12, 2  ;;  %v7758_v34 = vrot.slane %v7757_v58, 2 }
 0xb3e   :  { %v7685_v48 = vrot.slane %v7684_v14, 1  ;;  %v7696_v53 = vadd.f32 %v7695_v2, %v7694_v41  ;;  %7711 = vadd.xlane.f32.xlu0 %v7710_v8  ;;  %v7738_v37 = vadd.f32 %v7737_v57, %v7736_v30  ;;  %v7701_v31 = vadd.f32 %v15061_v50, %v15059_v45  ;;  %v11911_v2 = vld [vmem:[#allocation7 + $0x888] ss:$16 sps:$4 sm:$0xff]   ;;  %v11913_v8 = vld [vmem:[#allocation7 + $0x88c] ss:$16 sps:$4 sm:$0xff]  }
 0xb3f   :  { %v7747_v33 = vadd.f32 %v7746_v42, %v7745_v0  ;;  %v7692_v59 = vrot.slane %v7691_v46, 1  ;;  %v7752_v29 = vadd.f32 %v7751_v43, %v7750_v12  ;;  %v7759_v5 = vadd.f32 %v7758_v34, %v7757_v58  ;;  %v11908_v58 = vld [vmem:[#allocation7 + $0x880] ss:$16 sps:$4 sm:$0xff]   ;;  %8907 = vmatprep.subr.bf16.mxu0 %v11913_v8 }
 0xb40   :  { %v7686_v1 = vadd.f32 %v7685_v48, %v7684_v14  ;;  %v7697_v22 = vrot.slane %v7696_v53, 2  ;;  %v7739_v61 = vrot.slane %v7738_v37, 1  ;;  %v7702_v17 = vrot.slane %v7701_v31, 4  ;;  %v11910_v14 = vld [vmem:[#allocation7 + $0x884] ss:$16 sps:$4 sm:$0xff]   ;;  %8908 = vmatpush1.bf16.msra.mxu0 %v11911_v2 }
 0xb41   :  { %v7693_v24 = vadd.f32 %v7692_v59, %v7691_v46  ;;  %v7763_v40 = vrot.slane %v15077_v13, 4  ;;  %v7753_v25 = vrot.slane %v7752_v29, 1  ;;  %v7760_v62 = vrot.slane %v7759_v5, 1  ;;  %8854 = vmatprep.subr.bf16.mxu1 %v11910_v14  ;;  %v11985_v14 = vld [vmem:[#allocation7 + $0x90c] ss:$16 sps:$4 sm:$0xff]  }
 0xb42   :  { %v7698_v44 = vadd.f32 %v7697_v22, %v7696_v53  ;;  %v7770_v32 = vrot.slane %v15041_v18, 4  ;;  %v7740_v21 = vadd.f32 %v7739_v61, %v7738_v37  ;;  %v7703_v7 = vadd.f32 %v7702_v17, %v7701_v31  ;;  %8855 = vmatpush1.bf16.msra.mxu1 %v11908_v58  ;;  %v11914_v31 = vld [vmem:[#allocation7 + $0x860] ss:$16 sps:$4 sm:$0xff]   ;;  %v11922_v61 = vld [vmem:[#allocation7 + $0x844] ss:$16 sps:$4 sm:$0xff]  }
 0xb43   :  { %v7764_v41 = vadd.f32 %v7763_v40, %v15077_v13  ;;  %v7754_v63 = vadd.f32 %v7753_v25, %v7752_v29  ;;  %v7713_v50 = vadd.f32 %v7693_v24, %v7686_v1  ;;  %v7776_v51 = vadd.f32 %v7732_v15, %v7728_v23  ;;  %v11916_v29 = vld [vmem:[#allocation7 + $0x864] ss:$16 sps:$4 sm:$0xff]   ;;  %v11919_v1 = vld [vmem:[#allocation7 + $0x86c] ss:$16 sps:$4 sm:$0xff]   ;;  %v11920_v22 = vld [vmem:[#allocation7 + $0x840] ss:$16 sps:$4 sm:$0xff]  }
 0xb44   :  { %v7699_v45 = vrot.slane %v7698_v44, 1  ;;  %v7771_v16 = vadd.f32 %v7770_v32, %v15041_v18  ;;  %v7790_v38 = vadd.f32 %v7747_v33, %v7740_v21  ;;  %v7704_v28 = vrot.slane %v7703_v7, 2  ;;  %8856 = vmatprep.subr.bf16.mxu1 %v11916_v29  ;;  %8909 = vmatprep.subr.bf16.mxu0 %v11919_v1  ;;  %v11923_v24 = vld [vmem:[#allocation7 + $0x848] ss:$16 sps:$4 sm:$0xff]   ;;  %v11925_v17 = vld [vmem:[#allocation7 + $0x84c] ss:$16 sps:$4 sm:$0xff]  }
 0xb45   :  { %v7765_v54 = vrot.slane %v7764_v41, 2  ;;  %v7761_v36 = vadd.f32 %v7760_v62, %v7759_v5  ;;  %v7783_v11 = vadd.f32 %v15072_v35, %v15068_v9  ;;  %v7777_v55 = vrot.slane %v7776_v51, 4  ;;  %v11917_v5 = vld [vmem:[#allocation7 + $0x868] ss:$16 sps:$4 sm:$0xff]   ;;  %v11928_v40 = vld [vmem:[#allocation7 + $0x824] ss:$16 sps:$4 sm:$0xff]  }
 0xb46   :  { %v7700_v56 = vadd.f32 %v7699_v45, %v7698_v44  ;;  %v7772_v19 = vrot.slane %v7771_v16, 2  ;;  %v7791_v52 = vadd.f32 %v7790_v38, %v7754_v63  ;;  %v7705_v49 = vadd.f32 %v7704_v28, %v7703_v7  ;;  %8857 = vmatpush1.bf16.msra.mxu1 %v11914_v31  ;;  %8910 = vmatpush1.bf16.msra.mxu0 %v11917_v5  ;;  %v11931_v25 = vld [vmem:[#allocation7 + $0x82c] ss:$16 sps:$4 sm:$0xff]   ;;  %v11926_v62 = vld [vmem:[#allocation7 + $0x820] ss:$16 sps:$4 sm:$0xff]  }
 0xb47   :  { %v7766_v27 = vadd.f32 %v7765_v54, %v7764_v41  ;;  %v7784_v20 = vrot.slane %v7783_v11, 4  ;;  %v7778_v30 = vadd.f32 %v7777_v55, %v7776_v51  ;;  %8858 = vmatprep.subr.bf16.mxu1 %v11922_v61  ;;  %8911 = vmatprep.subr.bf16.mxu0 %v11925_v17  ;;  %v11929_v44 = vld [vmem:[#allocation7 + $0x828] ss:$16 sps:$4 sm:$0xff]   ;;  %v11934_v32 = vld [vmem:[#allocation7 + $0x804] ss:$16 sps:$4 sm:$0xff]  }
 0xb48   :  { %v7714_v13 = vadd.f32 %v7713_v50, %v7700_v56  ;;  %v7773_v26 = vadd.f32 %v7772_v19, %v7771_v16  ;;  %v7792_v3 = vadd.f32 %v7791_v52, %v7761_v36  ;;  %v7706_v60 = vrot.slane %v7705_v49, 1  ;;  %v11937_v21 = vld [vmem:[#allocation7 + $0x80c] ss:$16 sps:$4 sm:$0xff]   ;;  %v11932_v7 = vld [vmem:[#allocation7 + $0x800] ss:$16 sps:$4 sm:$0xff]  }
 0xb49   :  { %v7767_v18 = vrot.slane %v7766_v27, 1  ;;  %v7785_v10 = vadd.f32 %v7784_v20, %v7783_v11  ;;  %v7779_v12 = vrot.slane %v7778_v30, 2  ;;  %v11935_v41 = vld [vmem:[#allocation7 + $0x808] ss:$16 sps:$4 sm:$0xff]   ;;  %v11940_v63 = vld [vmem:[#allocation7 + $0x9e4] ss:$16 sps:$4 sm:$0xff]  }
 0xb4a   :  { %v7774_v0 = vrot.slane %v7773_v26, 1  ;;  %7793 = vadd.xlane.f32.xlu1 %v7792_v3  ;;  %v7707_v23 = vadd.f32 %v7706_v60, %v7705_v49  ;;  %8859 = vmatpush1.bf16.msra.mxu1 %v11920_v22  ;;  %v11943_v45 = vld [vmem:[#allocation7 + $0x9ec] ss:$16 sps:$4 sm:$0xff]   ;;  %v11938_v50 = vld [vmem:[#allocation7 + $0x9e0] ss:$16 sps:$4 sm:$0xff]  }
 0xb4b   :  { %v7768_v15 = vadd.f32 %v7767_v18, %v7766_v27  ;;  %v7786_v35 = vrot.slane %v7785_v10, 2  ;;  %v7780_v42 = vadd.f32 %v7779_v12, %v7778_v30  ;;  %8912 = vmatpush1.bf16.msra.mxu0 %v11923_v24  ;;  %8860 = vmatprep.subr.bf16.mxu1 %v11928_v40  ;;  %v11941_v16 = vld [vmem:[#allocation7 + $0x9e8] ss:$16 sps:$4 sm:$0xff]   ;;  %v11946_v38 = vld [vmem:[#allocation7 + $0x9c4] ss:$16 sps:$4 sm:$0xff]  }
 0xb4c   :  { %v7775_v9 = vadd.f32 %v7774_v0, %v7773_v26  ;;  %v7715_v57 = vadd.f32 %v7714_v13, %v7707_v23  ;;  %8913 = vmatprep.subr.bf16.mxu0 %v11931_v25  ;;  %v11949_v28 = vld [vmem:[#allocation7 + $0x9cc] ss:$16 sps:$4 sm:$0xff]   ;;  %v11944_v54 = vld [vmem:[#allocation7 + $0x9c0] ss:$16 sps:$4 sm:$0xff]   ;;  %v11947_v51 = vld [vmem:[#allocation7 + $0x9c8] ss:$16 sps:$4 sm:$0xff]  }
 0xb4d   :  { %v7787_v46 = vadd.f32 %v7786_v35, %v7785_v10  ;;  %v7781_v43 = vrot.slane %v7780_v42, 1  ;;  %v11952_v36 = vld [vmem:[#allocation7 + $0x9a4] ss:$16 sps:$4 sm:$0xff]   ;;  %v11955_v56 = vld [vmem:[#allocation7 + $0x9ac] ss:$16 sps:$4 sm:$0xff]  }
 0xb4e   :  { %7716 = vadd.xlane.f32.xlu0 %v7715_v57  ;;  %v7795_v34 = vadd.f32 %v7775_v9, %v7768_v15  ;;  %8861 = vmatpush1.bf16.msra.mxu1 %v11926_v62  ;;  %v11950_v19 = vld [vmem:[#allocation7 + $0x9a0] ss:$16 sps:$4 sm:$0xff]   ;;  %v11953_v11 = vld [vmem:[#allocation7 + $0x9a8] ss:$16 sps:$4 sm:$0xff]   ;;  %v11958_v52 = vld [vmem:[#allocation7 + $0x984] ss:$16 sps:$4 sm:$0xff]  }
 0xb4f   :  { %v7788_v48 = vrot.slane %v7787_v46, 1  ;;  %v7782_v53 = vadd.f32 %v7781_v43, %v7780_v42  ;;  %8914 = vmatpush1.bf16.msra.mxu0 %v11929_v44  ;;  %8862 = vmatprep.subr.bf16.mxu1 %v11934_v32  ;;  %v11961_v49 = vld [vmem:[#allocation7 + $0x98c] ss:$16 sps:$4 sm:$0xff]   ;;  %v11956_v27 = vld [vmem:[#allocation7 + $0x980] ss:$16 sps:$4 sm:$0xff]  }
 0xb50   :  { %8915 = vmatprep.subr.bf16.mxu0 %v11937_v21  ;;  %v11959_v55 = vld [vmem:[#allocation7 + $0x988] ss:$16 sps:$4 sm:$0xff]   ;;  %v11964_v13 = vld [vmem:[#allocation7 + $0x964] ss:$16 sps:$4 sm:$0xff]   ;;  %v11967_v26 = vld [vmem:[#allocation7 + $0x96c] ss:$16 sps:$4 sm:$0xff]  }
 0xb51   :  { %v7789_v37 = vadd.f32 %v7788_v48, %v7787_v46  ;;  %v7796_v33 = vadd.f32 %v7795_v34, %v7782_v53  ;;  %v11962_v20 = vld [vmem:[#allocation7 + $0x960] ss:$16 sps:$4 sm:$0xff]   ;;  %v11965_v3 = vld [vmem:[#allocation7 + $0x968] ss:$16 sps:$4 sm:$0xff]   ;;  %v11970_v60 = vld [vmem:[#allocation7 + $0x944] ss:$16 sps:$4 sm:$0xff]  }
 0xb52   :  { %8863 = vmatpush1.bf16.msra.mxu1 %v11932_v7  ;;  %v11973_v18 = vld [vmem:[#allocation7 + $0x94c] ss:$16 sps:$4 sm:$0xff]   ;;  %v11968_v30 = vld [vmem:[#allocation7 + $0x940] ss:$16 sps:$4 sm:$0xff]   ;;  %v11971_v0 = vld [vmem:[#allocation7 + $0x948] ss:$16 sps:$4 sm:$0xff]  }
 0xb53   :  { %v7797_v59 = vadd.f32 %v7796_v33, %v7789_v37  ;;  %8916 = vmatpush1.bf16.msra.mxu0 %v11935_v41  ;;  %8864 = vmatprep.subr.bf16.mxu1 %v11940_v63  ;;  %v11976_v10 = vld [vmem:[#allocation7 + $0x924] ss:$16 sps:$4 sm:$0xff]   ;;  %v11979_v23 = vld [vmem:[#allocation7 + $0x92c] ss:$16 sps:$4 sm:$0xff]   ;;  %v11974_v15 = vld [vmem:[#allocation7 + $0x920] ss:$16 sps:$4 sm:$0xff]  }
 0xb54   :  { %8917 = vmatprep.subr.bf16.mxu0 %v11943_v45  ;;  %v11977_v12 = vld [vmem:[#allocation7 + $0x928] ss:$16 sps:$4 sm:$0xff]   ;;  %v11982_v58 = vld [vmem:[#allocation7 + $0x904] ss:$16 sps:$4 sm:$0xff]   ;;  %v11980_v9 = vld [vmem:[#allocation7 + $0x900] ss:$16 sps:$4 sm:$0xff]  }
 0xb55   :  { %7798 = vadd.xlane.f32.xlu1 %v7797_v59  ;;  %v11983_v35 = vld [vmem:[#allocation7 + $0x908] ss:$16 sps:$4 sm:$0xff]  }
 0xb56   :  { %8865 = vmatpush2.bf16.msra.mxu1 %v11938_v50  ;;  %v8306_v45 = vld [vmem:[#allocation19 + $0x3] ss:$8 sm:$0x3] }
 0xb57   :  { %8918 = vmatpush2.bf16.msra.mxu0 %v11941_v16  ;;  %8866 = vmatprep.subr.bf16.mxu1 %v11946_v38 }
 0xb58   :  { %8919 = vmatprep.subr.bf16.mxu0 %v11949_v28 }
 0xb5a   :  { %8867 = vmatpush2.bf16.msra.mxu1 %v11944_v54  ;;  %v8308_v54 = vld [vmem:[#allocation20 + $0x3] ss:$8 sm:$0x3] }
 0xb5b   :  { %8920 = vmatpush2.bf16.msra.mxu0 %v11947_v51  ;;  %8868 = vmatprep.subr.bf16.mxu1 %v11952_v36 }
 0xb5c   :  { %8921 = vmatprep.subr.bf16.mxu0 %v11955_v56  ;;  %v16033_v56 = vld [vmem:[#allocation38_spill] sm:$0xff] }
 0xb5e   :  { %8869 = vmatpush2.bf16.msra.mxu1 %v11950_v19 }
 0xb5f   :  { %8922 = vmatpush2.bf16.msra.mxu0 %v11953_v11  ;;  %8870 = vmatprep.subr.bf16.mxu1 %v11958_v52  ;;  %v16034_v52 = vld [vmem:[#allocation46_spill] sm:$0xff] }
 0xb60   :  { %8923 = vmatprep.subr.bf16.mxu0 %v11961_v49 }
 0xb62   :  { %8871 = vmatpush2.bf16.msra.mxu1 %v11956_v27  ;;  %v16035_v27 = vld [vmem:[#allocation31_spill] sm:$0xff] }
 0xb63   :  { %8924 = vmatpush2.bf16.msra.mxu0 %v11959_v55  ;;  %8872 = vmatprep.subr.bf16.mxu1 %v11964_v13  ;;  %v16036_v13 = vld [vmem:[#allocation32_spill] sm:$0xff] }
 0xb64   :  { %8925 = vmatprep.subr.bf16.mxu0 %v11967_v26 }
 0xb66   :  { %8873 = vmatpush2.bf16.msra.mxu1 %v11962_v20 }
 0xb67   :  { %8926 = vmatpush2.bf16.msra.mxu0 %v11965_v3  ;;  %8874 = vmatprep.subr.bf16.mxu1 %v11970_v60  ;;  %v16037_v3 = vld [vmem:[#allocation39_spill] sm:$0xff] }
 0xb68   :  { %8927 = vmatprep.subr.bf16.mxu0 %v11973_v18  ;;  %v16038_v18 = vld [vmem:[#allocation41_spill] sm:$0xff] }
 0xb6a   :  { %8875 = vmatpush2.bf16.msra.mxu1 %v11968_v30 }
 0xb6b   :  { %8928 = vmatpush2.bf16.msra.mxu0 %v11971_v0  ;;  %8876 = vmatprep.subr.bf16.mxu1 %v11976_v10 }
 0xb6c   :  { %8929 = vmatprep.subr.bf16.mxu0 %v11979_v23 }
 0xb6e   :  { %8877 = vmatpush2.bf16.msra.mxu1 %v11974_v15 }
 0xb6f   :  { %8930 = vmatpush2.bf16.msra.mxu0 %v11977_v12  ;;  %8878 = vmatprep.subr.bf16.mxu1 %v11982_v58 }
 0xb70   :  { %8931 = vmatprep.subr.bf16.mxu0 %v11985_v14 }
 0xb72   :  { %8879 = vmatpush2.bf16.msra.mxu1 %v11980_v9 }
 0xb73   :  { %8932 = vmatpush2.bf16.msra.mxu0 %v11983_v35 }
 0xbc7   :  { %v7712_v2 = vpop.xlane.xlu0 %7711 }
 0xbc8   :  { %v7800_v8 = vmul.f32 0.00012207031, %v7712_v2 }
 0xbca   :  { %v7804_v57 = vmul.f32 %v7800_v8, %v7800_v8 }
 0xbd3   :  { %v7794_v42 = vpop.xlane.xlu1 %7793 }
 0xbd4   :  { %v7802_v46 = vmul.f32 0.00012207031, %v7794_v42  ;;  %v8233_v53 = vpop.f32.mrf.mxu1 }
 0xbd6   :  { %v7806_v43 = vsub.f32 %v7802_v46, %v7804_v57  ;;  %v8235_v31 = vpop.f32.mrf.mxu1 }
 0xbd7   :  { %v7717_v34 = vpop.xlane.xlu0 %7716  ;;  %v8286_v37 = vpop.f32.mrf.mxu0 }
 0xbd8   :  { %v7808_v48 = vmax.f32 %v7806_v43, 0.0  ;;  %v7801_v59 = vmul.f32 0.00012207031, %v7717_v34  ;;  %v8237_v61 = vpop.f32.mrf.mxu1  ;;  %v8287_v32 = vadd.f32 %v8286_v37, %v8233_v53 }
 0xbd9   :  { %v8288_v29 = vpop.f32.mrf.mxu0 }
 0xbda   :  { %v7810_v33 = vadd.f32 1e-08, %v7808_v48  ;;  %v7805_v5 = vmul.f32 %v7801_v59, %v7801_v59  ;;  %v8239_v25 = vpop.f32.mrf.mxu1  ;;  %v8289_v21 = vadd.f32 %v8288_v29, %v8235_v31 }
 0xbdb   :  { %v8290_v24 = vpop.f32.mrf.mxu0 }
 0xbdc   :  { %12131 = vrsqrt.f32 %v7810_v33  ;;  %v8291_v7 = vadd.f32 %v8290_v24, %v8237_v61  ;;  %v16043_v61 = vld [vmem:[#allocation33_spill] sm:$0xff] }
 0xbdd   :  { %v8292_v62 = vpop.f32.mrf.mxu0 }
 0xbde   :  { %v7799_v1 = vpop.xlane.xlu1 %7798  ;;  %v8293_v41 = vadd.f32 %v8292_v62, %v8239_v25 }
 0xbdf   :  { %v7803_v22 = vmul.f32 0.00012207031, %v7799_v1 }
 0xbe1   :  { %v7807_v17 = vsub.f32 %v7803_v22, %v7805_v5 }
 0xbe3   :  { %v7809_v40 = vmax.f32 %v7807_v17, 0.0 }
 0xbe5   :  { %v7811_v44 = vadd.f32 1e-08, %v7809_v40 }
 0xbe7   :  { %12133 = vrsqrt.f32 %v7811_v44 }
 0xbe9   :  { %v12132_v63 = vpop.eup %12131 }
 0xbea   :  { %v8309_v50 = vmul.f32 %v12132_v63, %v7800_v8  ;;  %v8315_v16 = vmul.f32 %v12132_v63, %v8287_v32  ;;  %v8316_v38 = vmul.f32 %v12132_v63, %v8289_v21  ;;  %v8317_v28 = vmul.f32 %v12132_v63, %v8291_v7  ;;  %v16044_v7 = vld [vmem:[#allocation34_spill] sm:$0xff] }
 0xbeb   :  { %v8318_v51 = vmul.f32 %v12132_v63, %v8293_v41 }
 0xbec   :  { %v8311_v36 = vmul.f32 %v8309_v50, %v8306_v45  ;;  %v8323_v19 = vadd.f32 %v8315_v16, %v16033_v56  ;;  %v8324_v49 = vadd.f32 %v8316_v38, %v16034_v52  ;;  %v8325_v55 = vadd.f32 %v8317_v28, %v16035_v27  ;;  %v16045_v56 = vld [vmem:[#allocation35_spill] sm:$0xff] }
 0xbed   :  { %v8326_v26 = vadd.f32 %v8318_v51, %v16036_v13 }
 0xbee   :  { %v8313_v11 = vsub.f32 %v8308_v54, %v8311_v36 }
 0xbef   :  { %v8243_v20 = vpop.f32.mrf.mxu1 }
 0xbf0   :  { %v8336_v60 = vrot.slane %v8313_v11, %v16037_v3  ;;  %v8340_v30 = vrot.slane %v8313_v11, %v16038_v18 }
 0xbf1   :  { %v8245_v0 = vpop.f32.mrf.mxu1 }
 0xbf2   :  { %v15100_v10 = vadd.f32 %v8336_v60, %v8323_v19  ;;  %v15102_v23 = vadd.f32 %v8340_v30, %v8324_v49  ;;  %v15104_v15 = vadd.f32 %v8336_v60, %v8325_v55  ;;  %v15106_v12 = vadd.f32 %v8340_v30, %v8326_v26 }
 0xbf3   :  { %v8247_v14 = vpop.f32.mrf.mxu1 }
 0xbf4   :  { %16039 = vst [vmem:[#allocation37_spill] sm:$0xff] %v15100_v10  ;;  %16040 = vst [vmem:[#allocation38_spill] sm:$0xff] %v15102_v23  ;;  %v8296_v58 = vpop.f32.mrf.mxu0  ;;  %v8361_v9 = vmax.f32 %v15100_v10, 0.0  ;;  %v8363_v35 = vmax.f32 %v15104_v15, 0.0  ;;  %v12134_v8 = vpop.eup %12133  ;;  %v8362_v42 = vmax.f32 %v15102_v23, 0.0  ;;  %v8364_v46 = vmax.f32 %v15106_v12, 0.0 }
 0xbf5   :  { %16041 = vst [vmem:[#allocation46_spill] sm:$0xff] %v15104_v15  ;;  %16042 = vst [vmem:[#allocation31_spill] sm:$0xff] %v15106_v12  ;;  %v8297_v2 = vadd.f32 %v8296_v58, %v8243_v20  ;;  %v8310_v43 = vmul.f32 %v12134_v8, %v7801_v59  ;;  %v8249_v33 = vpop.f32.mrf.mxu1  ;;  %v16049_v20 = vld [vmem:[#allocation36_spill] sm:$0xff] }
 0xbf6   :  { %v8298_v57 = vpop.f32.mrf.mxu0  ;;  %v8459_v53 = vpack.c.bf16 %v8363_v35, %v8361_v9  ;;  %v8460_v31 = vpack.c.bf16 %v8364_v46, %v8362_v42  ;;  %v8369_v29 = vadd.f32 %v8363_v35, %v8361_v9  ;;  %v8376_v5 = vadd.f32 %v8364_v46, %v8362_v42 }
 0xbf7   :  { %v8319_v34 = vmul.f32 %v12134_v8, %v8297_v2  ;;  %v8299_v48 = vadd.f32 %v8298_v57, %v8245_v0  ;;  %v8403_v1 = vmul.f32 %v8361_v9, %v8361_v9  ;;  %v8312_v22 = vmul.f32 %v8310_v43, %v8306_v45 }
 0xbf8   :  { %v8300_v37 = vpop.f32.mrf.mxu0  ;;  %8880 = vmatprep.mubr.bf16.mxu1 %v8460_v31  ;;  %8933 = vmatprep.mubr.bf16.mxu0 %v8460_v31  ;;  %v8370_v62 = vrot.slane %v8369_v29, 4  ;;  %v8377_v44 = vrot.slane %v8376_v5, 4  ;;  %v8404_v59 = vmul.f32 %v8362_v42, %v8362_v42  ;;  %v8405_v32 = vmul.f32 %v8363_v35, %v8363_v35 }
 0xbf9   :  { %v8327_v24 = vadd.f32 %v8319_v34, %v16043_v61  ;;  %v8320_v17 = vmul.f32 %v12134_v8, %v8299_v48  ;;  %v8301_v40 = vadd.f32 %v8300_v37, %v8247_v14  ;;  %v8314_v21 = vsub.f32 %v8308_v54, %v8312_v22  ;;  %8881 = vmatmul.mubr.bf16.vlgmr.msra.gmra.mxu1 %v8459_v53 }
 0xbfa   :  { %v8302_v25 = vpop.f32.mrf.mxu0  ;;  %8934 = vmatmul.mubr.bf16.vlgmr.msra.gmra.mxu0 %v8459_v53  ;;  %v8371_v16 = vadd.f32 %v8370_v62, %v8369_v29  ;;  %v8378_v45 = vadd.f32 %v8377_v44, %v8376_v5  ;;  %v8406_v38 = vmul.f32 %v8364_v46, %v8364_v46  ;;  %v8411_v28 = vadd.f32 %v8405_v32, %v8403_v1 }
 0xbfb   :  { %v8328_v41 = vadd.f32 %v8320_v17, %v16044_v7  ;;  %v8321_v63 = vmul.f32 %v12134_v8, %v8301_v40  ;;  %v8303_v50 = vadd.f32 %v8302_v25, %v8249_v33  ;;  %v8344_v51 = vrot.slane %v8314_v21, %v16037_v3 }
 0xbfc   :  { %v8348_v36 = vrot.slane %v8314_v21, %v16038_v18  ;;  %v8372_v52 = vrot.slane %v8371_v16, 2  ;;  %v8379_v49 = vrot.slane %v8378_v45, 2  ;;  %v8412_v54 = vrot.slane %v8411_v28, 4 }
 0xbfd   :  { %v8329_v19 = vadd.f32 %v8321_v63, %v16045_v56  ;;  %v8322_v11 = vmul.f32 %v12134_v8, %v8303_v50  ;;  %v8418_v27 = vadd.f32 %v8406_v38, %v8404_v59  ;;  %v15117_v55 = vadd.f32 %v8344_v51, %v8327_v24 }
 0xbfe   :  { %v15119_v13 = vadd.f32 %v8348_v36, %v8328_v41  ;;  %v8373_v30 = vadd.f32 %v8372_v52, %v8371_v16  ;;  %v8380_v0 = vadd.f32 %v8379_v49, %v8378_v45  ;;  %v8413_v58 = vadd.f32 %v8412_v54, %v8411_v28 }
 0xbff   :  { %16046 = vst [vmem:[#allocation32_spill] sm:$0xff] %v15117_v55  ;;  %v15121_v26 = vadd.f32 %v8344_v51, %v8329_v19  ;;  %v8330_v60 = vadd.f32 %v8322_v11, %v16049_v20  ;;  %v8419_v14 = vrot.slane %v8418_v27, 4  ;;  %v8365_v35 = vmax.f32 %v15117_v55, 0.0 }
 0xc00   :  { %16047 = vst [vmem:[#allocation39_spill] sm:$0xff] %v15119_v13  ;;  %v8374_v8 = vrot.slane %v8373_v30, 1  ;;  %v8381_v57 = vrot.slane %v8380_v0, 1  ;;  %v8414_v42 = vrot.slane %v8413_v58, 2  ;;  %v8366_v43 = vmax.f32 %v15119_v13, 0.0 }
 0xc01   :  { %16048 = vst [vmem:[#allocation33_spill] sm:$0xff] %v15121_v26  ;;  %v15124_v9 = vadd.f32 %v8348_v36, %v8330_v60  ;;  %v8367_v2 = vmax.f32 %v15121_v26, 0.0  ;;  %v8420_v46 = vadd.f32 %v8419_v14, %v8418_v27  ;;  %v8407_v61 = vmul.f32 %v8365_v35, %v8365_v35 }
 0xc02   :  { %v8375_v37 = vadd.f32 %v8374_v8, %v8373_v30  ;;  %v8382_v33 = vadd.f32 %v8381_v57, %v8380_v0  ;;  %v8415_v31 = vadd.f32 %v8414_v42, %v8413_v58  ;;  %v8408_v59 = vmul.f32 %v8366_v43, %v8366_v43 }
 0xc03   :  { %16050 = vst [vmem:[#allocation34_spill] sm:$0xff] %v15124_v9  ;;  %v8368_v34 = vmax.f32 %v15124_v9, 0.0  ;;  %v8461_v48 = vpack.c.bf16 %v8367_v2, %v8365_v35  ;;  %v8383_v53 = vadd.f32 %v8367_v2, %v8365_v35  ;;  %v8421_v29 = vrot.slane %v8420_v46, 2 }
 0xc04   :  { %v8397_v24 = vadd.f32 %v8382_v33, %v8375_v37  ;;  %v8416_v17 = vrot.slane %v8415_v31, 1  ;;  %v8409_v25 = vmul.f32 %v8367_v2, %v8367_v2 }
 0xc05   :  { %v8462_v5 = vpack.c.bf16 %v8368_v34, %v8366_v43  ;;  %v8384_v1 = vrot.slane %v8383_v53, 4  ;;  %v8390_v22 = vadd.f32 %v8368_v34, %v8366_v43  ;;  %v8422_v40 = vadd.f32 %v8421_v29, %v8420_v46 }
 0xc06   :  { %v8410_v32 = vmul.f32 %v8368_v34, %v8368_v34  ;;  %v8425_v7 = vadd.f32 %v8409_v25, %v8407_v61  ;;  %8398 = vadd.xlane.f32.xlu0 %v8397_v24  ;;  %v8417_v16 = vadd.f32 %v8416_v17, %v8415_v31 }
 0xc07   :  { %8890 = vmatprep.mubr.bf16.mxu1 %v8462_v5  ;;  %8943 = vmatprep.mubr.bf16.mxu0 %v8462_v5  ;;  %v8385_v62 = vadd.f32 %v8384_v1, %v8383_v53  ;;  %v8391_v44 = vrot.slane %v8390_v22, 4  ;;  %v8423_v21 = vrot.slane %v8422_v40, 1 }
 0xc08   :  { %8891 = vmatmul.mubr.bf16.gmra.mxu1 %v8461_v48  ;;  %8944 = vmatmul.mubr.bf16.gmra.mxu0 %v8461_v48  ;;  %v8432_v50 = vadd.f32 %v8410_v32, %v8408_v59  ;;  %v8426_v38 = vrot.slane %v8425_v7, 4  ;;  %v8957_v32 = vld [vmem:[#allocation14 + $0x4] ss:$8 sm:$0xf] }
 0xc09   :  { %v8386_v41 = vrot.slane %v8385_v62, 2  ;;  %v8392_v63 = vadd.f32 %v8391_v44, %v8390_v22  ;;  %v8424_v45 = vadd.f32 %v8423_v21, %v8422_v40  ;;  %v8955_v44 = vld [vmem:[#allocation13 + $0x4] ss:$8 sm:$0xf] }
 0xc0a   :  { %v8433_v36 = vrot.slane %v8432_v50, 4  ;;  %v8427_v19 = vadd.f32 %v8426_v38, %v8425_v7 }
 0xc0b   :  { %v8387_v28 = vadd.f32 %v8386_v41, %v8385_v62  ;;  %v8393_v51 = vrot.slane %v8392_v63, 2  ;;  %v8439_v56 = vadd.f32 %v8424_v45, %v8417_v16 }
 0xc0c   :  { %v8434_v49 = vadd.f32 %v8433_v36, %v8432_v50  ;;  %v8428_v54 = vrot.slane %v8427_v19, 2 }
 0xc0d   :  { %v8388_v11 = vrot.slane %v8387_v28, 1  ;;  %v8394_v52 = vadd.f32 %v8393_v51, %v8392_v63  ;;  %8440 = vadd.xlane.f32.xlu0 %v8439_v56  ;;  %v16051_v51 = vld [vmem:[#allocation40_spill] sm:$0xff] }
 0xc0e   :  { %v8435_v20 = vrot.slane %v8434_v49, 2  ;;  %v8429_v60 = vadd.f32 %v8428_v54, %v8427_v19 }
 0xc0f   :  { %v8395_v27 = vrot.slane %v8394_v52, 1  ;;  %v8389_v30 = vadd.f32 %v8388_v11, %v8387_v28 }
 0xc10   :  { %v8436_v58 = vadd.f32 %v8435_v20, %v8434_v49  ;;  %v8430_v14 = vrot.slane %v8429_v60, 1 }
 0xc11   :  { %v8396_v0 = vadd.f32 %v8395_v27, %v8394_v52 }
 0xc12   :  { %v8437_v2 = vrot.slane %v8436_v58, 1  ;;  %v8431_v8 = vadd.f32 %v8430_v14, %v8429_v60  ;;  %v16052_v60 = vld [vmem:[#allocation42_spill] sm:$0xff] }
 0xc13   :  { %v8400_v35 = vadd.f32 %v8396_v0, %v8389_v30 }
 0xc14   :  { %v8438_v57 = vadd.f32 %v8437_v2, %v8436_v58 }
 0xc15   :  { %8401 = vadd.xlane.f32.xlu1 %v8400_v35 }
 0xc16   :  { %v8442_v42 = vadd.f32 %v8438_v57, %v8431_v8 }
 0xc19   :  { %8443 = vadd.xlane.f32.xlu1 %v8442_v42 }
 0xc8f   :  { %v8399_v46 = vpop.xlane.xlu0 %8398 }
 0xc90   :  { %v8445_v43 = vmul.f32 0.00024414063, %v8399_v46 }
 0xc92   :  { %v8449_v48 = vmul.f32 %v8445_v43, %v8445_v43 }
 0xc96   :  { %v8441_v34 = vpop.xlane.xlu0 %8440 }
 0xc97   :  { %v8447_v53 = vmul.f32 0.00024414063, %v8441_v34 }
 0xc99   :  { %v8451_v37 = vsub.f32 %v8447_v53, %v8449_v48 }
 0xc9b   :  { %v8453_v33 = vmax.f32 %v8451_v37, 0.0 }
 0xc9d   :  { %v8455_v31 = vadd.f32 1e-08, %v8453_v33 }
 0xc9e   :  { %v8402_v29 = vpop.xlane.xlu1 %8401 }
 0xc9f   :  { %v8446_v5 = vmul.f32 0.00024414063, %v8402_v29  ;;  %12135 = vrsqrt.f32 %v8455_v31 }
 0xca1   :  { %v8450_v22 = vmul.f32 %v8446_v5, %v8446_v5 }
 0xca2   :  { %v8444_v1 = vpop.xlane.xlu1 %8443 }
 0xca3   :  { %v8448_v61 = vmul.f32 0.00024414063, %v8444_v1 }
 0xca5   :  { %v8452_v24 = vsub.f32 %v8448_v61, %v8450_v22 }
 0xca7   :  { %v8454_v17 = vmax.f32 %v8452_v24, 0.0 }
 0xca9   :  { %v8456_v40 = vadd.f32 1e-08, %v8454_v17 }
 0xcab   :  { %12137 = vrsqrt.f32 %v8456_v40 }
 0xcac   :  { %v12136_v25 = vpop.eup %12135 }
 0xcad   :  { %v8958_v62 = vmul.f32 %v12136_v25, %v8445_v43 }
 0xcaf   :  { %v8960_v59 = vmul.f32 %v8958_v62, %v8955_v44 }
 0xcb1   :  { %v8962_v7 = vsub.f32 %v8957_v32, %v8960_v59 }
 0xcb3   :  { %v8985_v45 = vrot.slane %v8962_v7, %v16037_v3  ;;  %v8993_v36 = vrot.slane %v8962_v7, %v16051_v51  ;;  %v8989_v52 = vrot.slane %v8962_v7, %v16038_v18  ;;  %v8997_v30 = vrot.slane %v8962_v7, %v16052_v60 }
 0xcb8   :  { %v15130_v21 = vpop.eup %12137 }
 0xcb9   :  { %v8959_v41 = vmul.f32 %v15130_v21, %v8446_v5  ;;  %v8882_v63 = vpop.f32.mrf.mxu1 }
 0xcba   :  { %v8964_v16 = vmul.f32 %v12136_v25, %v8882_v63  ;;  %v8935_v38 = vpop.f32.mrf.mxu0 }
 0xcbb   :  { %v8961_v50 = vmul.f32 %v8959_v41, %v8955_v44  ;;  %v8966_v28 = vmul.f32 %v12136_v25, %v8935_v38  ;;  %v8884_v56 = vpop.f32.mrf.mxu1 }
 0xcbc   :  { %v9022_v19 = vadd.f32 %v8985_v45, %v8964_v16  ;;  %v8965_v11 = vmul.f32 %v12136_v25, %v8884_v56  ;;  %v8937_v49 = vpop.f32.mrf.mxu0 }
 0xcbd   :  { %v8963_v54 = vsub.f32 %v8957_v32, %v8961_v50  ;;  %v9024_v27 = vadd.f32 %v8993_v36, %v8966_v28  ;;  %v8967_v20 = vmul.f32 %v12136_v25, %v8937_v49  ;;  %v8886_v0 = vpop.f32.mrf.mxu1 }
 0xcbe   :  { %v9023_v58 = vadd.f32 %v8989_v52, %v8965_v11  ;;  %v8968_v14 = vmul.f32 %v12136_v25, %v8886_v0  ;;  %v8939_v35 = vpop.f32.mrf.mxu0  ;;  %v15137_v2 = vmax.f32 %v9022_v19, 0.0 }
 0xcbf   :  { %v15139_v8 = vmax.f32 %v9024_v27, 0.0  ;;  %v9025_v57 = vadd.f32 %v8997_v30, %v8967_v20  ;;  %v8970_v42 = vmul.f32 %v12136_v25, %v8939_v35  ;;  %v8888_v46 = vpop.f32.mrf.mxu1  ;;  %v9001_v37 = vrot.slane %v8963_v54, %v16037_v3 }
 0xcc0   :  { %v15141_v43 = vmax.f32 %v9023_v58, 0.0  ;;  %v9026_v34 = vadd.f32 %v8985_v45, %v8968_v14  ;;  %v8969_v48 = vmul.f32 %v12136_v25, %v8888_v46  ;;  %v8941_v53 = vpop.f32.mrf.mxu0  ;;  %v9009_v5 = vrot.slane %v8963_v54, %v16051_v51 }
 0xcc1   :  { %v15144_v33 = vmax.f32 %v9025_v57, 0.0  ;;  %v9028_v31 = vadd.f32 %v8993_v36, %v8970_v42  ;;  %v8971_v29 = vmul.f32 %v12136_v25, %v8941_v53  ;;  %v15150_v61 = vrot.slane %v8963_v54, %v16038_v18 }
 0xcc2   :  { %v15147_v1 = vmax.f32 %v9026_v34, 0.0  ;;  %v9027_v22 = vadd.f32 %v8989_v52, %v8969_v48  ;;  %v15153_v24 = vrot.slane %v8963_v54, %v16052_v60  ;;  %v9120_v17 = vmul.f32 %v15137_v2, %v15137_v2 }
 0xcc3   :  { %v9122_v40 = vmul.f32 %v15139_v8, %v15139_v8  ;;  %v15159_v62 = vmax.f32 %v9028_v31, 0.0  ;;  %v9029_v25 = vadd.f32 %v8997_v30, %v8971_v29  ;;  %v9121_v44 = vmul.f32 %v15141_v43, %v15141_v43 }
 0xcc4   :  { %v9054_v59 = vadd.f32 %v15147_v1, %v15137_v2  ;;  %v9124_v32 = vmul.f32 %v15147_v1, %v15147_v1  ;;  %v15167_v7 = vmax.f32 %v9027_v22, 0.0  ;;  %v15171_v41 = vmul.f32 %v15144_v33, %v15144_v33 }
 0xcc5   :  { %v9068_v63 = vadd.f32 %v15159_v62, %v15139_v8  ;;  %v9126_v50 = vmul.f32 %v15159_v62, %v15159_v62  ;;  %v15177_v16 = vmax.f32 %v9029_v25, 0.0 }
 0xcc6   :  { %v9055_v45 = vrot.slane %v9054_v59, 4  ;;  %v15179_v38 = vadd.f32 %v9124_v32, %v9120_v17  ;;  %v9061_v28 = vadd.f32 %v15167_v7, %v15141_v43  ;;  %v9125_v36 = vmul.f32 %v15167_v7, %v15167_v7 }
 0xcc7   :  { %v9069_v11 = vrot.slane %v9068_v63, 4  ;;  %v15185_v52 = vadd.f32 %v9126_v50, %v9122_v40  ;;  %v15189_v49 = vadd.f32 %v15177_v16, %v15144_v33  ;;  %v15193_v54 = vmul.f32 %v15177_v16, %v15177_v16 }
 0xcc8   :  { %v8892_v56 = vpop.f32.mrf.mxu1  ;;  %v8945_v19 = vpop.f32.mrf.mxu0  ;;  %v9056_v27 = vadd.f32 %v9055_v45, %v9054_v59  ;;  %v9062_v30 = vrot.slane %v9061_v28, 4  ;;  %v15196_v0 = vadd.f32 %v9125_v36, %v9121_v44  ;;  %v16054_v9 = vrot.slane %v15179_v38, 4 }
 0xcc9   :  { %v8972_v35 = vmul.f32 %v15130_v21, %v8892_v56  ;;  %v8974_v57 = vmul.f32 %v15130_v21, %v8945_v19  ;;  %v9070_v22 = vadd.f32 %v9069_v11, %v9068_v63  ;;  %v9151_v23 = vrot.slane %v15185_v52, 4 }
 0xcca   :  { %v8894_v58 = vpop.f32.mrf.mxu1  ;;  %v8947_v14 = vpop.f32.mrf.mxu0  ;;  %v9063_v34 = vadd.f32 %v9062_v30, %v9061_v28  ;;  %v9144_v48 = vrot.slane %v15196_v0, 4  ;;  %v9057_v29 = vrot.slane %v9056_v27, 2  ;;  %v9138_v26 = vadd.f32 %v16054_v9, %v15179_v38 }
 0xccb   :  { %v8973_v42 = vmul.f32 %v15130_v21, %v8894_v58  ;;  %v8975_v46 = vmul.f32 %v15130_v21, %v8947_v14  ;;  %v9030_v17 = vadd.f32 %v9001_v37, %v8972_v35  ;;  %v9032_v40 = vadd.f32 %v9009_v5, %v8974_v57 }
 0xccc   :  { %v8896_v53 = vpop.f32.mrf.mxu1  ;;  %v8949_v31 = vpop.f32.mrf.mxu0  ;;  %v9058_v36 = vadd.f32 %v9057_v29, %v9056_v27  ;;  %v9064_v28 = vrot.slane %v9063_v34, 2  ;;  %v9145_v13 = vadd.f32 %v9144_v48, %v15196_v0 }
 0xccd   :  { %v9031_v25 = vadd.f32 %v15150_v61, %v8973_v42  ;;  %v9033_v44 = vadd.f32 %v15153_v24, %v8975_v46  ;;  %v8976_v59 = vmul.f32 %v15130_v21, %v8896_v53  ;;  %v8978_v32 = vmul.f32 %v15130_v21, %v8949_v31 }
 0xcce   :  { %v8898_v50 = vpop.f32.mrf.mxu1  ;;  %v8951_v45 = vpop.f32.mrf.mxu0  ;;  %v15207_v56 = vmax.f32 %v9030_v17, 0.0  ;;  %v15209_v19 = vmax.f32 %v9032_v40, 0.0  ;;  %v9059_v31 = vrot.slane %v9058_v36, 1  ;;  %v9065_v29 = vadd.f32 %v9064_v28, %v9063_v34 }
 0xccf   :  { %v15211_v30 = vmax.f32 %v9031_v25, 0.0  ;;  %v15213_v63 = vmax.f32 %v9033_v44, 0.0  ;;  %v9034_v11 = vadd.f32 %v9001_v37, %v8976_v59  ;;  %v9036_v58 = vadd.f32 %v9009_v5, %v8978_v32 }
 0xcd0   :  { %v8977_v14 = vmul.f32 %v15130_v21, %v8898_v50  ;;  %v8979_v35 = vmul.f32 %v15130_v21, %v8951_v45  ;;  %v9128_v57 = vmul.f32 %v15207_v56, %v15207_v56  ;;  %v9130_v27 = vmul.f32 %v15209_v19, %v15209_v19 }
 0xcd1   :  { %v9129_v42 = vmul.f32 %v15211_v30, %v15211_v30  ;;  %v15225_v46 = vmul.f32 %v15213_v63, %v15213_v63  ;;  %v15227_v53 = vmax.f32 %v9034_v11, 0.0  ;;  %v15229_v37 = vmax.f32 %v9036_v58, 0.0 }
 0xcd2   :  { %v9035_v5 = vadd.f32 %v15150_v61, %v8977_v14  ;;  %v9037_v21 = vadd.f32 %v15153_v24, %v8979_v35  ;;  %v9071_v17 = vrot.slane %v9070_v22, 2  ;;  %v9076_v40 = vrot.slane %v15189_v49, 4 }
 0xcd3   :  { %v9082_v25 = vadd.f32 %v15227_v53, %v15207_v56  ;;  %v9132_v44 = vmul.f32 %v15227_v53, %v15227_v53  ;;  %v9096_v59 = vadd.f32 %v15229_v37, %v15209_v19  ;;  %v9134_v32 = vmul.f32 %v15229_v37, %v15229_v37 }
 0xcd4   :  { %v15242_v61 = vmax.f32 %v9035_v5, 0.0  ;;  %v15244_v24 = vmax.f32 %v9037_v21, 0.0  ;;  %v9060_v34 = vadd.f32 %v9059_v31, %v9058_v36  ;;  %v9066_v50 = vrot.slane %v9065_v29, 1 }
 0xcd5   :  { %v9083_v45 = vrot.slane %v9082_v25, 4  ;;  %v9164_v28 = vadd.f32 %v9132_v44, %v9128_v57  ;;  %v9097_v11 = vrot.slane %v9096_v59, 4  ;;  %v15246_v58 = vadd.f32 %v9134_v32, %v9130_v27 }
 0xcd6   :  { %16053 = vst [vmem:[#allocation35_spill] sm:$0xff] %v15244_v24  ;;  %v9089_v14 = vadd.f32 %v15242_v61, %v15211_v30  ;;  %v9133_v35 = vmul.f32 %v15242_v61, %v15242_v61  ;;  %v9103_v20 = vadd.f32 %v15244_v24, %v15213_v63  ;;  %v15256_v5 = vmul.f32 %v15244_v24, %v15244_v24 }
 0xcd7   :  { %v9084_v36 = vadd.f32 %v9083_v45, %v9082_v25  ;;  %v9165_v21 = vrot.slane %v9164_v28, 4  ;;  %v9067_v31 = vadd.f32 %v9066_v50, %v9065_v29  ;;  %v9072_v57 = vadd.f32 %v9071_v17, %v9070_v22 }
 0xcd8   :  { %v9090_v44 = vrot.slane %v9089_v14, 4  ;;  %v9171_v27 = vadd.f32 %v9133_v35, %v9129_v42  ;;  %v9077_v32 = vadd.f32 %v9076_v40, %v15189_v49  ;;  %v9139_v45 = vrot.slane %v9138_v26, 2 }
 0xcd9   :  { %v9073_v12 = vrot.slane %v9072_v57, 1  ;;  %v9110_v15 = vadd.f32 %v9067_v31, %v9060_v34  ;;  %v9146_v22 = vrot.slane %v9145_v13, 2  ;;  %v9152_v42 = vadd.f32 %v9151_v23, %v15185_v52 }
 0xcda   :  { %v9091_v10 = vadd.f32 %v9090_v44, %v9089_v14  ;;  %v9172_v55 = vrot.slane %v9171_v27, 4  ;;  %v9078_v25 = vrot.slane %v9077_v32, 2  ;;  %v9157_v49 = vadd.f32 %v15193_v54, %v15171_v41 }
 0xcdb   :  { %v9074_v29 = vadd.f32 %v9073_v12, %v9072_v57  ;;  %v9140_v40 = vadd.f32 %v9139_v45, %v9138_v26  ;;  %v9085_v9 = vrot.slane %v9084_v36, 2  ;;  %v9147_v50 = vadd.f32 %v9146_v22, %v9145_v13 }
 0xcdc   :  { %v9079_v17 = vadd.f32 %v9078_v25, %v9077_v32  ;;  %v9092_v38 = vrot.slane %v9091_v10, 2  ;;  %v9153_v0 = vrot.slane %v9152_v42, 2  ;;  %v9158_v48 = vrot.slane %v9157_v49, 4 }
 0xcdd   :  { %v9111_v34 = vadd.f32 %v9110_v15, %v9074_v29  ;;  %v9141_v14 = vrot.slane %v9140_v40, 1  ;;  %v9086_v31 = vadd.f32 %v9085_v9, %v9084_v36  ;;  %v9148_v39 = vrot.slane %v9147_v50, 1 }
 0xcde   :  { %v9080_v35 = vrot.slane %v9079_v17, 1  ;;  %v9093_v44 = vadd.f32 %v9092_v38, %v9091_v10  ;;  %v9154_v12 = vadd.f32 %v9153_v0, %v9152_v42  ;;  %v9159_v57 = vadd.f32 %v9158_v48, %v9157_v49 }
 0xcdf   :  { %v9098_v6 = vadd.f32 %v9097_v11, %v9096_v59  ;;  %v9142_v52 = vadd.f32 %v9141_v14, %v9140_v40  ;;  %v9087_v47 = vrot.slane %v9086_v31, 1  ;;  %v9149_v54 = vadd.f32 %v9148_v39, %v9147_v50 }
 0xce0   :  { %v9081_v23 = vadd.f32 %v9080_v35, %v9079_v17  ;;  %v9094_v41 = vrot.slane %v9093_v44, 1  ;;  %v9155_v26 = vrot.slane %v9154_v12, 1  ;;  %v9160_v32 = vrot.slane %v9159_v57, 2 }
 0xce1   :  { %v9099_v25 = vrot.slane %v9098_v6, 2  ;;  %v9088_v13 = vadd.f32 %v9087_v47, %v9086_v31  ;;  %v9104_v29 = vrot.slane %v9103_v20, 4  ;;  %v9192_v36 = vadd.f32 %v9149_v54, %v9142_v52 }
 0xce2   :  { %v9112_v15 = vadd.f32 %v9111_v34, %v9081_v23  ;;  %v9095_v45 = vadd.f32 %v9094_v41, %v9093_v44  ;;  %v9156_v22 = vadd.f32 %v9155_v26, %v9154_v12  ;;  %v9161_v24 = vadd.f32 %v9160_v32, %v9159_v57 }
 0xce3   :  { %v9100_v10 = vadd.f32 %v9099_v25, %v9098_v6  ;;  %v9105_v42 = vadd.f32 %v9104_v29, %v9103_v20  ;;  %v9166_v59 = vadd.f32 %v9165_v21, %v9164_v28  ;;  %v9173_v11 = vadd.f32 %v9172_v55, %v9171_v27  ;;  %v11989_v29 = vld [vmem:[#allocation8 + $0x970] ss:$8 sps:$4 sm:$0xff]  }
 0xce4   :  { %9113 = vadd.xlane.f32.xlu0 %v9112_v15  ;;  %v9115_v49 = vadd.f32 %v9095_v45, %v9088_v13  ;;  %v9162_v17 = vrot.slane %v9161_v24, 1  ;;  %v9193_v40 = vadd.f32 %v9192_v36, %v9156_v22  ;;  %v9179_v39 = vrot.slane %v15246_v58, 4  ;;  %v11986_v15 = vld [vmem:[#allocation8 + $0x870] ss:$8 sps:$4 sm:$0xff]   ;;  %v11988_v13 = vld [vmem:[#allocation8 + $0x874] ss:$8 sps:$4 sm:$0xff]  }
 0xce5   :  { %v9101_v9 = vrot.slane %v9100_v10, 1  ;;  %v9106_v38 = vrot.slane %v9105_v42, 2  ;;  %v9167_v50 = vrot.slane %v9166_v59, 2  ;;  %v9174_v34 = vrot.slane %v9173_v11, 2  ;;  %v11991_v22 = vld [vmem:[#allocation8 + $0x974] ss:$8 sps:$4 sm:$0xff]   ;;  %10213 = vmatprep.subr.bf16.mxu1 %v11988_v13 }
 0xce6   :  { %v9185_v47 = vadd.f32 %v15256_v5, %v15225_v46  ;;  %v9163_v0 = vadd.f32 %v9162_v17, %v9161_v24  ;;  %v9180_v6 = vadd.f32 %v9179_v39, %v15246_v58  ;;  %10266 = vmatprep.subr.bf16.mxu0 %v11991_v22  ;;  %10214 = vmatpush1.bf16.msra.mxu1 %v11986_v15  ;;  %v12000_v17 = vld [vmem:[#allocation8 + $0x854] ss:$8 sps:$4 sm:$0xff]   ;;  %v12001_v39 = vld [vmem:[#allocation8 + $0x950] ss:$8 sps:$4 sm:$0xff]   ;;  %v12057_v22 = vld [vmem:[#allocation8 + $0x9c4] ss:$8 sps:$4 sm:$0xff]  }
 0xce7   :  { %v9102_v48 = vadd.f32 %v9101_v9, %v9100_v10  ;;  %v9107_v35 = vadd.f32 %v9106_v38, %v9105_v42  ;;  %v9168_v20 = vadd.f32 %v9167_v50, %v9166_v59  ;;  %v9175_v14 = vadd.f32 %v9174_v34, %v9173_v11  ;;  %10267 = vmatpush1.bf16.msra.mxu0 %v11989_v29  ;;  %v11994_v42 = vld [vmem:[#allocation8 + $0x864] ss:$8 sps:$4 sm:$0xff]   ;;  %v11992_v59 = vld [vmem:[#allocation8 + $0x860] ss:$8 sps:$4 sm:$0xff]   ;;  %v11998_v9 = vld [vmem:[#allocation8 + $0x850] ss:$8 sps:$4 sm:$0xff]  }
 0xce8   :  { %v9186_v28 = vrot.slane %v9185_v47, 4  ;;  %v9194_v55 = vadd.f32 %v9193_v40, %v9163_v0  ;;  %v9181_v27 = vrot.slane %v9180_v6, 2  ;;  %v11995_v11 = vld [vmem:[#allocation8 + $0x960] ss:$8 sps:$4 sm:$0xff]   ;;  %10215 = vmatprep.subr.bf16.mxu1 %v11994_v42  ;;  %v12003_v40 = vld [vmem:[#allocation8 + $0x954] ss:$8 sps:$4 sm:$0xff]  }
 0xce9   :  { %v9116_v21 = vadd.f32 %v9115_v49, %v9102_v48  ;;  %v9108_v31 = vrot.slane %v9107_v35, 1  ;;  %v9169_v44 = vrot.slane %v9168_v20, 1  ;;  %v9176_v12 = vrot.slane %v9175_v14, 1  ;;  %v11997_v49 = vld [vmem:[#allocation8 + $0x964] ss:$8 sps:$4 sm:$0xff]  }
 0xcea   :  { %v9187_v57 = vadd.f32 %v9186_v28, %v9185_v47  ;;  %9195 = vadd.xlane.f32.xlu0 %v9194_v55  ;;  %v9182_v23 = vadd.f32 %v9181_v27, %v9180_v6  ;;  %10268 = vmatprep.subr.bf16.mxu0 %v11997_v49  ;;  %v12006_v38 = vld [vmem:[#allocation8 + $0x844] ss:$8 sps:$4 sm:$0xff]   ;;  %v12004_v34 = vld [vmem:[#allocation8 + $0x840] ss:$8 sps:$4 sm:$0xff]   ;;  %v12012_v0 = vld [vmem:[#allocation8 + $0x834] ss:$8 sps:$4 sm:$0xff]  }
 0xceb   :  { %v9109_v52 = vadd.f32 %v9108_v31, %v9107_v35  ;;  %v9170_v41 = vadd.f32 %v9169_v44, %v9168_v20  ;;  %v9177_v46 = vadd.f32 %v9176_v12, %v9175_v14  ;;  %10216 = vmatpush1.bf16.msra.mxu1 %v11992_v59  ;;  %10269 = vmatpush1.bf16.msra.mxu0 %v11995_v11  ;;  %v12009_v50 = vld [vmem:[#allocation8 + $0x944] ss:$8 sps:$4 sm:$0xff]   ;;  %v12007_v47 = vld [vmem:[#allocation8 + $0x940] ss:$8 sps:$4 sm:$0xff]   ;;  %v12015_v48 = vld [vmem:[#allocation8 + $0x934] ss:$8 sps:$4 sm:$0xff]  }
 0xcec   :  { %v9188_v24 = vrot.slane %v9187_v57, 2  ;;  %v9183_v5 = vrot.slane %v9182_v23, 1  ;;  %10217 = vmatprep.subr.bf16.mxu1 %v12000_v17  ;;  %10270 = vmatprep.subr.bf16.mxu0 %v12003_v40  ;;  %v12010_v6 = vld [vmem:[#allocation8 + $0x830] ss:$8 sps:$4 sm:$0xff]   ;;  %v12018_v20 = vld [vmem:[#allocation8 + $0x824] ss:$8 sps:$4 sm:$0xff]  }
 0xced   :  { %v9117_v54 = vadd.f32 %v9116_v21, %v9109_v52  ;;  %v9197_v26 = vadd.f32 %v9177_v46, %v9170_v41  ;;  %v12013_v35 = vld [vmem:[#allocation8 + $0x930] ss:$8 sps:$4 sm:$0xff]   ;;  %v12021_v14 = vld [vmem:[#allocation8 + $0x924] ss:$8 sps:$4 sm:$0xff]   ;;  %v12016_v28 = vld [vmem:[#allocation8 + $0x820] ss:$8 sps:$4 sm:$0xff]  }
 0xcee   :  { %v9189_v58 = vadd.f32 %v9188_v24, %v9187_v57  ;;  %v9184_v32 = vadd.f32 %v9183_v5, %v9182_v23  ;;  %v12019_v55 = vld [vmem:[#allocation8 + $0x920] ss:$8 sps:$4 sm:$0xff]   ;;  %v12024_v21 = vld [vmem:[#allocation8 + $0x814] ss:$8 sps:$4 sm:$0xff]   ;;  %v12022_v31 = vld [vmem:[#allocation8 + $0x810] ss:$8 sps:$4 sm:$0xff]  }
 0xcef   :  { %9118 = vadd.xlane.f32.xlu1 %v9117_v54  ;;  %10218 = vmatpush1.bf16.msra.mxu1 %v11998_v9  ;;  %v12027_v27 = vld [vmem:[#allocation8 + $0x914] ss:$8 sps:$4 sm:$0xff]   ;;  %v12025_v44 = vld [vmem:[#allocation8 + $0x910] ss:$8 sps:$4 sm:$0xff]   ;;  %v12028_v12 = vld [vmem:[#allocation8 + $0x800] ss:$8 sps:$4 sm:$0xff]  }
 0xcf0   :  { %v9190_v25 = vrot.slane %v9189_v58, 1  ;;  %v9198_v45 = vadd.f32 %v9197_v26, %v9184_v32  ;;  %10271 = vmatpush1.bf16.msra.mxu0 %v12001_v39  ;;  %10219 = vmatprep.subr.bf16.mxu1 %v12006_v38  ;;  %v12030_v57 = vld [vmem:[#allocation8 + $0x804] ss:$8 sps:$4 sm:$0xff]   ;;  %v12031_v23 = vld [vmem:[#allocation8 + $0x900] ss:$8 sps:$4 sm:$0xff]  }
 0xcf1   :  { %10272 = vmatprep.subr.bf16.mxu0 %v12009_v50  ;;  %v12033_v52 = vld [vmem:[#allocation8 + $0x904] ss:$8 sps:$4 sm:$0xff]   ;;  %v12036_v41 = vld [vmem:[#allocation8 + $0x8f4] ss:$8 sps:$4 sm:$0xff]   ;;  %v12034_v24 = vld [vmem:[#allocation8 + $0x8f0] ss:$8 sps:$4 sm:$0xff]  }
 0xcf2   :  { %v9191_v36 = vadd.f32 %v9190_v25, %v9189_v58  ;;  %v12039_v46 = vld [vmem:[#allocation8 + $0x9f4] ss:$8 sps:$4 sm:$0xff]   ;;  %v12037_v5 = vld [vmem:[#allocation8 + $0x9f0] ss:$8 sps:$4 sm:$0xff]   ;;  %v12042_v54 = vld [vmem:[#allocation8 + $0x8e4] ss:$8 sps:$4 sm:$0xff]  }
 0xcf3   :  { %10220 = vmatpush1.bf16.msra.mxu1 %v12004_v34  ;;  %v12045_v58 = vld [vmem:[#allocation8 + $0x9e4] ss:$8 sps:$4 sm:$0xff]   ;;  %v12040_v26 = vld [vmem:[#allocation8 + $0x8e0] ss:$8 sps:$4 sm:$0xff]   ;;  %v12048_v25 = vld [vmem:[#allocation8 + $0x8d4] ss:$8 sps:$4 sm:$0xff]  }
 0xcf4   :  { %v9199_v10 = vadd.f32 %v9198_v45, %v9191_v36  ;;  %10273 = vmatpush1.bf16.msra.mxu0 %v12007_v47  ;;  %10221 = vmatprep.subr.bf16.mxu1 %v12012_v0  ;;  %v12043_v32 = vld [vmem:[#allocation8 + $0x9e0] ss:$8 sps:$4 sm:$0xff]   ;;  %v12051_v15 = vld [vmem:[#allocation8 + $0x9d4] ss:$8 sps:$4 sm:$0xff]   ;;  %v12046_v13 = vld [vmem:[#allocation8 + $0x8d0] ss:$8 sps:$4 sm:$0xff]  }
 0xcf5   :  { %10274 = vmatprep.subr.bf16.mxu0 %v12015_v48  ;;  %v12049_v45 = vld [vmem:[#allocation8 + $0x9d0] ss:$8 sps:$4 sm:$0xff]   ;;  %v12054_v29 = vld [vmem:[#allocation8 + $0x8c4] ss:$8 sps:$4 sm:$0xff]   ;;  %v12052_v36 = vld [vmem:[#allocation8 + $0x8c0] ss:$8 sps:$4 sm:$0xff]  }
 0xcf6   :  { %9200 = vadd.xlane.f32.xlu1 %v9199_v10  ;;  %v12055_v10 = vld [vmem:[#allocation8 + $0x9c0] ss:$8 sps:$4 sm:$0xff]   ;;  %v12060_v42 = vld [vmem:[#allocation8 + $0x8b4] ss:$8 sps:$4 sm:$0xff]   ;;  %v12058_v59 = vld [vmem:[#allocation8 + $0x8b0] ss:$8 sps:$4 sm:$0xff]  }
 0xcf7   :  { %10222 = vmatpush1.bf16.msra.mxu1 %v12010_v6  ;;  %v12063_v49 = vld [vmem:[#allocation8 + $0x9b4] ss:$8 sps:$4 sm:$0xff]   ;;  %v12061_v11 = vld [vmem:[#allocation8 + $0x9b0] ss:$8 sps:$4 sm:$0xff]   ;;  %v12066_v17 = vld [vmem:[#allocation8 + $0x8a4] ss:$8 sps:$4 sm:$0xff]  }
 0xcf8   :  { %10275 = vmatpush1.bf16.msra.mxu0 %v12013_v35  ;;  %10223 = vmatprep.subr.bf16.mxu1 %v12018_v20  ;;  %v12069_v40 = vld [vmem:[#allocation8 + $0x9a4] ss:$8 sps:$4 sm:$0xff]   ;;  %v12064_v9 = vld [vmem:[#allocation8 + $0x8a0] ss:$8 sps:$4 sm:$0xff]   ;;  %v12072_v38 = vld [vmem:[#allocation8 + $0x894] ss:$8 sps:$4 sm:$0xff]  }
 0xcf9   :  { %10276 = vmatprep.subr.bf16.mxu0 %v12021_v14  ;;  %v12067_v39 = vld [vmem:[#allocation8 + $0x9a0] ss:$8 sps:$4 sm:$0xff]   ;;  %v12075_v50 = vld [vmem:[#allocation8 + $0x994] ss:$8 sps:$4 sm:$0xff]   ;;  %v12070_v34 = vld [vmem:[#allocation8 + $0x890] ss:$8 sps:$4 sm:$0xff]  }
 0xcfa   :  { %v12073_v47 = vld [vmem:[#allocation8 + $0x990] ss:$8 sps:$4 sm:$0xff]   ;;  %v12078_v0 = vld [vmem:[#allocation8 + $0x884] ss:$8 sps:$4 sm:$0xff]   ;;  %v12076_v6 = vld [vmem:[#allocation8 + $0x880] ss:$8 sps:$4 sm:$0xff]  }
 0xcfb   :  { %10224 = vmatpush1.bf16.msra.mxu1 %v12016_v28  ;;  %v12081_v48 = vld [vmem:[#allocation8 + $0x984] ss:$8 sps:$4 sm:$0xff]   ;;  %v12079_v35 = vld [vmem:[#allocation8 + $0x980] ss:$8 sps:$4 sm:$0xff]  }
 0xcfc   :  { %10277 = vmatpush1.bf16.msra.mxu0 %v12019_v55  ;;  %10225 = vmatprep.subr.bf16.mxu1 %v12024_v21  ;;  %v9447_v28 = vld [vmem:[#allocation10 + $0x20] sm:$0xff] }
 0xcfd   :  { %10278 = vmatprep.subr.bf16.mxu0 %v12027_v27 }
 0xcff   :  { %10226 = vmatpush1.bf16.msra.mxu1 %v12022_v31  ;;  %v9449_v31 = vcombine.high %v9447_v28, %v9447_v28 }
 0xd00   :  { %10279 = vmatpush1.bf16.msra.mxu0 %v12025_v44  ;;  %10227 = vmatprep.subr.bf16.mxu1 %v12030_v57 }
 0xd01   :  { %10280 = vmatprep.subr.bf16.mxu0 %v12033_v52 }
 0xd03   :  { %10228 = vmatpush1.bf16.msra.mxu1 %v12028_v12 }
 0xd04   :  { %10281 = vmatpush1.bf16.msra.mxu0 %v12031_v23  ;;  %10229 = vmatprep.subr.bf16.mxu1 %v12036_v41  ;;  %v16055_v23 = vld [vmem:[#allocation43_spill] sm:$0xff] }
 0xd05   :  { %10282 = vmatprep.subr.bf16.mxu0 %v12039_v46  ;;  %v9456_v52 = vrot.slane %v9447_v28, %v16055_v23  ;;  %v9463_v41 = vrot.slane %v9449_v31, %v16055_v23 }
 0xd07   :  { %10230 = vmatpush2.bf16.msra.mxu1 %v12034_v24  ;;  %v9481_v31 = vpack.i.b16 %v9463_v41, %v9463_v41 }
 0xd08   :  { %10283 = vmatpush2.bf16.msra.mxu0 %v12037_v5  ;;  %10231 = vmatprep.subr.bf16.mxu1 %v12042_v54  ;;  %v9464_v5 = vcombine.high %v9456_v52, %v9456_v52  ;;  %v9465_v54 = vcombine.high %v9463_v41, %v9463_v41 }
 0xd09   :  { %10284 = vmatprep.subr.bf16.mxu0 %v12045_v58 }
 0xd0b   :  { %10232 = vmatpush2.bf16.msra.mxu1 %v12040_v26 }
 0xd0c   :  { %10285 = vmatpush2.bf16.msra.mxu0 %v12043_v32  ;;  %10233 = vmatprep.subr.bf16.mxu1 %v12048_v25  ;;  %v9578_v25 = vld [vmem:[#allocation11] sm:$0x44] }
 0xd0d   :  { %10286 = vmatprep.subr.bf16.mxu0 %v12051_v15  ;;  %v9502_v15 = vshrl.u32 %v9456_v52, 16 }
 0xd0f   :  { %10234 = vmatpush2.bf16.msra.mxu1 %v12046_v13 }
 0xd10   :  { %10287 = vmatpush2.bf16.msra.mxu0 %v12049_v45  ;;  %10235 = vmatprep.subr.bf16.mxu1 %v12054_v29  ;;  %v9509_v45 = vshrl.u32 %v9464_v5, 16  ;;  %v9523_v29 = vshrl.u32 %v9465_v54, 16 }
 0xd11   :  { %10288 = vmatprep.subr.bf16.mxu0 %v12057_v22  ;;  %v9516_v22 = vshrl.u32 %v9463_v41, 16 }
 0xd13   :  { %10236 = vmatpush2.bf16.msra.mxu1 %v12052_v36 }
 0xd14   :  { %10289 = vmatpush2.bf16.msra.mxu0 %v12055_v10  ;;  %10237 = vmatprep.subr.bf16.mxu1 %v12060_v42  ;;  %v11007_v10 = vcombine.low %v9578_v25, %v9578_v25  ;;  %v11008_v42 = vcombine.high %v9578_v25, %v9578_v25 }
 0xd15   :  { %10290 = vmatprep.subr.bf16.mxu0 %v12063_v49  ;;  %v9579_v49 = vld [vmem:[#allocation11 + $0x8] sm:$0x44] }
 0xd17   :  { %10238 = vmatpush2.bf16.msra.mxu1 %v12058_v59  ;;  %v9474_v59 = vpack.i.b16 %v9464_v5, %v9464_v5 }
 0xd18   :  { %10291 = vmatpush2.bf16.msra.mxu0 %v12061_v11  ;;  %10239 = vmatprep.subr.bf16.mxu1 %v12066_v17  ;;  %v9503_v11 = vpack.i.b16 %v9502_v15, %v9502_v15 }
 0xd19   :  { %10292 = vmatprep.subr.bf16.mxu0 %v12069_v40  ;;  %v9510_v40 = vpack.i.b16 %v9509_v45, %v9509_v45 }
 0xd1b   :  { %10240 = vmatpush2.bf16.msra.mxu1 %v12064_v9  ;;  %v9524_v9 = vpack.i.b16 %v9523_v29, %v9523_v29  ;;  %v15318_v29 = vrot.slane %v9481_v31, %v16037_v3 }
 0xd1c   :  { %10293 = vmatpush2.bf16.msra.mxu0 %v12067_v39  ;;  %10241 = vmatprep.subr.bf16.mxu1 %v12072_v38  ;;  %v11009_v39 = vcombine.low %v9579_v49, %v9579_v49  ;;  %v11010_v38 = vcombine.high %v9579_v49, %v9579_v49 }
 0xd1d   :  { %10294 = vmatprep.subr.bf16.mxu0 %v12075_v50  ;;  %v9517_v50 = vpack.i.b16 %v9516_v22, %v9516_v22 }
 0xd1f   :  { %10242 = vmatpush2.bf16.msra.mxu1 %v12070_v34  ;;  %v9217_v34 = vld [vmem:[#allocation16 + $0x4] ss:$8 sm:$0xf]  ;;  %v15293_v23 = vrot.slane %v9517_v50, %v16037_v3 }
 0xd20   :  { %10295 = vmatpush2.bf16.msra.mxu0 %v12073_v47  ;;  %10243 = vmatprep.subr.bf16.mxu1 %v12078_v0  ;;  %v9607_v47 = vpack.i.b16 %v11007_v10, %v11007_v10  ;;  %v9614_v0 = vpack.i.b16 %v11008_v42, %v11008_v42  ;;  %v15327_v10 = vrot.slane %v9481_v31, %v16038_v18 }
 0xd21   :  { %10296 = vmatprep.subr.bf16.mxu0 %v12081_v48  ;;  %v9488_v48 = vpack.i.b16 %v9465_v54, %v9465_v54 }
 0xd22   :  { %v15296_v5 = vrot.slane %v9607_v47, %v16051_v51  ;;  %v15299_v54 = vrot.slane %v9614_v0, %v16051_v51 }
 0xd23   :  { %10244 = vmatpush2.bf16.msra.mxu1 %v12076_v6  ;;  %v15278_v6 = vrot.slane %v9474_v59, %v16037_v3 }
 0xd24   :  { %10297 = vmatpush2.bf16.msra.mxu0 %v12079_v35  ;;  %v15281_v35 = vrot.slane %v9474_v59, %v16038_v18 }
 0xd6d   :  { %v9114_v20 = vpop.xlane.xlu0 %9113 }
 0xd6e   :  { %v9202_v14 = vmul.f32 0.00012207031, %v9114_v20  ;;  %v15284_v20 = vrot.slane %v9503_v11, %v16037_v3 }
 0xd70   :  { %v9206_v21 = vmul.f32 %v9202_v14, %v9202_v14 }
 0xd73   :  { %v9196_v55 = vpop.xlane.xlu0 %9195 }
 0xd74   :  { %v9204_v27 = vmul.f32 0.00012207031, %v9196_v55  ;;  %v15287_v55 = vrot.slane %v9510_v40, %v16037_v3 }
 0xd76   :  { %v9208_v44 = vsub.f32 %v9204_v27, %v9206_v21  ;;  %v15290_v21 = vrot.slane %v9524_v9, %v16037_v3  ;;  %v9467_v27 = vpack.i.b16 %v9456_v52, %v9456_v52 }
 0xd78   :  { %v9210_v12 = vmax.f32 %v9208_v44, 0.0  ;;  %v9119_v57 = vpop.xlane.xlu1 %9118  ;;  %v15311_v15 = vrot.slane %v9467_v27, %v16037_v3 }
 0xd79   :  { %v15273_v24 = vmul.f32 0.00012207031, %v9119_v57  ;;  %v9628_v57 = vpack.i.b16 %v11010_v38, %v11010_v38 }
 0xd7a   :  { %v9212_v46 = vadd.f32 1e-08, %v9210_v12  ;;  %v9621_v12 = vpack.i.b16 %v11009_v39, %v11009_v39 }
 0xd7b   :  { %v9207_v26 = vmul.f32 %v15273_v24, %v15273_v24 }
 0xd7c   :  { %12139 = vrsqrt.f32 %v9212_v46  ;;  %v9221_v46 = vld [vmem:[#allocation17 + $0x4] ss:$8 sm:$0xf] }
 0xd7f   :  { %v9201_v58 = vpop.xlane.xlu1 %9200 }
 0xd80   :  { %v9205_v32 = vmul.f32 0.00012207031, %v9201_v58  ;;  %v15302_v58 = vrot.slane %v9488_v48, %v16037_v3 }
 0xd82   :  { %v9209_v13 = vsub.f32 %v9205_v32, %v9207_v26  ;;  %v15305_v26 = vrot.slane %v9488_v48, %v16038_v18 }
 0xd84   :  { %v9211_v36 = vmax.f32 %v9209_v13, 0.0  ;;  %v15314_v13 = vrot.slane %v9467_v27, %v16038_v18 }
 0xd86   :  { %v9213_v17 = vadd.f32 1e-08, %v9211_v36  ;;  %v15324_v36 = vrot.slane %v9628_v57, %v16051_v51 }
 0xd88   :  { %12141 = vrsqrt.f32 %v9213_v17 }
 0xd89   :  { %v12140_v28 = vpop.eup %12139 }
 0xd8a   :  { %v9218_v44 = vmul.f32 %v12140_v28, %v9217_v34 }
 0xd8c   :  { %v9222_v52 = vmul.f32 %v9218_v44, %v9202_v14  ;;  %v9235_v41 = vrot.slane %v9218_v44, %v16038_v18  ;;  %v9243_v32 = vrot.slane %v9218_v44, %v16052_v60  ;;  %v9231_v25 = vrot.slane %v9218_v44, %v16037_v3 }
 0xd8d   :  { %v9239_v45 = vrot.slane %v9218_v44, %v16051_v51  ;;  %v15321_v14 = vrot.slane %v9621_v12, %v16051_v51 }
 0xd8e   :  { %v9224_v22 = vsub.f32 %v9221_v46, %v9222_v52  ;;  %v9269_v42 = vmul.f32 %v9235_v41, %v15141_v43  ;;  %v9273_v49 = vmul.f32 %v9235_v41, %v15167_v7  ;;  %v9271_v59 = vmul.f32 %v9243_v32, %v15144_v33 }
 0xd8f   :  { %v9275_v11 = vmul.f32 %v9243_v32, %v15177_v16  ;;  %v9268_v9 = vmul.f32 %v9231_v25, %v15137_v2  ;;  %v9272_v38 = vmul.f32 %v9231_v25, %v15147_v1  ;;  %v9270_v50 = vmul.f32 %v9239_v45, %v15139_v8 }
 0xd90   :  { %v9293_v17 = vrot.slane %v9224_v22, %v16038_v18  ;;  %v9301_v40 = vrot.slane %v9224_v22, %v16052_v60  ;;  %v9289_v39 = vrot.slane %v9224_v22, %v16037_v3  ;;  %v9274_v43 = vmul.f32 %v9239_v45, %v15159_v62 }
 0xd91   :  { %v9297_v7 = vrot.slane %v9224_v22, %v16051_v51 }
 0xd92   :  { %v15341_v47 = vadd.f32 %v9293_v17, %v9269_v42  ;;  %v15343_v33 = vadd.f32 %v9293_v17, %v9273_v49  ;;  %v15345_v16 = vadd.f32 %v9301_v40, %v9271_v59  ;;  %v15347_v0 = vadd.f32 %v9301_v40, %v9275_v11 }
 0xd93   :  { %v15349_v48 = vadd.f32 %v9289_v39, %v9268_v9  ;;  %v15351_v2 = vadd.f32 %v9289_v39, %v9272_v38  ;;  %v15353_v28 = vadd.f32 %v9297_v7, %v9270_v50  ;;  %v15355_v1 = vadd.f32 %v9297_v7, %v9274_v43 }
 0xd94   :  { %v9343_v62 = vrot.slane %v15341_v47, 7  ;;  %v15859_v27 = vrot.slane %v15343_v33, 7  ;;  %v15857_v31 = vrot.slane %v15341_v47, 1  ;;  %v9395_v44 = vrot.slane %v15343_v33, 1 }
 0xd95   :  { %v12142_v8 = vpop.eup %12141  ;;  %v9439_v57 = vpack.c.bf16 %v15343_v33, %v15341_v47  ;;  %v9345_v52 = vrot.slane %v15345_v16, 7  ;;  %v15854_v41 = vrot.slane %v15347_v0, 7  ;;  %v15855_v45 = vrot.slane %v15345_v16, 1 }
 0xd96   :  { %v9219_v12 = vmul.f32 %v12142_v8, %v9217_v34  ;;  %v9367_v32 = vsel %vm1296_vm4, %v9343_v62, %v15859_v27  ;;  %v9415_v25 = vsel %vm1345_vm5, %v15857_v31, %v9395_v44  ;;  %v9397_v34 = vrot.slane %v15347_v0, 1 }
 0xd97   :  { %v15380_v11 = vmul.bf16 %v15287_v55, %v9439_v57  ;;  %v9369_v40 = vsel %vm1296_vm4, %v9345_v52, %v15854_v41  ;;  %v16056_v57 = vld [vmem:[#allocation35_spill] sm:$0xff] }
 0xd98   :  { %v9223_v22 = vmul.f32 %v9219_v12, %v15273_v24  ;;  %v9247_v42 = vrot.slane %v9219_v12, %v16037_v3  ;;  %v9255_v49 = vrot.slane %v9219_v12, %v16051_v51  ;;  %v9251_v59 = vrot.slane %v9219_v12, %v16038_v18 }
 0xd99   :  { %v9259_v17 = vrot.slane %v9219_v12, %v16052_v60  ;;  %v9417_v24 = vsel %vm1345_vm5, %v15855_v45, %v9397_v34  ;;  %v9441_v45 = vpack.c.bf16 %v15347_v0, %v15345_v16 }
 0xd9a   :  { %v9276_v9 = vmul.f32 %v9247_v42, %v15207_v56  ;;  %v9278_v39 = vmul.f32 %v9255_v49, %v15209_v19  ;;  %v9280_v38 = vmul.f32 %v9247_v42, %v15227_v53  ;;  %v9282_v50 = vmul.f32 %v9255_v49, %v15229_v37 }
 0xd9b   :  { %v9225_v43 = vsub.f32 %v9221_v46, %v9223_v22  ;;  %v9277_v7 = vmul.f32 %v9251_v59, %v15211_v30  ;;  %v9281_v8 = vmul.f32 %v9251_v59, %v15242_v61  ;;  %v9279_v12 = vmul.f32 %v9259_v17, %v15213_v63 }
 0xd9c   :  { %v9283_v41 = vmul.f32 %v9259_v17, %v16056_v57  ;;  %v9342_v56 = vrot.slane %v15349_v48, 7  ;;  %v15856_v19 = vrot.slane %v15351_v2, 7  ;;  %v15858_v30 = vrot.slane %v15349_v48, 1 }
 0xd9d   :  { %v9309_v53 = vrot.slane %v9225_v43, %v16038_v18  ;;  %v9317_v37 = vrot.slane %v9225_v43, %v16052_v60  ;;  %v9305_v46 = vrot.slane %v9225_v43, %v16037_v3  ;;  %v9533_v61 = vmul.bf16 %v15290_v21, %v9441_v45  ;;  %v16059_v18 = vld [vmem:[#allocation44_spill] sm:$0xff] }
 0xd9e   :  { %v9366_v63 = vsel %vm1296_vm4, %v9342_v56, %v15856_v19  ;;  %v9394_v22 = vrot.slane %v15351_v2, 1  ;;  %v9438_v42 = vpack.c.bf16 %v15351_v2, %v15349_v48 }
 0xd9f   :  { %v15415_v49 = vadd.f32 %v9309_v53, %v9277_v7  ;;  %v15417_v59 = vadd.f32 %v9309_v53, %v9281_v8  ;;  %v15419_v60 = vadd.f32 %v9317_v37, %v9279_v12  ;;  %v15421_v17 = vadd.f32 %v9317_v37, %v9283_v41 }
 0xda0   :  { %v15423_v57 = vadd.f32 %v9305_v46, %v9276_v9  ;;  %v15425_v45 = vadd.f32 %v9305_v46, %v9280_v38  ;;  %v9414_v19 = vsel %vm1345_vm5, %v15858_v30, %v9394_v22  ;;  %v9530_v31 = vmul.bf16 %v15284_v20, %v9438_v42 }
 0xda1   :  { %v15860_v7 = vrot.slane %v15417_v59, 7  ;;  %v15861_v8 = vrot.slane %v15415_v49, 1  ;;  %v15862_v12 = vrot.slane %v15421_v17, 7  ;;  %v9401_v41 = vrot.slane %v15419_v60, 1 }
 0xda2   :  { %v9313_v53 = vrot.slane %v9225_v43, %v16051_v51  ;;  %v9344_v37 = vrot.slane %v15353_v28, 7 }
 0xda3   :  { %v9371_v46 = vsel %vm1296_vm4, %v15860_v7, %v9343_v62  ;;  %v9411_v42 = vsel %vm1345_vm5, %v9395_v44, %v15861_v8  ;;  %v9373_v30 = vsel %vm1296_vm4, %v15862_v12, %v9345_v52  ;;  %v9413_v51 = vsel %vm1345_vm5, %v9397_v34, %v9401_v41 }
 0xda4   :  { %v9375_v43 = vpack.c.bf16 %v9367_v32, %v9371_v46  ;;  %v9423_v27 = vpack.c.bf16 %v9411_v42, %v9415_v25  ;;  %v9377_v38 = vpack.c.bf16 %v9369_v40, %v9373_v30  ;;  %v9425_v9 = vpack.c.bf16 %v9413_v51, %v9417_v24  ;;  %v16060_v32 = vld [vmem:[#allocation45_spill] sm:$0xff] }
 0xda5   :  { %v16057_v62 = vrot.slane %v15425_v45, 7  ;;  %v16058_v44 = vrot.slane %v15423_v57, 1  ;;  %v15464_v52 = vadd.f32 %v9313_v53, %v9278_v39  ;;  %v15466_v12 = vadd.f32 %v9313_v53, %v9282_v50 }
 0xda6   :  { %v9383_v34 = vmul.bf16 %v9375_v43, %v16059_v18  ;;  %v9431_v25 = vmul.bf16 %v9423_v27, %v16060_v32  ;;  %v9385_v40 = vmul.bf16 %v9377_v38, %v16059_v18  ;;  %v9433_v24 = vmul.bf16 %v9425_v9, %v16060_v32 }
 0xda7   :  { %v9370_v7 = vsel %vm1296_vm4, %v16057_v62, %v9342_v56  ;;  %v9410_v8 = vsel %vm1345_vm5, %v9394_v22, %v16058_v44  ;;  %v9348_v56 = vrot.slane %v15355_v1, 7  ;;  %v9356_v42 = vrot.slane %v15466_v12, 7 }
 0xda8   :  { %v9374_v30 = vpack.c.bf16 %v9366_v63, %v9370_v7  ;;  %v9422_v46 = vpack.c.bf16 %v9410_v8, %v9414_v19  ;;  %v9495_v22 = vmul.bf16 %v15278_v6, %v9383_v34  ;;  %v9563_v39 = vmul.bf16 %v15281_v35, %v9431_v25 }
 0xda9   :  { %v9497_v50 = vmul.bf16 %v15302_v58, %v9385_v40  ;;  %v9565_v53 = vmul.bf16 %v15305_v26, %v9433_v24  ;;  %v9368_v19 = vsel %vm1296_vm4, %v9344_v37, %v9348_v56  ;;  %v9372_v63 = vsel %vm1296_vm4, %v9356_v42, %v9344_v37 }
 0xdaa   :  { %v9382_v27 = vmul.bf16 %v9374_v30, %v16059_v18  ;;  %v9430_v38 = vmul.bf16 %v9422_v46, %v16060_v32  ;;  %v9539_v7 = vadd.bf16 %v15380_v11, %v9495_v22  ;;  %v9376_v9 = vpack.c.bf16 %v9368_v19, %v9372_v63 }
 0xdab   :  { %v9541_v8 = vadd.bf16 %v9533_v61, %v9497_v50  ;;  %v15864_v51 = vrot.slane %v15353_v28, 1  ;;  %v9396_v44 = vrot.slane %v15355_v1, 1  ;;  %v9400_v34 = vrot.slane %v15464_v52, 1 }
 0xdac   :  { %v9494_v43 = vmul.bf16 %v15311_v15, %v9382_v27  ;;  %v9562_v62 = vmul.bf16 %v15314_v13, %v9430_v38  ;;  %v9571_v25 = vadd.bf16 %v9563_v39, %v9539_v7  ;;  %v9384_v24 = vmul.bf16 %v9376_v9, %v16059_v18 }
 0xdad   :  { %v9573_v40 = vadd.bf16 %v9565_v53, %v9541_v8  ;;  %v9440_v37 = vpack.c.bf16 %v15355_v1, %v15353_v28  ;;  %v9412_v61 = vsel %vm1345_vm5, %v9396_v44, %v9400_v34  ;;  %v9416_v30 = vsel %vm1345_vm5, %v15864_v51, %v9396_v44 }
 0xdae   :  { %v9538_v11 = vadd.bf16 %v9530_v31, %v9494_v43  ;;  %v9351_v46 = vrot.slane %v15415_v49, 7  ;;  %v16061_v22 = vmov 0   ;;  %v9424_v38 = vpack.c.bf16 %v9412_v61, %v9416_v30 }
 0xdaf   :  { %v9581_v39 = vmax.bf16 %v16061_v22, %v9571_v25  ;;  %v9589_v50 = vmin.bf16 %v16061_v22, %v9571_v25  ;;  %v9583_v53 = vmax.bf16 %v16061_v22, %v9573_v40  ;;  %v9591_v31 = vmin.bf16 %v16061_v22, %v9573_v40 }
 0xdb0   :  { %v9570_v27 = vadd.bf16 %v9562_v62, %v9538_v11  ;;  %v9496_v19 = vmul.bf16 %v15318_v29, %v9384_v24  ;;  %v9532_v63 = vmul.bf16 %v15293_v23, %v9440_v37  ;;  %v16062_v9 = vrot.slane %v15417_v59, 7 }
 0xdb1   :  { %v9635_v7 = vmul.bf16 %v15299_v54, %v9589_v50  ;;  %v9637_v8 = vmul.bf16 %v15324_v36, %v9591_v31  ;;  %v16063_v44 = vrot.slane %v15343_v33, 7  ;;  %v9432_v24 = vmul.bf16 %v9424_v38, %v16060_v32 }
 0xdb2   :  { %v9359_v43 = vsel %vm1296_vm4, %v9351_v46, %v16062_v9  ;;  %v9580_v62 = vmax.bf16 %v16061_v22, %v9570_v27  ;;  %v9588_v40 = vmin.bf16 %v16061_v22, %v9570_v27  ;;  %v9540_v37 = vadd.bf16 %v9532_v63, %v9496_v19 }
 0xdb3   :  { %v9363_v25 = vsel %vm1296_vm4, %v16063_v44, %v9351_v46  ;;  %v9643_v11 = vadd.bf16 %v9635_v7, %v9581_v39  ;;  %v9645_v61 = vadd.bf16 %v9637_v8, %v9583_v53  ;;  %v9403_v50 = vrot.slane %v15417_v59, 1 }
 0xdb4   :  { %v9379_v30 = vpack.c.bf16 %v9359_v43, %v9363_v25  ;;  %v9634_v31 = vmul.bf16 %v15296_v5, %v9588_v40  ;;  %v9564_v9 = vmul.bf16 %v15327_v10, %v9432_v24  ;;  %v9443_v33 = vpack.c.bf16 %v15417_v59, %v15415_v49 }
 0xdb5   :  { %v9353_v46 = vrot.slane %v15419_v60, 7  ;;  %v9651_v44 = vunpack.c.l.bf16 %v9643_v11  ;;  %v9655_v51 = vunpack.c.h.bf16 %v9643_v11  ;;  %10245 = vmatprep.mubr.bf16.mxu1 %v9643_v11  ;;  %v15531_v27 = vunpack.c.l.bf16 %v9645_v61  ;;  %10298 = vmatprep.mubr.bf16.mxu0 %v9645_v61 }
 0xdb6   :  { %v15533_v38 = vunpack.c.h.bf16 %v9645_v61  ;;  %v15535_v39 = vadd.bf16 %v9634_v31, %v9580_v62  ;;  %v9572_v53 = vadd.bf16 %v9564_v9, %v9540_v37  ;;  %v9387_v19 = vmul.bf16 %v9379_v30, %v16059_v18 }
 0xdb7   :  { %v16064_v63 = vrot.slane %v15415_v49, 1  ;;  %v15542_v7 = vadd.f32 %v9655_v51, %v9651_v44  ;;  %v9733_v8 = vmul.f32 %v9651_v44, %v9651_v44  ;;  %v9737_v43 = vmul.f32 %v9655_v51, %v9655_v51 }
 0xdb8   :  { %v15546_v25 = vmul.f32 %v15531_v27, %v15531_v27  ;;  %v15550_v62 = vmul.f32 %v15533_v38, %v15533_v38  ;;  %10246 = vmatmul.mubr.bf16.vlgmr.msra.gmra.mxu1 %v15535_v39  ;;  %v9582_v40 = vmax.bf16 %v16061_v22, %v9572_v53  ;;  %v9590_v49 = vmin.bf16 %v16061_v22, %v9572_v53 }
 0xdb9   :  { %v9407_v59 = vsel %vm1345_vm5, %v16064_v63, %v9403_v50  ;;  %v16065_v24 = vrot.slane %v15341_v47, 1  ;;  %v9674_v51 = vrot.slane %v15542_v7, 4  ;;  %v15560_v11 = vadd.f32 %v9737_v43, %v9733_v8 }
 0xdba   :  { %v9499_v30 = vmul.bf16 %v15278_v6, %v9387_v19  ;;  %v9636_v31 = vmul.bf16 %v15321_v14, %v9590_v49  ;;  %v9535_v9 = vmul.bf16 %v15287_v55, %v9443_v33  ;;  %v16066_v44 = vrot.slane %v15421_v17, 7 }
 0xdbb   :  { %v9419_v37 = vsel %vm1345_vm5, %v9403_v50, %v16065_v24  ;;  %v16067_v47 = vrot.slane %v15347_v0, 7  ;;  %v9445_v6 = vpack.c.bf16 %v15421_v17, %v15419_v60  ;;  %v9350_v33 = vrot.slane %v15423_v57, 7 }
 0xdbc   :  { %v9427_v61 = vpack.c.bf16 %v9419_v37, %v9407_v59  ;;  %v9361_v53 = vsel %vm1296_vm4, %v9353_v46, %v16066_v44  ;;  %v9405_v59 = vrot.slane %v15421_v17, 1  ;;  %v15577_v19 = vadd.bf16 %v9636_v31, %v9582_v40 }
 0xdbd   :  { %v9365_v50 = vsel %vm1296_vm4, %v16067_v47, %v9353_v46  ;;  %v9543_v55 = vadd.bf16 %v9535_v9, %v9499_v30  ;;  %v9402_v43 = vrot.slane %v15425_v45, 1  ;;  %v16068_v24 = vrot.slane %v15345_v16, 1 }
 0xdbe   :  { %v9435_v63 = vmul.bf16 %v9427_v61, %v16060_v32  ;;  %v9381_v8 = vpack.c.bf16 %v9361_v53, %v9365_v50  ;;  %v9409_v46 = vsel %vm1345_vm5, %v9401_v41, %v9405_v59  ;;  %10299 = vmatmul.mubr.bf16.vlgmr.msra.gmra.mxu0 %v15577_v19  ;;  %v9537_v37 = vmul.bf16 %v15290_v21, %v9445_v6 }
 0xdbf   :  { %v9421_v17 = vsel %vm1345_vm5, %v9405_v59, %v16068_v24  ;;  %v16069_v61 = vrot.slane %v15425_v45, 7  ;;  %v16070_v60 = vrot.slane %v15351_v2, 7  ;;  %v16071_v9 = vrot.slane %v15423_v57, 1 }
 0xdc0   :  { %v9567_v0 = vmul.bf16 %v15281_v35, %v9435_v63  ;;  %v9389_v49 = vmul.bf16 %v9381_v8, %v16059_v18  ;;  %v9429_v40 = vpack.c.bf16 %v9421_v17, %v9409_v46  ;;  %v16072_v53 = vrot.slane %v15349_v48, 1 }
 0xdc1   :  { %v9358_v35 = vsel %vm1296_vm4, %v9350_v33, %v16069_v61  ;;  %v9362_v41 = vsel %vm1296_vm4, %v16070_v60, %v9350_v33  ;;  %v9406_v44 = vsel %vm1345_vm5, %v16071_v9, %v9402_v43  ;;  %v9442_v2 = vpack.c.bf16 %v15425_v45, %v15423_v57 }
 0xdc2   :  { %v9575_v30 = vadd.bf16 %v9567_v0, %v9543_v55  ;;  %v9501_v16 = vmul.bf16 %v15302_v58, %v9389_v49  ;;  %v9378_v31 = vpack.c.bf16 %v9358_v35, %v9362_v41  ;;  %v9437_v21 = vmul.bf16 %v9429_v40, %v16060_v32 }
 0xdc3   :  { %v9418_v47 = vsel %vm1345_vm5, %v9402_v43, %v16072_v53  ;;  %v9352_v50 = vrot.slane %v15464_v52, 7  ;;  %v9534_v48 = vmul.bf16 %v15284_v20, %v9442_v2  ;;  %v9404_v0 = vrot.slane %v15466_v12, 1 }
 0xdc4   :  { %v9585_v58 = vmax.bf16 %v16061_v22, %v9575_v30  ;;  %v9593_v63 = vmin.bf16 %v16061_v22, %v9575_v30  ;;  %v9545_v8 = vadd.bf16 %v9537_v37, %v9501_v16  ;;  %v9386_v59 = vmul.bf16 %v9378_v31, %v16059_v18 }
 0xdc5   :  { %v9569_v6 = vmul.bf16 %v15305_v26, %v9437_v21  ;;  %v9426_v55 = vpack.c.bf16 %v9418_v47, %v9406_v44  ;;  %v9360_v33 = vsel %vm1296_vm4, %v9352_v50, %v9356_v42  ;;  %v9364_v43 = vsel %vm1296_vm4, %v9348_v56, %v9352_v50 }
 0xdc6   :  { %v9639_v57 = vmul.bf16 %v15299_v54, %v9593_v63  ;;  %v9498_v45 = vmul.bf16 %v15311_v15, %v9386_v59  ;;  %v9380_v20 = vpack.c.bf16 %v9360_v33, %v9364_v43  ;;  %v9444_v46 = vpack.c.bf16 %v15466_v12, %v15464_v52 }
 0xdc7   :  { %v9577_v26 = vadd.bf16 %v9569_v6, %v9545_v8  ;;  %v9434_v49 = vmul.bf16 %v9426_v55, %v16060_v32  ;;  %v9408_v54 = vsel %vm1345_vm5, %v9400_v34, %v9404_v0  ;;  %v16073_v15 = vrot.slane %v15353_v28, 1 }
 0xdc8   :  { %v9647_v24 = vadd.bf16 %v9639_v57, %v9585_v58  ;;  %v9542_v42 = vadd.bf16 %v9534_v48, %v9498_v45  ;;  %v9388_v12 = vmul.bf16 %v9380_v20, %v16059_v18  ;;  %v9536_v35 = vmul.bf16 %v15293_v23, %v9444_v46 }
 0xdc9   :  { %v9420_v1 = vsel %vm1345_vm5, %v9404_v0, %v16073_v15  ;;  %v9587_v56 = vmax.bf16 %v16061_v22, %v9577_v26  ;;  %v9595_v17 = vmin.bf16 %v16061_v22, %v9577_v26  ;;  %v9566_v40 = vmul.bf16 %v15314_v13, %v9434_v49 }
 0xdca   :  { %v9659_v37 = vunpack.c.l.bf16 %v9647_v24  ;;  %v9663_v61 = vunpack.c.h.bf16 %v9647_v24  ;;  %10255 = vmatprep.mubr.bf16.mxu1 %v9647_v24  ;;  %v9428_v52 = vpack.c.bf16 %v9420_v1, %v9408_v54  ;;  %v9500_v4 = vmul.bf16 %v15318_v29, %v9388_v12 }
 0xdcb   :  { %v9641_v34 = vmul.bf16 %v15324_v36, %v9595_v17  ;;  %v9574_v28 = vadd.bf16 %v9566_v40, %v9542_v42  ;;  %v15649_v60 = vunpack.c.l.bf16 %v15535_v39  ;;  %v15658_v29 = vunpack.c.l.bf16 %v15577_v19 }
 0xdcc   :  { %v9701_v41 = vadd.f32 %v9663_v61, %v9659_v37  ;;  %v9741_v30 = vmul.f32 %v9659_v37, %v9659_v37  ;;  %v9745_v16 = vmul.f32 %v9663_v61, %v9663_v61  ;;  %v9436_v13 = vmul.bf16 %v9428_v52, %v16060_v32 }
 0xdcd   :  { %v9649_v18 = vadd.bf16 %v9641_v34, %v9587_v56  ;;  %v9584_v31 = vmax.bf16 %v16061_v22, %v9574_v28  ;;  %v9592_v9 = vmin.bf16 %v16061_v22, %v9574_v28  ;;  %v9544_v44 = vadd.bf16 %v9536_v35, %v9500_v4 }
 0xdce   :  { %v9702_v23 = vrot.slane %v9701_v41, 4  ;;  %v15654_v21 = vadd.f32 %v9745_v16, %v9741_v30  ;;  %v9568_v36 = vmul.bf16 %v15327_v10, %v9436_v13  ;;  %v15662_v32 = vunpack.c.h.bf16 %v15535_v39 }
 0xdcf   :  { %v9661_v53 = vunpack.c.l.bf16 %v9649_v18  ;;  %v9665_v47 = vunpack.c.h.bf16 %v9649_v18  ;;  %10308 = vmatprep.mubr.bf16.mxu0 %v9649_v18  ;;  %v9638_v2 = vmul.bf16 %v15296_v5, %v9592_v9  ;;  %v15665_v63 = vunpack.c.h.bf16 %v15577_v19 }
 0xdd0   :  { %v9576_v50 = vadd.bf16 %v9568_v36, %v9544_v44  ;;  %v9703_v58 = vadd.f32 %v9702_v23, %v9701_v41  ;;  %v9675_v10 = vadd.f32 %v9674_v51, %v15542_v7  ;;  %v9666_v33 = vadd.f32 %v15662_v32, %v15649_v60 }
 0xdd1   :  { %v15670_v8 = vmul.f32 %v9661_v53, %v9661_v53  ;;  %v15672_v59 = vmul.f32 %v9665_v47, %v9665_v47  ;;  %v9646_v6 = vadd.bf16 %v9638_v2, %v9584_v31  ;;  %v9715_v55 = vadd.f32 %v9665_v47, %v9661_v53 }
 0xdd2   :  { %v9586_v5 = vmax.bf16 %v16061_v22, %v9576_v50  ;;  %v9594_v39 = vmin.bf16 %v16061_v22, %v9576_v50  ;;  %v9704_v48 = vrot.slane %v9703_v58, 2  ;;  %v9676_v43 = vrot.slane %v9675_v10, 2 }
 0xdd3   :  { %v9658_v19 = vunpack.c.l.bf16 %v9646_v6  ;;  %v9662_v57 = vunpack.c.h.bf16 %v9646_v6  ;;  %10256 = vmatmul.mubr.bf16.gmra.mxu1 %v9646_v6  ;;  %v9716_v45 = vrot.slane %v9715_v55, 4  ;;  %v9667_v0 = vrot.slane %v9666_v33, 4 }
 0xdd4   :  { %v9640_v7 = vmul.bf16 %v15321_v14, %v9594_v39  ;;  %v9705_v51 = vadd.f32 %v9704_v48, %v9703_v58  ;;  %v9680_v26 = vadd.f32 %v15665_v63, %v15658_v29  ;;  %v9677_v15 = vadd.f32 %v9676_v43, %v9675_v10 }
 0xdd5   :  { %v9694_v49 = vadd.f32 %v9662_v57, %v9658_v19  ;;  %v9740_v20 = vmul.f32 %v9658_v19, %v9658_v19  ;;  %v9744_v46 = vmul.f32 %v9662_v57, %v9662_v57  ;;  %v9717_v22 = vadd.f32 %v9716_v45, %v9715_v55 }
 0xdd6   :  { %v9648_v24 = vadd.bf16 %v9640_v7, %v9586_v5  ;;  %v9706_v42 = vrot.slane %v9705_v51, 1  ;;  %v9668_v54 = vadd.f32 %v9667_v0, %v9666_v33  ;;  %v9681_v40 = vrot.slane %v9680_v26, 4 }
 0xdd7   :  { %v9695_v1 = vrot.slane %v9694_v49, 4  ;;  %v9776_v56 = vadd.f32 %v9744_v46, %v9740_v20  ;;  %v9718_v17 = vrot.slane %v9717_v22, 2  ;;  %v9678_v34 = vrot.slane %v9677_v15, 1 }
 0xdd8   :  { %v9660_v12 = vunpack.c.l.bf16 %v9648_v24  ;;  %v9664_v37 = vunpack.c.h.bf16 %v9648_v24  ;;  %10309 = vmatmul.mubr.bf16.gmra.mxu0 %v9648_v24  ;;  %v9707_v14 = vadd.f32 %v9706_v42, %v9705_v51  ;;  %v9669_v61 = vrot.slane %v9668_v54, 2 }
 0xdd9   :  { %v9696_v52 = vadd.f32 %v9695_v1, %v9694_v49  ;;  %v9719_v35 = vadd.f32 %v9718_v17, %v9717_v22  ;;  %v9682_v28 = vadd.f32 %v9681_v40, %v9680_v26  ;;  %v9679_v31 = vadd.f32 %v9678_v34, %v9677_v15 }
 0xdda   :  { %v9708_v4 = vadd.f32 %v9664_v37, %v9660_v12  ;;  %v9742_v41 = vmul.f32 %v9660_v12, %v9660_v12  ;;  %v9746_v30 = vmul.f32 %v9664_v37, %v9664_v37  ;;  %v9670_v16 = vadd.f32 %v9669_v61, %v9668_v54 }
 0xddb   :  { %v9697_v13 = vrot.slane %v9696_v52, 2  ;;  %v9720_v18 = vrot.slane %v9719_v35, 1  ;;  %v9683_v9 = vrot.slane %v9682_v28, 2  ;;  %v9687_v36 = vadd.f32 %v15533_v38, %v15531_v27 }
 0xddc   :  { %v9709_v44 = vrot.slane %v9708_v4, 4  ;;  %v9671_v23 = vrot.slane %v9670_v16, 1  ;;  %v9777_v53 = vrot.slane %v9776_v56, 4  ;;  %v9784_v58 = vrot.slane %v15654_v21, 4 }
 0xddd   :  { %v9698_v47 = vadd.f32 %v9697_v13, %v9696_v52  ;;  %v9721_v2 = vadd.f32 %v9720_v18, %v9719_v35  ;;  %v9684_v50 = vadd.f32 %v9683_v9, %v9682_v28  ;;  %v9688_v55 = vrot.slane %v9687_v36, 4 }
 0xdde   :  { %v9710_v10 = vadd.f32 %v9709_v44, %v9708_v4  ;;  %v9672_v6 = vadd.f32 %v9671_v23, %v9670_v16  ;;  %v9778_v5 = vadd.f32 %v9777_v53, %v9776_v56  ;;  %v9785_v33 = vadd.f32 %v9784_v58, %v15654_v21 }
 0xddf   :  { %v9699_v39 = vrot.slane %v9698_v47, 1  ;;  %v9685_v48 = vrot.slane %v9684_v50, 1  ;;  %v9790_v19 = vadd.f32 %v9746_v30, %v9742_v41  ;;  %v9689_v45 = vadd.f32 %v9688_v55, %v9687_v36 }
 0xde0   :  { %v9711_v57 = vrot.slane %v9710_v10, 2  ;;  %v9722_v43 = vadd.f32 %v9679_v31, %v9672_v6  ;;  %v9779_v7 = vrot.slane %v9778_v5, 2  ;;  %v9786_v51 = vrot.slane %v9785_v33, 2 }
 0xde1   :  { %v9700_v27 = vadd.f32 %v9699_v39, %v9698_v47  ;;  %v9686_v38 = vadd.f32 %v9685_v48, %v9684_v50  ;;  %v9791_v0 = vrot.slane %v9790_v19, 4  ;;  %v9690_v49 = vrot.slane %v9689_v45, 2 }
 0xde2   :  { %v9712_v26 = vadd.f32 %v9711_v57, %v9710_v10  ;;  %v9780_v20 = vadd.f32 %v9779_v7, %v9778_v5  ;;  %v9797_v46 = vadd.f32 %v15672_v59, %v15670_v8  ;;  %v9787_v42 = vadd.f32 %v9786_v51, %v9785_v33 }
 0xde3   :  { %v9727_v22 = vadd.f32 %v9707_v14, %v9700_v27  ;;  %v9723_v24 = vadd.f32 %v9722_v43, %v9686_v38  ;;  %v9792_v54 = vadd.f32 %v9791_v0, %v9790_v19  ;;  %v9691_v15 = vadd.f32 %v9690_v49, %v9689_v45 }
 0xde4   :  { %v9713_v21 = vrot.slane %v9712_v26, 1  ;;  %v9781_v1 = vrot.slane %v9780_v20, 1  ;;  %v9798_v56 = vrot.slane %v9797_v46, 4  ;;  %v9788_v17 = vrot.slane %v9787_v42, 1 }
 0xde5   :  { %v9793_v40 = vrot.slane %v9792_v54, 2  ;;  %v9732_v12 = vmul.f32 %v15649_v60, %v15649_v60  ;;  %v9734_v37 = vmul.f32 %v15658_v29, %v15658_v29  ;;  %v9692_v52 = vrot.slane %v9691_v15, 1 }
 0xde6   :  { %v9714_v61 = vadd.f32 %v9713_v21, %v9712_v26  ;;  %v9782_v35 = vadd.f32 %v9781_v1, %v9780_v20  ;;  %v9799_v8 = vadd.f32 %v9798_v56, %v9797_v46  ;;  %v9789_v59 = vadd.f32 %v9788_v17, %v9787_v42 }
 0xde7   :  { %v9794_v14 = vadd.f32 %v9793_v40, %v9792_v54  ;;  %v9736_v34 = vmul.f32 %v15662_v32, %v15662_v32  ;;  %v9738_v28 = vmul.f32 %v15665_v63, %v15665_v63  ;;  %v9693_v41 = vadd.f32 %v9692_v52, %v9691_v15 }
 0xde8   :  { %v9728_v4 = vadd.f32 %v9727_v22, %v9714_v61  ;;  %v9800_v30 = vrot.slane %v9799_v8, 2  ;;  %v9756_v60 = vrot.slane %v15560_v11, 4  ;;  %v9809_v13 = vadd.f32 %v9789_v59, %v9782_v35 }
 0xde9   :  { %v9795_v16 = vrot.slane %v9794_v14, 1  ;;  %v9748_v29 = vadd.f32 %v9736_v34, %v9732_v12  ;;  %v9762_v18 = vadd.f32 %v9738_v28, %v9734_v37  ;;  %v9724_v9 = vadd.f32 %v9723_v24, %v9693_v41 }
 0xdea   :  { %v9729_v31 = vadd.f32 %v9728_v4, %v9721_v2  ;;  %v9801_v44 = vadd.f32 %v9800_v30, %v9799_v8  ;;  %v9757_v23 = vadd.f32 %v9756_v60, %v15560_v11  ;;  %v9769_v63 = vadd.f32 %v15550_v62, %v15546_v25 }
 0xdeb   :  { %v9796_v36 = vadd.f32 %v9795_v16, %v9794_v14  ;;  %v9749_v53 = vrot.slane %v9748_v29, 4  ;;  %v9763_v32 = vrot.slane %v9762_v18, 4  ;;  %9725 = vadd.xlane.f32.xlu0 %v9724_v9  ;;  %v10320_v16 = vld [vmem:[#allocation19 + $0x4] ss:$8 sm:$0x3] }
 0xdec   :  { %9730 = vadd.xlane.f32.xlu1 %v9729_v31  ;;  %v9802_v47 = vrot.slane %v9801_v44, 1  ;;  %v9758_v50 = vrot.slane %v9757_v23, 2  ;;  %v9770_v55 = vrot.slane %v9769_v63, 4  ;;  %v10322_v9 = vld [vmem:[#allocation20 + $0x4] ss:$8 sm:$0x3] }
 0xded   :  { %v9810_v58 = vadd.f32 %v9809_v13, %v9796_v36  ;;  %v9750_v10 = vadd.f32 %v9749_v53, %v9748_v29  ;;  %v9764_v6 = vadd.f32 %v9763_v32, %v9762_v18 }
 0xdee   :  { %v9803_v5 = vadd.f32 %v9802_v47, %v9801_v44  ;;  %v9759_v2 = vadd.f32 %v9758_v50, %v9757_v23  ;;  %v9771_v33 = vadd.f32 %v9770_v55, %v9769_v63 }
 0xdef   :  { %v9751_v39 = vrot.slane %v9750_v10, 2  ;;  %v9765_v48 = vrot.slane %v9764_v6, 2 }
 0xdf0   :  { %v9811_v11 = vadd.f32 %v9810_v58, %v9803_v5  ;;  %v9760_v19 = vrot.slane %v9759_v2, 1  ;;  %v9772_v43 = vrot.slane %v9771_v33, 2 }
 0xdf1   :  { %v9752_v57 = vadd.f32 %v9751_v39, %v9750_v10  ;;  %v9766_v45 = vadd.f32 %v9765_v48, %v9764_v6 }
 0xdf2   :  { %9812 = vadd.xlane.f32.xlu1 %v9811_v11  ;;  %v9761_v62 = vadd.f32 %v9760_v19, %v9759_v2  ;;  %v9773_v27 = vadd.f32 %v9772_v43, %v9771_v33 }
 0xdf3   :  { %v9753_v25 = vrot.slane %v9752_v57, 1  ;;  %v9767_v7 = vrot.slane %v9766_v45, 1 }
 0xdf4   :  { %v9774_v51 = vrot.slane %v9773_v27, 1 }
 0xdf5   :  { %v9754_v38 = vadd.f32 %v9753_v25, %v9752_v57  ;;  %v9768_v0 = vadd.f32 %v9767_v7, %v9766_v45  ;;  %v16074_v45 = vld [vmem:[#allocation32_spill] sm:$0xff] }
 0xdf6   :  { %v9775_v49 = vadd.f32 %v9774_v51, %v9773_v27  ;;  %v16075_v51 = vld [vmem:[#allocation37_spill] sm:$0xff] }
 0xdf7   :  { %v9804_v26 = vadd.f32 %v9761_v62, %v9754_v38 }
 0xdf9   :  { %v9805_v20 = vadd.f32 %v9804_v26, %v9768_v0  ;;  %v16076_v26 = vld [vmem:[#allocation41_spill] sm:$0xff] }
 0xdfb   :  { %v9806_v46 = vadd.f32 %v9805_v20, %v9775_v49  ;;  %v16077_v20 = vld [vmem:[#allocation38_spill] sm:$0xff] }
 0xdfd   :  { %9807 = vadd.xlane.f32.xlu0 %v9806_v46 }
 0xe74   :  { %v9726_v1 = vpop.xlane.xlu0 %9725 }
 0xe75   :  { %v9731_v22 = vpop.xlane.xlu1 %9730  ;;  %v9814_v40 = vmul.f32 0.00012207031, %v9726_v1 }
 0xe76   :  { %v9815_v24 = vmul.f32 0.00012207031, %v9731_v22 }
 0xe77   :  { %v9818_v61 = vmul.f32 %v9814_v40, %v9814_v40 }
 0xe78   :  { %v9819_v54 = vmul.f32 %v9815_v24, %v9815_v24  ;;  %v10247_v12 = vpop.f32.mrf.mxu1 }
 0xe7a   :  { %v10249_v35 = vpop.f32.mrf.mxu1 }
 0xe7b   :  { %v9813_v42 = vpop.xlane.xlu1 %9812 }
 0xe7c   :  { %v9817_v21 = vmul.f32 0.00012207031, %v9813_v42  ;;  %v10251_v34 = vpop.f32.mrf.mxu1 }
 0xe7e   :  { %v9821_v15 = vsub.f32 %v9817_v21, %v9819_v54  ;;  %v10300_v8 = vpop.f32.mrf.mxu0  ;;  %v10253_v41 = vpop.f32.mrf.mxu1 }
 0xe7f   :  { %v10301_v53 = vadd.f32 %v10300_v8, %v10247_v12 }
 0xe80   :  { %v9823_v56 = vmax.f32 %v9821_v15, 0.0  ;;  %v10302_v28 = vpop.f32.mrf.mxu0  ;;  %v16079_v15 = vld [vmem:[#allocation46_spill] sm:$0xff] }
 0xe81   :  { %v10303_v32 = vadd.f32 %v10302_v28, %v10249_v35 }
 0xe82   :  { %v9825_v17 = vadd.f32 1e-08, %v9823_v56  ;;  %v10304_v30 = vpop.f32.mrf.mxu0  ;;  %v16080_v56 = vld [vmem:[#allocation31_spill] sm:$0xff] }
 0xe83   :  { %v10305_v63 = vadd.f32 %v10304_v30, %v10251_v34 }
 0xe84   :  { %12143 = vrsqrt.f32 %v9825_v17  ;;  %v10306_v18 = vpop.f32.mrf.mxu0 }
 0xe85   :  { %v10307_v50 = vadd.f32 %v10306_v18, %v10253_v41  ;;  %v16082_v41 = vld [vmem:[#allocation34_spill] sm:$0xff] }
 0xe86   :  { %v9808_v37 = vpop.xlane.xlu0 %9807 }
 0xe87   :  { %v9816_v52 = vmul.f32 0.00012207031, %v9808_v37  ;;  %v16081_v37 = vld [vmem:[#allocation33_spill] sm:$0xff] }
 0xe89   :  { %v9820_v59 = vsub.f32 %v9816_v52, %v9818_v61 }
 0xe8b   :  { %v9822_v14 = vmax.f32 %v9820_v59, 0.0 }
 0xe8d   :  { %v9824_v4 = vadd.f32 1e-08, %v9822_v14 }
 0xe8f   :  { %12145 = vrsqrt.f32 %v9824_v4 }
 0xe91   :  { %v12144_v60 = vpop.eup %12143 }
 0xe92   :  { %v10324_v13 = vmul.f32 %v12144_v60, %v9815_v24  ;;  %v16078_v24 = vld [vmem:[#allocation39_spill] sm:$0xff] }
 0xe93   :  { %v10257_v29 = vpop.f32.mrf.mxu1 }
 0xe94   :  { %v10326_v31 = vmul.f32 %v10324_v13, %v10320_v16 }
 0xe95   :  { %v10259_v44 = vpop.f32.mrf.mxu1 }
 0xe96   :  { %v10328_v36 = vsub.f32 %v10322_v9, %v10326_v31 }
 0xe97   :  { %v10261_v10 = vpop.f32.mrf.mxu1 }
 0xe98   :  { %v10310_v23 = vpop.f32.mrf.mxu0  ;;  %v10358_v2 = vrot.slane %v10328_v36, %v16037_v3  ;;  %v10362_v49 = vrot.slane %v10328_v36, %v16076_v26 }
 0xe99   :  { %v10311_v47 = vadd.f32 %v10310_v23, %v10257_v29  ;;  %v10263_v7 = vpop.f32.mrf.mxu1 }
 0xe9a   :  { %v10312_v58 = vpop.f32.mrf.mxu0 }
 0xe9b   :  { %v10333_v6 = vmul.f32 %v12144_v60, %v10311_v47  ;;  %v10313_v55 = vadd.f32 %v10312_v58, %v10259_v44 }
 0xe9c   :  { %v12146_v5 = vpop.eup %12145  ;;  %v10314_v39 = vpop.f32.mrf.mxu0 }
 0xe9d   :  { %v10323_v48 = vmul.f32 %v12146_v5, %v9814_v40  ;;  %v10329_v33 = vmul.f32 %v12146_v5, %v10301_v53  ;;  %v10330_v11 = vmul.f32 %v12146_v5, %v10303_v32  ;;  %v10331_v19 = vmul.f32 %v12146_v5, %v10305_v63 }
 0xe9e   :  { %v10332_v57 = vmul.f32 %v12146_v5, %v10307_v50  ;;  %v10341_v43 = vadd.f32 %v10333_v6, %v16074_v45  ;;  %v10334_v25 = vmul.f32 %v12144_v60, %v10313_v55  ;;  %v10315_v62 = vadd.f32 %v10314_v39, %v10261_v10  ;;  %v10316_v27 = vpop.f32.mrf.mxu0 }
 0xe9f   :  { %v10325_v38 = vmul.f32 %v10323_v48, %v10320_v16  ;;  %v10337_v0 = vadd.f32 %v10329_v33, %v16075_v51  ;;  %v10338_v46 = vadd.f32 %v10330_v11, %v16077_v20  ;;  %v10339_v1 = vadd.f32 %v10331_v19, %v16079_v15 }
 0xea0   :  { %v10371_v22 = vadd.f32 %v10358_v2, %v10341_v43  ;;  %v10342_v42 = vadd.f32 %v10334_v25, %v16078_v24  ;;  %v10335_v54 = vmul.f32 %v12144_v60, %v10315_v62  ;;  %v10340_v17 = vadd.f32 %v10332_v57, %v16080_v56 }
 0xea1   :  { %v10327_v21 = vsub.f32 %v10322_v9, %v10325_v38  ;;  %v10317_v40 = vadd.f32 %v10316_v27, %v10263_v7 }
 0xea2   :  { %10379 = vst [vmem:[#allocation22 + $0x20] sm:$0xff] %v10371_v22  ;;  %v10372_v12 = vadd.f32 %v10362_v49, %v10342_v42  ;;  %v10343_v61 = vadd.f32 %v10335_v54, %v16081_v37 }
 0xea3   :  { %v10350_v52 = vrot.slane %v10327_v21, %v16037_v3  ;;  %v10354_v35 = vrot.slane %v10327_v21, %v16076_v26  ;;  %v10336_v8 = vmul.f32 %v12144_v60, %v10317_v40 }
 0xea4   :  { %10380 = vst [vmem:[#allocation22 + $0x28] sm:$0xff] %v10372_v12  ;;  %v10373_v59 = vadd.f32 %v10358_v2, %v10343_v61 }
 0xea5   :  { %v10367_v14 = vadd.f32 %v10350_v52, %v10337_v0  ;;  %v10368_v34 = vadd.f32 %v10354_v35, %v10338_v46  ;;  %v10369_v28 = vadd.f32 %v10350_v52, %v10339_v1  ;;  %v10370_v4 = vadd.f32 %v10354_v35, %v10340_v17 }
 0xea6   :  { %10381 = vst [vmem:[#allocation22 + $0x30] sm:$0xff] %v10373_v59  ;;  %v10344_v30 = vadd.f32 %v10336_v8, %v16082_v41 }
 0xea7   :  { %10375 = vst [vmem:[#allocation22] sm:$0xff] %v10367_v14  ;;  %10376 = vst [vmem:[#allocation22 + $0x8] sm:$0xff] %v10368_v34 }
 0xea8   :  { %10377 = vst [vmem:[#allocation22 + $0x10] sm:$0xff] %v10369_v28  ;;  %10378 = vst [vmem:[#allocation22 + $0x18] sm:$0xff] %v10370_v4  ;;  %v10374_v16 = vadd.f32 %v10362_v49, %v10344_v30 }
 0xeaa   :  { %10382 = vst [vmem:[#allocation22 + $0x38] sm:$0xff] %v10374_v16 }
 0xeab   :  { %12398 = shalt.err (!%p12395_p8)
}
 0xeac   :  { %10394 = dma.vmem_to_hbm [thread:$0]  %s10389_s11, 1024, %s15729_s12, [#allocation4], %s12432_s9, %s12432_s9, %s12433_s18  }
 0xead   :  { %12421 = dma.done.wait [#allocation4], 1024  }
 0xeae   :  { %12422 = vsyncadd [#allocation4], 4294966272 }
 0xeaf   :  { %10398 = vsyncpa [#allocation3], 1 }
 0xeb0   :  { %10399 = vsyncpa [#allocation6], 1 }
 0xeb1   :  { %10400 = vsyncpa [#allocation9], 1 }
 0xeb2   :  { %10401 = vsyncpa [#allocation12], 1 }
 0xeb3   :  { %10402 = vsyncpa [#allocation15], 1 }
 0xeb4   :  { %10403 = vsyncpa [#allocation18], 1 }
 0xeb5   :  { %10404 = vsyncpa [#allocation21], 1 }
 0xeb6   :  { %10405 = vsyncpa [#allocation4], 1 }

</bundles_post_ra>
